<compile_context>
chip_gen: v7x
topology: tpu7x:2x2x1
jax: 0.10.0
libtpu: 0.0.40
codegen_flags: <defaults>
</compile_context>

<pallas_src>
import functools

import jax
import jax.numpy as jnp
import numpy as np
from jax.experimental import pallas as pl
from jax.experimental.pallas import tpu as pltpu


# ----------------------------------------------------------------------------
# Fused CBAM kernel: Nb images per grid step, everything stays in VMEM/vregs.
# ----------------------------------------------------------------------------
def _cbam_fused_kernel(x_ref, w1_ref, b1_ref, w2_ref, b2_ref,
                       ca1_ref, ca2_ref, sa_ref, o_ref, *, Nb, H, W, C, Cr):
    # x_ref  : (Nb, H, W, C)  bf16  NHWC input block
    # w1_ref : (9*C, C)       bf16  conv1 weights, tap-major rows [t*C + cin]
    # b1_ref : (1, C)         f32
    # w2_ref : (9*C, C)       bf16  conv2 weights
    # b2_ref : (1, C)         f32
    # ca1_ref: (Cr, C)        f32   channel-attention fc1 (1x1 conv, no bias)
    # ca2_ref: (Cr, C)        f32   channel-attention fc2 (transposed, no bias)
    # sa_ref : (18,)   SMEM   f32   spatial-attention weights, [c*9 + ky*3 + kx]
    # o_ref  : (Nb, H, W, C)  f32
    f32 = jnp.float32
    bf16 = jnp.bfloat16

    def pad_hw(v, p):
        """Zero-pad axes 1 (H) and 2 (W) of a (Nb, H, W[, C]) value by p."""
        zr = jnp.zeros(v.shape[:1] + (p,) + v.shape[2:], v.dtype)
        v = jnp.concatenate([zr, v, zr], axis=1)
        zc = jnp.zeros(v.shape[:2] + (p,) + v.shape[3:], v.dtype)
        return jnp.concatenate([zc, v, zc], axis=2)

    def conv3x3_d2_relu(act_bf16, w_ref_, b_ref_):
        """3x3 dilation-2 pad-2 conv + bias + ReLU as one K=9*C im2col matmul.

        The activation is already bf16, so the (Nb*H*W, 9C) slab is assembled
        directly in bf16 (no f32 slab + per-slab cast)."""
        xp = pad_hw(act_bf16, 2)                                   # (Nb, H+4, W+4, C)
        cols = [xp[:, ky * 2:ky * 2 + H, kx * 2:kx * 2 + W, :].reshape(Nb * H * W, C)
                for ky in range(3) for kx in range(3)]
        slab = jnp.concatenate(cols, axis=1)                       # (Nb*H*W, 9C) bf16
        out = jnp.dot(slab, w_ref_[...], preferred_element_type=f32)
        return jnp.maximum(out + b_ref_[...], 0.0)                 # (Nb*H*W, C) f32

    x = x_ref[...].astype(bf16)                                    # (Nb, H, W, C)
    a1 = conv3x3_d2_relu(x, w1_ref, b1_ref)                        # (Nb*H*W, C) f32
    a2 = conv3x3_d2_relu(a1.reshape(Nb, H, W, C).astype(bf16),
                         w2_ref, b2_ref)                           # (Nb*H*W, C) f32

    # --- channel attention: shared MLP on stacked [avgpool; maxpool] rows ----
    # Tiny (M=2*Nb, K=C, hidden=Cr) MLP runs on the VPU (broadcast-mul + lane
    # reduce) instead of the MXU: removes a serialized RHS-push / FIFO-pop.
    a2b = a2.reshape(Nb, H * W, C)
    pooled = jnp.concatenate(
        [jnp.mean(a2b, axis=1), jnp.max(a2b, axis=1)], axis=0)     # (2*Nb, C) f32
    fc = jnp.zeros((2 * Nb, C), f32)
    for j in range(Cr):
        hid_j = jnp.maximum(
            jnp.sum(pooled * ca1_ref[j:j + 1, :], axis=-1, keepdims=True), 0.0)
        fc = fc + hid_j * ca2_ref[j:j + 1, :]
    ca = jax.nn.sigmoid(fc[0:Nb, :] + fc[Nb:2 * Nb, :])            # (Nb, C)
    y3 = (a2b * ca[:, None, :]).reshape(Nb, H, W, C)               # f32

    # --- spatial attention: mean/max over C, 3x3 conv (2 -> 1), sigmoid ------
    avg_p = pad_hw(jnp.mean(y3, axis=3), 1)                        # (Nb, H+2, W+2)
    max_p = pad_hw(jnp.max(y3, axis=3), 1)
    sa = jnp.zeros((Nb, H, W), f32)
    for t in range(9):
        ky, kx = t // 3, t % 3
        sa = sa + (sa_ref[t] * avg_p[:, ky:ky + H, kx:kx + W]
                   + sa_ref[9 + t] * max_p[:, ky:ky + H, kx:kx + W])
    sa = jax.nn.sigmoid(sa)

    # final module-level ReLU (mathematically a no-op here, kept for fidelity)
    o_ref[...] = jnp.maximum(y3 * sa[:, :, :, None], 0.0).astype(o_ref.dtype)


# ----------------------------------------------------------------------------
# Wrapper: pick a batch tile that fits VMEM comfortably, build the grid.
# ----------------------------------------------------------------------------
def _pick_batch_tile(N, H, W, C, budget_bytes=16 * 1024 * 1024, cap=8):
    """Largest divisor of N (<= cap) whose per-step working set fits budget."""
    per_img = (H * W * C * 4 * 7            # a1/a2/y3/out/f32 temporaries
               + H * W * 9 * C * 2 * 2      # bf16 im2col cols + slab
               + (H + 4) * (W + 4) * C * 2)  # padded bf16 activation
    max_nb = max(1, min(cap, budget_bytes // max(per_img, 1)))
    nb = 1
    for d in range(1, N + 1):
        if N % d == 0 and d <= max_nb:
            nb = d
    return nb


def cbam_forward_nhwc(x_nhwc, w1_flat, b1, w2_flat, b2, ca_w1, ca_w2, sa_w_flat,
                      out_dtype=jnp.float32):
    N, H, W, C = x_nhwc.shape
    Cr = ca_w1.shape[0]
    Nb = _pick_batch_tile(N, H, W, C)
    kernel = functools.partial(_cbam_fused_kernel, Nb=Nb, H=H, W=W, C=C, Cr=Cr)
    return pl.pallas_call(
        kernel,
        out_shape=jax.ShapeDtypeStruct((N, H, W, C), out_dtype),
        grid=(N // Nb,),
        in_specs=[
            pl.BlockSpec((Nb, H, W, C), lambda n: (n, 0, 0, 0)),
            pl.BlockSpec((9 * C, C), lambda n: (0, 0)),
            pl.BlockSpec((1, C), lambda n: (0, 0)),
            pl.BlockSpec((9 * C, C), lambda n: (0, 0)),
            pl.BlockSpec((1, C), lambda n: (0, 0)),
            pl.BlockSpec((Cr, C), lambda n: (0, 0)),
            pl.BlockSpec((Cr, C), lambda n: (0, 0)),
            pl.BlockSpec(memory_space=pltpu.MemorySpace.SMEM),
        ],
        out_specs=pl.BlockSpec((Nb, H, W, C), lambda n: (n, 0, 0, 0)),
        compiler_params=pltpu.CompilerParams(dimension_semantics=("parallel",)),
    )(x_nhwc, w1_flat, b1.reshape(1, C), w2_flat, b2.reshape(1, C),
      ca_w1, ca_w2, sa_w_flat)


def cbam_forward(x_nchw, *params):
    """NCHW in / NCHW out, matching the PyTorch module (f32 output)."""
    # Kernel consumes bf16 activations anyway; casting at the boundary halves
    # the input DMA bytes.  Keep the whole model NHWC to drop both transposes.
    x = jnp.transpose(x_nchw, (0, 2, 3, 1)).astype(jnp.bfloat16)   # NCHW -> NHWC
    out = cbam_forward_nhwc(x, *params)                            # f32
    return jnp.transpose(out, (0, 3, 1, 2))                        # NHWC -> NCHW


# ----------------------------------------------------------------------------
# Parameter preparation: PyTorch (OIHW etc.) layouts -> kernel layouts.
# ----------------------------------------------------------------------------
def prepare_params(p):
    def conv_w(w_oihw):
        # (Cout, Cin, 3, 3) -> (9*Cin, Cout), tap-major rows [t*Cin + cin], bf16
        cout, cin = w_oihw.shape[:2]
        return jnp.transpose(w_oihw, (2, 3, 1, 0)).reshape(9 * cin, cout).astype(jnp.bfloat16)

    w1 = conv_w(p["w1_t"])
    w2 = conv_w(p["w2_t"])
    ca_w1 = p["ca_w1_t"][:, :, 0, 0].astype(jnp.float32)      # (Cr, C)
    ca_w2 = p["ca_w2_t"][:, :, 0, 0].T.astype(jnp.float32)    # (Cr, C) (transposed)
    sa_w = p["sa_w_t"][0].reshape(-1).astype(jnp.float32)     # (18,)
    return (w1, p["b1"].astype(jnp.float32), w2, p["b2"].astype(jnp.float32),
            ca_w1, ca_w2, sa_w)


# ----------------------------------------------------------------------------
# Pure-JAX f32 reference (direct transcription of the PyTorch forward).
# ----------------------------------------------------------------------------
def cbam_reference(x, p):
    def conv_relu(x, w_oihw, b):
        out = jax.lax.conv_general_dilated(
            x, w_oihw, (1, 1), ((2, 2), (2, 2)), rhs_dilation=(2, 2),
            dimension_numbers=("NCHW", "OIHW", "NCHW"))
        return jnp.maximum(out + b[None, :, None, None], 0.0)

    out = conv_relu(x, p["w1_t"], p["b1"])
    out = conv_relu(out, p["w2_t"], p["b2"])

    avg = jnp.mean(out, axis=(2, 3))
    mx = jnp.max(out, axis=(2, 3))

    def fc(v):
        h = jnp.maximum(v @ p["ca_w1_t"][:, :, 0, 0].T, 0.0)
        return h @ p["ca_w2_t"][:, :, 0, 0].T

    ca = jax.nn.sigmoid(fc(avg) + fc(mx))
    out = out * ca[:, :, None, None]

    avg_s = jnp.mean(out, axis=1, keepdims=True)
    max_s = jnp.max(out, axis=1, keepdims=True)
    cat = jnp.concatenate([avg_s, max_s], axis=1)
    sa = jax.lax.conv_general_dilated(
        cat, p["sa_w_t"], (1, 1), ((1, 1), (1, 1)),
        dimension_numbers=("NCHW", "OIHW", "NCHW"))
    out = out * jax.nn.sigmoid(sa)
    return jnp.maximum(out, 0.0)


if __name__ == "__main__":
    N, C, H, W = 2, 32, 16, 16
    ratio = 16
    Cr = C // ratio  # 2

    key = jax.random.PRNGKey(0)
    k = jax.random.split(key, 8)
    # Deterministic synthetic parameters in PyTorch (OIHW) layout.
    p = {
        "w1_t": jax.random.normal(k[0], (C, C, 3, 3), jnp.float32) * 0.05,
        "b1":   jax.random.normal(k[1], (C,), jnp.float32) * 0.05,
        "w2_t": jax.random.normal(k[2], (C, C, 3, 3), jnp.float32) * 0.05,
        "b2":   jax.random.normal(k[3], (C,), jnp.float32) * 0.05,
        "ca_w1_t": jax.random.normal(k[4], (Cr, C, 1, 1), jnp.float32) * 0.1,
        "ca_w2_t": jax.random.normal(k[5], (C, Cr, 1, 1), jnp.float32) * 0.1,
        "sa_w_t":  jax.random.normal(k[6], (1, 2, 3, 3), jnp.float32) * 0.1,
    }
    x = jax.random.normal(k[7], (N, C, H, W), jnp.float32)

    params = prepare_params(p)
    out = cbam_forward(x, *params)
    out = jax.block_until_ready(out)

    ref = cbam_reference(x, p)
    # Kernel feeds bf16 activations/weights to the MXU (f32 accumulation, f32
    # elementwise tail); the reference is full f32, hence the looser tolerance.
    np.testing.assert_allclose(np.asarray(out), np.asarray(ref), rtol=5e-2, atol=1e-2)
    print("KERNEL_OK")
</pallas_src>

<mosaic_0001>
module attributes {stable_mosaic.version = 11 : i64} {
  func.func @_cbam_fused_kernel(%arg0: i32, %arg1: memref<2x16x16x32xbf16, #tpu.memory_space<vmem>>, %arg2: memref<288x32xbf16, #tpu.memory_space<vmem>>, %arg3: memref<1x32xf32, #tpu.memory_space<vmem>>, %arg4: memref<288x32xbf16, #tpu.memory_space<vmem>>, %arg5: memref<1x32xf32, #tpu.memory_space<vmem>>, %arg6: memref<2x32xf32, #tpu.memory_space<vmem>>, %arg7: memref<2x32xf32, #tpu.memory_space<vmem>>, %arg8: memref<18xf32, #tpu.memory_space<smem>>, %arg9: memref<2x16x16x32xf32, #tpu.memory_space<vmem>>) attributes {dimension_semantics = [#tpu.dimension_semantics<parallel>], iteration_bounds = array<i64: 1>, scalar_prefetch = 0 : i64, scratch_operands = 0 : i64, tpu.core_type = #tpu.core_type<tc>, window_params = [{transform_indices = @transform_0, window_bounds = array<i64: 2, 16, 16, 32>}, {pipeline_mode = #tpu.pipeline_mode<synchronous>, transform_indices = @transform_1, window_bounds = array<i64: 288, 32>}, {pipeline_mode = #tpu.pipeline_mode<synchronous>, transform_indices = @transform_2, window_bounds = array<i64: 1, 32>}, {pipeline_mode = #tpu.pipeline_mode<synchronous>, transform_indices = @transform_3, window_bounds = array<i64: 288, 32>}, {pipeline_mode = #tpu.pipeline_mode<synchronous>, transform_indices = @transform_4, window_bounds = array<i64: 1, 32>}, {pipeline_mode = #tpu.pipeline_mode<synchronous>, transform_indices = @transform_5, window_bounds = array<i64: 2, 32>}, {pipeline_mode = #tpu.pipeline_mode<synchronous>, transform_indices = @transform_6, window_bounds = array<i64: 2, 32>}, {transform_indices = @transform_7, window_bounds = array<i64: 18>}, {transform_indices = @transform_8, window_bounds = array<i64: 2, 16, 16, 32>}]} {
    %c0 = arith.constant 0 : index
    %c0_0 = arith.constant 0 : index
    %c0_1 = arith.constant 0 : index
    %c0_2 = arith.constant 0 : index
    %0 = vector.load %arg1[%c0, %c0_0, %c0_1, %c0_2] : memref<2x16x16x32xbf16, #tpu.memory_space<vmem>>, vector<2x16x16x32xbf16>
    %cst = arith.constant 0.000000e+00 : bf16
    %1 = vector.broadcast %cst : bf16 to vector<2x2x16x32xbf16>
    %2 = tpu.concatenate %1, %0, %1 in 1 : vector<2x2x16x32xbf16>, vector<2x16x16x32xbf16>, vector<2x2x16x32xbf16> -> vector<2x20x16x32xbf16>
    %cst_3 = arith.constant 0.000000e+00 : bf16
    %3 = vector.broadcast %cst_3 : bf16 to vector<2x20x2x32xbf16>
    %4 = tpu.concatenate %3, %2, %3 in 2 : vector<2x20x2x32xbf16>, vector<2x20x16x32xbf16>, vector<2x20x2x32xbf16> -> vector<2x20x20x32xbf16>
    %5 = vector.extract_strided_slice %4 {offsets = [0, 0, 0, 0], sizes = [2, 16, 16, 32], strides = [1, 1, 1, 1]} : vector<2x20x20x32xbf16> to vector<2x16x16x32xbf16>
    %6 = vector.shape_cast %5 : vector<2x16x16x32xbf16> to vector<512x32xbf16>
    %7 = vector.extract_strided_slice %4 {offsets = [0, 0, 2, 0], sizes = [2, 16, 16, 32], strides = [1, 1, 1, 1]} : vector<2x20x20x32xbf16> to vector<2x16x16x32xbf16>
    %8 = vector.shape_cast %7 : vector<2x16x16x32xbf16> to vector<512x32xbf16>
    %9 = vector.extract_strided_slice %4 {offsets = [0, 0, 4, 0], sizes = [2, 16, 16, 32], strides = [1, 1, 1, 1]} : vector<2x20x20x32xbf16> to vector<2x16x16x32xbf16>
    %10 = vector.shape_cast %9 : vector<2x16x16x32xbf16> to vector<512x32xbf16>
    %11 = vector.extract_strided_slice %4 {offsets = [0, 2, 0, 0], sizes = [2, 16, 16, 32], strides = [1, 1, 1, 1]} : vector<2x20x20x32xbf16> to vector<2x16x16x32xbf16>
    %12 = vector.shape_cast %11 : vector<2x16x16x32xbf16> to vector<512x32xbf16>
    %13 = vector.extract_strided_slice %4 {offsets = [0, 2, 2, 0], sizes = [2, 16, 16, 32], strides = [1, 1, 1, 1]} : vector<2x20x20x32xbf16> to vector<2x16x16x32xbf16>
    %14 = vector.shape_cast %13 : vector<2x16x16x32xbf16> to vector<512x32xbf16>
    %15 = vector.extract_strided_slice %4 {offsets = [0, 2, 4, 0], sizes = [2, 16, 16, 32], strides = [1, 1, 1, 1]} : vector<2x20x20x32xbf16> to vector<2x16x16x32xbf16>
    %16 = vector.shape_cast %15 : vector<2x16x16x32xbf16> to vector<512x32xbf16>
    %17 = vector.extract_strided_slice %4 {offsets = [0, 4, 0, 0], sizes = [2, 16, 16, 32], strides = [1, 1, 1, 1]} : vector<2x20x20x32xbf16> to vector<2x16x16x32xbf16>
    %18 = vector.shape_cast %17 : vector<2x16x16x32xbf16> to vector<512x32xbf16>
    %19 = vector.extract_strided_slice %4 {offsets = [0, 4, 2, 0], sizes = [2, 16, 16, 32], strides = [1, 1, 1, 1]} : vector<2x20x20x32xbf16> to vector<2x16x16x32xbf16>
    %20 = vector.shape_cast %19 : vector<2x16x16x32xbf16> to vector<512x32xbf16>
    %21 = vector.extract_strided_slice %4 {offsets = [0, 4, 4, 0], sizes = [2, 16, 16, 32], strides = [1, 1, 1, 1]} : vector<2x20x20x32xbf16> to vector<2x16x16x32xbf16>
    %22 = vector.shape_cast %21 : vector<2x16x16x32xbf16> to vector<512x32xbf16>
    %23 = tpu.concatenate %6, %8, %10, %12, %14, %16, %18, %20, %22 in 1 : vector<512x32xbf16>, vector<512x32xbf16>, vector<512x32xbf16>, vector<512x32xbf16>, vector<512x32xbf16>, vector<512x32xbf16>, vector<512x32xbf16>, vector<512x32xbf16>, vector<512x32xbf16> -> vector<512x288xbf16>
    %c0_4 = arith.constant 0 : index
    %c0_5 = arith.constant 0 : index
    %24 = vector.load %arg2[%c0_4, %c0_5] : memref<288x32xbf16, #tpu.memory_space<vmem>>, vector<288x32xbf16>
    %cst_6 = arith.constant dense<0.000000e+00> : vector<512x32xf32>
    %25 = tpu.matmul %23, %24, %cst_6 {dimension_numbers = #tpu.dot_dimension_numbers<[1], [0], [0], [1], [0, 0, 1, 1], [], []>} : vector<512x288xbf16>, vector<288x32xbf16>, vector<512x32xf32> -> vector<512x32xf32>
    %c0_7 = arith.constant 0 : index
    %c0_8 = arith.constant 0 : index
    %26 = vector.load %arg3[%c0_7, %c0_8] : memref<1x32xf32, #tpu.memory_space<vmem>>, vector<1x32xf32>
    %27 = vector.broadcast %26 : vector<1x32xf32> to vector<512x32xf32>
    %28 = arith.addf %25, %27 : vector<512x32xf32>
    %cst_9 = arith.constant 0.000000e+00 : f32
    %29 = vector.broadcast %cst_9 : f32 to vector<512x32xf32>
    %30 = arith.maximumf %28, %29 : vector<512x32xf32>
    %31 = vector.shape_cast %30 : vector<512x32xf32> to vector<2x16x16x32xf32>
    %32 = arith.truncf %31 : vector<2x16x16x32xf32> to vector<2x16x16x32xbf16>
    %cst_10 = arith.constant 0.000000e+00 : bf16
    %33 = vector.broadcast %cst_10 : bf16 to vector<2x2x16x32xbf16>
    %34 = tpu.concatenate %33, %32, %33 in 1 : vector<2x2x16x32xbf16>, vector<2x16x16x32xbf16>, vector<2x2x16x32xbf16> -> vector<2x20x16x32xbf16>
    %cst_11 = arith.constant 0.000000e+00 : bf16
    %35 = vector.broadcast %cst_11 : bf16 to vector<2x20x2x32xbf16>
    %36 = tpu.concatenate %35, %34, %35 in 2 : vector<2x20x2x32xbf16>, vector<2x20x16x32xbf16>, vector<2x20x2x32xbf16> -> vector<2x20x20x32xbf16>
    %37 = vector.extract_strided_slice %36 {offsets = [0, 0, 0, 0], sizes = [2, 16, 16, 32], strides = [1, 1, 1, 1]} : vector<2x20x20x32xbf16> to vector<2x16x16x32xbf16>
    %38 = vector.shape_cast %37 : vector<2x16x16x32xbf16> to vector<512x32xbf16>
    %39 = vector.extract_strided_slice %36 {offsets = [0, 0, 2, 0], sizes = [2, 16, 16, 32], strides = [1, 1, 1, 1]} : vector<2x20x20x32xbf16> to vector<2x16x16x32xbf16>
    %40 = vector.shape_cast %39 : vector<2x16x16x32xbf16> to vector<512x32xbf16>
    %41 = vector.extract_strided_slice %36 {offsets = [0, 0, 4, 0], sizes = [2, 16, 16, 32], strides = [1, 1, 1, 1]} : vector<2x20x20x32xbf16> to vector<2x16x16x32xbf16>
    %42 = vector.shape_cast %41 : vector<2x16x16x32xbf16> to vector<512x32xbf16>
    %43 = vector.extract_strided_slice %36 {offsets = [0, 2, 0, 0], sizes = [2, 16, 16, 32], strides = [1, 1, 1, 1]} : vector<2x20x20x32xbf16> to vector<2x16x16x32xbf16>
    %44 = vector.shape_cast %43 : vector<2x16x16x32xbf16> to vector<512x32xbf16>
    %45 = vector.extract_strided_slice %36 {offsets = [0, 2, 2, 0], sizes = [2, 16, 16, 32], strides = [1, 1, 1, 1]} : vector<2x20x20x32xbf16> to vector<2x16x16x32xbf16>
    %46 = vector.shape_cast %45 : vector<2x16x16x32xbf16> to vector<512x32xbf16>
    %47 = vector.extract_strided_slice %36 {offsets = [0, 2, 4, 0], sizes = [2, 16, 16, 32], strides = [1, 1, 1, 1]} : vector<2x20x20x32xbf16> to vector<2x16x16x32xbf16>
    %48 = vector.shape_cast %47 : vector<2x16x16x32xbf16> to vector<512x32xbf16>
    %49 = vector.extract_strided_slice %36 {offsets = [0, 4, 0, 0], sizes = [2, 16, 16, 32], strides = [1, 1, 1, 1]} : vector<2x20x20x32xbf16> to vector<2x16x16x32xbf16>
    %50 = vector.shape_cast %49 : vector<2x16x16x32xbf16> to vector<512x32xbf16>
    %51 = vector.extract_strided_slice %36 {offsets = [0, 4, 2, 0], sizes = [2, 16, 16, 32], strides = [1, 1, 1, 1]} : vector<2x20x20x32xbf16> to vector<2x16x16x32xbf16>
    %52 = vector.shape_cast %51 : vector<2x16x16x32xbf16> to vector<512x32xbf16>
    %53 = vector.extract_strided_slice %36 {offsets = [0, 4, 4, 0], sizes = [2, 16, 16, 32], strides = [1, 1, 1, 1]} : vector<2x20x20x32xbf16> to vector<2x16x16x32xbf16>
    %54 = vector.shape_cast %53 : vector<2x16x16x32xbf16> to vector<512x32xbf16>
    %55 = tpu.concatenate %38, %40, %42, %44, %46, %48, %50, %52, %54 in 1 : vector<512x32xbf16>, vector<512x32xbf16>, vector<512x32xbf16>, vector<512x32xbf16>, vector<512x32xbf16>, vector<512x32xbf16>, vector<512x32xbf16>, vector<512x32xbf16>, vector<512x32xbf16> -> vector<512x288xbf16>
    %c0_12 = arith.constant 0 : index
    %c0_13 = arith.constant 0 : index
    %56 = vector.load %arg4[%c0_12, %c0_13] : memref<288x32xbf16, #tpu.memory_space<vmem>>, vector<288x32xbf16>
    %cst_14 = arith.constant dense<0.000000e+00> : vector<512x32xf32>
    %57 = tpu.matmul %55, %56, %cst_14 {dimension_numbers = #tpu.dot_dimension_numbers<[1], [0], [0], [1], [0, 0, 1, 1], [], []>} : vector<512x288xbf16>, vector<288x32xbf16>, vector<512x32xf32> -> vector<512x32xf32>
    %c0_15 = arith.constant 0 : index
    %c0_16 = arith.constant 0 : index
    %58 = vector.load %arg5[%c0_15, %c0_16] : memref<1x32xf32, #tpu.memory_space<vmem>>, vector<1x32xf32>
    %59 = vector.broadcast %58 : vector<1x32xf32> to vector<512x32xf32>
    %60 = arith.addf %57, %59 : vector<512x32xf32>
    %cst_17 = arith.constant 0.000000e+00 : f32
    %61 = vector.broadcast %cst_17 : f32 to vector<512x32xf32>
    %62 = arith.maximumf %60, %61 : vector<512x32xf32>
    %63 = vector.shape_cast %62 : vector<512x32xf32> to vector<2x256x32xf32>
    %cst_18 = arith.constant dense<0.000000e+00> : vector<2x32xf32>
    %64 = vector.multi_reduction <add>, %63, %cst_18 [1] : vector<2x256x32xf32> to vector<2x32xf32>
    %cst_19 = arith.constant 2.560000e+02 : f32
    %65 = vector.broadcast %cst_19 : f32 to vector<2x32xf32>
    %66 = arith.divf %64, %65 : vector<2x32xf32>
    %cst_20 = arith.constant dense<0xFF800000> : vector<2x32xf32>
    %67 = vector.multi_reduction <maximumf>, %63, %cst_20 [1] : vector<2x256x32xf32> to vector<2x32xf32>
    %68 = tpu.concatenate %66, %67 in 0 : vector<2x32xf32>, vector<2x32xf32> -> vector<4x32xf32>
    %cst_21 = arith.constant 0.000000e+00 : f32
    %69 = vector.broadcast %cst_21 : f32 to vector<4x32xf32>
    %c0_22 = arith.constant 0 : index
    %c0_23 = arith.constant 0 : index
    %70 = vector.load %arg6[%c0_22, %c0_23] : memref<2x32xf32, #tpu.memory_space<vmem>>, vector<1x32xf32>
    %71 = vector.broadcast %70 : vector<1x32xf32> to vector<4x32xf32>
    %72 = arith.mulf %68, %71 : vector<4x32xf32>
    %cst_24 = arith.constant dense<0.000000e+00> : vector<4xf32>
    %73 = vector.multi_reduction <add>, %72, %cst_24 [1] : vector<4x32xf32> to vector<4xf32>
    %74 = vector.shape_cast %73 : vector<4xf32> to vector<4x1xf32>
    %cst_25 = arith.constant 0.000000e+00 : f32
    %75 = vector.broadcast %cst_25 : f32 to vector<4x1xf32>
    %76 = arith.maximumf %74, %75 : vector<4x1xf32>
    %c0_26 = arith.constant 0 : index
    %c0_27 = arith.constant 0 : index
    %77 = vector.load %arg7[%c0_26, %c0_27] : memref<2x32xf32, #tpu.memory_space<vmem>>, vector<1x32xf32>
    %78 = vector.broadcast %76 : vector<4x1xf32> to vector<4x32xf32>
    %79 = vector.broadcast %77 : vector<1x32xf32> to vector<4x32xf32>
    %80 = arith.mulf %78, %79 : vector<4x32xf32>
    %81 = arith.addf %69, %80 : vector<4x32xf32>
    %c1 = arith.constant 1 : index
    %c0_28 = arith.constant 0 : index
    %82 = vector.load %arg6[%c1, %c0_28] : memref<2x32xf32, #tpu.memory_space<vmem>>, vector<1x32xf32>
    %83 = vector.broadcast %82 : vector<1x32xf32> to vector<4x32xf32>
    %84 = arith.mulf %68, %83 : vector<4x32xf32>
    %cst_29 = arith.constant dense<0.000000e+00> : vector<4xf32>
    %85 = vector.multi_reduction <add>, %84, %cst_29 [1] : vector<4x32xf32> to vector<4xf32>
    %86 = vector.shape_cast %85 : vector<4xf32> to vector<4x1xf32>
    %cst_30 = arith.constant 0.000000e+00 : f32
    %87 = vector.broadcast %cst_30 : f32 to vector<4x1xf32>
    %88 = arith.maximumf %86, %87 : vector<4x1xf32>
    %c1_31 = arith.constant 1 : index
    %c0_32 = arith.constant 0 : index
    %89 = vector.load %arg7[%c1_31, %c0_32] : memref<2x32xf32, #tpu.memory_space<vmem>>, vector<1x32xf32>
    %90 = vector.broadcast %88 : vector<4x1xf32> to vector<4x32xf32>
    %91 = vector.broadcast %89 : vector<1x32xf32> to vector<4x32xf32>
    %92 = arith.mulf %90, %91 : vector<4x32xf32>
    %93 = arith.addf %81, %92 : vector<4x32xf32>
    %94 = vector.extract_strided_slice %93 {offsets = [0, 0], sizes = [2, 32], strides = [1, 1]} : vector<4x32xf32> to vector<2x32xf32>
    %95 = vector.extract_strided_slice %93 {offsets = [2, 0], sizes = [2, 32], strides = [1, 1]} : vector<4x32xf32> to vector<2x32xf32>
    %96 = arith.addf %94, %95 : vector<2x32xf32>
    %97 = arith.negf %96 : vector<2x32xf32>
    %98 = math.exp %97 : vector<2x32xf32>
    %cst_33 = arith.constant 1.000000e+00 : f32
    %99 = vector.broadcast %cst_33 : f32 to vector<2x32xf32>
    %100 = arith.addf %99, %98 : vector<2x32xf32>
    %101 = arith.divf %99, %100 : vector<2x32xf32>
    %102 = vector.shape_cast %101 : vector<2x32xf32> to vector<2x1x32xf32>
    %103 = vector.broadcast %102 : vector<2x1x32xf32> to vector<2x256x32xf32>
    %104 = arith.mulf %63, %103 : vector<2x256x32xf32>
    %105 = vector.shape_cast %104 : vector<2x256x32xf32> to vector<2x16x16x32xf32>
    %cst_34 = arith.constant dense<0.000000e+00> : vector<2x16x16xf32>
    %106 = vector.multi_reduction <add>, %105, %cst_34 [3] : vector<2x16x16x32xf32> to vector<2x16x16xf32>
    %cst_35 = arith.constant 3.200000e+01 : f32
    %107 = vector.broadcast %cst_35 : f32 to vector<2x16x16xf32>
    %108 = arith.divf %106, %107 : vector<2x16x16xf32>
    %cst_36 = arith.constant 0.000000e+00 : f32
    %109 = vector.broadcast %cst_36 : f32 to vector<2x1x16xf32>
    %110 = tpu.concatenate %109, %108, %109 in 1 : vector<2x1x16xf32>, vector<2x16x16xf32>, vector<2x1x16xf32> -> vector<2x18x16xf32>
    %cst_37 = arith.constant 0.000000e+00 : f32
    %111 = vector.broadcast %cst_37 : f32 to vector<2x18x1xf32>
    %112 = tpu.concatenate %111, %110, %111 in 2 : vector<2x18x1xf32>, vector<2x18x16xf32>, vector<2x18x1xf32> -> vector<2x18x18xf32>
    %cst_38 = arith.constant dense<0xFF800000> : vector<2x16x16xf32>
    %113 = vector.multi_reduction <maximumf>, %105, %cst_38 [3] : vector<2x16x16x32xf32> to vector<2x16x16xf32>
    %cst_39 = arith.constant 0.000000e+00 : f32
    %114 = vector.broadcast %cst_39 : f32 to vector<2x1x16xf32>
    %115 = tpu.concatenate %114, %113, %114 in 1 : vector<2x1x16xf32>, vector<2x16x16xf32>, vector<2x1x16xf32> -> vector<2x18x16xf32>
    %cst_40 = arith.constant 0.000000e+00 : f32
    %116 = vector.broadcast %cst_40 : f32 to vector<2x18x1xf32>
    %117 = tpu.concatenate %116, %115, %116 in 2 : vector<2x18x1xf32>, vector<2x18x16xf32>, vector<2x18x1xf32> -> vector<2x18x18xf32>
    %cst_41 = arith.constant 0.000000e+00 : f32
    %118 = vector.broadcast %cst_41 : f32 to vector<2x16x16xf32>
    %c0_42 = arith.constant 0 : index
    %119 = memref.load %arg8[%c0_42] : memref<18xf32, #tpu.memory_space<smem>>
    %120 = vector.extract_strided_slice %112 {offsets = [0, 0, 0], sizes = [2, 16, 16], strides = [1, 1, 1]} : vector<2x18x18xf32> to vector<2x16x16xf32>
    %121 = vector.broadcast %119 : f32 to vector<2x16x16xf32>
    %122 = arith.mulf %121, %120 : vector<2x16x16xf32>
    %c9 = arith.constant 9 : index
    %123 = memref.load %arg8[%c9] : memref<18xf32, #tpu.memory_space<smem>>
    %124 = vector.extract_strided_slice %117 {offsets = [0, 0, 0], sizes = [2, 16, 16], strides = [1, 1, 1]} : vector<2x18x18xf32> to vector<2x16x16xf32>
    %125 = vector.broadcast %123 : f32 to vector<2x16x16xf32>
    %126 = arith.mulf %125, %124 : vector<2x16x16xf32>
    %127 = arith.addf %122, %126 : vector<2x16x16xf32>
    %128 = arith.addf %118, %127 : vector<2x16x16xf32>
    %c1_43 = arith.constant 1 : index
    %129 = memref.load %arg8[%c1_43] : memref<18xf32, #tpu.memory_space<smem>>
    %130 = vector.extract_strided_slice %112 {offsets = [0, 0, 1], sizes = [2, 16, 16], strides = [1, 1, 1]} : vector<2x18x18xf32> to vector<2x16x16xf32>
    %131 = vector.broadcast %129 : f32 to vector<2x16x16xf32>
    %132 = arith.mulf %131, %130 : vector<2x16x16xf32>
    %c10 = arith.constant 10 : index
    %133 = memref.load %arg8[%c10] : memref<18xf32, #tpu.memory_space<smem>>
    %134 = vector.extract_strided_slice %117 {offsets = [0, 0, 1], sizes = [2, 16, 16], strides = [1, 1, 1]} : vector<2x18x18xf32> to vector<2x16x16xf32>
    %135 = vector.broadcast %133 : f32 to vector<2x16x16xf32>
    %136 = arith.mulf %135, %134 : vector<2x16x16xf32>
    %137 = arith.addf %132, %136 : vector<2x16x16xf32>
    %138 = arith.addf %128, %137 : vector<2x16x16xf32>
    %c2 = arith.constant 2 : index
    %139 = memref.load %arg8[%c2] : memref<18xf32, #tpu.memory_space<smem>>
    %140 = vector.extract_strided_slice %112 {offsets = [0, 0, 2], sizes = [2, 16, 16], strides = [1, 1, 1]} : vector<2x18x18xf32> to vector<2x16x16xf32>
    %141 = vector.broadcast %139 : f32 to vector<2x16x16xf32>
    %142 = arith.mulf %141, %140 : vector<2x16x16xf32>
    %c11 = arith.constant 11 : index
    %143 = memref.load %arg8[%c11] : memref<18xf32, #tpu.memory_space<smem>>
    %144 = vector.extract_strided_slice %117 {offsets = [0, 0, 2], sizes = [2, 16, 16], strides = [1, 1, 1]} : vector<2x18x18xf32> to vector<2x16x16xf32>
    %145 = vector.broadcast %143 : f32 to vector<2x16x16xf32>
    %146 = arith.mulf %145, %144 : vector<2x16x16xf32>
    %147 = arith.addf %142, %146 : vector<2x16x16xf32>
    %148 = arith.addf %138, %147 : vector<2x16x16xf32>
    %c3 = arith.constant 3 : index
    %149 = memref.load %arg8[%c3] : memref<18xf32, #tpu.memory_space<smem>>
    %150 = vector.extract_strided_slice %112 {offsets = [0, 1, 0], sizes = [2, 16, 16], strides = [1, 1, 1]} : vector<2x18x18xf32> to vector<2x16x16xf32>
    %151 = vector.broadcast %149 : f32 to vector<2x16x16xf32>
    %152 = arith.mulf %151, %150 : vector<2x16x16xf32>
    %c12 = arith.constant 12 : index
    %153 = memref.load %arg8[%c12] : memref<18xf32, #tpu.memory_space<smem>>
    %154 = vector.extract_strided_slice %117 {offsets = [0, 1, 0], sizes = [2, 16, 16], strides = [1, 1, 1]} : vector<2x18x18xf32> to vector<2x16x16xf32>
    %155 = vector.broadcast %153 : f32 to vector<2x16x16xf32>
    %156 = arith.mulf %155, %154 : vector<2x16x16xf32>
    %157 = arith.addf %152, %156 : vector<2x16x16xf32>
    %158 = arith.addf %148, %157 : vector<2x16x16xf32>
    %c4 = arith.constant 4 : index
    %159 = memref.load %arg8[%c4] : memref<18xf32, #tpu.memory_space<smem>>
    %160 = vector.extract_strided_slice %112 {offsets = [0, 1, 1], sizes = [2, 16, 16], strides = [1, 1, 1]} : vector<2x18x18xf32> to vector<2x16x16xf32>
    %161 = vector.broadcast %159 : f32 to vector<2x16x16xf32>
    %162 = arith.mulf %161, %160 : vector<2x16x16xf32>
    %c13 = arith.constant 13 : index
    %163 = memref.load %arg8[%c13] : memref<18xf32, #tpu.memory_space<smem>>
    %164 = vector.extract_strided_slice %117 {offsets = [0, 1, 1], sizes = [2, 16, 16], strides = [1, 1, 1]} : vector<2x18x18xf32> to vector<2x16x16xf32>
    %165 = vector.broadcast %163 : f32 to vector<2x16x16xf32>
    %166 = arith.mulf %165, %164 : vector<2x16x16xf32>
    %167 = arith.addf %162, %166 : vector<2x16x16xf32>
    %168 = arith.addf %158, %167 : vector<2x16x16xf32>
    %c5 = arith.constant 5 : index
    %169 = memref.load %arg8[%c5] : memref<18xf32, #tpu.memory_space<smem>>
    %170 = vector.extract_strided_slice %112 {offsets = [0, 1, 2], sizes = [2, 16, 16], strides = [1, 1, 1]} : vector<2x18x18xf32> to vector<2x16x16xf32>
    %171 = vector.broadcast %169 : f32 to vector<2x16x16xf32>
    %172 = arith.mulf %171, %170 : vector<2x16x16xf32>
    %c14 = arith.constant 14 : index
    %173 = memref.load %arg8[%c14] : memref<18xf32, #tpu.memory_space<smem>>
    %174 = vector.extract_strided_slice %117 {offsets = [0, 1, 2], sizes = [2, 16, 16], strides = [1, 1, 1]} : vector<2x18x18xf32> to vector<2x16x16xf32>
    %175 = vector.broadcast %173 : f32 to vector<2x16x16xf32>
    %176 = arith.mulf %175, %174 : vector<2x16x16xf32>
    %177 = arith.addf %172, %176 : vector<2x16x16xf32>
    %178 = arith.addf %168, %177 : vector<2x16x16xf32>
    %c6 = arith.constant 6 : index
    %179 = memref.load %arg8[%c6] : memref<18xf32, #tpu.memory_space<smem>>
    %180 = vector.extract_strided_slice %112 {offsets = [0, 2, 0], sizes = [2, 16, 16], strides = [1, 1, 1]} : vector<2x18x18xf32> to vector<2x16x16xf32>
    %181 = vector.broadcast %179 : f32 to vector<2x16x16xf32>
    %182 = arith.mulf %181, %180 : vector<2x16x16xf32>
    %c15 = arith.constant 15 : index
    %183 = memref.load %arg8[%c15] : memref<18xf32, #tpu.memory_space<smem>>
    %184 = vector.extract_strided_slice %117 {offsets = [0, 2, 0], sizes = [2, 16, 16], strides = [1, 1, 1]} : vector<2x18x18xf32> to vector<2x16x16xf32>
    %185 = vector.broadcast %183 : f32 to vector<2x16x16xf32>
    %186 = arith.mulf %185, %184 : vector<2x16x16xf32>
    %187 = arith.addf %182, %186 : vector<2x16x16xf32>
    %188 = arith.addf %178, %187 : vector<2x16x16xf32>
    %c7 = arith.constant 7 : index
    %189 = memref.load %arg8[%c7] : memref<18xf32, #tpu.memory_space<smem>>
    %190 = vector.extract_strided_slice %112 {offsets = [0, 2, 1], sizes = [2, 16, 16], strides = [1, 1, 1]} : vector<2x18x18xf32> to vector<2x16x16xf32>
    %191 = vector.broadcast %189 : f32 to vector<2x16x16xf32>
    %192 = arith.mulf %191, %190 : vector<2x16x16xf32>
    %c16 = arith.constant 16 : index
    %193 = memref.load %arg8[%c16] : memref<18xf32, #tpu.memory_space<smem>>
    %194 = vector.extract_strided_slice %117 {offsets = [0, 2, 1], sizes = [2, 16, 16], strides = [1, 1, 1]} : vector<2x18x18xf32> to vector<2x16x16xf32>
    %195 = vector.broadcast %193 : f32 to vector<2x16x16xf32>
    %196 = arith.mulf %195, %194 : vector<2x16x16xf32>
    %197 = arith.addf %192, %196 : vector<2x16x16xf32>
    %198 = arith.addf %188, %197 : vector<2x16x16xf32>
    %c8 = arith.constant 8 : index
    %199 = memref.load %arg8[%c8] : memref<18xf32, #tpu.memory_space<smem>>
    %200 = vector.extract_strided_slice %112 {offsets = [0, 2, 2], sizes = [2, 16, 16], strides = [1, 1, 1]} : vector<2x18x18xf32> to vector<2x16x16xf32>
    %201 = vector.broadcast %199 : f32 to vector<2x16x16xf32>
    %202 = arith.mulf %201, %200 : vector<2x16x16xf32>
    %c17 = arith.constant 17 : index
    %203 = memref.load %arg8[%c17] : memref<18xf32, #tpu.memory_space<smem>>
    %204 = vector.extract_strided_slice %117 {offsets = [0, 2, 2], sizes = [2, 16, 16], strides = [1, 1, 1]} : vector<2x18x18xf32> to vector<2x16x16xf32>
    %205 = vector.broadcast %203 : f32 to vector<2x16x16xf32>
    %206 = arith.mulf %205, %204 : vector<2x16x16xf32>
    %207 = arith.addf %202, %206 : vector<2x16x16xf32>
    %208 = arith.addf %198, %207 : vector<2x16x16xf32>
    %209 = arith.negf %208 : vector<2x16x16xf32>
    %210 = math.exp %209 : vector<2x16x16xf32>
    %cst_44 = arith.constant 1.000000e+00 : f32
    %211 = vector.broadcast %cst_44 : f32 to vector<2x16x16xf32>
    %212 = arith.addf %211, %210 : vector<2x16x16xf32>
    %213 = arith.divf %211, %212 : vector<2x16x16xf32>
    %214 = vector.shape_cast %213 : vector<2x16x16xf32> to vector<2x16x16x1xf32>
    %215 = vector.broadcast %214 : vector<2x16x16x1xf32> to vector<2x16x16x32xf32>
    %216 = arith.mulf %105, %215 : vector<2x16x16x32xf32>
    %cst_45 = arith.constant 0.000000e+00 : f32
    %217 = vector.broadcast %cst_45 : f32 to vector<2x16x16x32xf32>
    %218 = arith.maximumf %216, %217 : vector<2x16x16x32xf32>
    %c0_46 = arith.constant 0 : index
    %c0_47 = arith.constant 0 : index
    %c0_48 = arith.constant 0 : index
    %c0_49 = arith.constant 0 : index
    %219 = vector.load %arg9[%c0_46, %c0_47, %c0_48, %c0_49] : memref<2x16x16x32xf32, #tpu.memory_space<vmem>>, vector<2x16x16x32xf32>
    tpu.vector_store %arg9[%c0_46, %c0_47, %c0_48, %c0_49], %218 {strides = array<i32>} : memref<2x16x16x32xf32, #tpu.memory_space<vmem>>, vector<2x16x16x32xf32>,
    return
  }
  func.func @transform_0(%arg0: i32) -> (i32, i32, i32, i32) {
    %c0_i32 = arith.constant 0 : i32
    %c0_i32_0 = arith.constant 0 : i32
    %c0_i32_1 = arith.constant 0 : i32
    %c0_i32_2 = arith.constant 0 : i32
    return %arg0, %c0_i32, %c0_i32_0, %c0_i32_1 : i32, i32, i32, i32
  }
  func.func @transform_1(%arg0: i32) -> (i32, i32) {
    %c0_i32 = arith.constant 0 : i32
    %c0_i32_0 = arith.constant 0 : i32
    %c0_i32_1 = arith.constant 0 : i32
    return %c0_i32, %c0_i32_0 : i32, i32
  }
  func.func @transform_2(%arg0: i32) -> (i32, i32) {
    %c0_i32 = arith.constant 0 : i32
    %c0_i32_0 = arith.constant 0 : i32
    %c0_i32_1 = arith.constant 0 : i32
    return %c0_i32, %c0_i32_0 : i32, i32
  }
  func.func @transform_3(%arg0: i32) -> (i32, i32) {
    %c0_i32 = arith.constant 0 : i32
    %c0_i32_0 = arith.constant 0 : i32
    %c0_i32_1 = arith.constant 0 : i32
    return %c0_i32, %c0_i32_0 : i32, i32
  }
  func.func @transform_4(%arg0: i32) -> (i32, i32) {
    %c0_i32 = arith.constant 0 : i32
    %c0_i32_0 = arith.constant 0 : i32
    %c0_i32_1 = arith.constant 0 : i32
    return %c0_i32, %c0_i32_0 : i32, i32
  }
  func.func @transform_5(%arg0: i32) -> (i32, i32) {
    %c0_i32 = arith.constant 0 : i32
    %c0_i32_0 = arith.constant 0 : i32
    %c0_i32_1 = arith.constant 0 : i32
    return %c0_i32, %c0_i32_0 : i32, i32
  }
  func.func @transform_6(%arg0: i32) -> (i32, i32) {
    %c0_i32 = arith.constant 0 : i32
    %c0_i32_0 = arith.constant 0 : i32
    %c0_i32_1 = arith.constant 0 : i32
    return %c0_i32, %c0_i32_0 : i32, i32
  }
  func.func @transform_7(%arg0: i32) -> i32 {
    %c0_i32 = arith.constant 0 : i32
    %c0_i32_0 = arith.constant 0 : i32
    return %c0_i32 : i32
  }
  func.func @transform_8(%arg0: i32) -> (i32, i32, i32, i32) {
    %c0_i32 = arith.constant 0 : i32
    %c0_i32_0 = arith.constant 0 : i32
    %c0_i32_1 = arith.constant 0 : i32
    %c0_i32_2 = arith.constant 0 : i32
    return %arg0, %c0_i32, %c0_i32_0, %c0_i32_1 : i32, i32, i32, i32
  }
}

</mosaic_0001>

<bundles_post_ra>
// kernel: tpu_custom_call.1
= control target key start
LH: loop header
LB: loop body
LE: loop exit
PB: predicated region body
PF: predicated region fallthrough
CT: control target
= control target key end

     0   :  { %13 = vsyncpa [#allocation4], 0  ;;  %s13145_s0 = inlined_call_operand.vmem [shape: bf16[2,16,16,32], index: 0, kind: input, shape index: {}]   ;;  %s13146_s1 = inlined_call_operand.vmem [shape: bf16[288,32], index: 1, kind: input, shape index: {}]   ;;  %s13147_s2 = inlined_call_operand.vmem [shape: f32[1,32], index: 2, kind: input, shape index: {}]   ;;  %s13148_s3 = inlined_call_operand.vmem [shape: bf16[288,32], index: 3, kind: input, shape index: {}]   ;;  %s13149_s4 = inlined_call_operand.vmem [shape: f32[1,32], index: 4, kind: input, shape index: {}]   ;;  %s13150_s5 = inlined_call_operand.vmem [shape: f32[2,32], index: 5, kind: input, shape index: {}]   ;;  %s13151_s6 = inlined_call_operand.vmem [shape: f32[2,32], index: 6, kind: input, shape index: {}]   ;;  %s13152_s7 = inlined_call_operand.vmem [shape: f32[18], index: 7, kind: input, shape index: {}]   ;;  %s13153_s8 = inlined_call_operand.hbm [shape: f32[2,16,16,32], index: 8, kind: output, shape index: {}]  }
   0x1   :  { %14 = vsyncpa [#allocation3], 0  ;;  %s35_s29 = sshll.u32 %s13152_s7, 4  ;;  %s36_s29 = int_to_ptr.vmem [resolvable:$true] %s35_s29 }
   0x2   :  { %s7700_s30 = scalar_lea.vmem %s36_s29, 16  ;;  %p7705_p1 = scmp.lt.s32.totalorder %s36_s29, %s36_s29 }
   0x3   :  { %p7701_p0 = scmp.ne.s32.totalorder %s36_s29, %s7700_s30  ;;  %p7706_p2 = scmp.lt.s32.totalorder %s7700_s30, %s7700_s30 }
   0x5   :  { %p7707_p3 = por %p7706_p2, %p7705_p1 }
   0x7   :  { %p7708_p4 = pnand %p7707_p3, %p7701_p0 }
   0x9   :  { %7711 = shalt.err (!%p7708_p4)
}
   0xa   :  { %s7738_s9 = smov [#allocation2]  }
   0xb   :  { %38 = dma.vmem_to_smem %s36_s29, 16, %s7738_s9, [#allocation4]  }
   0xc   :  { %7734 = dma.done.wait [#allocation4], 16  }
   0xd   :  { %7735 = vsyncadd [#allocation4], 4294967280 }
   0xe   :  { %42 = sfence }
   0xf   :  { %v7607_v0 = vld [vmem:[%s13145_s0 + $0x10] sm:$0xff]   ;;  %vm302_vm0 = vcmask 1040384   ;;  %v7608_v1 = vld [vmem:[%s13145_s0] sm:$0xff]   ;;  %v13154_v3 = vmov 0   ;;  %vm461_vm1 = vcmask 1046528   ;;  %vm549_vm2 = vcmask 1045504  }
  0x10   :  { %v272_v2 = vrot.slane %v7607_v0, 7  ;;  %v269_v4 = vrot.slane %v13154_v3, 7  ;;  %1732 = vmatprep.subr.bf16.mxu0 %v13154_v3  ;;  %v270_v5 = vrot.slane %v7608_v1, 7  ;;  %v7610_v9 = vld [vmem:[%s13145_s0 + $0x8] sm:$0xff]   ;;  %s7740_s15 = smov 64   ;;  %v7609_v17 = vld [vmem:[%s13145_s0 + $0x18] sm:$0xff]  }
  0x11   :  { %s7741_s18 = smov 32   ;;  %v271_v22 = vrot.slane %v7610_v9, 7  ;;  %v273_v26 = vrot.slane %v7609_v17, 7  ;;  %s7742_s19 = smov 96   ;;  %v7615_v34 = vld [vmem:[%s13146_s1] sm:$0xff]   ;;  %v7616_v39 = vld [vmem:[%s13146_s1 + $0x8] sm:$0xff]  }
  0x12   :  { %v7807_v6 = vsel %vm302_vm0, 0, %v272_v2  ;;  %v7810_v7 = vsel %vm302_vm0, 0, %v269_v4  ;;  %v370_v8 = vsel %vm302_vm0, %v269_v4, 0  ;;  %v7821_v14 = vsel %vm302_vm0, 0, %v270_v5  ;;  %v7611_v38 = vld [vmem:[%s13145_s0 + $0x20] sm:$0xff]   ;;  %1733 = vmatpush1.bf16.msra.mxu0 %v7615_v34  ;;  %v7617_v46 = vld [vmem:[%s13146_s1 + $0x10] sm:$0xff]  }
  0x13   :  { %913 = vrot.lane.b32.xlu1 %v7807_v6, %s7740_s15  ;;  %v462_v10 = vrot.slane %v7810_v7, 1  ;;  %v463_v11 = vrot.slane %v370_v8, 1  ;;  %v550_v12 = vrot.slane %v7810_v7, 2  ;;  %v551_v13 = vrot.slane %v370_v8, 2  ;;  %1734 = vmatprep.subr.bf16.mxu0 %v13154_v3  ;;  %v7619_v51 = vld [vmem:[%s13146_s1 + $0x18] sm:$0xff]   ;;  %v7612_v52 = vld [vmem:[%s13145_s0 + $0x28] sm:$0xff]  }
  0x14   :  { %v371_v15 = vsel %vm302_vm0, %v270_v5, 0  ;;  %v373_v16 = vsel %vm302_vm0, %v272_v2, 0  ;;  %v553_v20 = vrot.slane %v7821_v14, 2  ;;  %v471_v24 = vrot.slane %v7807_v6, 1  ;;  %v7620_v55 = vld [vmem:[%s13146_s1 + $0x20] sm:$0xff]   ;;  %v7621_v62 = vld [vmem:[%s13146_s1 + $0x28] sm:$0xff]  }
  0x15   :  { %v7829_v18 = vsel %vm461_vm1, %v462_v10, %v463_v11  ;;  %v7832_v19 = vsel %vm549_vm2, %v550_v12, %v551_v13  ;;  %v554_v21 = vrot.slane %v371_v15, 2  ;;  %v472_v25 = vrot.slane %v373_v16, 1  ;;  %v7623_v2 = vld [vmem:[%s13146_s1 + $0x30] sm:$0xff]   ;;  %v7634_v8 = vld [vmem:[%s13146_s1 + $0x80] sm:$0xff]   ;;  %v7614_v10 = vld [vmem:[%s13145_s0 + $0x38] sm:$0xff]   ;;  %s12326_s13 = sld [smem:[#allocation2 + $0x5]] }
  0x16   :  { %13299 = vst [vmem:[#allocation8_spill] sm:$0xff] %v7832_v19  ;;  %669 = vrot.lane.b32.xlu0 %v7829_v18, %s7741_s18  ;;  %v7842_v27 = vsel %vm302_vm0, 0, %v271_v22  ;;  %v372_v28 = vsel %vm302_vm0, %v271_v22, 0  ;;  %v7853_v32 = vsel %vm302_vm0, 0, %v273_v26  ;;  %v374_v33 = vsel %vm302_vm0, %v273_v26, 0  ;;  %1735 = vmatpush1.bf16.msra.mxu0 %v7616_v39  ;;  %v7613_v5 = vld [vmem:[%s13145_s0 + $0x30] sm:$0xff]  }
  0x17   :  { %727 = vrot.lane.b32.xlu1 %v7832_v19, %s7740_s15  ;;  %v555_v23 = vsel %vm549_vm2, %v553_v20, %v554_v21  ;;  %v7849_v29 = vsel %vm461_vm1, %v471_v24, %v472_v25  ;;  %v556_v30 = vrot.slane %v7842_v27, 2  ;;  %v557_v31 = vrot.slane %v372_v28, 2  ;;  %1736 = vmatprep.subr.bf16.mxu0 %v13154_v3  ;;  %v7624_v12 = vld [vmem:[%s13146_s1 + $0x38] sm:$0xff]   ;;  %v7625_v22 = vld [vmem:[%s13146_s1 + $0x40] sm:$0xff]   ;;  %s12332_s14 = sld [smem:[#allocation2 + $0x7]]  ;;  %s12334_s16 = sld [smem:[#allocation2 + $0x8]] }
  0x18   :  { %v474_v36 = vrot.slane %v7853_v32, 1  ;;  %v475_v37 = vrot.slane %v374_v33, 1  ;;  %v465_v40 = vrot.slane %v7821_v14, 1  ;;  %v466_v41 = vrot.slane %v371_v15, 1  ;;  %7455 = vmatprep.subr.bf16.mxu1 %v7634_v8  ;;  %v7637_v15 = vld [vmem:[%s13146_s1 + $0x88] sm:$0xff]   ;;  %v7618_v26 = vld [vmem:[%s13145_s0 + $0x40] sm:$0xff]  }
  0x19   :  { %v558_v35 = vsel %vm549_vm2, %v556_v30, %v557_v31  ;;  %v559_v43 = vrot.slane %v7807_v6, 2  ;;  %v560_v44 = vrot.slane %v373_v16, 2  ;;  %v274_v45 = vrot.slane %v7611_v38, 7  ;;  %7456 = vmatpush3.bf16.msra.mxu1 %v7634_v8  ;;  %s12342_s17 = sld [smem:[#allocation2 + $0x3]]  ;;  %s12344_s20 = sld [smem:[#allocation2 + $0x6]] }
  0x1a   :  { %849 = vrot.lane.b32.xlu0 %v555_v23, %s7741_s18  ;;  %v7877_v42 = vsel %vm461_vm1, %v474_v36, %v475_v37  ;;  %v7884_v47 = vsel %vm461_vm1, %v465_v40, %v466_v41  ;;  %1737 = vmatpush1.bf16.msra.mxu0 %v7617_v46  ;;  %vm1029_vm3 = vcmask 261120   ;;  %v468_v56 = vrot.slane %v7842_v27, 1  ;;  %v7628_v41 = vld [vmem:[%s13146_s1 + $0x50] sm:$0xff]   ;;  %s12350_s21 = sld [smem:[#allocation2 + $0xd]]  ;;  %s12352_s22 = sld [smem:[#allocation2 + $0xe]] }
  0x1b   :  { %785 = vrot.lane.b32.xlu1 %v7821_v14, %s7742_s19  ;;  %v7892_v48 = vsel %vm549_vm2, %v559_v43, %v560_v44  ;;  %v7895_v49 = vsel %vm302_vm0, 0, %v274_v45  ;;  %v7898_v50 = vsel %vm302_vm0, %v274_v45, 0  ;;  %1738 = vmatprep.subr.bf16.mxu0 %v13154_v3  ;;  %v469_v57 = vrot.slane %v372_v28, 1  ;;  %v7622_v43 = vld [vmem:[%s13145_s0 + $0x48] sm:$0xff]   ;;  %v7626_v45 = vld [vmem:[%s13145_s0 + $0x50] sm:$0xff]   ;;  %s12358_s23 = sld [smem:[#allocation2 + $0x10]] }
  0x1c   :  { %v477_v53 = vrot.slane %v7895_v49, 1  ;;  %v478_v54 = vrot.slane %v7898_v50, 1  ;;  %7459 = vmatprep.mubr.msk.bf16.mxu1 %vm1029_vm3, %v7892_v48  ;;  %v562_v58 = vrot.slane %v7853_v32, 2  ;;  %v563_v59 = vrot.slane %v374_v33, 2  ;;  %7457 = vmatprep.subr.bf16.mxu1 %v7637_v15  ;;  %v7627_v33 = vld [vmem:[%s13146_s1 + $0x48] sm:$0xff]   ;;  %s12360_s24 = sld [smem:[#allocation2 + $0x11]] }
  0x1d   :  { %v275_v61 = vrot.slane %v7612_v52, 7  ;;  %v7931_v63 = vsel %vm461_vm1, %v468_v56, %v469_v57  ;;  %v276_v13 = vrot.slane %v7613_v5, 7  ;;  %v277_v16 = vrot.slane %v7614_v10, 7  ;;  %7458 = vmatpush3.bf16.msra.mxu1 %v7637_v15  ;;  %s12373_s25 = sld [smem:[#allocation2 + $0xc]]  ;;  %s12375_s26 = sld [smem:[#allocation2 + $0xf]] }
  0x1e   :  { %971 = vrot.lane.b32.xlu0 %v7849_v29, %s7742_s19  ;;  %1739 = vmatpush1.bf16.msra.mxu0 %v7619_v51  ;;  %v7925_v60 = vsel %vm461_vm1, %v477_v53, %v478_v54  ;;  %v7939_v0 = vsel %vm549_vm2, %v562_v58, %v563_v59  ;;  %v565_v20 = vrot.slane %v7895_v49, 2  ;;  %v566_v21 = vrot.slane %v7898_v50, 2  ;;  %v7629_v51 = vld [vmem:[%s13146_s1 + $0x58] sm:$0xff]   ;;  %s12394_s27 = sld [smem:[#allocation2]]  ;;  %s12396_s28 = sld [smem:[#allocation2 + $0x9]] }
  0x1f   :  { %915 = vrot.lane.b32.xlu1 %v7853_v32, %s7740_s15  ;;  %1740 = vmatprep.subr.bf16.mxu0 %v13154_v3  ;;  %v7942_v1 = vsel %vm302_vm0, 0, %v275_v61  ;;  %v376_v4 = vsel %vm302_vm0, %v275_v61, 0  ;;  %v377_v24 = vsel %vm302_vm0, %v276_v13, 0  ;;  %v7990_v25 = vsel %vm302_vm0, 0, %v277_v16  ;;  %s12588_s29 = sld [smem:[#allocation2 + $0x1]]  ;;  %s7745_s30 = smov 127  }
  0x20   :  { %v480_v9 = vrot.slane %v7942_v1, 1  ;;  %v481_v11 = vrot.slane %v376_v4, 1  ;;  %3865 = vmatprep.subr.bf16.mxu1 %v13154_v3  ;;  %v7998_v28 = vsel %vm549_vm2, %v565_v20, %v566_v21  ;;  %v568_v30 = vrot.slane %v7942_v1, 2  ;;  %7460 = vmatmul.mubr.msk.bf16.vlgmr.msra.gmra.mrb[0].mxu1 %vm1029_vm3, %v7939_v0 }
  0x21   :  { %v569_v31 = vrot.slane %v376_v4, 2  ;;  %v8009_v36 = vsel %vm302_vm0, %v277_v16, 0  ;;  %v486_v37 = vrot.slane %v7990_v25, 1  ;;  %7463 = vmatprep.mubr.msk.bf16.mxu1 %vm1029_vm3, %v7998_v28  ;;  %v278_v39 = vrot.slane %v7618_v26, 7 }
  0x22   :  { %851 = vrot.lane.b32.xlu0 %v558_v35, %s7741_s18  ;;  %1741 = vmatpush1.bf16.msra.mxu0 %v7620_v55  ;;  %v7974_v17 = vsel %vm461_vm1, %v480_v9, %v481_v11  ;;  %v572_v40 = vrot.slane %v377_v24, 2  ;;  %v487_v50 = vrot.slane %v8009_v36, 1  ;;  %v574_v53 = vrot.slane %v7990_v25, 2  ;;  %v7632_v11 = vld [vmem:[%s13146_s1 + $0x68] sm:$0xff]  }
  0x23   :  { %787 = vrot.lane.b32.xlu1 %v7842_v27, %s7742_s19  ;;  %1742 = vmatprep.subr.bf16.mxu0 %v13154_v3  ;;  %v8029_v44 = vsel %vm302_vm0, 0, %v278_v39  ;;  %v575_v54 = vrot.slane %v8009_v36, 2  ;;  %v8055_v55 = vsel %vm302_vm0, %v278_v39, 0  ;;  %v279_v57 = vrot.slane %v7622_v43, 7  ;;  %v7639_v43 = vld [vmem:[%s13145_s0 + $0x70] sm:$0xff]  }
  0x24   :  { %13300 = vst [vmem:[#allocation9_spill] sm:$0xff] %v8029_v44  ;;  %v489_v56 = vrot.slane %v8029_v44, 1  ;;  %v577_v58 = vrot.slane %v8029_v44, 2  ;;  %v578_v59 = vrot.slane %v8055_v55, 2  ;;  %v280_v61 = vrot.slane %v7626_v45, 7 }
  0x25   :  { %v490_v4 = vrot.slane %v8055_v55, 1  ;;  %v8077_v5 = vsel %vm302_vm0, 0, %v279_v57  ;;  %v8082_v8 = vsel %vm549_vm2, %v574_v53, %v575_v54  ;;  %v8085_v9 = vsel %vm302_vm0, %v279_v57, 0 }
  0x26   :  { %973 = vrot.lane.b32.xlu0 %v7877_v42, %s7742_s19  ;;  %1743 = vmatpush1.bf16.msra.mxu0 %v7621_v62  ;;  %v7630_v62 = vld [vmem:[%s13145_s0 + $0x58] sm:$0xff]   ;;  %13301 = vst [vmem:[#allocation10_spill] sm:$0xff] %v8077_v5  ;;  %v581_v15 = vrot.slane %v8085_v9, 2  ;;  %v8102_v16 = vsel %vm302_vm0, 0, %v280_v61  ;;  %v8105_v20 = vsel %vm302_vm0, %v280_v61, 0  ;;  %vm1088_vm4 = vcmask 523264  }
  0x27   :  { %671 = vrot.lane.b32.xlu1 %v7884_v47, %s7741_s18  ;;  %1744 = vmatprep.subr.bf16.mxu0 %v13154_v3  ;;  %v281_v10 = vrot.slane %v7630_v62, 7  ;;  %13302 = vst [vmem:[#allocation11_spill] sm:$0xff] %v8102_v16  ;;  %v583_v21 = vrot.slane %v8102_v16, 2  ;;  %v8173_v53 = vsel %vm461_vm1, %v489_v56, %v490_v4  ;;  %vm1147_vm5 = vcmask 785408  }
  0x28   :  { %vm4788_vm6 = vcmask 1041409   ;;  %vm4793_vm7 = vcmask 1043459   ;;  %vm4796_vm8 = vcmask 1041408   ;;  %vm4804_vm9 = vcmask 257024  }
  0x29   :  { %v8119_v26 = vsel %vm302_vm0, 0, %v281_v10  ;;  %vm5272_vm10 = vcmask 130112   ;;  %vm5553_vm11 = vcmask 1042434   ;;  %vm5556_vm12 = vcmask 1044484  }
  0x2a   :  { %853 = vrot.lane.b32.xlu0 %v7892_v48, %s7741_s18  ;;  %1745 = vmatpush1.bf16.msra.mxu0 %v7623_v2  ;;  %v7631_v2 = vld [vmem:[%s13146_s1 + $0x60] sm:$0xff]   ;;  %13303 = vst [vmem:[#allocation12_spill] sm:$0xff] %v8119_v26  ;;  %vm5558_vm13 = vcmask 1045509   ;;  %vm5560_vm14 = vcmask 1046534   ;;  %vm5562_vm15 = vcmask 1047559  }
  0x2b   :  { %729 = vrot.lane.b32.xlu1 %v555_v23, %s7740_s15  ;;  %1746 = vmatprep.subr.bf16.mxu0 %v13154_v3  ;;  %v7983_v23 = vsel %vm302_vm0, 0, %v276_v13  ;;  %v8094_v13 = vsel %vm549_vm2, %v577_v58, %v578_v59  ;;  %v7640_v58 = vld [vmem:[%s13145_s0 + $0x78] sm:$0xff]  }
  0x2c   :  { %v483_v34 = vrot.slane %v7983_v23, 1  ;;  %v571_v38 = vrot.slane %v7983_v23, 2 }
  0x2e   :  { %917 = vrot.lane.b32.xlu0 %v7895_v49, %s7740_s15  ;;  %1747 = vmatpush1.bf16.msra.mxu0 %v7624_v12  ;;  %v8047_v52 = vsel %vm549_vm2, %v571_v38, %v572_v40  ;;  %v7635_v12 = vld [vmem:[%s13145_s0 + $0x60] sm:$0xff]   ;;  %v7638_v40 = vld [vmem:[%s13145_s0 + $0x68] sm:$0xff]  }
  0x2f   :  { %789 = vrot.lane.b32.xlu1 %v7807_v6, %s7742_s19  ;;  %1748 = vmatprep.subr.bf16.mxu0 %v13154_v3 }
  0x32   :  { %975 = vrot.lane.b32.xlu0 %v7925_v60, %s7742_s19  ;;  %1749 = vmatpush1.bf16.msra.mxu0 %v7625_v22  ;;  %v584_v22 = vrot.slane %v8105_v20, 2 }
  0x33   :  { %673 = vrot.lane.b32.xlu1 %v7931_v63, %s7741_s18  ;;  %1750 = vmatprep.subr.bf16.mxu0 %v13154_v3 }
  0x34   :  { %v8144_v39 = vsel %vm549_vm2, %v583_v21, %v584_v22 }
  0x36   :  { %855 = vrot.lane.b32.xlu0 %v7939_v0, %s7741_s18  ;;  %1751 = vmatpush1.bf16.msra.mxu0 %v7627_v33  ;;  %v282_v33 = vrot.slane %v7635_v12, 7  ;;  %v492_v12 = vrot.slane %v8077_v5, 1 }
  0x37   :  { %731 = vrot.lane.b32.xlu1 %v558_v35, %s7740_s15  ;;  %v484_v35 = vrot.slane %v377_v24, 1  ;;  %1752 = vmatprep.subr.bf16.mxu0 %v13154_v3  ;;  %v8116_v24 = vsel %vm461_vm1, %v486_v37, %v487_v50 }
  0x38   :  { %v8140_v37 = vsel %vm302_vm0, 0, %v282_v33 }
  0x39   :  { %v8037_v46 = vsel %vm461_vm1, %v483_v34, %v484_v35  ;;  %v7636_v34 = vld [vmem:[%s13146_s1 + $0x78] sm:$0xff]   ;;  %v586_v35 = vrot.slane %v8119_v26, 2  ;;  %v589_v45 = vrot.slane %v8140_v37, 2 }
  0x3a   :  { %919 = vrot.lane.b32.xlu0 %v7942_v1, %s7740_s15  ;;  %1753 = vmatpush1.bf16.msra.mxu0 %v7628_v41  ;;  %v8153_v41 = vsel %vm302_vm0, %v282_v33, 0 }
  0x3b   :  { %791 = vrot.lane.b32.xlu1 %v7853_v32, %s7742_s19  ;;  %1754 = vmatprep.subr.bf16.mxu0 %v13154_v3  ;;  %v590_v50 = vrot.slane %v8153_v41, 2 }
  0x3d   :  { %v8179_v55 = vsel %vm549_vm2, %v589_v45, %v590_v50  ;;  %v496_v45 = vrot.slane %v8105_v20, 1 }
  0x3e   :  { %977 = vrot.lane.b32.xlu0 %v7974_v17, %s7742_s19  ;;  %1755 = vmatpush1.bf16.msra.mxu0 %v7629_v51  ;;  %v283_v51 = vrot.slane %v7638_v40, 7  ;;  %v7643_v40 = vld [vmem:[%s13145_s0 + $0x98] sm:$0xff]  }
  0x3f   :  { %675 = vrot.lane.b32.xlu1 %v7849_v29, %s7741_s18  ;;  %1756 = vmatprep.subr.bf16.mxu0 %v13154_v3 }
  0x40   :  { %v8188_v57 = vsel %vm302_vm0, 0, %v283_v51  ;;  %v8191_v56 = vsel %vm302_vm0, %v283_v51, 0 }
  0x41   :  { %v592_v62 = vrot.slane %v8188_v57, 2 }
  0x42   :  { %857 = vrot.lane.b32.xlu0 %v7998_v28, %s7741_s18  ;;  %1757 = vmatpush1.bf16.msra.mxu0 %v7631_v2  ;;  %v593_v2 = vrot.slane %v8191_v56, 2 }
  0x43   :  { %733 = vrot.lane.b32.xlu1 %v7892_v48, %s7740_s15  ;;  %v8040_v48 = vsel %vm549_vm2, %v568_v30, %v569_v31  ;;  %1758 = vmatprep.subr.bf16.mxu0 %v13154_v3  ;;  %v8122_v30 = vsel %vm302_vm0, %v281_v10, 0  ;;  %v7633_v31 = vld [vmem:[%s13146_s1 + $0x70] sm:$0xff]  }
  0x44   :  { %7464 = vmatmul.mubr.msk.bf16.gmra.mrb[4].mxu1 %vm1029_vm3, %v8040_v48  ;;  %v587_v38 = vrot.slane %v8122_v30, 2 }
  0x45   :  { %7467 = vmatprep.mubr.msk.bf16.mxu1 %vm1029_vm3, %v8047_v52 }
  0x46   :  { %921 = vrot.lane.b32.xlu0 %v7983_v23, %s7740_s15  ;;  %1759 = vmatpush1.bf16.msra.mxu0 %v7632_v11  ;;  %v8176_v54 = vsel %vm549_vm2, %v586_v35, %v587_v38  ;;  %v285_v11 = vrot.slane %v7640_v58, 7 }
  0x47   :  { %793 = vrot.lane.b32.xlu1 %v7895_v49, %s7742_s19  ;;  %1760 = vmatprep.subr.bf16.mxu0 %v13154_v3 }
  0x4a   :  { %979 = vrot.lane.b32.xlu0 %v8037_v46, %s7742_s19  ;;  %1761 = vmatpush1.bf16.msra.mxu0 %v7633_v31 }
  0x4b   :  { %677 = vrot.lane.b32.xlu1 %v7877_v42, %s7741_s18  ;;  %1762 = vmatprep.subr.bf16.mxu0 %v13154_v3 }
  0x4c   :  { %7468 = vmatmul.mubr.msk.bf16.gmra.mrb[8].mxu1 %vm1029_vm3, %v8082_v8 }
  0x4d   :  { %7471 = vmatprep.mubr.msk.bf16.mxu1 %vm1029_vm3, %v8094_v13 }
  0x4e   :  { %859 = vrot.lane.b32.xlu0 %v8040_v48, %s7741_s18  ;;  %1763 = vmatpush1.bf16.msra.mxu0 %v7636_v34  ;;  %v7641_v34 = vld [vmem:[%s13145_s0 + $0x90] sm:$0xff]  }
  0x4f   :  { %735 = vrot.lane.b32.xlu1 %v7939_v0, %s7740_s15  ;;  %v580_v0 = vrot.slane %v8077_v5, 2  ;;  %v288_v38 = vrot.slane %v7641_v34, 7 }
  0x51   :  { %v8137_v36 = vsel %vm549_vm2, %v580_v0, %v581_v15  ;;  %v493_v0 = vrot.slane %v8085_v9, 1  ;;  %v8215_v15 = vsel %vm549_vm2, %v592_v62, %v593_v2  ;;  %v8230_v9 = vsel %vm302_vm0, %v285_v11, 0 }
  0x52   :  { %923 = vrot.lane.b32.xlu0 %v7990_v25, %s7740_s15  ;;  %v661_v33 = vrot.slane %v8230_v9, 2  ;;  %v8263_v50 = vsel %vm302_vm0, 0, %v288_v38  ;;  %v8266_v51 = vsel %vm302_vm0, %v288_v38, 0 }
  0x53   :  { %795 = vrot.lane.b32.xlu1 %v7942_v1, %s7742_s19  ;;  %v8235_v22 = vsel %vm461_vm1, %v492_v12, %v493_v0  ;;  %13304 = vst [vmem:[#allocation13_spill] sm:$0xff] %v8263_v50  ;;  %v601_v58 = vrot.slane %v8263_v50, 2  ;;  %v602_v62 = vrot.slane %v8266_v51, 2  ;;  %v7646_v12 = vld [vmem:[%s13145_s0 + $0xa8] sm:$0xff]  }
  0x54   :  { %7472 = vmatmul.mubr.msk.bf16.gmra.mrb[12].mxu1 %vm1029_vm3, %v8137_v36 }
  0x55   :  { %7475 = vmatprep.mubr.msk.bf16.mxu1 %vm1029_vm3, %v8144_v39 }
  0x56   :  { %981 = vrot.lane.b32.xlu0 %v8116_v24, %s7742_s19 }
  0x57   :  { %679 = vrot.lane.b32.xlu1 %v7925_v60, %s7741_s18 }
  0x5a   :  { %861 = vrot.lane.b32.xlu0 %v8047_v52, %s7741_s18 }
  0x5b   :  { %737 = vrot.lane.b32.xlu1 %v7998_v28, %s7740_s15  ;;  %v284_v28 = vrot.slane %v7639_v43, 7  ;;  %v495_v43 = vrot.slane %v8102_v16, 1 }
  0x5c   :  { %7476 = vmatmul.mubr.msk.bf16.gmra.mrb[16].mxu1 %vm1029_vm3, %v8176_v54 }
  0x5d   :  { %7479 = vmatprep.mubr.msk.bf16.mxu1 %vm1029_vm3, %v8179_v55  ;;  %v8199_v59 = vsel %vm302_vm0, 0, %v284_v28  ;;  %v8202_v61 = vsel %vm302_vm0, %v284_v28, 0  ;;  %v7645_v28 = vld [vmem:[%s13145_s0 + $0xa0] sm:$0xff]   ;;  %v8278_v20 = vsel %vm461_vm1, %v495_v43, %v496_v45  ;;  %v291_v43 = vrot.slane %v7646_v12, 7 }
  0x5e   :  { %925 = vrot.lane.b32.xlu0 %v8029_v44, %s7740_s15  ;;  %v657_v4 = vrot.slane %v8199_v59, 2  ;;  %v658_v10 = vrot.slane %v8202_v61, 2  ;;  %v290_v2 = vrot.slane %v7645_v28, 7  ;;  %v498_v45 = vrot.slane %v8119_v26, 1 }
  0x5f   :  { %797 = vrot.lane.b32.xlu1 %v7983_v23, %s7742_s19  ;;  %v499_v28 = vrot.slane %v8122_v30, 1  ;;  %v8332_v30 = vsel %vm302_vm0, %v291_v43, 0 }
  0x60   :  { %v8218_v21 = vsel %vm549_vm2, %v657_v4, %v658_v10  ;;  %v8281_v4 = vsel %vm549_vm2, %v601_v58, %v602_v62  ;;  %v8301_v0 = vsel %vm302_vm0, 0, %v290_v2 }
  0x61   :  { %v607_v38 = vrot.slane %v8301_v0, 2 }
  0x62   :  { %983 = vrot.lane.b32.xlu0 %v8173_v53, %s7742_s19 }
  0x63   :  { %681 = vrot.lane.b32.xlu1 %v7974_v17, %s7741_s18 }
  0x64   :  { %7480 = vmatmul.mubr.msk.bf16.gmra.mrb[20].mxu1 %vm1029_vm3, %v8215_v15 }
  0x65   :  { %7483 = vmatprep.mubr.msk.bf16.mxu1 %vm1029_vm3, %v8218_v21 }
  0x66   :  { %863 = vrot.lane.b32.xlu0 %v8082_v8, %s7741_s18 }
  0x67   :  { %739 = vrot.lane.b32.xlu1 %v8040_v48, %s7740_s15  ;;  %v8227_v48 = vsel %vm302_vm0, 0, %v285_v11 }
  0x68   :  { %v660_v31 = vrot.slane %v8227_v48, 2 }
  0x6a   :  { %927 = vrot.lane.b32.xlu0 %v8077_v5, %s7740_s15  ;;  %v8247_v35 = vsel %vm549_vm2, %v660_v31, %v661_v33  ;;  %v8304_v31 = vsel %vm302_vm0, %v290_v2, 0  ;;  %v8340_v2 = vsel %vm461_vm1, %v498_v45, %v499_v28 }
  0x6b   :  { %799 = vrot.lane.b32.xlu1 %v7990_v25, %s7742_s19 }
  0x6c   :  { %7484 = vmatmul.mubr.msk.bf16.gmra.mrb[24].mxu1 %vm1029_vm3, %v8247_v35 }
  0x6d   :  { %7487 = vmatprep.mubr.msk.bf16.mxu1 %vm1029_vm3, %v7832_v19 }
  0x6e   :  { %985 = vrot.lane.b32.xlu0 %v8235_v22, %s7742_s19 }
  0x6f   :  { %683 = vrot.lane.b32.xlu1 %v8037_v46, %s7741_s18 }
  0x72   :  { %865 = vrot.lane.b32.xlu0 %v8094_v13, %s7741_s18 }
  0x73   :  { %741 = vrot.lane.b32.xlu1 %v8047_v52, %s7740_s15  ;;  %v289_v52 = vrot.slane %v7643_v40, 7  ;;  %v608_v40 = vrot.slane %v8304_v31, 2 }
  0x74   :  { %7488 = vmatmul.mubr.msk.bf16.gmra.mrb[28].mxu1 %vm1029_vm3, %v7832_v19 }
  0x75   :  { %7491 = vmatprep.mubr.msk.bf16.mxu1 %vm1029_vm3, %v8281_v4  ;;  %v8290_v10 = vsel %vm302_vm0, 0, %v289_v52  ;;  %v8293_v11 = vsel %vm302_vm0, %v289_v52, 0  ;;  %v8320_v62 = vsel %vm549_vm2, %v607_v38, %v608_v40  ;;  %v7647_v52 = vld [vmem:[%s13145_s0 + $0xb0] sm:$0xff]  }
  0x76   :  { %929 = vrot.lane.b32.xlu0 %v8102_v16, %s7740_s15  ;;  %v604_v33 = vrot.slane %v8290_v10, 2  ;;  %v605_v34 = vrot.slane %v8293_v11, 2  ;;  %13305 = vst [vmem:[#allocation14_spill] sm:$0xff] %v8320_v62  ;;  %v292_v38 = vrot.slane %v7647_v52, 7  ;;  %v501_v52 = vrot.slane %v8140_v37, 1 }
  0x77   :  { %801 = vrot.lane.b32.xlu1 %v8029_v44, %s7742_s19 }
  0x78   :  { %v8317_v58 = vsel %vm549_vm2, %v604_v33, %v605_v34  ;;  %v611_v33 = vrot.slane %v8332_v30, 2  ;;  %v8356_v28 = vsel %vm302_vm0, 0, %v292_v38  ;;  %v8359_v3 = vsel %vm302_vm0, %v292_v38, 0 }
  0x79   :  { %13307 = vst [vmem:[#allocation16_spill] sm:$0xff] %v8356_v28 }
  0x7a   :  { %987 = vrot.lane.b32.xlu0 %v8278_v20, %s7742_s19 }
  0x7b   :  { %685 = vrot.lane.b32.xlu1 %v8116_v24, %s7741_s18 }
  0x7c   :  { %7492 = vmatmul.mubr.msk.bf16.gmra.mrb[32].mxu1 %vm1029_vm3, %v8317_v58 }
  0x7d   :  { %7495 = vmatprep.mubr.msk.bf16.mxu1 %vm1029_vm3, %v8320_v62 }
  0x7e   :  { %867 = vrot.lane.b32.xlu0 %v8137_v36, %s7741_s18 }
  0x7f   :  { %743 = vrot.lane.b32.xlu1 %v8082_v8, %s7740_s15  ;;  %v8329_v8 = vsel %vm302_vm0, 0, %v291_v43 }
  0x80   :  { %v610_v12 = vrot.slane %v8329_v8, 2 }
  0x82   :  { %931 = vrot.lane.b32.xlu0 %v8119_v26, %s7740_s15  ;;  %v8349_v40 = vsel %vm549_vm2, %v610_v12, %v611_v33  ;;  %v502_v12 = vrot.slane %v8153_v41, 1  ;;  %v613_v33 = vrot.slane %v8356_v28, 2 }
  0x83   :  { %803 = vrot.lane.b32.xlu1 %v8077_v5, %s7742_s19  ;;  %13306 = vst [vmem:[#allocation15_spill] sm:$0xff] %v8349_v40  ;;  %v614_v5 = vrot.slane %v8359_v3, 2 }
  0x84   :  { %7496 = vmatmul.mubr.msk.bf16.gmra.mrb[36].mxu1 %vm1029_vm3, %v8349_v40 }
  0x85   :  { %v914_v34 = vpop.permute.xlu1 %913  ;;  %v8370_v62 = vsel %vm549_vm2, %v613_v33, %v614_v5 }
  0x86   :  { %989 = vrot.lane.b32.xlu0 %v8340_v2, %s7742_s19  ;;  %13308 = vst [vmem:[#allocation17_spill] sm:$0xff] %v8370_v62  ;;  %7499 = vmatprep.mubr.msk.bf16.mxu1 %vm1029_vm3, %v8370_v62 }
  0x87   :  { %687 = vrot.lane.b32.xlu1 %v8173_v53, %s7741_s18 }
  0x88   :  { %v670_v43 = vpop.permute.xlu0 %669 }
  0x89   :  { %v728_v45 = vpop.permute.xlu1 %727  ;;  %v1031_v38 = vsel %vm1029_vm3, %v7810_v7, %v670_v43 }
  0x8a   :  { %869 = vrot.lane.b32.xlu0 %v8144_v39, %s7741_s18 }
  0x8b   :  { %745 = vrot.lane.b32.xlu1 %v8094_v13, %s7740_s15  ;;  %v7648_v13 = vld [vmem:[%s13145_s0 + $0xb8] sm:$0xff]  }
  0x8c   :  { %v850_v40 = vpop.permute.xlu0 %849  ;;  %v293_v62 = vrot.slane %v7648_v13, 7 }
  0x8d   :  { %v1246_v44 = vsel %vm1029_vm3, %v7884_v47, %v850_v40  ;;  %v786_v19 = vpop.permute.xlu1 %785  ;;  %v8384_v47 = vsel %vm461_vm1, %v501_v52, %v502_v12  ;;  %v8388_v40 = vsel %vm1088_vm4, %v1031_v38, %v728_v45 }
  0x8e   :  { %933 = vrot.lane.b32.xlu0 %v8140_v37, %s7740_s15  ;;  %v1341_v41 = vsel %vm1088_vm4, %v1246_v44, %v914_v34  ;;  %13309 = vst [vmem:[#allocation18_spill] sm:$0xff] %v8388_v40  ;;  %v8402_v45 = vsel %vm302_vm0, 0, %v293_v62  ;;  %v8405_v12 = vsel %vm302_vm0, %v293_v62, 0 }
  0x8f   :  { %805 = vrot.lane.b32.xlu1 %v8102_v16, %s7742_s19  ;;  %v1149_v16 = vsel %vm1147_vm5, %v8388_v40, %v786_v19  ;;  %13310 = vst [vmem:[#allocation19_spill] sm:$0xff] %v8402_v45  ;;  %v504_v19 = vrot.slane %v8188_v57, 1  ;;  %v616_v38 = vrot.slane %v8402_v45, 2 }
  0x90   :  { %v972_v5 = vpop.permute.xlu0 %971 }
  0x91   :  { %v1402_v43 = vsel %vm1147_vm5, %v1341_v41, %v972_v5  ;;  %v916_v33 = vpop.permute.xlu1 %915 }
  0x92   :  { %991 = vrot.lane.b32.xlu0 %v8384_v47, %s7742_s19  ;;  %1764 = vmatprep.mubr.bf16.mxu0 %v1402_v43 }
  0x93   :  { %1765 = vmatmul.mubr.bf16.vlgmr.msra.gmra.mrb[0].mxu0 %v1149_v16  ;;  %689 = vrot.lane.b32.xlu1 %v8235_v22, %s7741_s18  ;;  %v505_v16 = vrot.slane %v8191_v56, 1  ;;  %v7649_v56 = vld [vmem:[%s13145_s0 + $0xc0] sm:$0xff]  }
  0x94   :  { %v852_v52 = vpop.permute.xlu0 %851 }
  0x95   :  { %v1249_v44 = vsel %vm1029_vm3, %v7931_v63, %v852_v52  ;;  %v788_v34 = vpop.permute.xlu1 %787  ;;  %v617_v63 = vrot.slane %v8405_v12, 2  ;;  %v8425_v62 = vsel %vm461_vm1, %v504_v19, %v505_v16  ;;  %v645_v16 = vrot.slane %v8199_v59, 1 }
  0x96   :  { %871 = vrot.lane.b32.xlu0 %v8176_v54, %s7741_s18  ;;  %v1343_v5 = vsel %vm1088_vm4, %v1249_v44, %v916_v33 }
  0x97   :  { %747 = vrot.lane.b32.xlu1 %v8137_v36, %s7740_s15  ;;  %v1152_v36 = vsel %vm1147_vm5, %v8388_v40, %v788_v34  ;;  %v8428_v33 = vsel %vm549_vm2, %v616_v38, %v617_v63  ;;  %v294_v34 = vrot.slane %v7649_v56, 7 }
  0x98   :  { %v974_v13 = vpop.permute.xlu0 %973  ;;  %13311 = vst [vmem:[#allocation20_spill] sm:$0xff] %v8428_v33  ;;  %7500 = vmatmul.mubr.msk.bf16.gmra.mrb[40].mxu1 %vm1029_vm3, %v8428_v33 }
  0x99   :  { %v1405_v41 = vsel %vm1147_vm5, %v1343_v5, %v974_v13  ;;  %v672_v43 = vpop.permute.xlu1 %671  ;;  %v8442_v38 = vsel %vm302_vm0, 0, %v294_v34  ;;  %v8445_v63 = vsel %vm302_vm0, %v294_v34, 0 }
  0x9a   :  { %935 = vrot.lane.b32.xlu0 %v8188_v57, %s7740_s15  ;;  %1772 = vmatprep.mubr.bf16.mxu0 %v1405_v41  ;;  %v1033_v19 = vsel %vm1029_vm3, %v7821_v14, %v672_v43  ;;  %v619_v14 = vrot.slane %v8442_v38, 2  ;;  %v620_v43 = vrot.slane %v8445_v63, 2 }
  0x9b   :  { %1773 = vmatmul.mubr.bf16.gmra.mrb[4].mxu0 %v1152_v36  ;;  %807 = vrot.lane.b32.xlu1 %v8119_v26, %s7742_s19  ;;  %v646_v36 = vrot.slane %v8202_v61, 1 }
  0x9c   :  { %v854_v52 = vpop.permute.xlu0 %853 }
  0x9d   :  { %v730_v44 = vpop.permute.xlu1 %729  ;;  %v1252_v41 = vsel %vm1029_vm3, %v7849_v29, %v854_v52  ;;  %v8466_v61 = vsel %vm461_vm1, %v645_v16, %v646_v36  ;;  %v648_v16 = vrot.slane %v8227_v48, 1 }
  0x9e   :  { %993 = vrot.lane.b32.xlu0 %v8425_v62, %s7742_s19  ;;  %v1092_v26 = vsel %vm1088_vm4, %v1033_v19, %v730_v44 }
  0x9f   :  { %691 = vrot.lane.b32.xlu1 %v8278_v20, %s7741_s18 }
  0xa0   :  { %v918_v13 = vpop.permute.xlu0 %917 }
  0xa1   :  { %v790_v5 = vpop.permute.xlu1 %789  ;;  %v1345_v56 = vsel %vm1088_vm4, %v1252_v41, %v918_v13 }
  0xa2   :  { %873 = vrot.lane.b32.xlu0 %v8179_v55, %s7741_s18  ;;  %v1155_v29 = vsel %vm1147_vm5, %v1092_v26, %v790_v5 }
  0xa3   :  { %749 = vrot.lane.b32.xlu1 %v8144_v39, %s7740_s15  ;;  %v7650_v39 = vld [vmem:[%s13145_s0 + $0xc8] sm:$0xff]  }
  0xa4   :  { %v976_v40 = vpop.permute.xlu0 %975  ;;  %v295_v26 = vrot.slane %v7650_v39, 7 }
  0xa5   :  { %v1408_v34 = vsel %vm1147_vm5, %v1345_v56, %v976_v40  ;;  %v674_v33 = vpop.permute.xlu1 %673  ;;  %v8469_v40 = vsel %vm549_vm2, %v619_v14, %v620_v43  ;;  %v649_v43 = vrot.slane %v8230_v9, 1 }
  0xa6   :  { %937 = vrot.lane.b32.xlu0 %v8199_v59, %s7740_s15  ;;  %1780 = vmatprep.mubr.bf16.mxu0 %v1408_v34  ;;  %v1035_v19 = vsel %vm1029_vm3, %v7842_v27, %v674_v33  ;;  %v8483_v41 = vsel %vm302_vm0, 0, %v295_v26  ;;  %v8486_v36 = vsel %vm302_vm0, %v295_v26, 0 }
  0xa7   :  { %1781 = vmatmul.mubr.bf16.gmra.mrb[8].mxu0 %v1155_v29  ;;  %809 = vrot.lane.b32.xlu1 %v8140_v37, %s7742_s19  ;;  %v622_v27 = vrot.slane %v8483_v41, 2  ;;  %v623_v33 = vrot.slane %v8486_v36, 2  ;;  %v8507_v9 = vsel %vm461_vm1, %v648_v16, %v649_v43  ;;  %v7642_v43 = vld [vmem:[%s13145_s0 + $0x80] sm:$0xff]  }
  0xa8   :  { %v856_v52 = vpop.permute.xlu0 %855  ;;  %7503 = vmatprep.mubr.msk.bf16.mxu1 %vm1029_vm3, %v8469_v40 }
  0xa9   :  { %v732_v44 = vpop.permute.xlu1 %731  ;;  %v1255_v14 = vsel %vm1029_vm3, %v7877_v42, %v856_v52  ;;  %v8510_v52 = vsel %vm549_vm2, %v622_v27, %v623_v33 }
  0xaa   :  { %995 = vrot.lane.b32.xlu0 %v8466_v61, %s7742_s19  ;;  %v1094_v29 = vsel %vm1088_vm4, %v1035_v19, %v732_v44  ;;  %7504 = vmatmul.mubr.msk.bf16.gmra.mrb[44].mxu1 %vm1029_vm3, %v8510_v52 }
  0xab   :  { %693 = vrot.lane.b32.xlu1 %v8340_v2, %s7741_s18 }
  0xac   :  { %v920_v13 = vpop.permute.xlu0 %919 }
  0xad   :  { %v792_v5 = vpop.permute.xlu1 %791  ;;  %v1347_v56 = vsel %vm1088_vm4, %v1255_v14, %v920_v13 }
  0xae   :  { %875 = vrot.lane.b32.xlu0 %v8215_v15, %s7741_s18  ;;  %v1158_v42 = vsel %vm1147_vm5, %v1094_v29, %v792_v5 }
  0xaf   :  { %751 = vrot.lane.b32.xlu1 %v8176_v54, %s7740_s15  ;;  %v7651_v54 = vld [vmem:[%s13145_s0 + $0xd0] sm:$0xff]  }
  0xb0   :  { %v978_v34 = vpop.permute.xlu0 %977  ;;  %v296_v5 = vrot.slane %v7651_v54, 7  ;;  %v286_v54 = vrot.slane %v7642_v43, 7 }
  0xb1   :  { %v1411_v39 = vsel %vm1147_vm5, %v1347_v56, %v978_v34  ;;  %v676_v26 = vpop.permute.xlu1 %675 }
  0xb2   :  { %939 = vrot.lane.b32.xlu0 %v8227_v48, %s7740_s15  ;;  %1788 = vmatprep.mubr.bf16.mxu0 %v1411_v39  ;;  %v1037_v16 = vsel %vm1029_vm3, %v7807_v6, %v676_v26  ;;  %v8526_v27 = vsel %vm302_vm0, 0, %v296_v5  ;;  %v8529_v33 = vsel %vm302_vm0, %v296_v5, 0  ;;  %v8556_v5 = vsel %vm302_vm0, 0, %v286_v54 }
  0xb3   :  { %1789 = vmatmul.mubr.bf16.gmra.mrb[12].mxu0 %v1158_v42  ;;  %811 = vrot.lane.b32.xlu1 %v8188_v57, %s7742_s19  ;;  %v625_v6 = vrot.slane %v8526_v27, 2  ;;  %13312 = vst [vmem:[#allocation21_spill] sm:$0xff] %v8556_v5 }
  0xb4   :  { %v858_v44 = vpop.permute.xlu0 %857 }
  0xb5   :  { %v734_v13 = vpop.permute.xlu1 %733  ;;  %v1258_v56 = vsel %vm1029_vm3, %v7925_v60, %v858_v44 }
  0xb6   :  { %997 = vrot.lane.b32.xlu0 %v8507_v9, %s7742_s19  ;;  %v1096_v39 = vsel %vm1088_vm4, %v1037_v16, %v734_v13  ;;  %v8564_v16 = vsel %vm302_vm0, %v286_v54, 0 }
  0xb7   :  { %695 = vrot.lane.b32.xlu1 %v8384_v47, %s7741_s18 }
  0xb8   :  { %v922_v19 = vpop.permute.xlu0 %921 }
  0xb9   :  { %v794_v14 = vpop.permute.xlu1 %793  ;;  %v1349_v34 = vsel %vm1088_vm4, %v1258_v56, %v922_v19  ;;  %v7644_v19 = vld [vmem:[%s13145_s0 + $0x88] sm:$0xff]   ;;  %v595_v56 = vrot.slane %v8556_v5, 2 }
  0xba   :  { %877 = vrot.lane.b32.xlu0 %v8218_v21, %s7741_s18  ;;  %v626_v21 = vrot.slane %v8529_v33, 2  ;;  %v1161_v60 = vsel %vm1147_vm5, %v1096_v39, %v794_v14  ;;  %v596_v39 = vrot.slane %v8564_v16, 2 }
  0xbb   :  { %753 = vrot.lane.b32.xlu1 %v8179_v55, %s7740_s15  ;;  %v7652_v55 = vld [vmem:[%s13145_s0 + $0xd8] sm:$0xff]  }
  0xbc   :  { %v980_v29 = vpop.permute.xlu0 %979  ;;  %v8549_v44 = vsel %vm549_vm2, %v625_v6, %v626_v21  ;;  %v297_v14 = vrot.slane %v7652_v55, 7  ;;  %v287_v6 = vrot.slane %v7644_v19, 7  ;;  %v7653_v19 = vld [vmem:[%s13145_s0 + $0xe0] sm:$0xff]  }
  0xbd   :  { %v1414_v26 = vsel %vm1147_vm5, %v1349_v34, %v980_v29  ;;  %v678_v42 = vpop.permute.xlu1 %677  ;;  %7507 = vmatprep.mubr.msk.bf16.mxu1 %vm1029_vm3, %v8549_v44 }
  0xbe   :  { %941 = vrot.lane.b32.xlu0 %v7810_v7, %s7740_s15  ;;  %1796 = vmatprep.mubr.bf16.mxu0 %v1414_v26  ;;  %v8572_v21 = vsel %vm302_vm0, 0, %v297_v14  ;;  %v8575_v34 = vsel %vm302_vm0, %v297_v14, 0  ;;  %v514_v14 = vrot.slane %v8266_v51, 1 }
  0xbf   :  { %1797 = vmatmul.mubr.bf16.gmra.mrb[16].mxu0 %v1161_v60  ;;  %813 = vrot.lane.b32.xlu1 %v8199_v59, %s7742_s19  ;;  %v629_v26 = vrot.slane %v8575_v34, 2 }
  0xc0   :  { %v860_v13 = vpop.permute.xlu0 %859 }
  0xc1   :  { %v736_v7 = vpop.permute.xlu1 %735  ;;  %v1261_v29 = vsel %vm1029_vm3, %v7974_v17, %v860_v13  ;;  %v8594_v13 = vsel %vm302_vm0, %v287_v6, 0 }
  0xc2   :  { %999 = vrot.lane.b32.xlu0 %v7829_v18, %s7742_s19  ;;  %v1039_v18 = vsel %vm1029_vm3, %v7853_v32, %v678_v42  ;;  %v628_v32 = vrot.slane %v8572_v21, 2 }
  0xc3   :  { %697 = vrot.lane.b32.xlu1 %v8425_v62, %s7741_s18  ;;  %v1098_v60 = vsel %vm1088_vm4, %v1039_v18, %v736_v7  ;;  %v597_v7 = vsel %vm549_vm2, %v595_v56, %v596_v39 }
  0xc4   :  { %v924_v59 = vpop.permute.xlu0 %923 }
  0xc5   :  { %v796_v43 = vpop.permute.xlu1 %795 }
  0xc6   :  { %879 = vrot.lane.b32.xlu0 %v8247_v35, %s7741_s18  ;;  %v1351_v35 = vsel %vm1088_vm4, %v1261_v29, %v924_v59  ;;  %v1164_v17 = vsel %vm1147_vm5, %v1098_v60, %v796_v43  ;;  %v8605_v59 = vsel %vm549_vm2, %v628_v32, %v629_v26  ;;  %v599_v29 = vrot.slane %v8594_v13, 2 }
  0xc7   :  { %815 = vrot.lane.b32.xlu1 %v8227_v48, %s7742_s19  ;;  %v8591_v48 = vsel %vm302_vm0, 0, %v287_v6  ;;  %7508 = vmatmul.mubr.msk.bf16.gmra.mrb[48].mxu1 %vm1029_vm3, %v8605_v59 }
  0xc8   :  { %v982_v42 = vpop.permute.xlu0 %981  ;;  %v598_v6 = vrot.slane %v8591_v48, 2 }
  0xc9   :  { %v1417_v54 = vsel %vm1147_vm5, %v1351_v35, %v982_v42  ;;  %v680_v55 = vpop.permute.xlu1 %679  ;;  %v298_v35 = vrot.slane %v7653_v19, 7  ;;  %v516_v42 = vrot.slane %v8290_v10, 1  ;;  %v517_v19 = vrot.slane %v8293_v11, 1 }
  0xca   :  { %755 = vrot.lane.b32.xlu0 %v8215_v15, %s7740_s15  ;;  %1804 = vmatprep.mubr.bf16.mxu0 %v1417_v54  ;;  %v513_v15 = vrot.slane %v8263_v50, 1  ;;  %v8618_v32 = vsel %vm549_vm2, %v598_v6, %v599_v29  ;;  %v1041_v26 = vsel %vm1029_vm3, %v7895_v49, %v680_v55  ;;  %v507_v6 = vrot.slane %v8556_v5, 1 }
  0xcb   :  { %1805 = vmatmul.mubr.bf16.gmra.mrb[20].mxu0 %v1164_v17  ;;  %943 = vrot.lane.b32.xlu1 %v8263_v50, %s7740_s15  ;;  %v8626_v60 = vsel %vm302_vm0, 0, %v298_v35  ;;  %v8629_v54 = vsel %vm302_vm0, %v298_v35, 0  ;;  %v508_v29 = vrot.slane %v8564_v16, 1  ;;  %v8652_v16 = vsel %vm461_vm1, %v516_v42, %v517_v19 }
  0xcc   :  { %v862_v43 = vpop.permute.xlu0 %861  ;;  %v8615_v51 = vsel %vm461_vm1, %v513_v15, %v514_v14  ;;  %v631_v49 = vrot.slane %v8626_v60, 2  ;;  %v632_v55 = vrot.slane %v8629_v54, 2 }
  0xcd   :  { %v738_v18 = vpop.permute.xlu1 %737  ;;  %v1264_v17 = vsel %vm1029_vm3, %v8037_v46, %v862_v43 }
  0xce   :  { %881 = vrot.lane.b32.xlu0 %v597_v7, %s7741_s18  ;;  %v1100_v35 = vsel %vm1088_vm4, %v1041_v26, %v738_v18  ;;  %v8655_v18 = vsel %vm549_vm2, %v631_v49, %v632_v55  ;;  %v519_v55 = vrot.slane %v8301_v0, 1 }
  0xcf   :  { %817 = vrot.lane.b32.xlu1 %v8556_v5, %s7742_s19  ;;  %13313 = vst [vmem:[#allocation22_spill] sm:$0xff] %v8655_v18  ;;  %7511 = vmatprep.mubr.msk.bf16.mxu1 %vm1029_vm3, %v8655_v18  ;;  %v511_v18 = vrot.slane %v8594_v13, 1 }
  0xd0   :  { %v926_v56 = vpop.permute.xlu0 %925 }
  0xd1   :  { %v798_v39 = vpop.permute.xlu1 %797  ;;  %v1353_v15 = vsel %vm1088_vm4, %v1264_v17, %v926_v56  ;;  %v7654_v56 = vld [vmem:[%s13145_s0 + $0xe8] sm:$0xff]   ;;  %v8658_v17 = vsel %vm461_vm1, %v507_v6, %v508_v29 }
  0xd2   :  { %1001 = vrot.lane.b32.xlu0 %v8615_v51, %s7742_s19  ;;  %v1167_v11 = vsel %vm1147_vm5, %v1100_v35, %v798_v39  ;;  %v520_v35 = vrot.slane %v8304_v31, 1 }
  0xd3   :  { %945 = vrot.lane.b32.xlu1 %v8290_v10, %s7740_s15 }
  0xd4   :  { %v984_v14 = vpop.permute.xlu0 %983  ;;  %v8697_v13 = vsel %vm461_vm1, %v519_v55, %v520_v35  ;;  %v7656_v55 = vld [vmem:[%s13145_s0 + $0xf8] sm:$0xff]   ;;  %v522_v35 = vrot.slane %v8329_v8, 1 }
  0xd5   :  { %v1420_v46 = vsel %vm1147_vm5, %v1353_v15, %v984_v14  ;;  %v682_v43 = vpop.permute.xlu1 %681  ;;  %v299_v15 = vrot.slane %v7654_v56, 7  ;;  %v510_v56 = vrot.slane %v8591_v48, 1 }
  0xd6   :  { %883 = vrot.lane.b32.xlu0 %v8618_v32, %s7741_s18  ;;  %1812 = vmatprep.mubr.bf16.mxu0 %v1420_v46  ;;  %v1043_v49 = vsel %vm1029_vm3, %v7942_v1, %v682_v43 }
  0xd7   :  { %1813 = vmatmul.mubr.bf16.gmra.mrb[24].mxu0 %v1167_v11  ;;  %819 = vrot.lane.b32.xlu1 %v8591_v48, %s7742_s19  ;;  %v8672_v14 = vsel %vm302_vm0, 0, %v299_v15  ;;  %v8675_v6 = vsel %vm302_vm0, %v299_v15, 0 }
  0xd8   :  { %v864_v26 = vpop.permute.xlu0 %863  ;;  %v634_v1 = vrot.slane %v8672_v14, 2  ;;  %v635_v46 = vrot.slane %v8675_v6, 2 }
  0xd9   :  { %v740_v39 = vpop.permute.xlu1 %739  ;;  %v1267_v29 = vsel %vm1029_vm3, %v8116_v24, %v864_v26 }
  0xda   :  { %1003 = vrot.lane.b32.xlu0 %v8652_v16, %s7742_s19  ;;  %v1102_v15 = vsel %vm1088_vm4, %v1043_v49, %v740_v39  ;;  %v8700_v26 = vsel %vm549_vm2, %v634_v1, %v635_v46 }
  0xdb   :  { %699 = vrot.lane.b32.xlu1 %v8658_v17, %s7741_s18  ;;  %7512 = vmatmul.mubr.msk.bf16.gmra.mrb[52].mxu1 %vm1029_vm3, %v8700_v26 }
  0xdc   :  { %v928_v42 = vpop.permute.xlu0 %927 }
  0xdd   :  { %v800_v19 = vpop.permute.xlu1 %799  ;;  %v1355_v43 = vsel %vm1088_vm4, %v1267_v29, %v928_v42  ;;  %v8703_v42 = vsel %vm461_vm1, %v510_v56, %v511_v18 }
  0xde   :  { %885 = vrot.lane.b32.xlu0 %v8281_v4, %s7741_s18  ;;  %v1170_v31 = vsel %vm1147_vm5, %v1102_v15, %v800_v19 }
  0xdf   :  { %757 = vrot.lane.b32.xlu1 %v597_v7, %s7740_s15  ;;  %v7655_v7 = vld [vmem:[%s13145_s0 + $0xf0] sm:$0xff]   ;;  %s7369_s0 = sld [smem:[#allocation2 + $0x2]] }
  0xe0   :  { %v986_v11 = vpop.permute.xlu0 %985  ;;  %v300_v19 = vrot.slane %v7655_v7, 7 }
  0xe1   :  { %v1423_v5 = vsel %vm1147_vm5, %v1355_v43, %v986_v11  ;;  %v684_v24 = vpop.permute.xlu1 %683  ;;  %v523_v11 = vrot.slane %v8332_v30, 1 }
  0xe2   :  { %947 = vrot.lane.b32.xlu0 %v8301_v0, %s7740_s15  ;;  %1820 = vmatprep.mubr.bf16.mxu0 %v1423_v5  ;;  %v1045_v18 = vsel %vm1029_vm3, %v7983_v23, %v684_v24  ;;  %v8720_v1 = vsel %vm302_vm0, 0, %v300_v19  ;;  %v8723_v46 = vsel %vm302_vm0, %v300_v19, 0 }
  0xe3   :  { %1821 = vmatmul.mubr.bf16.gmra.mrb[28].mxu0 %v1170_v31  ;;  %821 = vrot.lane.b32.xlu1 %v8263_v50, %s7742_s19  ;;  %v663_v23 = vrot.slane %v8720_v1, 2  ;;  %v664_v56 = vrot.slane %v8723_v46, 2  ;;  %v301_v31 = vrot.slane %v7656_v55, 7  ;;  %v8741_v30 = vsel %vm461_vm1, %v522_v35, %v523_v11 }
  0xe4   :  { %v866_v39 = vpop.permute.xlu0 %865 }
  0xe5   :  { %v742_v5 = vpop.permute.xlu1 %741  ;;  %v1270_v43 = vsel %vm1029_vm3, %v8173_v53, %v866_v39 }
  0xe6   :  { %1005 = vrot.lane.b32.xlu0 %v8697_v13, %s7742_s19  ;;  %v1104_v7 = vsel %vm1088_vm4, %v1045_v18, %v742_v5  ;;  %v8747_v5 = vsel %vm302_vm0, 0, %v301_v31 }
  0xe7   :  { %701 = vrot.lane.b32.xlu1 %v8703_v42, %s7741_s18  ;;  %v666_v55 = vrot.slane %v8747_v5, 2 }
  0xe8   :  { %v930_v49 = vpop.permute.xlu0 %929 }
  0xe9   :  { %v802_v29 = vpop.permute.xlu1 %801  ;;  %v1357_v15 = vsel %vm1088_vm4, %v1270_v43, %v930_v49 }
  0xea   :  { %887 = vrot.lane.b32.xlu0 %v8317_v58, %s7741_s18  ;;  %v1173_v53 = vsel %vm1147_vm5, %v1104_v7, %v802_v29  ;;  %v8755_v29 = vsel %vm302_vm0, %v301_v31, 0  ;;  %v526_v31 = vrot.slane %v8359_v3, 1  ;;  %v13315_v7 = vld [vmem:[#allocation8_spill] sm:$0xff] }
  0xeb   :  { %759 = vrot.lane.b32.xlu1 %v8618_v32, %s7740_s15  ;;  %v8744_v32 = vsel %vm549_vm2, %v663_v23, %v664_v56  ;;  %v667_v18 = vrot.slane %v8755_v29, 2  ;;  %v13314_v56 = vld [vmem:[#allocation14_spill] sm:$0xff] }
  0xec   :  { %v988_v24 = vpop.permute.xlu0 %987  ;;  %7515 = vmatprep.mubr.msk.bf16.mxu1 %vm1029_vm3, %v8744_v32 }
  0xed   :  { %v1426_v19 = vsel %vm1147_vm5, %v1357_v15, %v988_v24  ;;  %v686_v50 = vpop.permute.xlu1 %685  ;;  %v8761_v11 = vsel %vm549_vm2, %v666_v55, %v667_v18  ;;  %v525_v24 = vrot.slane %v8356_v28, 1 }
  0xee   :  { %949 = vrot.lane.b32.xlu0 %v8329_v8, %s7740_s15  ;;  %1828 = vmatprep.mubr.bf16.mxu0 %v1426_v19  ;;  %v1047_v23 = vsel %vm1029_vm3, %v7990_v25, %v686_v50 }
  0xef   :  { %1829 = vmatmul.mubr.bf16.gmra.mrb[32].mxu0 %v1173_v53  ;;  %823 = vrot.lane.b32.xlu1 %v8290_v10, %s7742_s19  ;;  %v8786_v3 = vsel %vm461_vm1, %v525_v24, %v526_v31  ;;  %v528_v24 = vrot.slane %v8402_v45, 1  ;;  %v529_v31 = vrot.slane %v8405_v12, 1 }
  0xf0   :  { %v868_v39 = vpop.permute.xlu0 %867  ;;  %7516 = vmatmul.mubr.msk.bf16.gmra.mrb[56].mxu1 %vm1029_vm3, %v8761_v11 }
  0xf1   :  { %v744_v49 = vpop.permute.xlu1 %743  ;;  %v1273_v15 = vsel %vm1029_vm3, %v8235_v22, %v868_v39  ;;  %7519 = vmatprep.mubr.msk.bf16.mxu1 %vm1029_vm3, %v13315_v7 }
  0xf2   :  { %1007 = vrot.lane.b32.xlu0 %v8741_v30, %s7742_s19  ;;  %v1106_v19 = vsel %vm1088_vm4, %v1047_v23, %v744_v49  ;;  %v13317_v23 = vld [vmem:[#allocation15_spill] sm:$0xff] }
  0xf3   :  { %703 = vrot.lane.b32.xlu1 %v8615_v51, %s7741_s18 }
  0xf4   :  { %v932_v35 = vpop.permute.xlu0 %931 }
  0xf5   :  { %v804_v43 = vpop.permute.xlu1 %803  ;;  %v1359_v25 = vsel %vm1088_vm4, %v1273_v15, %v932_v35  ;;  %v13316_v35 = vld [vmem:[#allocation9_spill] sm:$0xff] }
  0xf6   :  { %889 = vrot.lane.b32.xlu0 %v13314_v56, %s7741_s18  ;;  %v1176_v22 = vsel %vm1147_vm5, %v1106_v19, %v804_v43 }
  0xf7   :  { %761 = vrot.lane.b32.xlu1 %v8281_v4, %s7740_s15 }
  0xf8   :  { %v990_v50 = vpop.permute.xlu0 %989  ;;  %7520 = vmatmul.mubr.msk.bf16.gmra.mrb[60].mxu1 %vm1029_vm3, %v13315_v7 }
  0xf9   :  { %v1429_v53 = vsel %vm1147_vm5, %v1359_v25, %v990_v50  ;;  %v688_v55 = vpop.permute.xlu1 %687 }
  0xfa   :  { %951 = vrot.lane.b32.xlu0 %v8356_v28, %s7740_s15  ;;  %1836 = vmatprep.mubr.bf16.mxu0 %v1429_v53  ;;  %v1049_v43 = vsel %vm1029_vm3, %v13316_v35, %v688_v55  ;;  %v13319_v35 = vld [vmem:[#allocation17_spill] sm:$0xff] }
  0xfb   :  { %1837 = vmatmul.mubr.bf16.gmra.mrb[36].mxu0 %v1176_v22  ;;  %825 = vrot.lane.b32.xlu1 %v8301_v0, %s7742_s19 }
  0xfc   :  { %v870_v4 = vpop.permute.xlu0 %869 }
  0xfd   :  { %v746_v39 = vpop.permute.xlu1 %745  ;;  %v1276_v15 = vsel %vm1029_vm3, %v8278_v20, %v870_v4 }
  0xfe   :  { %1009 = vrot.lane.b32.xlu0 %v8786_v3, %s7742_s19  ;;  %v1108_v19 = vsel %vm1088_vm4, %v1049_v43, %v746_v39 }
  0xff   :  { %705 = vrot.lane.b32.xlu1 %v8652_v16, %s7741_s18 }
 0x100   :  { %v934_v49 = vpop.permute.xlu0 %933 }
 0x101   :  { %v806_v18 = vpop.permute.xlu1 %805  ;;  %v1361_v25 = vsel %vm1088_vm4, %v1276_v15, %v934_v49  ;;  %v13318_v49 = vld [vmem:[#allocation10_spill] sm:$0xff]  ;;  %v531_v15 = vrot.slane %v8442_v38, 1 }
 0x102   :  { %891 = vrot.lane.b32.xlu0 %v13317_v23, %s7741_s18  ;;  %v1179_v20 = vsel %vm1147_vm5, %v1108_v19, %v806_v18 }
 0x103   :  { %763 = vrot.lane.b32.xlu1 %v8317_v58, %s7740_s15  ;;  %v8813_v58 = vsel %vm461_vm1, %v528_v24, %v529_v31  ;;  %v532_v24 = vrot.slane %v8445_v63, 1 }
 0x104   :  { %v992_v50 = vpop.permute.xlu0 %991 }
 0x105   :  { %v1432_v53 = vsel %vm1147_vm5, %v1361_v25, %v992_v50  ;;  %v690_v55 = vpop.permute.xlu1 %689  ;;  %v8838_v63 = vsel %vm461_vm1, %v531_v15, %v532_v24  ;;  %v13321_v15 = vld [vmem:[#allocation20_spill] sm:$0xff] }
 0x106   :  { %953 = vrot.lane.b32.xlu0 %v8402_v45, %s7740_s15  ;;  %1844 = vmatprep.mubr.bf16.mxu0 %v1432_v53  ;;  %v1051_v18 = vsel %vm1029_vm3, %v13318_v49, %v690_v55 }
 0x107   :  { %1845 = vmatmul.mubr.bf16.gmra.mrb[40].mxu0 %v1179_v20  ;;  %827 = vrot.lane.b32.xlu1 %v8329_v8, %s7742_s19 }
 0x108   :  { %v872_v12 = vpop.permute.xlu0 %871 }
 0x109   :  { %v748_v22 = vpop.permute.xlu1 %747  ;;  %v1279_v43 = vsel %vm1029_vm3, %v8340_v2, %v872_v12 }
 0x10a   :  { %1011 = vrot.lane.b32.xlu0 %v8813_v58, %s7742_s19  ;;  %v1110_v50 = vsel %vm1088_vm4, %v1051_v18, %v748_v22  ;;  %v13320_v18 = vld [vmem:[#allocation11_spill] sm:$0xff] }
 0x10b   :  { %707 = vrot.lane.b32.xlu1 %v8697_v13, %s7741_s18 }
 0x10c   :  { %v936_v4 = vpop.permute.xlu0 %935 }
 0x10d   :  { %v808_v39 = vpop.permute.xlu1 %807  ;;  %v1363_v31 = vsel %vm1088_vm4, %v1279_v43, %v936_v4 }
 0x10e   :  { %893 = vrot.lane.b32.xlu0 %v13319_v35, %s7741_s18  ;;  %v1182_v2 = vsel %vm1147_vm5, %v1110_v50, %v808_v39 }
 0x10f   :  { %765 = vrot.lane.b32.xlu1 %v13314_v56, %s7740_s15  ;;  %v8840_v56 = vpop.f32.mrb[0].mxu1 }
 0x110   :  { %v994_v25 = vpop.permute.xlu0 %993  ;;  %v8842_v20 = vpop.f32.mrb[1].mxu1 }
 0x111   :  { %v1435_v19 = vsel %vm1147_vm5, %v1363_v31, %v994_v25  ;;  %v692_v53 = vpop.permute.xlu1 %691  ;;  %v8844_v22 = vpop.f32.mrb[2].mxu1  ;;  %v534_v31 = vrot.slane %v8483_v41, 1  ;;  %v535_v25 = vrot.slane %v8486_v36, 1 }
 0x112   :  { %955 = vrot.lane.b32.xlu0 %v8442_v38, %s7740_s15  ;;  %1852 = vmatprep.mubr.bf16.mxu0 %v1435_v19  ;;  %v8848_v4 = vpop.f32.mrb[3].mxu1  ;;  %v1053_v43 = vsel %vm1029_vm3, %v13320_v18, %v692_v53 }
 0x113   :  { %1853 = vmatmul.mubr.bf16.gmra.mrb[44].mxu0 %v1182_v2  ;;  %829 = vrot.lane.b32.xlu1 %v8356_v28, %s7742_s19 }
 0x114   :  { %v874_v55 = vpop.permute.xlu0 %873 }
 0x115   :  { %v750_v12 = vpop.permute.xlu1 %749  ;;  %v1282_v24 = vsel %vm1029_vm3, %v8384_v47, %v874_v55  ;;  %v8879_v55 = vsel %vm461_vm1, %v534_v31, %v535_v25 }
 0x116   :  { %1013 = vrot.lane.b32.xlu0 %v8838_v63, %s7742_s19  ;;  %v1112_v53 = vsel %vm1088_vm4, %v1053_v43, %v750_v12 }
 0x117   :  { %709 = vrot.lane.b32.xlu1 %v8741_v30, %s7741_s18  ;;  %v8862_v50 = vpop.f32.mrb[4].mxu1 }
 0x118   :  { %v938_v39 = vpop.permute.xlu0 %937  ;;  %v8865_v7 = vpop.f32.mrb[5].mxu1 }
 0x119   :  { %v810_v49 = vpop.permute.xlu1 %809  ;;  %v1365_v19 = vsel %vm1088_vm4, %v1282_v24, %v938_v39  ;;  %v8869_v47 = vpop.f32.mrb[6].mxu1 }
 0x11a   :  { %895 = vrot.lane.b32.xlu0 %v13321_v15, %s7741_s18  ;;  %v1185_v36 = vsel %vm1147_vm5, %v1112_v53, %v810_v49  ;;  %v13325_v53 = vld [vmem:[#allocation12_spill] sm:$0xff] }
 0x11b   :  { %767 = vrot.lane.b32.xlu1 %v13317_v23, %s7740_s15  ;;  %v8874_v23 = vpop.f32.mrb[7].mxu1 }
 0x11c   :  { %v996_v2 = vpop.permute.xlu0 %995 }
 0x11d   :  { %v1438_v18 = vsel %vm1147_vm5, %v1365_v19, %v996_v2  ;;  %v694_v28 = vpop.permute.xlu1 %693 }
 0x11e   :  { %957 = vrot.lane.b32.xlu0 %v8483_v41, %s7740_s15  ;;  %1860 = vmatprep.mubr.bf16.mxu0 %v1438_v18  ;;  %v1055_v31 = vsel %vm1029_vm3, %v13325_v53, %v694_v28 }
 0x11f   :  { %1861 = vmatmul.mubr.bf16.gmra.mrb[48].mxu0 %v1185_v36  ;;  %831 = vrot.lane.b32.xlu1 %v8402_v45, %s7742_s19  ;;  %v8885_v43 = vpop.f32.mrb[8].mxu1  ;;  %v537_v36 = vrot.slane %v8526_v27, 1  ;;  %v538_v45 = vrot.slane %v8529_v33, 1 }
 0x120   :  { %v876_v12 = vpop.permute.xlu0 %875  ;;  %13322 = vst [vmem:[#allocation14_spill] sm:$0xff] %v8885_v43  ;;  %v8887_v24 = vpop.f32.mrb[9].mxu1 }
 0x121   :  { %v752_v39 = vpop.permute.xlu1 %751  ;;  %13323 = vst [vmem:[#allocation9_spill] sm:$0xff] %v8887_v24  ;;  %v8889_v2 = vpop.f32.mrb[10].mxu1  ;;  %v1285_v18 = vsel %vm1029_vm3, %v8425_v62, %v876_v12  ;;  %v8912_v33 = vsel %vm461_vm1, %v537_v36, %v538_v45  ;;  %v540_v36 = vrot.slane %v8572_v21, 1 }
 0x122   :  { %1015 = vrot.lane.b32.xlu0 %v8879_v55, %s7742_s19  ;;  %13324 = vst [vmem:[#allocation15_spill] sm:$0xff] %v8889_v2  ;;  %v8895_v25 = vpop.f32.mrb[11].mxu1  ;;  %v1114_v28 = vsel %vm1088_vm4, %v1055_v31, %v752_v39 }
 0x123   :  { %711 = vrot.lane.b32.xlu1 %v8786_v3, %s7741_s18 }
 0x124   :  { %v940_v49 = vpop.permute.xlu0 %939 }
 0x125   :  { %v812_v19 = vpop.permute.xlu1 %811  ;;  %v1367_v2 = vsel %vm1088_vm4, %v1285_v18, %v940_v49 }
 0x126   :  { %897 = vrot.lane.b32.xlu0 %v8469_v40, %s7741_s18  ;;  %v1188_v62 = vsel %vm1147_vm5, %v1114_v28, %v812_v19  ;;  %v541_v28 = vrot.slane %v8575_v34, 1 }
 0x127   :  { %769 = vrot.lane.b32.xlu1 %v13319_v35, %s7740_s15  ;;  %v8914_v35 = vpop.f32.mrb[12].mxu1 }
 0x128   :  { %v998_v43 = vpop.permute.xlu0 %997  ;;  %v8916_v39 = vpop.f32.mrb[13].mxu1  ;;  %v8951_v34 = vsel %vm461_vm1, %v540_v36, %v541_v28 }
 0x129   :  { %v1441_v53 = vsel %vm1147_vm5, %v1367_v2, %v998_v43  ;;  %v696_v24 = vpop.permute.xlu1 %695  ;;  %v8918_v49 = vpop.f32.mrb[14].mxu1 }
 0x12a   :  { %959 = vrot.lane.b32.xlu0 %v8526_v27, %s7740_s15  ;;  %1868 = vmatprep.mubr.bf16.mxu0 %v1441_v53  ;;  %13326 = vst [vmem:[#allocation10_spill] sm:$0xff] %v8918_v49  ;;  %v8922_v2 = vpop.f32.mrb[15].mxu1  ;;  %v1057_v31 = vsel %vm1029_vm3, %v8140_v37, %v696_v24 }
 0x12b   :  { %1869 = vmatmul.mubr.bf16.gmra.mrb[52].mxu0 %v1188_v62  ;;  %833 = vrot.lane.b32.xlu1 %v8442_v38, %s7742_s19 }
 0x12c   :  { %v878_v12 = vpop.permute.xlu0 %877 }
 0x12d   :  { %v754_v43 = vpop.permute.xlu1 %753  ;;  %v1288_v18 = vsel %vm1029_vm3, %v8466_v61, %v878_v12 }
 0x12e   :  { %1017 = vrot.lane.b32.xlu0 %v8912_v33, %s7742_s19  ;;  %v1116_v37 = vsel %vm1088_vm4, %v1057_v31, %v754_v43 }
 0x12f   :  { %713 = vrot.lane.b32.xlu1 %v8813_v58, %s7741_s18 }
 0x130   :  { %v8926_v19 = vpop.permute.xlu0 %941 }
 0x131   :  { %13327 = vst [vmem:[#allocation17_spill] sm:$0xff] %v8926_v19  ;;  %v814_v45 = vpop.permute.xlu1 %813  ;;  %v1369_v62 = vsel %vm1088_vm4, %v1288_v18, %v8926_v19 }
 0x132   :  { %899 = vrot.lane.b32.xlu0 %v8510_v52, %s7741_s18  ;;  %v1191_v61 = vsel %vm1147_vm5, %v1116_v37, %v814_v45  ;;  %v543_v37 = vrot.slane %v8626_v60, 1 }
 0x133   :  { %771 = vrot.lane.b32.xlu1 %v13321_v15, %s7740_s15 }
 0x134   :  { %v8938_v53 = vpop.permute.xlu0 %999 }
 0x135   :  { %13328 = vst [vmem:[#allocation11_spill] sm:$0xff] %v8938_v53  ;;  %v1444_v24 = vsel %vm1147_vm5, %v1369_v62, %v8938_v53  ;;  %v698_v49 = vpop.permute.xlu1 %697 }
 0x136   :  { %961 = vrot.lane.b32.xlu0 %v8572_v21, %s7740_s15  ;;  %1876 = vmatprep.mubr.bf16.mxu0 %v1444_v24  ;;  %v1059_v18 = vsel %vm1029_vm3, %v8188_v57, %v698_v49  ;;  %v544_v24 = vrot.slane %v8629_v54, 1  ;;  %v7657_v57 = vld [vmem:[%s13148_s3] sm:$0xff]   ;;  %v8986_v54 = vpop.f32.mrb[16].mxu1 }
 0x137   :  { %1877 = vmatmul.mubr.bf16.gmra.mrb[56].mxu0 %v1191_v61  ;;  %835 = vrot.lane.b32.xlu1 %v8483_v41, %s7742_s19 }
 0x138   :  { %v880_v15 = vpop.permute.xlu0 %879  ;;  %3866 = vmatpush1.bf16.msra.mxu1 %v7657_v57 }
 0x139   :  { %v1291_v12 = vsel %vm1029_vm3, %v8507_v9, %v880_v15  ;;  %v816_v43 = vpop.permute.xlu1 %815 }
 0x13a   :  { %1019 = vrot.lane.b32.xlu0 %v8951_v34, %s7742_s19  ;;  %v1370_v31 = vsel %vm1088_vm4, %v1291_v12, %v8926_v19  ;;  %v13329_v12 = vmov 0  }
 0x13b   :  { %v1446_v45 = vsel %vm1147_vm5, %v1370_v31, %v8938_v53  ;;  %715 = vrot.lane.b32.xlu1 %v8838_v63, %s7741_s18  ;;  %3867 = vmatprep.subr.bf16.mxu1 %v13329_v12 }
 0x13c   :  { %v756_v36 = vpop.permute.xlu0 %755  ;;  %1884 = vmatprep.mubr.bf16.mxu0 %v1446_v45  ;;  %v8992_v45 = vpop.f32.mrb[17].mxu1 }
 0x13d   :  { %v1118_v9 = vsel %vm1088_vm4, %v1059_v18, %v756_v36  ;;  %v944_v28 = vpop.permute.xlu1 %943 }
 0x13e   :  { %901 = vrot.lane.b32.xlu0 %v8549_v44, %s7741_s18  ;;  %v1194_v62 = vsel %vm1147_vm5, %v1118_v9, %v816_v43  ;;  %v7658_v43 = vld [vmem:[%s13148_s3 + $0x8] sm:$0xff]   ;;  %v8995_v9 = vpop.f32.mrb[18].mxu1 }
 0x13f   :  { %1885 = vmatmul.mubr.bf16.gmra.mrb[60].mxu0 %v1194_v62  ;;  %773 = vrot.lane.b32.xlu1 %v8469_v40, %s7740_s15  ;;  %v8984_v40 = vsel %vm461_vm1, %v543_v37, %v544_v24  ;;  %v13330_v62 = vld [vmem:[#allocation18_spill] sm:$0xff]  ;;  %v9001_v24 = vpop.f32.mrb[19].mxu1 }
 0x140   :  { %v882_v49 = vpop.permute.xlu0 %881  ;;  %3868 = vmatpush1.bf16.msra.mxu1 %v7658_v43  ;;  %v547_v43 = vrot.slane %v8675_v6, 1 }
 0x141   :  { %v1294_v61 = vsel %vm1029_vm3, %v8658_v17, %v882_v49  ;;  %v818_v15 = vpop.permute.xlu1 %817  ;;  %3869 = vmatprep.subr.bf16.mxu1 %v13329_v12 }
 0x142   :  { %963 = vrot.lane.b32.xlu0 %v8626_v60, %s7740_s15  ;;  %v1372_v31 = vsel %vm1088_vm4, %v1294_v61, %v944_v28  ;;  %v1197_v37 = vsel %vm1147_vm5, %v13330_v62, %v818_v15  ;;  %v7659_v28 = vld [vmem:[%s13148_s3 + $0x10] sm:$0xff]   ;;  %v546_v15 = vrot.slane %v8672_v14, 1 }
 0x143   :  { %837 = vrot.lane.b32.xlu1 %v8526_v27, %s7742_s19 }
 0x144   :  { %v1002_v17 = vpop.permute.xlu0 %1001  ;;  %3870 = vmatpush1.bf16.msra.mxu1 %v7659_v28  ;;  %v9030_v6 = vsel %vm461_vm1, %v546_v15, %v547_v43  ;;  %v13331_v43 = vld [vmem:[#allocation21_spill] sm:$0xff] }
 0x145   :  { %v1449_v18 = vsel %vm1147_vm5, %v1372_v31, %v1002_v17  ;;  %v946_v36 = vpop.permute.xlu1 %945  ;;  %3871 = vmatprep.subr.bf16.mxu1 %v13329_v12  ;;  %v7660_v17 = vld [vmem:[%s13148_s3 + $0x18] sm:$0xff]  }
 0x146   :  { %1021 = vrot.lane.b32.xlu0 %v8984_v40, %s7742_s19  ;;  %1892 = vmatprep.mubr.bf16.mxu0 %v1449_v18 }
 0x147   :  { %1893 = vmatmul.mubr.bf16.gmra.mrb[64].mxu0 %v1197_v37  ;;  %717 = vrot.lane.b32.xlu1 %v8879_v55, %s7741_s18 }
 0x148   :  { %v884_v57 = vpop.permute.xlu0 %883  ;;  %3872 = vmatpush1.bf16.msra.mxu1 %v7660_v17 }
 0x149   :  { %v1297_v49 = vsel %vm1029_vm3, %v8703_v42, %v884_v57  ;;  %v820_v61 = vpop.permute.xlu1 %819  ;;  %3873 = vmatprep.subr.bf16.mxu1 %v13329_v12 }
 0x14a   :  { %903 = vrot.lane.b32.xlu0 %v8605_v59, %s7741_s18  ;;  %v1374_v42 = vsel %vm1088_vm4, %v1297_v49, %v946_v36  ;;  %v7661_v36 = vld [vmem:[%s13148_s3 + $0x20] sm:$0xff]   ;;  %v7662_v49 = vld [vmem:[%s13148_s3 + $0x28] sm:$0xff]  }
 0x14b   :  { %775 = vrot.lane.b32.xlu1 %v8510_v52, %s7740_s15  ;;  %v1200_v52 = vsel %vm1147_vm5, %v13330_v62, %v820_v61 }
 0x14c   :  { %v1004_v31 = vpop.permute.xlu0 %1003  ;;  %3874 = vmatpush1.bf16.msra.mxu1 %v7661_v36  ;;  %v7663_v36 = vld [vmem:[%s13148_s3 + $0x30] sm:$0xff]  }
 0x14d   :  { %v1452_v18 = vsel %vm1147_vm5, %v1374_v42, %v1004_v31  ;;  %v700_v37 = vpop.permute.xlu1 %699  ;;  %3875 = vmatprep.subr.bf16.mxu1 %v13329_v12  ;;  %v13332_v31 = vld [vmem:[#allocation22_spill] sm:$0xff] }
 0x14e   :  { %965 = vrot.lane.b32.xlu0 %v8672_v14, %s7740_s15  ;;  %1900 = vmatprep.mubr.bf16.mxu0 %v1452_v18  ;;  %v1061_v17 = vsel %vm1029_vm3, %v13331_v43, %v700_v37  ;;  %v651_v18 = vrot.slane %v8720_v1, 1 }
 0x14f   :  { %1901 = vmatmul.mubr.bf16.gmra.mrb[68].mxu0 %v1200_v52  ;;  %839 = vrot.lane.b32.xlu1 %v8572_v21, %s7742_s19  ;;  %v652_v52 = vrot.slane %v8723_v46, 1  ;;  %v9069_v46 = vpop.f32.mrb[20].mxu1 }
 0x150   :  { %v886_v28 = vpop.permute.xlu0 %885  ;;  %3876 = vmatpush1.bf16.msra.mxu1 %v7662_v49 }
 0x151   :  { %v758_v57 = vpop.permute.xlu1 %757  ;;  %3877 = vmatprep.subr.bf16.mxu1 %v13329_v12  ;;  %v1300_v42 = vsel %vm1029_vm3, %v8615_v51, %v886_v28  ;;  %v9067_v51 = vsel %vm461_vm1, %v651_v18, %v652_v52  ;;  %v7664_v28 = vld [vmem:[%s13148_s3 + $0x38] sm:$0xff]  }
 0x152   :  { %1023 = vrot.lane.b32.xlu0 %v9030_v6, %s7742_s19  ;;  %v1120_v43 = vsel %vm1088_vm4, %v1061_v17, %v758_v57 }
 0x153   :  { %719 = vrot.lane.b32.xlu1 %v8912_v33, %s7741_s18 }
 0x154   :  { %v948_v61 = vpop.permute.xlu0 %947  ;;  %3878 = vmatpush1.bf16.msra.mxu1 %v7663_v36 }
 0x155   :  { %v822_v15 = vpop.permute.xlu1 %821  ;;  %v1376_v37 = vsel %vm1088_vm4, %v1300_v42, %v948_v61  ;;  %v9074_v61 = vpop.f32.mrb[21].mxu1  ;;  %3879 = vmatprep.subr.bf16.mxu1 %v13329_v12  ;;  %v7665_v42 = vld [vmem:[%s13148_s3 + $0x40] sm:$0xff]  }
 0x156   :  { %905 = vrot.lane.b32.xlu0 %v13332_v31, %s7741_s18 }
 0x157   :  { %777 = vrot.lane.b32.xlu1 %v8549_v44, %s7740_s15  ;;  %v1203_v44 = vsel %vm1147_vm5, %v1120_v43, %v822_v15  ;;  %v9077_v15 = vpop.f32.mrb[22].mxu1  ;;  %v655_v43 = vrot.slane %v8755_v29, 1 }
 0x158   :  { %v1006_v49 = vpop.permute.xlu0 %1005  ;;  %13333 = vst [vmem:[#allocation20_spill] sm:$0xff] %v9077_v15  ;;  %3880 = vmatpush1.bf16.msra.mxu1 %v7664_v28  ;;  %v9081_v17 = vpop.f32.mrb[23].mxu1 }
 0x159   :  { %v1455_v62 = vsel %vm1147_vm5, %v1376_v37, %v1006_v49  ;;  %v702_v53 = vpop.permute.xlu1 %701  ;;  %3881 = vmatprep.subr.bf16.mxu1 %v13329_v12  ;;  %v654_v49 = vrot.slane %v8747_v5, 1 }
 0x15a   :  { %967 = vrot.lane.b32.xlu0 %v8720_v1, %s7740_s15  ;;  %1908 = vmatprep.mubr.bf16.mxu0 %v1455_v62  ;;  %v1063_v36 = vsel %vm1029_vm3, %v8591_v48, %v702_v53  ;;  %v9104_v48 = vld [vmem:[%s13147_s2] ss:$0 sm:$0xff]  ;;  %v7666_v53 = vld [vmem:[%s13148_s3 + $0x48] sm:$0xff]  }
 0x15b   :  { %1909 = vmatmul.mubr.bf16.gmra.mrb[72].mxu0 %v1203_v44  ;;  %841 = vrot.lane.b32.xlu1 %v8626_v60, %s7742_s19  ;;  %v9118_v15 = vsel %vm461_vm1, %v654_v49, %v655_v43 }
 0x15c   :  { %v888_v57 = vpop.permute.xlu0 %887  ;;  %3882 = vmatpush1.bf16.msra.mxu1 %v7665_v42 }
 0x15d   :  { %v760_v62 = vpop.permute.xlu1 %759  ;;  %3883 = vmatprep.subr.bf16.mxu1 %v13329_v12  ;;  %v1303_v37 = vsel %vm1029_vm3, %v8652_v16, %v888_v57 }
 0x15e   :  { %1025 = vrot.lane.b32.xlu0 %v9067_v51, %s7742_s19  ;;  %v1122_v16 = vsel %vm1088_vm4, %v1063_v36, %v760_v62 }
 0x15f   :  { %721 = vrot.lane.b32.xlu1 %v8951_v34, %s7741_s18 }
 0x160   :  { %v950_v18 = vpop.permute.xlu0 %949  ;;  %3884 = vmatpush1.bf16.msra.mxu1 %v7666_v53  ;;  %v13334_v53 = vld [vmem:[#allocation13_spill] sm:$0xff] }
 0x161   :  { %v824_v52 = vpop.permute.xlu1 %823  ;;  %v1378_v44 = vsel %vm1088_vm4, %v1303_v37, %v950_v18  ;;  %3885 = vmatprep.subr.bf16.mxu1 %v13329_v12 }
 0x162   :  { %907 = vrot.lane.b32.xlu0 %v8700_v26, %s7741_s18  ;;  %v1206_v42 = vsel %vm1147_vm5, %v1122_v16, %v824_v52 }
 0x163   :  { %779 = vrot.lane.b32.xlu1 %v8605_v59, %s7740_s15 }
 0x164   :  { %v1008_v28 = vpop.permute.xlu0 %1007 }
 0x165   :  { %v1458_v59 = vsel %vm1147_vm5, %v1378_v44, %v1008_v28  ;;  %v704_v57 = vpop.permute.xlu1 %703  ;;  %v7667_v44 = vld [vmem:[%s13148_s3 + $0x50] sm:$0xff]  }
 0x166   :  { %969 = vrot.lane.b32.xlu0 %v8747_v5, %s7740_s15  ;;  %v1766_v29 = vpop.f32.mrb[0].mxu0  ;;  %1916 = vmatprep.mubr.bf16.mxu0 %v1458_v59 }
 0x167   :  { %v1767_v18 = vadd.f32 %v9104_v48, %v1766_v29  ;;  %v1768_v37 = vpop.f32.mrb[1].mxu0  ;;  %1917 = vmatmul.mubr.bf16.gmra.mrb[76].mxu0 %v1206_v42  ;;  %843 = vrot.lane.b32.xlu1 %v8672_v14, %s7742_s19  ;;  %v1065_v29 = vsel %vm1029_vm3, %v13334_v53, %v704_v57 }
 0x168   :  { %v890_v62 = vpop.permute.xlu0 %889  ;;  %v1769_v36 = vpop.f32.mrb[2].mxu0  ;;  %3886 = vmatpush1.bf16.msra.mxu1 %v7667_v44 }
 0x169   :  { %v2056_v28 = vadd.f32 %v8842_v20, %v1767_v18  ;;  %v1770_v52 = vadd.f32 %v9104_v48, %v1769_v36  ;;  %v1771_v16 = vpop.f32.mrb[3].mxu0  ;;  %v762_v59 = vpop.permute.xlu1 %761  ;;  %v7668_v20 = vld [vmem:[%s13148_s3 + $0x58] sm:$0xff]   ;;  %3887 = vmatprep.subr.bf16.mxu1 %v13329_v12  ;;  %v9142_v36 = vld [vmem:[%s13148_s3 + $0x80] sm:$0xff]   ;;  %v1306_v44 = vsel %vm1029_vm3, %v8697_v13, %v890_v62 }
 0x16a   :  { %1027 = vrot.lane.b32.xlu0 %v9118_v15, %s7742_s19  ;;  %v1124_v16 = vsel %vm1088_vm4, %v1065_v29, %v762_v59  ;;  %7523 = vmatprep.subr.bf16.mxu0 %v9142_v36  ;;  %v7670_v13 = vld [vmem:[%s13148_s3 + $0x60] sm:$0xff]   ;;  %v9169_v29 = vpop.f32.mrb[24].mxu1 }
 0x16b   :  { %v2059_v49 = vadd.f32 %v8848_v4, %v1770_v52  ;;  %723 = vrot.lane.b32.xlu1 %v8984_v40, %s7741_s18  ;;  %v2310_v42 = vmax.f32 %v2056_v28, 0.0  ;;  %7524 = vmatpush3.bf16.msra.mxu0 %v9142_v36 }
 0x16c   :  { %v952_v43 = vpop.permute.xlu0 %951  ;;  %3888 = vmatpush1.bf16.msra.mxu1 %v7668_v20 }
 0x16d   :  { %v2311_v18 = vmax.f32 %v2059_v49, 0.0  ;;  %v826_v37 = vpop.permute.xlu1 %825  ;;  %3889 = vmatprep.subr.bf16.mxu1 %v13329_v12 }
 0x16e   :  { %909 = vrot.lane.b32.xlu0 %v8744_v32, %s7741_s18  ;;  %v1774_v4 = vpop.f32.mrb[4].mxu0  ;;  %v1380_v32 = vsel %vm1088_vm4, %v1306_v44, %v952_v43  ;;  %v1209_v43 = vsel %vm1147_vm5, %v1124_v16, %v826_v37  ;;  %v9180_v16 = vpop.f32.mrb[25].mxu1 }
 0x16f   :  { %v2374_v52 = vpack.c.bf16 %v2311_v18, %v2310_v42  ;;  %v1775_v57 = vadd.f32 %v9104_v48, %v1774_v4  ;;  %v1776_v28 = vpop.f32.mrb[5].mxu0  ;;  %845 = vrot.lane.b32.xlu1 %v8720_v1, %s7742_s19 }
 0x170   :  { %v1010_v49 = vpop.permute.xlu0 %1009  ;;  %v1777_v53 = vpop.f32.mrb[6].mxu0  ;;  %3890 = vmatpush1.bf16.msra.mxu1 %v7670_v13 }
 0x171   :  { %v2438_v62 = vrot.slane %v2374_v52, 7  ;;  %v2064_v42 = vadd.f32 %v8840_v56, %v1775_v57  ;;  %v1778_v18 = vadd.f32 %v9104_v48, %v1777_v53  ;;  %v1779_v4 = vpop.f32.mrb[7].mxu0  ;;  %v1461_v1 = vsel %vm1147_vm5, %v1380_v32, %v1010_v49  ;;  %v706_v59 = vpop.permute.xlu1 %705  ;;  %v7671_v56 = vld [vmem:[%s13148_s3 + $0x88] sm:$0xff]   ;;  %3891 = vmatprep.subr.bf16.mxu1 %v13329_v12 }
 0x172   :  { %781 = vrot.lane.b32.xlu0 %v13332_v31, %s7740_s15  ;;  %1924 = vmatprep.mubr.bf16.mxu0 %v1461_v1  ;;  %v7672_v31 = vld [vmem:[%s13148_s3 + $0x68] sm:$0xff]   ;;  %v9185_v32 = vpop.f32.mrb[26].mxu1 }
 0x173   :  { %v2067_v20 = vadd.f32 %v8844_v22, %v1778_v18  ;;  %1925 = vmatmul.mubr.bf16.gmra.mrb[80].mxu0 %v1209_v43  ;;  %725 = vrot.lane.b32.xlu1 %v9030_v6, %s7741_s18  ;;  %v9175_v37 = vsel %vm302_vm0, %v2438_v62, 0  ;;  %v2312_v52 = vmax.f32 %v2064_v42, 0.0  ;;  %v9178_v22 = vsel %vm302_vm0, 0, %v2438_v62  ;;  %v9189_v53 = vpop.f32.mrb[27].mxu1  ;;  %v7673_v18 = vld [vmem:[%s13148_s3 + $0x70] sm:$0xff]  }
 0x174   :  { %v892_v44 = vpop.permute.xlu0 %891  ;;  %7525 = vmatprep.subr.bf16.mxu0 %v7671_v56  ;;  %13335 = vst [vmem:[#allocation12_spill] sm:$0xff] %v9178_v22  ;;  %v2707_v13 = vrot.slane %v9175_v37, 2  ;;  %v2706_v42 = vrot.slane %v9178_v22, 2  ;;  %3892 = vmatpush1.bf16.msra.mxu1 %v7672_v31 }
 0x175   :  { %v2313_v57 = vmax.f32 %v2067_v20, 0.0  ;;  %v764_v28 = vpop.permute.xlu1 %763  ;;  %7526 = vmatpush3.bf16.msra.mxu0 %v7671_v56  ;;  %3893 = vmatprep.subr.bf16.mxu1 %v13329_v12  ;;  %v1309_v43 = vsel %vm1029_vm3, %v8741_v30, %v892_v44 }
 0x176   :  { %911 = vrot.lane.b32.xlu0 %v8761_v11, %s7741_s18  ;;  %v1067_v11 = vsel %vm1029_vm3, %v8290_v10, %v706_v59  ;;  %v9215_v30 = vsel %vm549_vm2, %v2706_v42, %v2707_v13 }
 0x177   :  { %v2375_v49 = vpack.c.bf16 %v2313_v57, %v2312_v52  ;;  %847 = vrot.lane.b32.xlu1 %v8747_v5, %s7742_s19  ;;  %v1126_v59 = vsel %vm1088_vm4, %v1067_v11, %v764_v28 }
 0x178   :  { %v954_v62 = vpop.permute.xlu0 %953  ;;  %3894 = vmatpush1.bf16.msra.mxu1 %v7673_v18 }
 0x179   :  { %v828_v4 = vpop.permute.xlu1 %827  ;;  %v2439_v1 = vrot.slane %v2375_v49, 7  ;;  %v7674_v49 = vld [vmem:[%s13148_s3 + $0x78] sm:$0xff]   ;;  %3895 = vmatprep.subr.bf16.mxu1 %v13329_v12 }
 0x17a   :  { %783 = vrot.lane.b32.xlu0 %v8700_v26, %s7740_s15  ;;  %v1782_v5 = vpop.f32.mrb[8].mxu0  ;;  %v1382_v26 = vsel %vm1088_vm4, %v1309_v43, %v954_v62  ;;  %v1212_v13 = vsel %vm1147_vm5, %v1126_v59, %v828_v4 }
 0x17b   :  { %v1783_v56 = vadd.f32 %v9104_v48, %v1782_v5  ;;  %v1784_v20 = vpop.f32.mrb[9].mxu0  ;;  %2934 = vrot.lane.b32.xlu1 %v9178_v22, %s7742_s19  ;;  %v9207_v31 = vsel %vm302_vm0, 0, %v2439_v1  ;;  %v9210_v10 = vsel %vm302_vm0, %v2439_v1, 0 }
 0x17c   :  { %v1012_v52 = vpop.permute.xlu0 %1011  ;;  %v1785_v57 = vpop.f32.mrb[10].mxu0  ;;  %v2709_v44 = vrot.slane %v9207_v31, 2  ;;  %v2710_v11 = vrot.slane %v9210_v10, 2  ;;  %3896 = vmatpush1.bf16.msra.mxu1 %v7674_v49 }
 0x17d   :  { %v2072_v5 = vadd.f32 %v8865_v7, %v1783_v56  ;;  %v1786_v1 = vadd.f32 %v9104_v48, %v1785_v57  ;;  %v1787_v20 = vpop.f32.mrb[11].mxu0  ;;  %v1464_v28 = vsel %vm1147_vm5, %v1382_v26, %v1012_v52  ;;  %v708_v62 = vpop.permute.xlu1 %707  ;;  %7591 = vmatprep.subr.bf16.mxu1 %v9142_v36  ;;  %v2623_v52 = vrot.slane %v9175_v37, 1 }
 0x17e   :  { %1932 = vmatprep.mubr.bf16.mxu0 %v1464_v28  ;;  %2998 = vrot.lane.b32.xlu0 %v9215_v30, %s7741_s18  ;;  %v9233_v56 = vsel %vm549_vm2, %v2709_v44, %v2710_v11  ;;  %v2622_v57 = vrot.slane %v9178_v22, 1  ;;  %v1069_v49 = vsel %vm1029_vm3, %v8301_v0, %v708_v62 }
 0x17f   :  { %v2075_v42 = vadd.f32 %v8874_v23, %v1786_v1  ;;  %1933 = vmatmul.mubr.bf16.gmra.mrb[84].mxu0 %v1212_v13  ;;  %2936 = vrot.lane.b32.xlu1 %v9207_v31, %s7742_s19  ;;  %v2314_v18 = vmax.f32 %v2072_v5, 0.0 }
 0x180   :  { %v894_v7 = vpop.permute.xlu0 %893 }
 0x181   :  { %v2315_v43 = vmax.f32 %v2075_v42, 0.0  ;;  %v766_v12 = vpop.permute.xlu1 %765  ;;  %v1312_v1 = vsel %vm1029_vm3, %v8786_v3, %v894_v7 }
 0x182   :  { %3000 = vrot.lane.b32.xlu0 %v9233_v56, %s7741_s18  ;;  %v1128_v62 = vsel %vm1088_vm4, %v1069_v49, %v766_v12  ;;  %v9268_v12 = vpop.f32.mrb[28].mxu1 }
 0x183   :  { %v2376_v4 = vpack.c.bf16 %v2315_v43, %v2314_v18  ;;  %13337 = vst [vmem:[#allocation22_spill] sm:$0xff] %v9268_v12 }
 0x184   :  { %v956_v59 = vpop.permute.xlu0 %955 }
 0x185   :  { %v2440_v23 = vrot.slane %v2376_v4, 7  ;;  %v830_v26 = vpop.permute.xlu1 %829  ;;  %v1384_v37 = vsel %vm1088_vm4, %v1312_v1, %v956_v59 }
 0x186   :  { %v1790_v5 = vpop.f32.mrb[12].mxu0  ;;  %v1215_v59 = vsel %vm1147_vm5, %v1128_v62, %v830_v26 }
 0x187   :  { %v9243_v44 = vsel %vm302_vm0, 0, %v2440_v23  ;;  %v2536_v36 = vsel %vm302_vm0, %v2440_v23, 0  ;;  %v1791_v20 = vadd.f32 %v9104_v48, %v1790_v5  ;;  %v1792_v28 = vpop.f32.mrb[13].mxu0 }
 0x188   :  { %13336 = vst [vmem:[#allocation21_spill] sm:$0xff] %v9243_v44  ;;  %v2629_v11 = vrot.slane %v2536_v36, 1  ;;  %v1014_v13 = vpop.permute.xlu0 %1013  ;;  %v1793_v42 = vpop.f32.mrb[14].mxu0  ;;  %3062 = vrot.lane.b32.xlu1 %v9243_v44, %s7740_s15  ;;  %v2628_v0 = vrot.slane %v9243_v44, 1  ;;  %v2713_v23 = vrot.slane %v2536_v36, 2  ;;  %v2712_v1 = vrot.slane %v9243_v44, 2 }
 0x189   :  { %v2080_v18 = vadd.f32 %v8862_v50, %v1791_v20  ;;  %v1794_v43 = vadd.f32 %v9104_v48, %v1793_v42  ;;  %v1795_v3 = vpop.f32.mrb[15].mxu0  ;;  %v1467_v7 = vsel %vm1147_vm5, %v1384_v37, %v1014_v13  ;;  %v710_v4 = vpop.permute.xlu1 %709  ;;  %v9266_v50 = vsel %vm461_vm1, %v2622_v57, %v2623_v52 }
 0x18a   :  { %1940 = vmatprep.mubr.bf16.mxu0 %v1467_v7  ;;  %v9259_v5 = vsel %vm461_vm1, %v2628_v0, %v2629_v11  ;;  %v9272_v11 = vpop.f32.mrb[29].mxu1  ;;  %v1071_v62 = vsel %vm1029_vm3, %v8329_v8, %v710_v4 }
 0x18b   :  { %v2083_v28 = vadd.f32 %v8869_v47, %v1794_v43  ;;  %1941 = vmatmul.mubr.bf16.gmra.mrb[88].mxu0 %v1215_v59  ;;  %3118 = vrot.lane.b32.xlu0 %v9259_v5, %s7742_s19  ;;  %v2316_v26 = vmax.f32 %v2080_v18, 0.0  ;;  %v9275_v47 = vsel %vm549_vm2, %v2712_v1, %v2713_v23  ;;  %v9277_v37 = vpop.f32.mrb[30].mxu1 }
 0x18c   :  { %v896_v49 = vpop.permute.xlu0 %895  ;;  %2822 = vrot.lane.b32.xlu1 %v9266_v50, %s7741_s18  ;;  %13338 = vst [vmem:[#allocation13_spill] sm:$0xff] %v9277_v37  ;;  %v9281_v52 = vpop.f32.mrb[31].mxu1 }
 0x18d   :  { %v2317_v36 = vmax.f32 %v2083_v28, 0.0  ;;  %v768_v20 = vpop.permute.xlu1 %767  ;;  %v1315_v3 = vsel %vm1029_vm3, %v8813_v58, %v896_v49 }
 0x18f   :  { %v2377_v13 = vpack.c.bf16 %v2317_v36, %v2316_v26  ;;  %3002 = vrot.lane.b32.xlu0 %v9275_v47, %s7741_s18  ;;  %v1130_v36 = vsel %vm1088_vm4, %v1071_v62, %v768_v20 }
 0x190   :  { %v958_v57 = vpop.permute.xlu0 %957 }
 0x191   :  { %v2441_v42 = vrot.slane %v2377_v13, 7  ;;  %v832_v0 = vpop.permute.xlu1 %831  ;;  %v1386_v1 = vsel %vm1088_vm4, %v1315_v3, %v958_v57  ;;  %v13340_v13 = vld [vmem:[#allocation9_spill] sm:$0xff] }
 0x192   :  { %v1798_v18 = vpop.f32.mrb[16].mxu0  ;;  %v1218_v57 = vsel %vm1147_vm5, %v1130_v36, %v832_v0  ;;  %v2625_v0 = vrot.slane %v9207_v31, 1  ;;  %v13342_v36 = vld [vmem:[#allocation16_spill] sm:$0xff] }
 0x193   :  { %v2537_v43 = vsel %vm302_vm0, %v2441_v42, 0  ;;  %v1799_v7 = vadd.f32 %v9104_v48, %v1798_v18  ;;  %v1800_v23 = vpop.f32.mrb[17].mxu0  ;;  %v9290_v59 = vsel %vm302_vm0, 0, %v2441_v42 }
 0x194   :  { %13339 = vst [vmem:[#allocation23_spill] sm:$0xff] %v9290_v59  ;;  %v1016_v28 = vpop.permute.xlu0 %1015  ;;  %v1801_v26 = vpop.f32.mrb[18].mxu0  ;;  %3064 = vrot.lane.b32.xlu1 %v9290_v59, %s7740_s15  ;;  %v2631_v8 = vrot.slane %v9290_v59, 1  ;;  %v2632_v4 = vrot.slane %v2537_v43, 1  ;;  %v2715_v22 = vrot.slane %v9290_v59, 2  ;;  %v2716_v37 = vrot.slane %v2537_v43, 2 }
 0x195   :  { %v2088_v58 = vadd.f32 %v13340_v13, %v1799_v7  ;;  %v1802_v49 = vadd.f32 %v9104_v48, %v1801_v26  ;;  %v1803_v18 = vpop.f32.mrb[19].mxu0  ;;  %v1470_v42 = vsel %vm1147_vm5, %v1386_v1, %v1016_v28  ;;  %v712_v23 = vpop.permute.xlu1 %711  ;;  %v2626_v43 = vrot.slane %v9210_v10, 1 }
 0x196   :  { %1948 = vmatprep.mubr.bf16.mxu0 %v1470_v42  ;;  %v9302_v3 = vsel %vm461_vm1, %v2631_v8, %v2632_v4  ;;  %v9312_v28 = vsel %vm549_vm2, %v2715_v22, %v2716_v37  ;;  %v1073_v22 = vsel %vm1029_vm3, %v13342_v36, %v712_v23 }
 0x197   :  { %v2091_v12 = vadd.f32 %v8895_v25, %v1802_v49  ;;  %1949 = vmatmul.mubr.bf16.gmra.mrb[92].mxu0 %v1218_v57  ;;  %3120 = vrot.lane.b32.xlu0 %v9302_v3, %s7742_s19  ;;  %v2318_v62 = vmax.f32 %v2088_v58, 0.0  ;;  %v9317_v25 = vpop.f32.mrb[32].mxu1  ;;  %v9326_v10 = vsel %vm461_vm1, %v2625_v0, %v2626_v43 }
 0x198   :  { %v898_v20 = vpop.permute.xlu0 %897  ;;  %2878 = vrot.lane.b32.xlu1 %v9215_v30, %s7740_s15  ;;  %13341 = vst [vmem:[#allocation9_spill] sm:$0xff] %v9317_v25  ;;  %v9321_v4 = vpop.f32.mrb[33].mxu1 }
 0x199   :  { %v2319_v7 = vmax.f32 %v2091_v12, 0.0  ;;  %v770_v1 = vpop.permute.xlu1 %769  ;;  %v1318_v49 = vsel %vm1029_vm3, %v8838_v63, %v898_v20  ;;  %v9337_v57 = vpop.f32.mrb[34].mxu1  ;;  %v13345_v20 = vld [vmem:[#allocation14_spill] sm:$0xff] }
 0x19a   :  { %13344 = vst [vmem:[#allocation24_spill] sm:$0xff] %v9337_v57  ;;  %v1132_v63 = vsel %vm1088_vm4, %v1073_v22, %v770_v1  ;;  %v13346_v57 = vld [vmem:[#allocation15_spill] sm:$0xff] }
 0x19b   :  { %v2378_v26 = vpack.c.bf16 %v2319_v7, %v2318_v62  ;;  %3004 = vrot.lane.b32.xlu0 %v9312_v28, %s7741_s18 }
 0x19c   :  { %v960_v8 = vpop.permute.xlu0 %959  ;;  %2938 = vrot.lane.b32.xlu1 %v9243_v44, %s7742_s19  ;;  %v9354_v44 = vpop.f32.mrb[35].mxu1 }
 0x19d   :  { %v2442_v30 = vrot.slane %v2378_v26, 7  ;;  %v834_v12 = vpop.permute.xlu1 %833  ;;  %v1388_v62 = vsel %vm1088_vm4, %v1318_v49, %v960_v8 }
 0x19e   :  { %v1806_v37 = vpop.f32.mrb[20].mxu0  ;;  %v1221_v49 = vsel %vm1147_vm5, %v1132_v63, %v834_v12 }
 0x19f   :  { %v9329_v13 = vsel %vm302_vm0, 0, %v2442_v30  ;;  %v9332_v58 = vsel %vm302_vm0, %v2442_v30, 0  ;;  %v1807_v18 = vadd.f32 %v9104_v48, %v1806_v37  ;;  %v1808_v42 = vpop.f32.mrb[21].mxu0 }
 0x1a0   :  { %13343 = vst [vmem:[#allocation16_spill] sm:$0xff] %v9329_v13  ;;  %v2635_v23 = vrot.slane %v9332_v58, 1  ;;  %v1018_v7 = vpop.permute.xlu0 %1017  ;;  %v1809_v0 = vpop.f32.mrb[22].mxu0  ;;  %3066 = vrot.lane.b32.xlu0 %v9329_v13, %s7740_s15  ;;  %2824 = vrot.lane.b32.xlu1 %v9326_v10, %s7741_s18  ;;  %v2634_v43 = vrot.slane %v9329_v13, 1 }
 0x1a1   :  { %v2096_v26 = vadd.f32 %v13345_v20, %v1807_v18  ;;  %v1810_v30 = vadd.f32 %v9104_v48, %v1809_v0  ;;  %v1811_v36 = vpop.f32.mrb[23].mxu0  ;;  %v1473_v37 = vsel %vm1147_vm5, %v1388_v62, %v1018_v7  ;;  %v714_v8 = vpop.permute.xlu1 %713 }
 0x1a2   :  { %1956 = vmatprep.mubr.bf16.mxu0 %v1473_v37  ;;  %v9352_v42 = vsel %vm461_vm1, %v2634_v43, %v2635_v23  ;;  %v13347_v43 = vld [vmem:[#allocation19_spill] sm:$0xff] }
 0x1a3   :  { %v2099_v25 = vadd.f32 %v13346_v57, %v1810_v30  ;;  %1957 = vmatmul.mubr.bf16.gmra.mrb[96].mxu0 %v1221_v49  ;;  %v2320_v22 = vmax.f32 %v2096_v26, 0.0  ;;  %v1075_v57 = vsel %vm1029_vm3, %v13347_v43, %v714_v8 }
 0x1a4   :  { %v900_v1 = vpop.permute.xlu0 %899  ;;  %3122 = vrot.lane.b32.xlu0 %v9352_v42, %s7742_s19  ;;  %2880 = vrot.lane.b32.xlu1 %v9233_v56, %s7740_s15 }
 0x1a5   :  { %v2321_v18 = vmax.f32 %v2099_v25, 0.0  ;;  %v772_v62 = vpop.permute.xlu1 %771  ;;  %v1321_v56 = vsel %vm1029_vm3, %v8879_v55, %v900_v1 }
 0x1a6   :  { %v1134_v1 = vsel %vm1088_vm4, %v1075_v57, %v772_v62  ;;  %v2718_v62 = vrot.slane %v9329_v13, 2  ;;  %v9396_v57 = vpop.f32.mrb[36].mxu1 }
 0x1a7   :  { %v2379_v7 = vpack.c.bf16 %v2321_v18, %v2320_v22  ;;  %13348 = vst [vmem:[#allocation14_spill] sm:$0xff] %v9396_v57 }
 0x1a8   :  { %v962_v12 = vpop.permute.xlu0 %961  ;;  %2940 = vrot.lane.b32.xlu1 %v9290_v59, %s7742_s19 }
 0x1a9   :  { %v2443_v23 = vrot.slane %v2379_v7, 7  ;;  %v836_v0 = vpop.permute.xlu1 %835  ;;  %v1390_v36 = vsel %vm1088_vm4, %v1321_v56, %v962_v12  ;;  %v2719_v56 = vrot.slane %v9332_v58, 2 }
 0x1aa   :  { %v1814_v63 = vpop.f32.mrb[24].mxu0  ;;  %v1224_v43 = vsel %vm1147_vm5, %v1134_v1, %v836_v0 }
 0x1ab   :  { %v9366_v20 = vsel %vm302_vm0, %v2443_v23, 0  ;;  %v1815_v25 = vadd.f32 %v9104_v48, %v1814_v63  ;;  %v1816_v26 = vpop.f32.mrb[25].mxu0  ;;  %v9372_v30 = vsel %vm302_vm0, 0, %v2443_v23 }
 0x1ac   :  { %v1020_v37 = vpop.permute.xlu0 %1019  ;;  %v1817_v49 = vpop.f32.mrb[26].mxu0  ;;  %3068 = vrot.lane.b32.xlu0 %v9372_v30, %s7740_s15  ;;  %2826 = vrot.lane.b32.xlu1 %v9259_v5, %s7741_s18  ;;  %v2637_v8 = vrot.slane %v9372_v30, 1  ;;  %v2638_v55 = vrot.slane %v9366_v20, 1  ;;  %v2721_v59 = vrot.slane %v9372_v30, 2 }
 0x1ad   :  { %v2104_v22 = vadd.f32 %v8916_v39, %v1815_v25  ;;  %v1818_v18 = vadd.f32 %v9104_v48, %v1817_v49  ;;  %v1819_v7 = vpop.f32.mrb[27].mxu0  ;;  %v1476_v12 = vsel %vm1147_vm5, %v1390_v36, %v1020_v37  ;;  %v716_v23 = vpop.permute.xlu1 %715 }
 0x1ae   :  { %1964 = vmatprep.mubr.bf16.mxu0 %v1476_v12  ;;  %v9387_v63 = vsel %vm461_vm1, %v2637_v8, %v2638_v55  ;;  %v9398_v37 = vpop.f32.mrb[37].mxu1 }
 0x1af   :  { %v2107_v26 = vadd.f32 %v8922_v2, %v1818_v18  ;;  %1965 = vmatmul.mubr.bf16.gmra.mrb[100].mxu0 %v1224_v43  ;;  %v2322_v0 = vmax.f32 %v2104_v22, 0.0  ;;  %v9401_v2 = vsel %vm549_vm2, %v2718_v62, %v2719_v56  ;;  %v9403_v49 = vpop.f32.mrb[38].mxu1  ;;  %v1077_v18 = vsel %vm1029_vm3, %v8442_v38, %v716_v23 }
 0x1b0   :  { %v902_v39 = vpop.permute.xlu0 %901  ;;  %3124 = vrot.lane.b32.xlu0 %v9387_v63, %s7742_s19  ;;  %2882 = vrot.lane.b32.xlu1 %v9275_v47, %s7740_s15  ;;  %13349 = vst [vmem:[#allocation15_spill] sm:$0xff] %v9403_v49  ;;  %v9409_v55 = vpop.f32.mrb[39].mxu1  ;;  %v13351_v49 = vld [vmem:[#allocation10_spill] sm:$0xff] }
 0x1b1   :  { %v2323_v25 = vmax.f32 %v2107_v26, 0.0  ;;  %v774_v36 = vpop.permute.xlu1 %773  ;;  %v1324_v56 = vsel %vm1029_vm3, %v8912_v33, %v902_v39 }
 0x1b2   :  { %v1136_v23 = vsel %vm1088_vm4, %v1077_v18, %v774_v36  ;;  %v2722_v36 = vrot.slane %v9366_v20, 2 }
 0x1b3   :  { %v2380_v58 = vpack.c.bf16 %v2323_v25, %v2322_v0 }
 0x1b4   :  { %v964_v8 = vpop.permute.xlu0 %963  ;;  %3006 = vrot.lane.b32.xlu0 %v9401_v2, %s7741_s18  ;;  %2942 = vrot.lane.b32.xlu1 %v9329_v13, %s7742_s19 }
 0x1b5   :  { %v2444_v1 = vrot.slane %v2380_v58, 7  ;;  %v838_v22 = vpop.permute.xlu1 %837  ;;  %v1392_v25 = vsel %vm1088_vm4, %v1324_v56, %v964_v8 }
 0x1b6   :  { %v1822_v7 = vpop.f32.mrb[28].mxu0  ;;  %v1227_v56 = vsel %vm1147_vm5, %v1136_v23, %v838_v22 }
 0x1b7   :  { %v9414_v12 = vsel %vm302_vm0, 0, %v2444_v1  ;;  %v9417_v43 = vsel %vm302_vm0, %v2444_v1, 0  ;;  %v1823_v26 = vadd.f32 %v9104_v48, %v1822_v7  ;;  %v1824_v62 = vpop.f32.mrb[29].mxu0 }
 0x1b8   :  { %13350 = vst [vmem:[#allocation19_spill] sm:$0xff] %v9414_v12  ;;  %v2641_v0 = vrot.slane %v9417_v43, 1  ;;  %v1022_v58 = vpop.permute.xlu0 %1021  ;;  %v1825_v13 = vpop.f32.mrb[30].mxu0  ;;  %3070 = vrot.lane.b32.xlu0 %v9414_v12, %s7740_s15  ;;  %2828 = vrot.lane.b32.xlu1 %v9302_v3, %s7741_s18  ;;  %v2640_v38 = vrot.slane %v9414_v12, 1 }
 0x1b9   :  { %v2112_v33 = vadd.f32 %v8914_v35, %v1823_v26  ;;  %v1826_v39 = vadd.f32 %v9104_v48, %v1825_v13  ;;  %v1827_v1 = vpop.f32.mrb[31].mxu0  ;;  %v1479_v7 = vsel %vm1147_vm5, %v1392_v25, %v1022_v58  ;;  %v718_v8 = vpop.permute.xlu1 %717 }
 0x1ba   :  { %1972 = vmatprep.mubr.bf16.mxu0 %v1479_v7  ;;  %v9435_v62 = vsel %vm461_vm1, %v2640_v38, %v2641_v0  ;;  %v9445_v0 = vsel %vm549_vm2, %v2721_v59, %v2722_v36  ;;  %v1079_v58 = vsel %vm1029_vm3, %v8483_v41, %v718_v8 }
 0x1bb   :  { %v2115_v57 = vadd.f32 %v13351_v49, %v1826_v39  ;;  %1973 = vmatmul.mubr.bf16.gmra.mrb[104].mxu0 %v1227_v56  ;;  %v2324_v13 = vmax.f32 %v2112_v33, 0.0 }
 0x1bc   :  { %v904_v35 = vpop.permute.xlu0 %903  ;;  %3126 = vrot.lane.b32.xlu0 %v9435_v62, %s7742_s19  ;;  %2884 = vrot.lane.b32.xlu1 %v9312_v28, %s7740_s15 }
 0x1bd   :  { %v2325_v18 = vmax.f32 %v2115_v57, 0.0  ;;  %v776_v22 = vpop.permute.xlu1 %775  ;;  %v1327_v59 = vsel %vm1029_vm3, %v8951_v34, %v904_v35 }
 0x1be   :  { %v1138_v8 = vsel %vm1088_vm4, %v1079_v58, %v776_v22 }
 0x1bf   :  { %v2381_v26 = vpack.c.bf16 %v2325_v18, %v2324_v13 }
 0x1c0   :  { %v966_v49 = vpop.permute.xlu0 %965  ;;  %3008 = vrot.lane.b32.xlu0 %v9445_v0, %s7741_s18  ;;  %2944 = vrot.lane.b32.xlu1 %v9372_v30, %s7742_s19 }
 0x1c1   :  { %v2445_v20 = vrot.slane %v2381_v26, 7  ;;  %v840_v25 = vpop.permute.xlu1 %839  ;;  %v1394_v1 = vsel %vm1088_vm4, %v1327_v59, %v966_v49  ;;  %v2725_v59 = vrot.slane %v9417_v43, 2 }
 0x1c2   :  { %v1830_v38 = vpop.f32.mrb[32].mxu0  ;;  %v1230_v49 = vsel %vm1147_vm5, %v1138_v8, %v840_v25 }
 0x1c3   :  { %v9454_v57 = vsel %vm302_vm0, %v2445_v20, 0  ;;  %v1831_v23 = vadd.f32 %v9104_v48, %v1830_v38  ;;  %v1832_v33 = vpop.f32.mrb[33].mxu0  ;;  %v9460_v39 = vsel %vm302_vm0, 0, %v2445_v20  ;;  %v9477_v38 = vpop.f32.mrb[40].mxu1 }
 0x1c4   :  { %v1024_v7 = vpop.permute.xlu0 %1023  ;;  %v1833_v56 = vpop.f32.mrb[34].mxu0  ;;  %3072 = vrot.lane.b32.xlu0 %v9460_v39, %s7740_s15  ;;  %2830 = vrot.lane.b32.xlu1 %v9352_v42, %s7741_s18  ;;  %v2643_v41 = vrot.slane %v9460_v39, 1  ;;  %v2644_v34 = vrot.slane %v9454_v57, 1 }
 0x1c5   :  { %v2120_v36 = vadd.f32 %v8992_v45, %v1831_v23  ;;  %v1834_v35 = vadd.f32 %v9104_v48, %v1833_v56  ;;  %v1835_v13 = vpop.f32.mrb[35].mxu0  ;;  %v1482_v18 = vsel %vm1147_vm5, %v1394_v1, %v1024_v7  ;;  %v720_v26 = vpop.permute.xlu1 %719  ;;  %v2724_v45 = vrot.slane %v9414_v12, 2 }
 0x1c6   :  { %1980 = vmatprep.mubr.bf16.mxu0 %v1482_v18  ;;  %v9475_v20 = vsel %vm461_vm1, %v2643_v41, %v2644_v34  ;;  %v9482_v58 = vpop.f32.mrb[41].mxu1 }
 0x1c7   :  { %v2123_v22 = vadd.f32 %v9001_v24, %v1834_v35  ;;  %1981 = vmatmul.mubr.bf16.gmra.mrb[108].mxu0 %v1230_v49  ;;  %v9488_v25 = vpop.f32.mrb[42].mxu1  ;;  %v2326_v33 = vmax.f32 %v2120_v36, 0.0  ;;  %v9493_v56 = vsel %vm549_vm2, %v2724_v45, %v2725_v59  ;;  %v1081_v36 = vsel %vm1029_vm3, %v8526_v27, %v720_v26 }
 0x1c8   :  { %v906_v23 = vpop.permute.xlu0 %905  ;;  %3128 = vrot.lane.b32.xlu0 %v9475_v20, %s7742_s19  ;;  %2886 = vrot.lane.b32.xlu1 %v9401_v2, %s7740_s15  ;;  %13352 = vst [vmem:[#allocation10_spill] sm:$0xff] %v9488_v25  ;;  %v9490_v43 = vpop.f32.mrb[43].mxu1  ;;  %v2727_v25 = vrot.slane %v9460_v39, 2 }
 0x1c9   :  { %v2327_v1 = vmax.f32 %v2123_v22, 0.0  ;;  %v778_v7 = vpop.permute.xlu1 %777  ;;  %v1330_v49 = vsel %vm1029_vm3, %v8984_v40, %v906_v23 }
 0x1ca   :  { %v1140_v26 = vsel %vm1088_vm4, %v1081_v36, %v778_v7  ;;  %v2728_v7 = vrot.slane %v9454_v57, 2 }
 0x1cb   :  { %v2382_v24 = vpack.c.bf16 %v2327_v1, %v2326_v33 }
 0x1cc   :  { %v968_v41 = vpop.permute.xlu0 %967  ;;  %3010 = vrot.lane.b32.xlu0 %v9493_v56, %s7741_s18  ;;  %2946 = vrot.lane.b32.xlu1 %v9414_v12, %s7742_s19 }
 0x1cd   :  { %v2446_v34 = vrot.slane %v2382_v24, 7  ;;  %v842_v8 = vpop.permute.xlu1 %841  ;;  %v1396_v33 = vsel %vm1088_vm4, %v1330_v49, %v968_v41 }
 0x1ce   :  { %v1838_v35 = vpop.f32.mrb[36].mxu0  ;;  %v1233_v49 = vsel %vm1147_vm5, %v1140_v26, %v842_v8 }
 0x1cf   :  { %v9502_v13 = vsel %vm302_vm0, 0, %v2446_v34  ;;  %v9505_v18 = vsel %vm302_vm0, %v2446_v34, 0  ;;  %v1839_v59 = vadd.f32 %v9104_v48, %v1838_v35  ;;  %v1840_v22 = vpop.f32.mrb[37].mxu0 }
 0x1d0   :  { %v2647_v45 = vrot.slane %v9505_v18, 1  ;;  %v1026_v1 = vpop.permute.xlu0 %1025  ;;  %v1841_v24 = vpop.f32.mrb[38].mxu0  ;;  %3074 = vrot.lane.b32.xlu0 %v9502_v13, %s7740_s15  ;;  %2832 = vrot.lane.b32.xlu1 %v9387_v63, %s7741_s18  ;;  %v2646_v27 = vrot.slane %v9502_v13, 1 }
 0x1d1   :  { %v2128_v40 = vadd.f32 %v8986_v54, %v1839_v59  ;;  %v1842_v23 = vadd.f32 %v9104_v48, %v1841_v24  ;;  %v1843_v34 = vpop.f32.mrb[39].mxu0  ;;  %v1485_v35 = vsel %vm1147_vm5, %v1396_v33, %v1026_v1  ;;  %v722_v41 = vpop.permute.xlu1 %721 }
 0x1d2   :  { %1988 = vmatprep.mubr.bf16.mxu0 %v1485_v35  ;;  %v9523_v22 = vsel %vm461_vm1, %v2646_v27, %v2647_v45  ;;  %v9533_v45 = vsel %vm549_vm2, %v2727_v25, %v2728_v7  ;;  %v1083_v24 = vsel %vm1029_vm3, %v8572_v21, %v722_v41 }
 0x1d3   :  { %v2131_v12 = vadd.f32 %v8995_v9, %v1842_v23  ;;  %1989 = vmatmul.mubr.bf16.gmra.mrb[112].mxu0 %v1233_v49  ;;  %v2328_v36 = vmax.f32 %v2128_v40, 0.0 }
 0x1d4   :  { %v908_v54 = vpop.permute.xlu0 %907  ;;  %3130 = vrot.lane.b32.xlu0 %v9523_v22, %s7742_s19  ;;  %2888 = vrot.lane.b32.xlu1 %v9445_v0, %s7740_s15 }
 0x1d5   :  { %v2329_v59 = vmax.f32 %v2131_v12, 0.0  ;;  %v780_v8 = vpop.permute.xlu1 %779  ;;  %v1333_v25 = vsel %vm1029_vm3, %v9030_v6, %v908_v54 }
 0x1d6   :  { %v1142_v41 = vsel %vm1088_vm4, %v1083_v24, %v780_v8 }
 0x1d7   :  { %v2383_v33 = vpack.c.bf16 %v2329_v59, %v2328_v36 }
 0x1d8   :  { %v970_v9 = vpop.permute.xlu0 %969  ;;  %3012 = vrot.lane.b32.xlu0 %v9533_v45, %s7741_s18  ;;  %2948 = vrot.lane.b32.xlu1 %v9460_v39, %s7742_s19 }
 0x1d9   :  { %v2447_v57 = vrot.slane %v2383_v33, 7  ;;  %v844_v1 = vpop.permute.xlu1 %843  ;;  %v1398_v34 = vsel %vm1088_vm4, %v1333_v25, %v970_v9  ;;  %v2731_v25 = vrot.slane %v9505_v18, 2 }
 0x1da   :  { %v1846_v27 = vpop.f32.mrb[40].mxu0  ;;  %v1236_v9 = vsel %vm1147_vm5, %v1142_v41, %v844_v1  ;;  %v13353_v41 = vld [vmem:[#allocation11_spill] sm:$0xff] }
 0x1db   :  { %v9542_v12 = vsel %vm302_vm0, %v2447_v57, 0  ;;  %v1847_v26 = vadd.f32 %v9104_v48, %v1846_v27  ;;  %v1848_v40 = vpop.f32.mrb[41].mxu0  ;;  %v9548_v23 = vsel %vm302_vm0, 0, %v2447_v57  ;;  %v9565_v27 = vpop.f32.mrb[44].mxu1 }
 0x1dc   :  { %v1028_v35 = vpop.permute.xlu0 %1027  ;;  %v1849_v49 = vpop.f32.mrb[42].mxu0  ;;  %3076 = vrot.lane.b32.xlu0 %v9548_v23, %s7740_s15  ;;  %2834 = vrot.lane.b32.xlu1 %v9435_v62, %s7741_s18  ;;  %v2649_v21 = vrot.slane %v9548_v23, 1  ;;  %v2650_v6 = vrot.slane %v9542_v12, 1 }
 0x1dd   :  { %v2136_v7 = vadd.f32 %v9074_v61, %v1847_v26  ;;  %v1850_v54 = vadd.f32 %v9104_v48, %v1849_v49  ;;  %v1851_v36 = vpop.f32.mrb[43].mxu0  ;;  %v1488_v59 = vsel %vm1147_vm5, %v1398_v34, %v1028_v35  ;;  %v724_v33 = vpop.permute.xlu1 %723  ;;  %v2730_v61 = vrot.slane %v9502_v13, 2 }
 0x1de   :  { %1996 = vmatprep.mubr.bf16.mxu0 %v1488_v59  ;;  %v9563_v57 = vsel %vm461_vm1, %v2649_v21, %v2650_v6  ;;  %v9570_v24 = vpop.f32.mrb[45].mxu1  ;;  %v1085_v49 = vsel %vm1029_vm3, %v8626_v60, %v724_v33 }
 0x1df   :  { %v2139_v8 = vadd.f32 %v9081_v17, %v1850_v54  ;;  %1997 = vmatmul.mubr.bf16.gmra.mrb[116].mxu0 %v1236_v9  ;;  %v9576_v1 = vpop.f32.mrb[46].mxu1  ;;  %v2330_v40 = vmax.f32 %v2136_v7, 0.0  ;;  %v9589_v36 = vsel %vm549_vm2, %v2730_v61, %v2731_v25 }
 0x1e0   :  { %v910_v26 = vpop.permute.xlu0 %909  ;;  %3132 = vrot.lane.b32.xlu0 %v9563_v57, %s7742_s19  ;;  %2890 = vrot.lane.b32.xlu1 %v9493_v56, %s7740_s15  ;;  %v9580_v35 = vpop.f32.mrb[47].mxu1 }
 0x1e1   :  { %v2331_v34 = vmax.f32 %v2139_v8, 0.0  ;;  %v1336_v18 = vsel %vm1029_vm3, %v9067_v51, %v910_v26  ;;  %v846_v17 = vpop.permute.xlu1 %845 }
 0x1e2   :  { %v1399_v21 = vsel %vm1088_vm4, %v1336_v18, %v8926_v19 }
 0x1e3   :  { %v2384_v6 = vpack.c.bf16 %v2331_v34, %v2330_v40  ;;  %v1490_v54 = vsel %vm1147_vm5, %v1399_v21, %v13353_v41 }
 0x1e4   :  { %v782_v7 = vpop.permute.xlu0 %781  ;;  %2004 = vmatprep.mubr.bf16.mxu0 %v1490_v54  ;;  %3014 = vrot.lane.b32.xlu0 %v9589_v36, %s7741_s18 }
 0x1e5   :  { %v2448_v51 = vrot.slane %v2384_v6, 7  ;;  %v1144_v59 = vsel %vm1088_vm4, %v1085_v49, %v782_v7  ;;  %2950 = vrot.lane.b32.xlu1 %v9502_v13, %s7742_s19  ;;  %v726_v60 = vpop.permute.xlu1 %725 }
 0x1e6   :  { %v1854_v33 = vpop.f32.mrb[44].mxu0  ;;  %v1239_v9 = vsel %vm1147_vm5, %v1144_v59, %v846_v17  ;;  %v1087_v7 = vsel %vm1029_vm3, %v8672_v14, %v726_v60 }
 0x1e7   :  { %v9598_v8 = vsel %vm302_vm0, 0, %v2448_v51  ;;  %v9601_v25 = vsel %vm302_vm0, %v2448_v51, 0  ;;  %v1855_v61 = vadd.f32 %v9104_v48, %v1854_v33  ;;  %v1856_v26 = vpop.f32.mrb[45].mxu0  ;;  %2005 = vmatmul.mubr.bf16.gmra.mrb[120].mxu0 %v1239_v9 }
 0x1e8   :  { %v2653_v40 = vrot.slane %v9601_v25, 1  ;;  %v912_v34 = vpop.permute.xlu0 %911  ;;  %v1857_v18 = vpop.f32.mrb[46].mxu0  ;;  %3078 = vrot.lane.b32.xlu0 %v9598_v8, %s7740_s15  ;;  %v2652_v49 = vrot.slane %v9598_v8, 1 }
 0x1e9   :  { %v2144_v17 = vadd.f32 %v9069_v46, %v1855_v61  ;;  %v1339_v21 = vsel %vm1029_vm3, %v9118_v15, %v912_v34  ;;  %v1858_v6 = vadd.f32 %v9104_v48, %v1857_v18  ;;  %2836 = vrot.lane.b32.xlu1 %v9475_v20, %s7741_s18  ;;  %v1859_v54 = vpop.f32.mrb[47].mxu0  ;;  %v848_v51 = vpop.permute.xlu1 %847  ;;  %v13354_v46 = vld [vmem:[#allocation20_spill] sm:$0xff]  ;;  %v2733_v48 = vrot.slane %v9548_v23, 2 }
 0x1ea   :  { %v1400_v59 = vsel %vm1088_vm4, %v1339_v21, %v8926_v19  ;;  %v9619_v33 = vsel %vm461_vm1, %v2652_v49, %v2653_v40  ;;  %v2734_v61 = vrot.slane %v9542_v12, 2 }
 0x1eb   :  { %v2147_v9 = vadd.f32 %v13354_v46, %v1858_v6  ;;  %v1492_v15 = vsel %vm1147_vm5, %v1400_v59, %v13353_v41  ;;  %v2332_v14 = vmax.f32 %v2144_v17, 0.0 }
 0x1ec   :  { %v784_v26 = vpop.permute.xlu0 %783  ;;  %2012 = vmatprep.mubr.bf16.mxu0 %v1492_v15  ;;  %3134 = vrot.lane.b32.xlu0 %v9619_v33, %s7742_s19  ;;  %v9633_v49 = vsel %vm549_vm2, %v2733_v48, %v2734_v61 }
 0x1ed   :  { %v2333_v60 = vmax.f32 %v2147_v9, 0.0  ;;  %v1146_v34 = vsel %vm1088_vm4, %v1087_v7, %v784_v26  ;;  %2892 = vrot.lane.b32.xlu1 %v9533_v45, %s7740_s15  ;;  %v2935_v12 = vpop.permute.xlu1 %2934  ;;  %v9647_v7 = vld [vmem:[%s13147_s2] ss:$0 sm:$0xff] }
 0x1ee   :  { %v1242_v40 = vsel %vm1147_vm5, %v1146_v34, %v848_v51  ;;  %v9666_v34 = vpop.f32.mrb[48].mxu1 }
 0x1ef   :  { %v2385_v18 = vpack.c.bf16 %v2333_v60, %v2332_v14  ;;  %2013 = vmatmul.mubr.bf16.gmra.mrb[124].mxu0 %v1242_v40  ;;  %v2737_v40 = vrot.slane %v9601_v25, 2 }
 0x1f0   :  { %7527 = vmatprep.mubr.msk.bf16.mxu0 %vm1029_vm3, %v9275_v47  ;;  %3016 = vrot.lane.b32.xlu0 %v9633_v49, %s7741_s18  ;;  %v2999_v54 = vpop.permute.xlu0 %2998 }
 0x1f1   :  { %v2449_v17 = vrot.slane %v2385_v18, 7  ;;  %2952 = vrot.lane.b32.xlu1 %v9548_v23, %s7742_s19  ;;  %v9661_v14 = vpop.permute.xlu1 %2936 }
 0x1f2   :  { %v1862_v21 = vpop.f32.mrb[48].mxu0 }
 0x1f3   :  { %v9642_v6 = vsel %vm302_vm0, %v2449_v17, 0  ;;  %v1863_v51 = vadd.f32 %v9647_v7, %v1862_v21  ;;  %v1864_v47 = vpop.f32.mrb[49].mxu0  ;;  %v9651_v59 = vsel %vm302_vm0, 0, %v2449_v17  ;;  %v9673_v17 = vpop.f32.mrb[49].mxu1 }
 0x1f4   :  { %v1865_v46 = vpop.f32.mrb[50].mxu0  ;;  %3080 = vrot.lane.b32.xlu0 %v9651_v59, %s7740_s15  ;;  %v2655_v9 = vrot.slane %v9651_v59, 1  ;;  %v2656_v15 = vrot.slane %v9642_v6, 1  ;;  %v9679_v21 = vpop.f32.mrb[50].mxu1 }
 0x1f5   :  { %v1866_v48 = vadd.f32 %v9647_v7, %v1865_v46  ;;  %v2152_v61 = vadd.f32 %v9180_v16, %v1863_v51  ;;  %2838 = vrot.lane.b32.xlu1 %v9523_v22, %s7741_s18  ;;  %v1867_v26 = vpop.f32.mrb[51].mxu0  ;;  %v2736_v16 = vrot.slane %v9598_v8, 2  ;;  %v3001_v47 = vpop.permute.xlu0 %3000 }
 0x1f6   :  { %v9664_v60 = vsel %vm461_vm1, %v2655_v9, %v2656_v15 }
 0x1f7   :  { %v2155_v18 = vadd.f32 %v9189_v53, %v1866_v48  ;;  %7528 = vmatmul.mubr.msk.bf16.vlgmr.msra.gmra.mrb[128].mxu0 %vm1029_vm3, %v9312_v28  ;;  %v2334_v51 = vmax.f32 %v2152_v61, 0.0  ;;  %v9683_v53 = vpop.f32.mrb[51].mxu1  ;;  %v9686_v9 = vsel %vm549_vm2, %v2736_v16, %v2737_v40  ;;  %v13356_v16 = vld [vmem:[#allocation18_spill] sm:$0xff] }
 0x1f8   :  { %7531 = vmatprep.mubr.msk.bf16.mxu0 %vm1029_vm3, %v9401_v2  ;;  %3136 = vrot.lane.b32.xlu0 %v9664_v60, %s7742_s19  ;;  %v3384_v2 = vsel %vm1029_vm3, %v9266_v50, %v2999_v54 }
 0x1f9   :  { %v2335_v25 = vmax.f32 %v2155_v18, 0.0  ;;  %2894 = vrot.lane.b32.xlu1 %v9589_v36, %s7740_s15 }
 0x1fa   :  { %v3063_v28 = vpop.permute.xlu1 %3062 }
 0x1fb   :  { %v2386_v46 = vpack.c.bf16 %v2335_v25, %v2334_v51  ;;  %v3479_v48 = vsel %vm1088_vm4, %v3384_v2, %v3063_v28  ;;  %v3287_v25 = vsel %vm1147_vm5, %v13356_v16, %v2935_v12 }
 0x1fc   :  { %3018 = vrot.lane.b32.xlu0 %v9686_v9, %s7741_s18 }
 0x1fd   :  { %v2450_v15 = vrot.slane %v2386_v46, 7  ;;  %2954 = vrot.lane.b32.xlu1 %v9598_v8, %s7742_s19  ;;  %v3119_v61 = vpop.permute.xlu0 %3118 }
 0x1fe   :  { %v1870_v26 = vpop.f32.mrb[52].mxu0  ;;  %v3539_v18 = vsel %vm1147_vm5, %v3479_v48, %v3119_v61  ;;  %v9717_v12 = vpop.permute.xlu1 %2822 }
 0x1ff   :  { %v9697_v51 = vsel %vm302_vm0, 0, %v2450_v15  ;;  %v9700_v40 = vsel %vm302_vm0, %v2450_v15, 0  ;;  %v1871_v50 = vadd.f32 %v9647_v7, %v1870_v26  ;;  %v1872_v54 = vpop.f32.mrb[53].mxu0  ;;  %3897 = vmatprep.mubr.bf16.mxu1 %v3539_v18  ;;  %7532 = vmatmul.mubr.msk.bf16.gmra.mrb[132].mxu0 %vm1029_vm3, %v9445_v0  ;;  %v2740_v18 = vrot.slane %v9642_v6, 2 }
 0x200   :  { %13355 = vst [vmem:[#allocation20_spill] sm:$0xff] %v9697_v51  ;;  %v2659_v28 = vrot.slane %v9700_v40, 1  ;;  %v1873_v46 = vpop.f32.mrb[54].mxu0  ;;  %7535 = vmatprep.mubr.msk.bf16.mxu0 %vm1029_vm3, %v9493_v56  ;;  %3082 = vrot.lane.b32.xlu0 %v9697_v51, %s7740_s15  ;;  %v2658_v2 = vrot.slane %v9697_v51, 1  ;;  %v7696_v56 = vld [vmem:[%s13148_s3 + $0x80] sm:$0xff]  }
 0x201   :  { %v2160_v15 = vadd.f32 %v9169_v29, %v1871_v50  ;;  %v1874_v48 = vadd.f32 %v9647_v7, %v1873_v46  ;;  %2840 = vrot.lane.b32.xlu1 %v9563_v57, %s7741_s18  ;;  %3898 = vmatmul.mubr.bf16.vlgmr.msra.gmra.mrb[64].mxu1 %v3287_v25  ;;  %v1875_v0 = vpop.f32.mrb[55].mxu0  ;;  %v2739_v29 = vrot.slane %v9651_v59, 2  ;;  %v7697_v50 = vld [vmem:[%s13148_s3 + $0x88] sm:$0xff]   ;;  %s12600_s3 = sld [smem:[#allocation2 + $0xa]] }
 0x202   :  { %v9720_v61 = vsel %vm461_vm1, %v2658_v2, %v2659_v28  ;;  %7593 = vmatpush3.bf16.msra.mxu1 %v7696_v56  ;;  %v9733_v28 = vpop.permute.xlu0 %3002  ;;  %v3387_v2 = vsel %vm1029_vm3, %v9326_v10, %v3001_v47 }
 0x203   :  { %v2163_v26 = vadd.f32 %v9185_v32, %v1874_v48  ;;  %7592 = vmatprep.subr.bf16.mxu1 %v7697_v50  ;;  %v2336_v54 = vmax.f32 %v2160_v15, 0.0  ;;  %v9740_v6 = vsel %vm549_vm2, %v2739_v29, %v2740_v18  ;;  %v3290_v18 = vsel %vm1147_vm5, %v13356_v16, %v9661_v14 }
 0x204   :  { %3138 = vrot.lane.b32.xlu0 %v9720_v61, %s7742_s19 }
 0x205   :  { %v2337_v25 = vmax.f32 %v2163_v26, 0.0  ;;  %2896 = vrot.lane.b32.xlu1 %v9633_v49, %s7740_s15 }
 0x206   :  { %v3065_v32 = vpop.permute.xlu1 %3064  ;;  %7594 = vmatpush3.bf16.msra.mxu1 %v7697_v50 }
 0x207   :  { %v2387_v46 = vpack.c.bf16 %v2337_v25, %v2336_v54  ;;  %7536 = vmatmul.mubr.msk.bf16.gmra.mrb[136].mxu0 %vm1029_vm3, %v9533_v45  ;;  %v3481_v48 = vsel %vm1088_vm4, %v3387_v2, %v3065_v32 }
 0x208   :  { %7539 = vmatprep.mubr.msk.bf16.mxu0 %vm1029_vm3, %v9589_v36  ;;  %3020 = vrot.lane.b32.xlu0 %v9740_v6, %s7741_s18 }
 0x209   :  { %v2451_v15 = vrot.slane %v2387_v46, 7  ;;  %2956 = vrot.lane.b32.xlu1 %v9651_v59, %s7742_s19  ;;  %v3121_v0 = vpop.permute.xlu0 %3120 }
 0x20a   :  { %v1878_v45 = vpop.f32.mrb[56].mxu0  ;;  %v2879_v56 = vpop.permute.xlu1 %2878  ;;  %v3542_v26 = vsel %vm1147_vm5, %v3481_v48, %v3121_v0 }
 0x20b   :  { %v9753_v29 = vsel %vm302_vm0, %v2451_v15, 0  ;;  %v1879_v10 = vadd.f32 %v9647_v7, %v1878_v45  ;;  %v1880_v36 = vpop.f32.mrb[57].mxu0  ;;  %3905 = vmatprep.mubr.bf16.mxu1 %v3542_v26  ;;  %v9757_v47 = vsel %vm302_vm0, 0, %v2451_v15  ;;  %v9775_v0 = vpop.f32.mrb[52].mxu1  ;;  %v2743_v45 = vrot.slane %v9700_v40, 2 }
 0x20c   :  { %v1881_v50 = vpop.f32.mrb[58].mxu0  ;;  %3084 = vrot.lane.b32.xlu0 %v9757_v47, %s7740_s15  ;;  %3906 = vmatmul.mubr.bf16.gmra.mrb[68].mxu1 %v3290_v18  ;;  %v2661_v54 = vrot.slane %v9757_v47, 1  ;;  %v2662_v25 = vrot.slane %v9753_v29, 1  ;;  %13357 = vst [vmem:[#allocation25_spill] sm:$0xff] %v9775_v0 }
 0x20d   :  { %v1882_v32 = vadd.f32 %v9647_v7, %v1881_v50  ;;  %v2168_v46 = vadd.f32 %v9272_v11, %v1879_v10  ;;  %2842 = vrot.lane.b32.xlu1 %v9619_v33, %s7741_s18  ;;  %v1883_v2 = vpop.f32.mrb[59].mxu0  ;;  %v9770_v15 = vpop.permute.xlu0 %3004  ;;  %v2742_v11 = vrot.slane %v9697_v51, 2 }
 0x20e   :  { %v2939_v14 = vpop.permute.xlu1 %2938  ;;  %v9773_v48 = vsel %vm461_vm1, %v2661_v54, %v2662_v25  ;;  %v9782_v10 = vpop.f32.mrb[53].mxu1 }
 0x20f   :  { %v2171_v26 = vadd.f32 %v9281_v52, %v1882_v32  ;;  %7540 = vmatmul.mubr.msk.bf16.gmra.mrb[140].mxu0 %vm1029_vm3, %v9633_v49  ;;  %v9788_v36 = vpop.f32.mrb[54].mxu1  ;;  %v2338_v18 = vmax.f32 %v2168_v46, 0.0  ;;  %v9796_v16 = vsel %vm549_vm2, %v2742_v11, %v2743_v45  ;;  %v13360_v11 = vld [vmem:[#allocation13_spill] sm:$0xff] }
 0x210   :  { %7543 = vmatprep.mubr.msk.bf16.mxu0 %vm1029_vm3, %v9686_v9  ;;  %3140 = vrot.lane.b32.xlu0 %v9773_v48, %s7742_s19  ;;  %13358 = vst [vmem:[#allocation26_spill] sm:$0xff] %v9788_v36  ;;  %v9792_v52 = vpop.f32.mrb[55].mxu1 }
 0x211   :  { %v2339_v50 = vmax.f32 %v2171_v26, 0.0  ;;  %2898 = vrot.lane.b32.xlu1 %v9686_v9, %s7740_s15  ;;  %v13359_v26 = vld [vmem:[#allocation22_spill] sm:$0xff] }
 0x212   :  { %v1886_v49 = vpop.f32.mrb[60].mxu0  ;;  %v3067_v40 = vpop.permute.xlu0 %3066 }
 0x213   :  { %v2388_v54 = vpack.c.bf16 %v2339_v50, %v2338_v18  ;;  %v1887_v25 = vadd.f32 %v9647_v7, %v1886_v49  ;;  %v2825_v32 = vpop.permute.xlu1 %2824  ;;  %v1888_v2 = vpop.f32.mrb[61].mxu0  ;;  %v3390_v49 = vsel %vm1029_vm3, %v9259_v5, %v9733_v28 }
 0x214   :  { %v1889_v41 = vpop.f32.mrb[62].mxu0  ;;  %3022 = vrot.lane.b32.xlu0 %v9796_v16, %s7741_s18 }
 0x215   :  { %v2452_v46 = vrot.slane %v2388_v54, 7  ;;  %v2176_v19 = vadd.f32 %v13359_v26, %v1887_v25  ;;  %v1890_v9 = vadd.f32 %v9647_v7, %v1889_v41  ;;  %2958 = vrot.lane.b32.xlu1 %v9697_v51, %s7742_s19  ;;  %v1891_v18 = vpop.f32.mrb[63].mxu0  ;;  %v13361_v41 = vld [vmem:[#allocation12_spill] sm:$0xff]  ;;  %v2746_v51 = vrot.slane %v9753_v29, 2 }
 0x216   :  { %v3123_v50 = vpop.permute.xlu0 %3122  ;;  %v3175_v25 = vsel %vm1029_vm3, %v13361_v41, %v9717_v12  ;;  %v3483_v18 = vsel %vm1088_vm4, %v3390_v49, %v3067_v40  ;;  %v2745_v41 = vrot.slane %v9757_v47, 2 }
 0x217   :  { %v2548_v45 = vsel %vm302_vm0, %v2452_v46, 0  ;;  %v2179_v2 = vadd.f32 %v13360_v11, %v1890_v9  ;;  %v2881_v36 = vpop.permute.xlu1 %2880  ;;  %7544 = vmatmul.mubr.msk.bf16.gmra.mrb[144].mxu0 %vm1029_vm3, %v9740_v6  ;;  %v9812_v54 = vsel %vm302_vm0, 0, %v2452_v46  ;;  %v3231_v28 = vsel %vm1088_vm4, %v3175_v25, %v2879_v56 }
 0x218   :  { %v2799_v26 = vrot.slane %v2548_v45, 1  ;;  %7547 = vmatprep.mubr.msk.bf16.mxu0 %vm1029_vm3, %v9796_v16  ;;  %v2798_v5 = vrot.slane %v9812_v54, 1  ;;  %3086 = vrot.lane.b32.xlu0 %v9812_v54, %s7740_s15  ;;  %v2340_v9 = vmax.f32 %v2176_v19, 0.0  ;;  %v3545_v12 = vsel %vm1147_vm5, %v3483_v18, %v3123_v50 }
 0x219   :  { %v2341_v46 = vmax.f32 %v2179_v2, 0.0  ;;  %2844 = vrot.lane.b32.xlu1 %v9664_v60, %s7741_s18  ;;  %3913 = vmatprep.mubr.bf16.mxu1 %v3545_v12  ;;  %v3293_v40 = vsel %vm1147_vm5, %v3231_v28, %v2939_v14  ;;  %v2811_v0 = vrot.slane %v2548_v45, 2  ;;  %v2810_v19 = vrot.slane %v9812_v54, 2 }
 0x21a   :  { %v1894_v49 = vpop.f32.mrb[64].mxu0  ;;  %v9829_v11 = vsel %vm461_vm1, %v2798_v5, %v2799_v26  ;;  %3914 = vmatmul.mubr.bf16.gmra.mrb[72].mxu1 %v3293_v40  ;;  %v9842_v28 = vsel %vm549_vm2, %v2745_v41, %v2746_v51 }
 0x21b   :  { %v2389_v56 = vpack.c.bf16 %v2341_v46, %v2340_v9  ;;  %v1895_v2 = vadd.f32 %v9647_v7, %v1894_v49  ;;  %v2941_v25 = vpop.permute.xlu1 %2940  ;;  %v1896_v50 = vpop.f32.mrb[65].mxu0  ;;  %v2812_v12 = vsel %vm549_vm2, %v2810_v19, %v2811_v0 }
 0x21c   :  { %v1897_v18 = vpop.f32.mrb[66].mxu0  ;;  %3142 = vrot.lane.b32.xlu0 %v9829_v11, %s7742_s19 }
 0x21d   :  { %v1898_v14 = vadd.f32 %v9647_v7, %v1897_v18  ;;  %v2184_v26 = vadd.f32 %v9321_v4, %v1895_v2  ;;  %2900 = vrot.lane.b32.xlu1 %v9740_v6, %s7740_s15  ;;  %v1899_v29 = vpop.f32.mrb[67].mxu0  ;;  %v2453_v45 = vrot.slane %v2389_v56, 7  ;;  %v3177_v4 = vsel %vm1029_vm3, %v9207_v31, %v2825_v32 }
 0x21e   :  { %v3069_v5 = vpop.permute.xlu0 %3068  ;;  %v3233_v6 = vsel %vm1088_vm4, %v3177_v4, %v2881_v36 }
 0x21f   :  { %v2187_v9 = vadd.f32 %v9354_v44, %v1898_v14  ;;  %v2827_v46 = vpop.permute.xlu1 %2826  ;;  %7548 = vmatmul.mubr.msk.bf16.gmra.mrb[148].mxu0 %vm1029_vm3, %v9842_v28  ;;  %v9849_v40 = vsel %vm302_vm0, 0, %v2453_v45  ;;  %v2549_v51 = vsel %vm302_vm0, %v2453_v45, 0  ;;  %v3393_v44 = vsel %vm1029_vm3, %v9302_v3, %v9770_v15  ;;  %v13362_v45 = vld [vmem:[#allocation9_spill] sm:$0xff] }
 0x220   :  { %7551 = vmatprep.mubr.msk.bf16.mxu0 %vm1029_vm3, %v2812_v12  ;;  %3024 = vrot.lane.b32.xlu0 %v9842_v28, %s7741_s18  ;;  %v2342_v0 = vmax.f32 %v2184_v26, 0.0  ;;  %v3485_v31 = vsel %vm1088_vm4, %v3393_v44, %v3069_v5  ;;  %v2801_v56 = vrot.slane %v9849_v40, 1  ;;  %v2813_v19 = vrot.slane %v9849_v40, 2 }
 0x221   :  { %v2343_v49 = vmax.f32 %v2187_v9, 0.0  ;;  %2960 = vrot.lane.b32.xlu1 %v9757_v47, %s7742_s19  ;;  %v2814_v2 = vrot.slane %v2549_v51, 2  ;;  %v2802_v14 = vrot.slane %v2549_v51, 1  ;;  %v3296_v29 = vsel %vm1147_vm5, %v3233_v6, %v2941_v25  ;;  %v9876_v51 = vpop.f32.mrb[56].mxu1 }
 0x222   :  { %v1902_v32 = vpop.f32.mrb[68].mxu0  ;;  %v3125_v41 = vpop.permute.xlu0 %3124 }
 0x223   :  { %v2390_v50 = vpack.c.bf16 %v2343_v49, %v2342_v0  ;;  %v1903_v18 = vadd.f32 %v9647_v7, %v1902_v32  ;;  %v2883_v3 = vpop.permute.xlu1 %2882  ;;  %v1904_v15 = vpop.f32.mrb[69].mxu0  ;;  %v3548_v36 = vsel %vm1147_vm5, %v3485_v31, %v3125_v41  ;;  %v2815_v0 = vsel %vm549_vm2, %v2813_v19, %v2814_v2  ;;  %v13363_v49 = vld [vmem:[#allocation24_spill] sm:$0xff] }
 0x224   :  { %v1905_v26 = vpop.f32.mrb[70].mxu0  ;;  %3088 = vrot.lane.b32.xlu0 %v9849_v40, %s7740_s15  ;;  %3921 = vmatprep.mubr.bf16.mxu1 %v3548_v36  ;;  %v9881_v25 = vsel %vm461_vm1, %v2801_v56, %v2802_v14  ;;  %v9883_v6 = vpop.f32.mrb[57].mxu1  ;;  %v13364_v41 = vld [vmem:[#allocation8_spill] sm:$0xff] }
 0x225   :  { %v2192_v5 = vadd.f32 %v13362_v45, %v1903_v18  ;;  %v1906_v9 = vadd.f32 %v9647_v7, %v1905_v26  ;;  %2846 = vrot.lane.b32.xlu1 %v9720_v61, %s7741_s18  ;;  %v1907_v4 = vpop.f32.mrb[71].mxu0  ;;  %3922 = vmatmul.mubr.bf16.gmra.mrb[76].mxu1 %v3296_v29  ;;  %v9889_v18 = vpop.f32.mrb[58].mxu1  ;;  %v2454_v29 = vrot.slane %v2390_v50, 7  ;;  %v13365_v45 = vld [vmem:[#allocation21_spill] sm:$0xff] }
 0x226   :  { %v3007_v44 = vpop.permute.xlu0 %3006  ;;  %v9893_v15 = vpop.f32.mrb[59].mxu1 }
 0x227   :  { %v2195_v31 = vadd.f32 %v13363_v49, %v1906_v9  ;;  %v2943_v32 = vpop.permute.xlu1 %2942  ;;  %7552 = vmatmul.mubr.msk.bf16.gmra.mrb[152].mxu0 %vm1029_vm3, %v2815_v0  ;;  %v2344_v19 = vmax.f32 %v2192_v5, 0.0  ;;  %v3396_v26 = vsel %vm1029_vm3, %v9352_v42, %v3007_v44  ;;  %v3179_v5 = vsel %vm1029_vm3, %v13365_v45, %v2827_v46 }
 0x228   :  { %3144 = vrot.lane.b32.xlu0 %v9881_v25, %s7742_s19  ;;  %7555 = vmatprep.mubr.msk.bf16.mxu0 %vm1029_vm3, %v13364_v41  ;;  %v3235_v49 = vsel %vm1088_vm4, %v3179_v5, %v2883_v3 }
 0x229   :  { %v2345_v2 = vmax.f32 %v2195_v31, 0.0  ;;  %2962 = vrot.lane.b32.xlu1 %v9812_v54, %s7742_s19  ;;  %v3299_v46 = vsel %vm1147_vm5, %v3235_v49, %v2943_v32 }
 0x22a   :  { %v3071_v36 = vpop.permute.xlu0 %3070 }
 0x22b   :  { %v2391_v56 = vpack.c.bf16 %v2345_v2, %v2344_v19  ;;  %v2829_v14 = vpop.permute.xlu1 %2828  ;;  %v3487_v9 = vsel %vm1088_vm4, %v3396_v26, %v3071_v36  ;;  %v9916_v36 = vsel %vm302_vm0, 0, %v2454_v29  ;;  %v9919_v26 = vsel %vm302_vm0, %v2454_v29, 0 }
 0x22c   :  { %3026 = vrot.lane.b32.xlu0 %v2812_v12, %s7741_s18  ;;  %v2749_v32 = vrot.slane %v9919_v26, 2 }
 0x22d   :  { %2848 = vrot.lane.b32.xlu1 %v9773_v48, %s7741_s18 }
 0x22e   :  { %v1910_v54 = vpop.f32.mrb[72].mxu0  ;;  %v3127_v4 = vpop.permute.xlu0 %3126 }
 0x22f   :  { %v1911_v31 = vadd.f32 %v9647_v7, %v1910_v54  ;;  %v2885_v19 = vpop.permute.xlu1 %2884  ;;  %v1912_v12 = vpop.f32.mrb[73].mxu0  ;;  %v3551_v2 = vsel %vm1147_vm5, %v3487_v9, %v3127_v4  ;;  %7556 = vmatmul.mubr.msk.bf16.gmra.mrb[156].mxu0 %vm1029_vm3, %v13364_v41  ;;  %v2455_v54 = vrot.slane %v2391_v56, 7  ;;  %v13366_v56 = vld [vmem:[#allocation23_spill] sm:$0xff] }
 0x230   :  { %v1913_v42 = vpop.f32.mrb[74].mxu0  ;;  %2902 = vrot.lane.b32.xlu0 %v9796_v16, %s7740_s15  ;;  %3929 = vmatprep.mubr.bf16.mxu1 %v3551_v2 }
 0x231   :  { %v1914_v50 = vadd.f32 %v9647_v7, %v1913_v42  ;;  %v2200_v3 = vadd.f32 %v9398_v37, %v1911_v31  ;;  %2964 = vrot.lane.b32.xlu1 %v9849_v40, %s7742_s19  ;;  %v1915_v44 = vpop.f32.mrb[75].mxu0  ;;  %3930 = vmatmul.mubr.bf16.gmra.mrb[80].mxu1 %v3299_v46  ;;  %v2748_v40 = vrot.slane %v9916_v36, 2  ;;  %v9936_v2 = vsel %vm302_vm0, %v2455_v54, 0 }
 0x232   :  { %v3009_v45 = vpop.permute.xlu0 %3008  ;;  %v3181_v42 = vsel %vm1029_vm3, %v13366_v56, %v2829_v14 }
 0x233   :  { %v2203_v16 = vadd.f32 %v9409_v55, %v1914_v50  ;;  %v2945_v5 = vpop.permute.xlu1 %2944  ;;  %v2346_v37 = vmax.f32 %v2200_v3, 0.0  ;;  %v3399_v55 = vsel %vm1029_vm3, %v9387_v63, %v3009_v45  ;;  %v9930_v12 = vsel %vm549_vm2, %v2748_v40, %v2749_v32 }
 0x234   :  { %3028 = vrot.lane.b32.xlu0 %v2815_v0, %s7741_s18  ;;  %v9933_v0 = vsel %vm302_vm0, 0, %v2455_v54 }
 0x235   :  { %v2347_v9 = vmax.f32 %v2203_v16, 0.0 }
 0x236   :  { %v3073_v4 = vpop.permute.xlu0 %3072 }
 0x237   :  { %v2392_v49 = vpack.c.bf16 %v2347_v9, %v2346_v37  ;;  %v2831_v31 = vpop.permute.xlu1 %2830  ;;  %v3489_v46 = vsel %vm1088_vm4, %v3399_v55, %v3073_v4  ;;  %v3237_v37 = vsel %vm1088_vm4, %v3181_v42, %v2885_v19  ;;  %v13367_v4 = vld [vmem:[#allocation14_spill] sm:$0xff]  ;;  %v9957_v42 = vpop.f32.mrb[60].mxu1 }
 0x238   :  { %2904 = vrot.lane.b32.xlu0 %v9842_v28, %s7740_s15  ;;  %v3302_v56 = vsel %vm1147_vm5, %v3237_v37, %v2945_v5  ;;  %13368 = vst [vmem:[#allocation22_spill] sm:$0xff] %v9957_v42  ;;  %v2751_v5 = vrot.slane %v9933_v0, 2  ;;  %v2752_v37 = vrot.slane %v9936_v2, 2 }
 0x239   :  { %v2456_v29 = vrot.slane %v2392_v49, 7 }
 0x23a   :  { %v1918_v50 = vpop.f32.mrb[76].mxu0  ;;  %v3129_v28 = vpop.permute.xlu0 %3128 }
 0x23b   :  { %v9942_v3 = vsel %vm302_vm0, 0, %v2456_v29  ;;  %v2552_v63 = vsel %vm302_vm0, %v2456_v29, 0  ;;  %v1919_v44 = vadd.f32 %v9647_v7, %v1918_v50  ;;  %v2887_v45 = vpop.permute.xlu1 %2886  ;;  %v1920_v16 = vpop.f32.mrb[77].mxu0  ;;  %v3554_v32 = vsel %vm1147_vm5, %v3489_v46, %v3129_v28 }
 0x23c   :  { %v2671_v9 = vrot.slane %v2552_v63, 1  ;;  %v2755_v40 = vrot.slane %v2552_v63, 2  ;;  %v1921_v14 = vpop.f32.mrb[78].mxu0  ;;  %3030 = vrot.lane.b32.xlu0 %v9930_v12, %s7741_s18  ;;  %3090 = vrot.lane.b32.xlu1 %v9942_v3, %s7740_s15  ;;  %v2754_v54 = vrot.slane %v9942_v3, 2  ;;  %v2670_v19 = vrot.slane %v9942_v3, 1  ;;  %v9962_v28 = vpop.f32.mrb[61].mxu1 }
 0x23d   :  { %v2208_v49 = vadd.f32 %v13367_v4, %v1919_v44  ;;  %v1922_v29 = vadd.f32 %v9647_v7, %v1921_v14  ;;  %3937 = vmatprep.mubr.bf16.mxu1 %v3554_v32  ;;  %v1923_v55 = vpop.f32.mrb[79].mxu0  ;;  %13369 = vst [vmem:[#allocation13_spill] sm:$0xff] %v9962_v28  ;;  %v13370_v63 = vld [vmem:[#allocation15_spill] sm:$0xff]  ;;  %v9972_v14 = vpop.f32.mrb[62].mxu1 }
 0x23e   :  { %3938 = vmatmul.mubr.bf16.gmra.mrb[84].mxu1 %v3302_v56  ;;  %v3011_v46 = vpop.permute.xlu0 %3010  ;;  %v9960_v50 = vsel %vm549_vm2, %v2754_v54, %v2755_v40  ;;  %v9968_v32 = vsel %vm461_vm1, %v2670_v19, %v2671_v9  ;;  %13371 = vst [vmem:[#allocation12_spill] sm:$0xff] %v9972_v14  ;;  %v9978_v40 = vpop.f32.mrb[63].mxu1  ;;  %v9981_v56 = vsel %vm549_vm2, %v2751_v5, %v2752_v37  ;;  %v13373_v19 = vld [vmem:[#allocation16_spill] sm:$0xff] }
 0x23f   :  { %v2211_v16 = vadd.f32 %v13370_v63, %v1922_v29  ;;  %v2947_v44 = vpop.permute.xlu1 %2946  ;;  %7559 = vmatprep.mubr.msk.bf16.mxu0 %vm1029_vm3, %v9960_v50  ;;  %13372 = vst [vmem:[#allocation9_spill] sm:$0xff] %v9978_v40  ;;  %v2348_v54 = vmax.f32 %v2208_v49, 0.0  ;;  %v3183_v63 = vsel %vm1029_vm3, %v13373_v19, %v2831_v31  ;;  %v3402_v14 = vsel %vm1029_vm3, %v9435_v62, %v3011_v46 }
 0x240   :  { %3146 = vrot.lane.b32.xlu0 %v9968_v32, %s7742_s19  ;;  %2966 = vrot.lane.b32.xlu1 %v9916_v36, %s7742_s19  ;;  %v3239_v42 = vsel %vm1088_vm4, %v3183_v63, %v2887_v45 }
 0x241   :  { %v2349_v4 = vmax.f32 %v2211_v16, 0.0  ;;  %v3305_v62 = vsel %vm1147_vm5, %v3239_v42, %v2947_v44 }
 0x242   :  { %v3075_v29 = vpop.permute.xlu0 %3074 }
 0x243   :  { %v2393_v55 = vpack.c.bf16 %v2349_v4, %v2348_v54  ;;  %v2833_v9 = vpop.permute.xlu1 %2832  ;;  %v3491_v49 = vsel %vm1088_vm4, %v3402_v14, %v3075_v29 }
 0x244   :  { %3032 = vrot.lane.b32.xlu0 %v9981_v56, %s7741_s18 }
 0x245   :  { %v2457_v41 = vrot.slane %v2393_v55, 7 }
 0x246   :  { %v1926_v16 = vpop.f32.mrb[80].mxu0  ;;  %v3131_v54 = vpop.permute.xlu0 %3130 }
 0x247   :  { %v2553_v4 = vsel %vm302_vm0, %v2457_v41, 0  ;;  %v1927_v5 = vadd.f32 %v9647_v7, %v1926_v16  ;;  %v2889_v37 = vpop.permute.xlu1 %2888  ;;  %v1928_v40 = vpop.f32.mrb[81].mxu0  ;;  %v9994_v28 = vsel %vm302_vm0, 0, %v2457_v41  ;;  %v3557_v31 = vsel %vm1147_vm5, %v3491_v49, %v3131_v54 }
 0x248   :  { %v1929_v55 = vpop.f32.mrb[82].mxu0  ;;  %3092 = vrot.lane.b32.xlu1 %v9994_v28, %s7740_s15  ;;  %3945 = vmatprep.mubr.bf16.mxu1 %v3557_v31  ;;  %v2757_v45 = vrot.slane %v9994_v28, 2  ;;  %v2758_v46 = vrot.slane %v2553_v4, 2  ;;  %v2673_v14 = vrot.slane %v9994_v28, 1  ;;  %v2674_v19 = vrot.slane %v2553_v4, 1 }
 0x249   :  { %v2216_v29 = vadd.f32 %v9482_v58, %v1927_v5  ;;  %v1930_v40 = vadd.f32 %v9647_v7, %v1929_v55  ;;  %v1931_v41 = vpop.f32.mrb[83].mxu0  ;;  %3946 = vmatmul.mubr.bf16.gmra.mrb[88].mxu1 %v3305_v62  ;;  %v2665_v16 = vrot.slane %v9919_v26, 1  ;;  %v2664_v58 = vrot.slane %v9916_v36, 1 }
 0x24a   :  { %v3013_v63 = vpop.permute.xlu0 %3012  ;;  %v10005_v49 = vsel %vm549_vm2, %v2757_v45, %v2758_v46  ;;  %v10012_v54 = vsel %vm461_vm1, %v2673_v14, %v2674_v19  ;;  %v3185_v46 = vsel %vm1029_vm3, %v9372_v30, %v2833_v9 }
 0x24b   :  { %v2219_v42 = vadd.f32 %v9490_v43, %v1930_v40  ;;  %v2949_v44 = vpop.permute.xlu1 %2948  ;;  %7560 = vmatmul.mubr.msk.bf16.gmra.mrb[160].mxu0 %vm1029_vm3, %v10005_v49  ;;  %3148 = vrot.lane.b32.xlu0 %v10012_v54, %s7742_s19  ;;  %v2350_v4 = vmax.f32 %v2216_v29, 0.0  ;;  %v10020_v55 = vsel %vm461_vm1, %v2664_v58, %v2665_v16  ;;  %v3405_v45 = vsel %vm1029_vm3, %v9475_v20, %v3013_v63 }
 0x24c   :  { %2968 = vrot.lane.b32.xlu1 %v9933_v0, %s7742_s19  ;;  %v3241_v20 = vsel %vm1088_vm4, %v3185_v46, %v2889_v37 }
 0x24d   :  { %v2351_v5 = vmax.f32 %v2219_v42, 0.0  ;;  %v3308_v37 = vsel %vm1147_vm5, %v3241_v20, %v2949_v44 }
 0x24e   :  { %v3077_v26 = vpop.permute.xlu0 %3076 }
 0x24f   :  { %v2394_v31 = vpack.c.bf16 %v2351_v5, %v2350_v4  ;;  %v2835_v43 = vpop.permute.xlu1 %2834  ;;  %3034 = vrot.lane.b32.xlu0 %v9960_v50, %s7741_s18  ;;  %v3493_v14 = vsel %vm1088_vm4, %v3405_v45, %v3077_v26 }
 0x250   :  { %2850 = vrot.lane.b32.xlu1 %v10020_v55, %s7741_s18 }
 0x251   :  { %v2458_v62 = vrot.slane %v2394_v31, 7 }
 0x252   :  { %v1934_v29 = vpop.f32.mrb[84].mxu0  ;;  %v3133_v40 = vpop.permute.xlu0 %3132 }
 0x253   :  { %v2554_v41 = vsel %vm302_vm0, %v2458_v62, 0  ;;  %v1935_v19 = vadd.f32 %v9647_v7, %v1934_v29  ;;  %v2891_v16 = vpop.permute.xlu1 %2890  ;;  %v1936_v42 = vpop.f32.mrb[85].mxu0  ;;  %v10034_v58 = vsel %vm302_vm0, 0, %v2458_v62  ;;  %v3560_v4 = vsel %vm1147_vm5, %v3493_v14, %v3133_v40 }
 0x254   :  { %v1937_v63 = vpop.f32.mrb[86].mxu0  ;;  %3094 = vrot.lane.b32.xlu0 %v10034_v58, %s7740_s15  ;;  %2906 = vrot.lane.b32.xlu1 %v9930_v12, %s7740_s15  ;;  %v2760_v30 = vrot.slane %v10034_v58, 2  ;;  %v2761_v9 = vrot.slane %v2554_v41, 2  ;;  %v2676_v5 = vrot.slane %v10034_v58, 1  ;;  %v2677_v45 = vrot.slane %v2554_v41, 1  ;;  %v13374_v12 = vld [vmem:[#allocation10_spill] sm:$0xff] }
 0x255   :  { %v2224_v26 = vadd.f32 %v9477_v38, %v1935_v19  ;;  %v1938_v31 = vadd.f32 %v9647_v7, %v1937_v63  ;;  %3953 = vmatprep.mubr.bf16.mxu1 %v3560_v4  ;;  %v1939_v62 = vpop.f32.mrb[87].mxu0  ;;  %v2667_v19 = vrot.slane %v9933_v0, 1  ;;  %v2668_v42 = vrot.slane %v9936_v2, 1 }
 0x256   :  { %3954 = vmatmul.mubr.bf16.gmra.mrb[92].mxu1 %v3308_v37  ;;  %v3015_v46 = vpop.permute.xlu0 %3014  ;;  %v10048_v14 = vsel %vm549_vm2, %v2760_v30, %v2761_v9  ;;  %v10054_v38 = vsel %vm461_vm1, %v2676_v5, %v2677_v45  ;;  %v13375_v5 = vld [vmem:[#allocation19_spill] sm:$0xff] }
 0x257   :  { %v2227_v29 = vadd.f32 %v13374_v12, %v1938_v31  ;;  %v2951_v40 = vpop.permute.xlu1 %2950  ;;  %7563 = vmatprep.mubr.msk.bf16.mxu0 %vm1029_vm3, %v10048_v14  ;;  %v2352_v44 = vmax.f32 %v2224_v26, 0.0  ;;  %v10063_v30 = vsel %vm461_vm1, %v2667_v19, %v2668_v42  ;;  %v3408_v9 = vsel %vm1029_vm3, %v9523_v22, %v3015_v46 }
 0x258   :  { %3150 = vrot.lane.b32.xlu0 %v10054_v38, %s7742_s19  ;;  %2970 = vrot.lane.b32.xlu1 %v9942_v3, %s7742_s19  ;;  %v3187_v26 = vsel %vm1029_vm3, %v13375_v5, %v2835_v43 }
 0x259   :  { %v2353_v41 = vmax.f32 %v2227_v29, 0.0  ;;  %v3243_v22 = vsel %vm1088_vm4, %v3187_v26, %v2891_v16 }
 0x25a   :  { %v3079_v4 = vpop.permute.xlu0 %3078  ;;  %v3311_v16 = vsel %vm1147_vm5, %v3243_v22, %v2951_v40 }
 0x25b   :  { %v2395_v20 = vpack.c.bf16 %v2353_v41, %v2352_v44  ;;  %v2837_v63 = vpop.permute.xlu1 %2836  ;;  %v3495_v31 = vsel %vm1088_vm4, %v3408_v9, %v3079_v4 }
 0x25c   :  { %3036 = vrot.lane.b32.xlu0 %v10005_v49, %s7741_s18  ;;  %2852 = vrot.lane.b32.xlu1 %v10063_v30, %s7741_s18  ;;  %v3189_v22 = vsel %vm1029_vm3, %v9460_v39, %v2837_v63 }
 0x25d   :  { %v2459_v2 = vrot.slane %v2395_v20, 7 }
 0x25e   :  { %v1942_v62 = vpop.f32.mrb[88].mxu0  ;;  %v3135_v37 = vpop.permute.xlu0 %3134 }
 0x25f   :  { %v2555_v45 = vsel %vm302_vm0, %v2459_v2, 0  ;;  %v1943_v12 = vadd.f32 %v9647_v7, %v1942_v62  ;;  %v2893_v29 = vpop.permute.xlu1 %2892  ;;  %v1944_v19 = vpop.f32.mrb[89].mxu0  ;;  %v10077_v42 = vsel %vm302_vm0, 0, %v2459_v2  ;;  %v3563_v44 = vsel %vm1147_vm5, %v3495_v31, %v3135_v37 }
 0x260   :  { %v1945_v46 = vpop.f32.mrb[90].mxu0  ;;  %3096 = vrot.lane.b32.xlu0 %v10077_v42, %s7740_s15  ;;  %2908 = vrot.lane.b32.xlu1 %v9981_v56, %s7740_s15  ;;  %v2763_v43 = vrot.slane %v10077_v42, 2  ;;  %v2764_v41 = vrot.slane %v2555_v45, 2  ;;  %v2679_v4 = vrot.slane %v10077_v42, 1  ;;  %v2680_v5 = vrot.slane %v2555_v45, 1 }
 0x261   :  { %v2232_v20 = vadd.f32 %v9570_v24, %v1943_v12  ;;  %v1946_v2 = vadd.f32 %v9647_v7, %v1945_v46  ;;  %3961 = vmatprep.mubr.bf16.mxu1 %v3563_v44  ;;  %v1947_v9 = vpop.f32.mrb[91].mxu0 }
 0x262   :  { %3962 = vmatmul.mubr.bf16.gmra.mrb[96].mxu1 %v3311_v16  ;;  %v3017_v26 = vpop.permute.xlu0 %3016  ;;  %v10091_v31 = vsel %vm549_vm2, %v2763_v43, %v2764_v41  ;;  %v10097_v24 = vsel %vm461_vm1, %v2679_v4, %v2680_v5 }
 0x263   :  { %v2235_v56 = vadd.f32 %v9580_v35, %v1946_v2  ;;  %v2953_v62 = vpop.permute.xlu1 %2952  ;;  %7564 = vmatmul.mubr.msk.bf16.gmra.mrb[164].mxu0 %vm1029_vm3, %v10091_v31  ;;  %v2354_v40 = vmax.f32 %v2232_v20, 0.0  ;;  %v3411_v44 = vsel %vm1029_vm3, %v9563_v57, %v3017_v26  ;;  %v3245_v57 = vsel %vm1088_vm4, %v3189_v22, %v2893_v29 }
 0x264   :  { %3152 = vrot.lane.b32.xlu0 %v10097_v24, %s7742_s19  ;;  %2972 = vrot.lane.b32.xlu1 %v9994_v28, %s7742_s19  ;;  %v3314_v29 = vsel %vm1147_vm5, %v3245_v57, %v2953_v62 }
 0x265   :  { %v2355_v37 = vmax.f32 %v2235_v56, 0.0 }
 0x266   :  { %v3081_v45 = vpop.permute.xlu0 %3080 }
 0x267   :  { %v2396_v12 = vpack.c.bf16 %v2355_v37, %v2354_v40  ;;  %v2839_v19 = vpop.permute.xlu1 %2838  ;;  %v3497_v46 = vsel %vm1088_vm4, %v3411_v44, %v3081_v45 }
 0x268   :  { %3038 = vrot.lane.b32.xlu0 %v10048_v14, %s7741_s18  ;;  %2854 = vrot.lane.b32.xlu1 %v9968_v32, %s7741_s18 }
 0x269   :  { %v2460_v35 = vrot.slane %v2396_v12, 7 }
 0x26a   :  { %v1950_v43 = vpop.f32.mrb[92].mxu0  ;;  %v3137_v41 = vpop.permute.xlu0 %3136 }
 0x26b   :  { %v2556_v4 = vsel %vm302_vm0, %v2460_v35, 0  ;;  %v1951_v20 = vadd.f32 %v9647_v7, %v1950_v43  ;;  %v2895_v2 = vpop.permute.xlu1 %2894  ;;  %v1952_v9 = vpop.f32.mrb[93].mxu0  ;;  %v10115_v16 = vsel %vm302_vm0, 0, %v2460_v35  ;;  %v3566_v5 = vsel %vm1147_vm5, %v3497_v46, %v3137_v41 }
 0x26c   :  { %v1953_v26 = vpop.f32.mrb[94].mxu0  ;;  %3098 = vrot.lane.b32.xlu0 %v10115_v16, %s7740_s15  ;;  %2910 = vrot.lane.b32.xlu1 %v9960_v50, %s7740_s15  ;;  %v2766_v39 = vrot.slane %v10115_v16, 2  ;;  %v2767_v63 = vrot.slane %v2556_v4, 2  ;;  %v2682_v56 = vrot.slane %v10115_v16, 1  ;;  %v2683_v12 = vrot.slane %v2556_v4, 1 }
 0x26d   :  { %v2240_v40 = vadd.f32 %v9565_v27, %v1951_v20  ;;  %v1954_v37 = vadd.f32 %v9647_v7, %v1953_v26  ;;  %3969 = vmatprep.mubr.bf16.mxu1 %v3566_v5  ;;  %v1955_v45 = vpop.f32.mrb[95].mxu0  ;;  %v3191_v9 = vsel %vm1029_vm3, %v9502_v13, %v2839_v19 }
 0x26e   :  { %3970 = vmatmul.mubr.bf16.gmra.mrb[100].mxu1 %v3314_v29  ;;  %v3019_v35 = vpop.permute.xlu0 %3018  ;;  %v10129_v44 = vsel %vm549_vm2, %v2766_v39, %v2767_v63  ;;  %v10135_v27 = vsel %vm461_vm1, %v2682_v56, %v2683_v12 }
 0x26f   :  { %v2243_v50 = vadd.f32 %v9576_v1, %v1954_v37  ;;  %v2955_v22 = vpop.permute.xlu1 %2954  ;;  %7567 = vmatprep.mubr.msk.bf16.mxu0 %vm1029_vm3, %v10129_v44  ;;  %v2356_v62 = vmax.f32 %v2240_v40, 0.0  ;;  %v3414_v20 = vsel %vm1029_vm3, %v9619_v33, %v3019_v35  ;;  %v3247_v33 = vsel %vm1088_vm4, %v3191_v9, %v2895_v2 }
 0x270   :  { %3154 = vrot.lane.b32.xlu0 %v10135_v27, %s7742_s19  ;;  %2974 = vrot.lane.b32.xlu1 %v10034_v58, %s7742_s19  ;;  %v3317_v2 = vsel %vm1147_vm5, %v3247_v33, %v2955_v22  ;;  %v10192_v33 = vld [vmem:[%s13147_s2] ss:$0 sm:$0xff]  ;;  %s7370_s2 = sld [smem:[#allocation2 + $0xb]] }
 0x271   :  { %v2357_v46 = vmax.f32 %v2243_v50, 0.0 }
 0x272   :  { %v3083_v43 = vpop.permute.xlu0 %3082 }
 0x273   :  { %v2397_v41 = vpack.c.bf16 %v2357_v46, %v2356_v62  ;;  %v2841_v4 = vpop.permute.xlu1 %2840  ;;  %v3499_v5 = vsel %vm1088_vm4, %v3414_v20, %v3083_v43 }
 0x274   :  { %3040 = vrot.lane.b32.xlu0 %v10091_v31, %s7741_s18  ;;  %2856 = vrot.lane.b32.xlu1 %v10012_v54, %s7741_s18 }
 0x275   :  { %v2461_v1 = vrot.slane %v2397_v41, 7 }
 0x276   :  { %v1958_v57 = vpop.f32.mrb[96].mxu0  ;;  %v3139_v26 = vpop.permute.xlu0 %3138 }
 0x277   :  { %v2557_v39 = vsel %vm302_vm0, %v2461_v1, 0  ;;  %v1959_v63 = vadd.f32 %v9647_v7, %v1958_v57  ;;  %v2897_v56 = vpop.permute.xlu1 %2896  ;;  %v1960_v40 = vpop.f32.mrb[97].mxu0  ;;  %v10153_v37 = vsel %vm302_vm0, 0, %v2461_v1  ;;  %v3569_v45 = vsel %vm1147_vm5, %v3499_v5, %v3139_v26 }
 0x278   :  { %v1961_v29 = vpop.f32.mrb[98].mxu0  ;;  %3100 = vrot.lane.b32.xlu0 %v10153_v37, %s7740_s15  ;;  %2912 = vrot.lane.b32.xlu1 %v10005_v49, %s7740_s15  ;;  %v2769_v13 = vrot.slane %v10153_v37, 2  ;;  %v2770_v19 = vrot.slane %v2557_v39, 2  ;;  %v2685_v12 = vrot.slane %v10153_v37, 1  ;;  %v2686_v46 = vrot.slane %v2557_v39, 1 }
 0x279   :  { %v2248_v35 = vadd.f32 %v9673_v17, %v1959_v63  ;;  %v1962_v50 = vadd.f32 %v9647_v7, %v1961_v29  ;;  %3977 = vmatprep.mubr.bf16.mxu1 %v3569_v45  ;;  %v1963_v62 = vpop.f32.mrb[99].mxu0  ;;  %v3193_v26 = vsel %vm1029_vm3, %v9548_v23, %v2841_v4 }
 0x27a   :  { %3978 = vmatmul.mubr.bf16.gmra.mrb[104].mxu1 %v3317_v2  ;;  %v3021_v43 = vpop.permute.xlu0 %3020  ;;  %v10167_v41 = vsel %vm549_vm2, %v2769_v13, %v2770_v19  ;;  %v10173_v17 = vsel %vm461_vm1, %v2685_v12, %v2686_v46  ;;  %v3249_v4 = vsel %vm1088_vm4, %v3193_v26, %v2897_v56 }
 0x27b   :  { %v2251_v49 = vadd.f32 %v9683_v53, %v1962_v50  ;;  %v2957_v1 = vpop.permute.xlu1 %2956  ;;  %7568 = vmatmul.mubr.msk.bf16.gmra.mrb[168].mxu0 %vm1029_vm3, %v10167_v41  ;;  %v2358_v7 = vmax.f32 %v2248_v35, 0.0  ;;  %v3417_v57 = vsel %vm1029_vm3, %v9664_v60, %v3021_v43 }
 0x27c   :  { %3156 = vrot.lane.b32.xlu0 %v10173_v17, %s7742_s19  ;;  %2976 = vrot.lane.b32.xlu1 %v10077_v42, %s7742_s19  ;;  %v3320_v56 = vsel %vm1147_vm5, %v3249_v4, %v2957_v1 }
 0x27d   :  { %v2359_v22 = vmax.f32 %v2251_v49, 0.0 }
 0x27e   :  { %v3085_v20 = vpop.permute.xlu0 %3084 }
 0x27f   :  { %v2398_v9 = vpack.c.bf16 %v2359_v22, %v2358_v7  ;;  %v2843_v5 = vpop.permute.xlu1 %2842  ;;  %v3501_v39 = vsel %vm1088_vm4, %v3417_v57, %v3085_v20 }
 0x280   :  { %3042 = vrot.lane.b32.xlu0 %v10129_v44, %s7741_s18  ;;  %2858 = vrot.lane.b32.xlu1 %v10054_v38, %s7741_s18 }
 0x281   :  { %v2462_v53 = vrot.slane %v2398_v9, 7 }
 0x282   :  { %v1966_v63 = vpop.f32.mrb[100].mxu0  ;;  %v3141_v40 = vpop.permute.xlu0 %3140 }
 0x283   :  { %v2558_v45 = vsel %vm302_vm0, %v2462_v53, 0  ;;  %v1967_v29 = vadd.f32 %v10192_v33, %v1966_v63  ;;  %v2899_v13 = vpop.permute.xlu1 %2898  ;;  %v1968_v19 = vpop.f32.mrb[101].mxu0  ;;  %v10196_v60 = vsel %vm302_vm0, 0, %v2462_v53  ;;  %v3572_v23 = vsel %vm1147_vm5, %v3501_v39, %v3141_v40 }
 0x284   :  { %v1969_v12 = vpop.f32.mrb[102].mxu0  ;;  %3102 = vrot.lane.b32.xlu0 %v10196_v60, %s7740_s15  ;;  %2914 = vrot.lane.b32.xlu1 %v10048_v14, %s7740_s15  ;;  %v2772_v35 = vrot.slane %v10196_v60, 2  ;;  %v2773_v50 = vrot.slane %v2558_v45, 2  ;;  %v2688_v62 = vrot.slane %v10196_v60, 1  ;;  %v2689_v49 = vrot.slane %v2558_v45, 1 }
 0x285   :  { %v2256_v2 = vadd.f32 %v9666_v34, %v1967_v29  ;;  %v1970_v46 = vadd.f32 %v10192_v33, %v1969_v12  ;;  %3985 = vmatprep.mubr.bf16.mxu1 %v3572_v23  ;;  %v1971_v43 = vpop.f32.mrb[103].mxu0  ;;  %v3195_v63 = vsel %vm1029_vm3, %v9598_v8, %v2843_v5 }
 0x286   :  { %3986 = vmatmul.mubr.bf16.gmra.mrb[108].mxu1 %v3320_v56  ;;  %v3023_v7 = vpop.permute.xlu0 %3022  ;;  %v10210_v22 = vsel %vm549_vm2, %v2772_v35, %v2773_v50  ;;  %v10216_v34 = vsel %vm461_vm1, %v2688_v62, %v2689_v49 }
 0x287   :  { %v2259_v14 = vadd.f32 %v9679_v21, %v1970_v46  ;;  %v2959_v20 = vpop.permute.xlu1 %2958  ;;  %7571 = vmatprep.mubr.msk.bf16.mxu0 %vm1029_vm3, %v10210_v22  ;;  %v2360_v1 = vmax.f32 %v2256_v2, 0.0  ;;  %v3420_v39 = vsel %vm1029_vm3, %v9720_v61, %v3023_v7  ;;  %v3251_v61 = vsel %vm1088_vm4, %v3195_v63, %v2899_v13 }
 0x288   :  { %3158 = vrot.lane.b32.xlu0 %v10216_v34, %s7742_s19  ;;  %2978 = vrot.lane.b32.xlu1 %v10115_v16, %s7742_s19  ;;  %v3323_v13 = vsel %vm1147_vm5, %v3251_v61, %v2959_v20 }
 0x289   :  { %v2361_v9 = vmax.f32 %v2259_v14, 0.0 }
 0x28a   :  { %v3087_v53 = vpop.permute.xlu0 %3086 }
 0x28b   :  { %v2399_v57 = vpack.c.bf16 %v2361_v9, %v2360_v1  ;;  %v2845_v26 = vpop.permute.xlu1 %2844  ;;  %v3503_v40 = vsel %vm1088_vm4, %v3420_v39, %v3087_v53 }
 0x28c   :  { %3044 = vrot.lane.b32.xlu0 %v10167_v41, %s7741_s18  ;;  %2860 = vrot.lane.b32.xlu1 %v10097_v24, %s7741_s18 }
 0x28d   :  { %v2463_v21 = vrot.slane %v2399_v57, 7 }
 0x28e   :  { %v1974_v45 = vpop.f32.mrb[104].mxu0  ;;  %v3143_v29 = vpop.permute.xlu0 %3142 }
 0x28f   :  { %v2559_v19 = vsel %vm302_vm0, %v2463_v21, 0  ;;  %v1975_v23 = vadd.f32 %v10192_v33, %v1974_v45  ;;  %v2901_v4 = vpop.permute.xlu1 %2900  ;;  %v1976_v12 = vpop.f32.mrb[105].mxu0  ;;  %v10234_v35 = vsel %vm302_vm0, 0, %v2463_v21  ;;  %v3575_v50 = vsel %vm1147_vm5, %v3503_v40, %v3143_v29 }
 0x290   :  { %v1977_v62 = vpop.f32.mrb[106].mxu0  ;;  %3104 = vrot.lane.b32.xlu0 %v10234_v35, %s7740_s15  ;;  %2916 = vrot.lane.b32.xlu1 %v10091_v31, %s7740_s15  ;;  %v2775_v8 = vrot.slane %v10234_v35, 2  ;;  %v2776_v5 = vrot.slane %v2559_v19, 2  ;;  %v2691_v2 = vrot.slane %v10234_v35, 1  ;;  %v2692_v49 = vrot.slane %v2559_v19, 1 }
 0x291   :  { %v2264_v46 = vadd.f32 %v9782_v10, %v1975_v23  ;;  %v1978_v43 = vadd.f32 %v10192_v33, %v1977_v62  ;;  %3993 = vmatprep.mubr.bf16.mxu1 %v3575_v50  ;;  %v1979_v56 = vpop.f32.mrb[107].mxu0 }
 0x292   :  { %3994 = vmatmul.mubr.bf16.gmra.mrb[112].mxu1 %v3323_v13  ;;  %v3025_v7 = vpop.permute.xlu0 %3024  ;;  %v10248_v14 = vsel %vm549_vm2, %v2775_v8, %v2776_v5  ;;  %v10254_v10 = vsel %vm461_vm1, %v2691_v2, %v2692_v49  ;;  %v13376_v5 = vld [vmem:[#allocation25_spill] sm:$0xff] }
 0x293   :  { %v2267_v31 = vadd.f32 %v9792_v52, %v1978_v43  ;;  %v2961_v1 = vpop.permute.xlu1 %2960  ;;  %7572 = vmatmul.mubr.msk.bf16.gmra.mrb[172].mxu0 %vm1029_vm3, %v10248_v14  ;;  %v2362_v20 = vmax.f32 %v2264_v46, 0.0  ;;  %v3197_v52 = vsel %vm1029_vm3, %v9651_v59, %v2845_v26  ;;  %v3423_v63 = vsel %vm1029_vm3, %v9773_v48, %v3025_v7 }
 0x294   :  { %3160 = vrot.lane.b32.xlu0 %v10254_v10, %s7742_s19  ;;  %2980 = vrot.lane.b32.xlu1 %v10153_v37, %s7742_s19  ;;  %v3253_v40 = vsel %vm1088_vm4, %v3197_v52, %v2901_v4 }
 0x295   :  { %v2363_v9 = vmax.f32 %v2267_v31, 0.0  ;;  %v3326_v56 = vsel %vm1147_vm5, %v3253_v40, %v2961_v1  ;;  %v13377_v31 = vld [vmem:[#allocation26_spill] sm:$0xff]  ;;  %v13378_v1 = vld [vmem:[#allocation17_spill] sm:$0xff]  ;;  %v13380_v40 = vld [vmem:[#allocation20_spill] sm:$0xff] }
 0x296   :  { %v3089_v53 = vpop.permute.xlu0 %3088 }
 0x297   :  { %v2400_v57 = vpack.c.bf16 %v2363_v9, %v2362_v20  ;;  %v2847_v21 = vpop.permute.xlu1 %2846  ;;  %v3505_v45 = vsel %vm1088_vm4, %v3423_v63, %v3089_v53 }
 0x298   :  { %3046 = vrot.lane.b32.xlu0 %v10210_v22, %s7741_s18  ;;  %2862 = vrot.lane.b32.xlu1 %v10135_v27, %s7741_s18 }
 0x299   :  { %v2464_v39 = vrot.slane %v2400_v57, 7 }
 0x29a   :  { %v1982_v29 = vpop.f32.mrb[108].mxu0  ;;  %v3145_v19 = vpop.permute.xlu0 %3144 }
 0x29b   :  { %v2560_v23 = vsel %vm302_vm0, %v2464_v39, 0  ;;  %v1983_v12 = vadd.f32 %v10192_v33, %v1982_v29  ;;  %v1984_v50 = vpop.f32.mrb[109].mxu0  ;;  %v10273_v61 = vsel %vm302_vm0, 0, %v2464_v39  ;;  %v3578_v59 = vsel %vm1147_vm5, %v3505_v45, %v3145_v19  ;;  %v2963_v13 = vpop.permute.xlu1 %2962  ;;  %v13379_v39 = vld [vmem:[#allocation11_spill] sm:$0xff] }
 0x29c   :  { %v1985_v26 = vpop.f32.mrb[110].mxu0  ;;  %3106 = vrot.lane.b32.xlu0 %v10273_v61, %s7740_s15  ;;  %2918 = vrot.lane.b32.xlu1 %v10129_v44, %s7740_s15  ;;  %v2778_v48 = vrot.slane %v10273_v61, 2  ;;  %v2779_v4 = vrot.slane %v2560_v23, 2  ;;  %v2694_v62 = vrot.slane %v10273_v61, 1  ;;  %v2695_v8 = vrot.slane %v2560_v23, 1 }
 0x29d   :  { %v2272_v2 = vadd.f32 %v13376_v5, %v1983_v12  ;;  %v1986_v46 = vadd.f32 %v10192_v33, %v1985_v26  ;;  %4001 = vmatprep.mubr.bf16.mxu1 %v3578_v59  ;;  %v1987_v43 = vpop.f32.mrb[111].mxu0 }
 0x29e   :  { %4002 = vmatmul.mubr.bf16.gmra.mrb[116].mxu1 %v3326_v56  ;;  %v3027_v49 = vpop.permute.xlu0 %3026  ;;  %v10286_v7 = vsel %vm549_vm2, %v2778_v48, %v2779_v4  ;;  %v10289_v44 = vsel %vm461_vm1, %v2694_v62, %v2695_v8 }
 0x29f   :  { %v2275_v20 = vadd.f32 %v13377_v31, %v1986_v46  ;;  %v3426_v9 = vsel %vm1029_vm3, %v9829_v11, %v3027_v49  ;;  %7575 = vmatprep.mubr.msk.bf16.mxu0 %vm1029_vm3, %v10286_v7  ;;  %v2364_v57 = vmax.f32 %v2272_v2, 0.0  ;;  %v3199_v11 = vsel %vm1029_vm3, %v13380_v40, %v2847_v21  ;;  %v2849_v23 = vpop.permute.xlu1 %2848 }
 0x2a0   :  { %3162 = vrot.lane.b32.xlu0 %v10289_v44, %s7742_s19  ;;  %2982 = vrot.lane.b32.xlu1 %v10196_v60, %s7742_s19  ;;  %v3506_v53 = vsel %vm1088_vm4, %v3426_v9, %v13378_v1 }
 0x2a1   :  { %v2365_v52 = vmax.f32 %v2275_v20, 0.0  ;;  %v3580_v63 = vsel %vm1147_vm5, %v3506_v53, %v13379_v39 }
 0x2a2   :  { %v2903_v45 = vpop.permute.xlu0 %2902  ;;  %4009 = vmatprep.mubr.bf16.mxu1 %v3580_v63 }
 0x2a3   :  { %v2401_v29 = vpack.c.bf16 %v2365_v52, %v2364_v57  ;;  %v3255_v19 = vsel %vm1088_vm4, %v3199_v11, %v2903_v45  ;;  %v2965_v9 = vpop.permute.xlu1 %2964 }
 0x2a4   :  { %3048 = vrot.lane.b32.xlu0 %v10248_v14, %s7741_s18  ;;  %2864 = vrot.lane.b32.xlu1 %v10173_v17, %s7741_s18  ;;  %v3329_v12 = vsel %vm1147_vm5, %v3255_v19, %v2963_v13 }
 0x2a5   :  { %v2465_v50 = vrot.slane %v2401_v29, 7 }
 0x2a6   :  { %4010 = vmatmul.mubr.bf16.gmra.mrb[120].mxu1 %v3329_v12  ;;  %v1990_v59 = vpop.f32.mrb[112].mxu0  ;;  %v3029_v26 = vpop.permute.xlu0 %3028 }
 0x2a7   :  { %v2561_v21 = vsel %vm302_vm0, %v2465_v50, 0  ;;  %v1991_v48 = vadd.f32 %v10192_v33, %v1990_v59  ;;  %v3429_v4 = vsel %vm1029_vm3, %v9881_v25, %v3029_v26  ;;  %v1992_v62 = vpop.f32.mrb[113].mxu0  ;;  %v10317_v8 = vsel %vm302_vm0, 0, %v2465_v50 }
 0x2a8   :  { %v1993_v5 = vpop.f32.mrb[114].mxu0  ;;  %3108 = vrot.lane.b32.xlu0 %v10317_v8, %s7740_s15  ;;  %2920 = vrot.lane.b32.xlu1 %v10167_v41, %s7740_s15  ;;  %v3507_v2 = vsel %vm1088_vm4, %v3429_v4, %v13378_v1  ;;  %v2781_v46 = vrot.slane %v10317_v8, 2  ;;  %v2782_v43 = vrot.slane %v2561_v21, 2  ;;  %v2697_v56 = vrot.slane %v10317_v8, 1 }
 0x2a9   :  { %v2280_v25 = vadd.f32 %v9883_v6, %v1991_v48  ;;  %v1994_v13 = vadd.f32 %v10192_v33, %v1993_v5  ;;  %v1995_v49 = vpop.f32.mrb[115].mxu0  ;;  %v3582_v31 = vsel %vm1147_vm5, %v3507_v2, %v13379_v39  ;;  %v2698_v20 = vrot.slane %v2561_v21, 1  ;;  %v13381_v2 = vld [vmem:[#allocation18_spill] sm:$0xff] }
 0x2aa   :  { %v3201_v41 = vsel %vm1029_vm3, %v9757_v47, %v2849_v23  ;;  %v2905_v53 = vpop.permute.xlu0 %2904  ;;  %4017 = vmatprep.mubr.bf16.mxu1 %v3582_v31  ;;  %v10334_v57 = vsel %vm549_vm2, %v2781_v46, %v2782_v43 }
 0x2ab   :  { %v2283_v52 = vadd.f32 %v9893_v15, %v1994_v13  ;;  %v3257_v6 = vsel %vm1088_vm4, %v3201_v41, %v2905_v53  ;;  %7576 = vmatmul.mubr.msk.bf16.gmra.mrb[176].mxu0 %vm1029_vm3, %v10334_v57  ;;  %v10341_v63 = vsel %vm461_vm1, %v2697_v56, %v2698_v20  ;;  %v2366_v40 = vmax.f32 %v2280_v25, 0.0 }
 0x2ac   :  { %3164 = vrot.lane.b32.xlu0 %v10341_v63, %s7742_s19  ;;  %2984 = vrot.lane.b32.xlu1 %v10234_v35, %s7742_s19  ;;  %v3332_v47 = vsel %vm1147_vm5, %v3257_v6, %v2965_v9 }
 0x2ad   :  { %v2367_v11 = vmax.f32 %v2283_v52, 0.0 }
 0x2ae   :  { %4018 = vmatmul.mubr.bf16.gmra.mrb[124].mxu1 %v3332_v47  ;;  %v3031_v15 = vpop.permute.xlu0 %3030  ;;  %v3091_v45 = vpop.permute.xlu1 %3090 }
 0x2af   :  { %v2402_v29 = vpack.c.bf16 %v2367_v11, %v2366_v40  ;;  %v3432_v19 = vsel %vm1029_vm3, %v10020_v55, %v3031_v15 }
 0x2b0   :  { %3050 = vrot.lane.b32.xlu0 %v10286_v7, %s7741_s18  ;;  %2866 = vrot.lane.b32.xlu1 %v10216_v34, %s7741_s18  ;;  %v3509_v12 = vsel %vm1088_vm4, %v3432_v19, %v3091_v45  ;;  %v13382_v45 = vld [vmem:[#allocation13_spill] sm:$0xff] }
 0x2b1   :  { %v2466_v23 = vrot.slane %v2402_v29, 7 }
 0x2b2   :  { %v1998_v50 = vpop.f32.mrb[116].mxu0  ;;  %v3147_v59 = vpop.permute.xlu0 %3146 }
 0x2b3   :  { %v10356_v26 = vsel %vm302_vm0, %v2466_v23, 0  ;;  %v1999_v21 = vadd.f32 %v10192_v33, %v1998_v50  ;;  %v2967_v48 = vpop.permute.xlu1 %2966  ;;  %v2000_v4 = vpop.f32.mrb[117].mxu0  ;;  %v10360_v55 = vsel %vm302_vm0, 0, %v2466_v23  ;;  %v3585_v62 = vsel %vm1147_vm5, %v3509_v12, %v3147_v59 }
 0x2b4   :  { %v2001_v5 = vpop.f32.mrb[118].mxu0  ;;  %3110 = vrot.lane.b32.xlu0 %v10360_v55, %s7740_s15  ;;  %2922 = vrot.lane.b32.xlu1 %v10210_v22, %s7740_s15  ;;  %v3335_v46 = vsel %vm1147_vm5, %v13381_v2, %v2967_v48  ;;  %v2700_v43 = vrot.slane %v10360_v55, 1  ;;  %v2701_v56 = vrot.slane %v10356_v26, 1  ;;  %v13383_v48 = vld [vmem:[#allocation9_spill] sm:$0xff] }
 0x2b5   :  { %v2288_v25 = vadd.f32 %v9876_v51, %v1999_v21  ;;  %v2002_v13 = vadd.f32 %v10192_v33, %v2001_v5  ;;  %4025 = vmatprep.mubr.bf16.mxu1 %v3585_v62  ;;  %v2003_v49 = vpop.f32.mrb[119].mxu0 }
 0x2b6   :  { %4026 = vmatmul.mubr.bf16.gmra.mrb[128].mxu1 %v3335_v46  ;;  %v10374_v31 = vsel %vm461_vm1, %v2700_v43, %v2701_v56  ;;  %v3033_v9 = vpop.permute.xlu0 %3032 }
 0x2b7   :  { %v2291_v20 = vadd.f32 %v9889_v18, %v2002_v13  ;;  %v2368_v22 = vmax.f32 %v2288_v25, 0.0  ;;  %v3435_v11 = vsel %vm1029_vm3, %v10063_v30, %v3033_v9  ;;  %v2784_v9 = vrot.slane %v10360_v55, 2 }
 0x2b8   :  { %3166 = vrot.lane.b32.xlu0 %v10374_v31, %s7742_s19  ;;  %2986 = vrot.lane.b32.xlu1 %v10273_v61, %s7742_s19 }
 0x2b9   :  { %v2369_v41 = vmax.f32 %v2291_v20, 0.0 }
 0x2ba   :  { %v2006_v51 = vpop.f32.mrb[120].mxu0  ;;  %v3093_v53 = vpop.permute.xlu1 %3092 }
 0x2bb   :  { %v2403_v52 = vpack.c.bf16 %v2369_v41, %v2368_v22  ;;  %v2007_v6 = vadd.f32 %v10192_v33, %v2006_v51  ;;  %v2008_v47 = vpop.f32.mrb[121].mxu0  ;;  %v3511_v23 = vsel %vm1088_vm4, %v3435_v11, %v3093_v53  ;;  %v2785_v51 = vrot.slane %v10356_v26, 2  ;;  %v13385_v11 = vld [vmem:[#allocation12_spill] sm:$0xff] }
 0x2bc   :  { %v2009_v40 = vpop.f32.mrb[122].mxu0  ;;  %3052 = vrot.lane.b32.xlu0 %v10334_v57, %s7741_s18  ;;  %2868 = vrot.lane.b32.xlu1 %v10254_v10, %s7741_s18 }
 0x2bd   :  { %v2467_v18 = vrot.slane %v2403_v52, 7  ;;  %v2010_v15 = vadd.f32 %v10192_v33, %v2009_v40  ;;  %v2296_v29 = vadd.f32 %v13382_v45, %v2007_v6  ;;  %v2011_v19 = vpop.f32.mrb[123].mxu0  ;;  %v3149_v12 = vpop.permute.xlu0 %3148  ;;  %v13384_v52 = vld [vmem:[#allocation22_spill] sm:$0xff] }
 0x2be   :  { %v2969_v50 = vpop.permute.xlu1 %2968  ;;  %v3588_v62 = vsel %vm1147_vm5, %v3511_v23, %v3149_v12  ;;  %v10423_v19 = vsel %vm549_vm2, %v2784_v9, %v2785_v51 }
 0x2bf   :  { %v10392_v59 = vsel %vm302_vm0, %v2467_v18, 0  ;;  %v2370_v21 = vmax.f32 %v2296_v29, 0.0  ;;  %v2299_v4 = vadd.f32 %v13383_v48, %v2010_v15  ;;  %4033 = vmatprep.mubr.bf16.mxu1 %v3588_v62  ;;  %v10397_v30 = vsel %vm302_vm0, 0, %v2467_v18 }
 0x2c0   :  { %2924 = vrot.lane.b32.xlu1 %v10248_v14, %s7740_s15  ;;  %v3338_v5 = vsel %vm1147_vm5, %v13381_v2, %v2969_v50  ;;  %v2704_v46 = vrot.slane %v10392_v59, 1  ;;  %3112 = vrot.lane.b32.xlu0 %v10397_v30, %s7740_s15  ;;  %v2703_v56 = vrot.slane %v10397_v30, 1 }
 0x2c1   :  { %v2371_v43 = vmax.f32 %v2299_v4, 0.0  ;;  %4034 = vmatmul.mubr.bf16.gmra.mrb[132].mxu1 %v3338_v5  ;;  %v3035_v25 = vpop.permute.xlu0 %3034 }
 0x2c2   :  { %v2014_v13 = vpop.f32.mrb[124].mxu0  ;;  %v2851_v22 = vpop.permute.xlu1 %2850  ;;  %v10409_v14 = vsel %vm461_vm1, %v2703_v56, %v2704_v46  ;;  %v3438_v29 = vsel %vm1029_vm3, %v9968_v32, %v3035_v25 }
 0x2c3   :  { %v2404_v49 = vpack.c.bf16 %v2371_v43, %v2370_v21  ;;  %v2015_v20 = vadd.f32 %v10192_v33, %v2014_v13  ;;  %v2016_v41 = vpop.f32.mrb[125].mxu0  ;;  %v3203_v32 = vsel %vm1029_vm3, %v9916_v36, %v2851_v22 }
 0x2c4   :  { %v2017_v2 = vpop.f32.mrb[126].mxu0  ;;  %2988 = vrot.lane.b32.xlu1 %v10317_v8, %s7742_s19  ;;  %3168 = vrot.lane.b32.xlu0 %v10409_v14, %s7742_s19 }
 0x2c5   :  { %v2468_v53 = vrot.slane %v2404_v49, 7  ;;  %v2304_v6 = vadd.f32 %v13384_v52, %v2015_v20  ;;  %v2018_v47 = vadd.f32 %v10192_v33, %v2017_v2  ;;  %v2019_v40 = vpop.f32.mrb[127].mxu0  ;;  %v2787_v2 = vrot.slane %v10397_v30, 2  ;;  %v10465_v52 = vld [vmem:[%s13149_s4] ss:$0 sm:$0xff] }
 0x2c6   :  { %v3095_v18 = vpop.permute.xlu0 %3094  ;;  %v2907_v45 = vpop.permute.xlu1 %2906 }
 0x2c7   :  { %v2307_v15 = vadd.f32 %v13385_v11, %v2018_v47  ;;  %v10428_v26 = vsel %vm302_vm0, %v2468_v53, 0  ;;  %v2372_v33 = vmax.f32 %v2304_v6, 0.0  ;;  %v10433_v12 = vsel %vm302_vm0, 0, %v2468_v53 }
 0x2c8   :  { %2870 = vrot.lane.b32.xlu1 %v10289_v44, %s7741_s18  ;;  %3054 = vrot.lane.b32.xlu0 %v10423_v19, %s7741_s18  ;;  %v3513_v50 = vsel %vm1088_vm4, %v3438_v29, %v3095_v18  ;;  %v3259_v62 = vsel %vm1088_vm4, %v3203_v32, %v2907_v45  ;;  %v2805_v56 = vrot.slane %v10428_v26, 1  ;;  %v2804_v13 = vrot.slane %v10433_v12, 1 }
 0x2c9   :  { %v2373_v23 = vmax.f32 %v2307_v15, 0.0 }
 0x2ca   :  { %v10438_v21 = vpop.f32.mrb[128].mxu0  ;;  %v3151_v48 = vpop.permute.xlu0 %3150  ;;  %v10452_v41 = vsel %vm461_vm1, %v2804_v13, %v2805_v56 }
 0x2cb   :  { %v2405_v4 = vpack.c.bf16 %v2373_v23, %v2372_v33  ;;  %v2971_v5 = vpop.permute.xlu1 %2970  ;;  %v4188_v46 = vpop.f32.mrb[129].mxu0  ;;  %v3591_v43 = vsel %vm1147_vm5, %v3513_v50, %v3151_v48 }
 0x2cc   :  { %v10443_v25 = vpop.f32.mrb[130].mxu0  ;;  %2926 = vrot.lane.b32.xlu1 %v10286_v7, %s7740_s15  ;;  %4041 = vmatprep.mubr.bf16.mxu1 %v3591_v43  ;;  %v3341_v36 = vsel %vm1147_vm5, %v3259_v62, %v2971_v5  ;;  %v2788_v7 = vrot.slane %v10392_v59, 2 }
 0x2cd   :  { %3114 = vrot.lane.b32.xlu0 %v10433_v12, %s7740_s15  ;;  %4042 = vmatmul.mubr.bf16.gmra.mrb[136].mxu1 %v3341_v36  ;;  %v4191_v49 = vpop.f32.mrb[131].mxu0  ;;  %v2469_v9 = vrot.slane %v2405_v4, 7 }
 0x2ce   :  { %v3037_v20 = vpop.permute.xlu0 %3036  ;;  %v10472_v59 = vsel %vm549_vm2, %v2787_v2, %v2788_v7 }
 0x2cf   :  { %v2853_v22 = vpop.permute.xlu1 %2852  ;;  %v3441_v11 = vsel %vm1029_vm3, %v10012_v54, %v3037_v20  ;;  %v10484_v33 = vsel %vm302_vm0, 0, %v2469_v9  ;;  %v10487_v23 = vsel %vm302_vm0, %v2469_v9, 0 }
 0x2d0   :  { %2990 = vrot.lane.b32.xlu1 %v10360_v55, %s7742_s19  ;;  %v3205_v32 = vsel %vm1029_vm3, %v9933_v0, %v2853_v22  ;;  %v2807_v36 = vrot.slane %v10484_v33, 1  ;;  %v2808_v20 = vrot.slane %v10487_v23, 1 }
 0x2d1   :  { %3170 = vrot.lane.b32.xlu0 %v10452_v41, %s7742_s19 }
 0x2d2   :  { %v10460_v51 = vpop.f32.mrb[132].mxu0  ;;  %v3097_v53 = vpop.permute.xlu0 %3096 }
 0x2d3   :  { %v2909_v6 = vpop.permute.xlu1 %2908  ;;  %v10467_v47 = vpop.f32.mrb[133].mxu0  ;;  %v3515_v50 = vsel %vm1088_vm4, %v3441_v11, %v3097_v53  ;;  %v2817_v53 = vrot.slane %v10428_v26, 2 }
 0x2d4   :  { %v3899_v40 = vpop.f32.mrb[64].mxu1  ;;  %v10469_v18 = vpop.f32.mrb[134].mxu0  ;;  %2872 = vrot.lane.b32.xlu1 %v10341_v63, %s7741_s18  ;;  %v3261_v4 = vsel %vm1088_vm4, %v3205_v32, %v2909_v6 }
 0x2d5   :  { %v3900_v15 = vadd.f32 %v10465_v52, %v3899_v40  ;;  %3056 = vrot.lane.b32.xlu0 %v10472_v59, %s7741_s18  ;;  %v3901_v45 = vpop.f32.mrb[65].mxu1  ;;  %v10481_v29 = vpop.f32.mrb[135].mxu0  ;;  %v10515_v40 = vsel %vm461_vm1, %v2807_v36, %v2808_v20 }
 0x2d6   :  { %v3902_v54 = vpop.f32.mrb[66].mxu1  ;;  %v3153_v48 = vpop.permute.xlu0 %3152 }
 0x2d7   :  { %v10493_v62 = vadd.f32 %v4188_v46, %v3900_v15  ;;  %v3903_v5 = vadd.f32 %v10465_v52, %v3902_v54  ;;  %v2973_v43 = vpop.permute.xlu1 %2972  ;;  %v3904_v56 = vpop.f32.mrb[67].mxu1  ;;  %v3594_v13 = vsel %vm1147_vm5, %v3515_v50, %v3153_v48 }
 0x2d8   :  { %2928 = vrot.lane.b32.xlu1 %v10334_v57, %s7740_s15  ;;  %4049 = vmatprep.mubr.bf16.mxu1 %v3594_v13  ;;  %v3344_v0 = vsel %vm1147_vm5, %v3261_v4, %v2973_v43  ;;  %v2816_v57 = vrot.slane %v10433_v12, 2 }
 0x2d9   :  { %13386 = vst [vmem:[#allocation24_spill] sm:$0xff] %v10493_v62  ;;  %v10502_v22 = vadd.f32 %v4191_v49, %v3903_v5  ;;  %3116 = vrot.lane.b32.xlu0 %v10484_v33, %s7740_s15  ;;  %4050 = vmatmul.mubr.bf16.gmra.mrb[140].mxu1 %v3344_v0 }
 0x2da   :  { %v10506_v46 = vpop.f32.mrb[136].mxu0  ;;  %v3039_v2 = vpop.permute.xlu0 %3038  ;;  %v10525_v32 = vsel %vm549_vm2, %v2816_v57, %v2817_v53  ;;  %v2819_v53 = vrot.slane %v10484_v33, 2  ;;  %v2820_v57 = vrot.slane %v10487_v23, 2 }
 0x2db   :  { %13387 = vst [vmem:[#allocation21_spill] sm:$0xff] %v10502_v22  ;;  %v2855_v7 = vpop.permute.xlu1 %2854  ;;  %v10508_v9 = vpop.f32.mrb[137].mxu0  ;;  %v3444_v54 = vsel %vm1029_vm3, %v10054_v38, %v3039_v2 }
 0x2dc   :  { %v10512_v6 = vpop.f32.mrb[138].mxu0  ;;  %2992 = vrot.lane.b32.xlu1 %v10397_v30, %s7742_s19  ;;  %v3207_v4 = vsel %vm1029_vm3, %v9942_v3, %v2855_v7 }
 0x2dd   :  { %3172 = vrot.lane.b32.xlu0 %v10515_v40, %s7742_s19  ;;  %v10521_v49 = vpop.f32.mrb[139].mxu0 }
 0x2de   :  { %v3099_v11 = vpop.permute.xlu0 %3098 }
 0x2df   :  { %v2911_v15 = vpop.permute.xlu1 %2910  ;;  %v3907_v45 = vpop.f32.mrb[68].mxu1  ;;  %v3517_v5 = vsel %vm1088_vm4, %v3444_v54, %v3099_v11 }
 0x2e0   :  { %v3908_v26 = vadd.f32 %v10465_v52, %v3907_v45  ;;  %2874 = vrot.lane.b32.xlu1 %v10374_v31, %s7741_s18  ;;  %v3909_v50 = vpop.f32.mrb[69].mxu1  ;;  %v3263_v0 = vsel %vm1088_vm4, %v3207_v4, %v2911_v15 }
 0x2e1   :  { %3058 = vrot.lane.b32.xlu0 %v10525_v32, %s7741_s18  ;;  %v3910_v48 = vpop.f32.mrb[70].mxu1 }
 0x2e2   :  { %v10537_v43 = vadd.f32 %v10438_v21, %v3908_v26  ;;  %v3911_v56 = vadd.f32 %v10465_v52, %v3910_v48  ;;  %v10540_v13 = vpop.f32.mrb[140].mxu0  ;;  %v3155_v36 = vpop.permute.xlu0 %3154  ;;  %v10561_v26 = vsel %vm549_vm2, %v2819_v53, %v2820_v57 }
 0x2e3   :  { %v2975_v38 = vpop.permute.xlu1 %2974  ;;  %v3912_v20 = vpop.f32.mrb[71].mxu1  ;;  %v3597_v2 = vsel %vm1147_vm5, %v3517_v5, %v3155_v36 }
 0x2e4   :  { %13388 = vst [vmem:[#allocation23_spill] sm:$0xff] %v10537_v43  ;;  %v10546_v3 = vadd.f32 %v10443_v25, %v3911_v56  ;;  %v10548_v7 = vpop.f32.mrb[141].mxu0  ;;  %2994 = vrot.lane.b32.xlu1 %v10433_v12, %s7742_s19  ;;  %4057 = vmatprep.mubr.bf16.mxu1 %v3597_v2  ;;  %v3347_v21 = vsel %vm1147_vm5, %v3263_v0, %v2975_v38 }
 0x2e5   :  { %v10554_v11 = vpop.f32.mrb[142].mxu0  ;;  %2930 = vrot.lane.b32.xlu0 %v10423_v19, %s7740_s15  ;;  %4058 = vmatmul.mubr.bf16.gmra.mrb[144].mxu1 %v3347_v21 }
 0x2e6   :  { %13389 = vst [vmem:[#allocation14_spill] sm:$0xff] %v10546_v3  ;;  %v10558_v15 = vpop.f32.mrb[143].mxu0  ;;  %v3041_v25 = vpop.permute.xlu0 %3040 }
 0x2e7   :  { %v2857_v45 = vpop.permute.xlu1 %2856  ;;  %v3447_v4 = vsel %vm1029_vm3, %v10097_v24, %v3041_v25 }
 0x2e8   :  { %2876 = vrot.lane.b32.xlu1 %v10409_v14, %s7741_s18  ;;  %v3209_v56 = vsel %vm1029_vm3, %v9994_v28, %v2857_v45 }
 0x2e9   :  { %3060 = vrot.lane.b32.xlu0 %v10561_v26, %s7741_s18  ;;  %s7747_s18 = smov [#allocation5]  }
 0x2ea   :  { %v10567_v12 = vpop.f32.mrb[144].mxu0  ;;  %v3101_v23 = vpop.permute.xlu0 %3100 }
 0x2eb   :  { %v2913_v50 = vpop.permute.xlu1 %2912  ;;  %v10569_v54 = vpop.f32.mrb[145].mxu0  ;;  %v3519_v36 = vsel %vm1088_vm4, %v3447_v4, %v3101_v23 }
 0x2ec   :  { %v10571_v48 = vpop.f32.mrb[146].mxu0  ;;  %2996 = vrot.lane.b32.xlu1 %v10484_v33, %s7742_s19  ;;  %v3265_v20 = vsel %vm1088_vm4, %v3209_v56, %v2913_v50 }
 0x2ed   :  { %2932 = vrot.lane.b32.xlu0 %v10472_v59, %s7740_s15  ;;  %v10579_v5 = vpop.f32.mrb[147].mxu0  ;;  %v3915_v0 = vpop.f32.mrb[72].mxu1  ;;  %s7746_s15 = smov 126  }
 0x2ee   :  { %v3157_v38 = vpop.permute.xlu0 %3156  ;;  %v3916_v2 = vadd.f32 %v10465_v52, %v3915_v0  ;;  %v3917_v33 = vpop.f32.mrb[73].mxu1 }
 0x2ef   :  { %v2977_v53 = vpop.permute.xlu1 %2976  ;;  %v3600_v24 = vsel %vm1147_vm5, %v3519_v36, %v3157_v38  ;;  %v3918_v21 = vpop.f32.mrb[74].mxu1 }
 0x2f0   :  { %4065 = vmatprep.mubr.bf16.mxu1 %v3600_v24  ;;  %v3350_v57 = vsel %vm1147_vm5, %v3265_v20, %v2977_v53  ;;  %v10589_v25 = vadd.f32 %v10467_v47, %v3916_v2  ;;  %v3919_v28 = vadd.f32 %v10465_v52, %v3918_v21  ;;  %v3920_v45 = vpop.f32.mrb[75].mxu1 }
 0x2f1   :  { %4066 = vmatmul.mubr.bf16.gmra.mrb[148].mxu1 %v3350_v57 }
 0x2f2   :  { %13390 = vst [vmem:[#allocation15_spill] sm:$0xff] %v10589_v25  ;;  %v10592_v23 = vpop.f32.mrb[148].mxu0  ;;  %v3043_v50 = vpop.permute.xlu0 %3042  ;;  %v10595_v4 = vadd.f32 %v10481_v29, %v3919_v28 }
 0x2f3   :  { %v2859_v56 = vpop.permute.xlu1 %2858  ;;  %v10597_v0 = vpop.f32.mrb[149].mxu0  ;;  %v3450_v33 = vsel %vm1029_vm3, %v10135_v27, %v3043_v50 }
 0x2f4   :  { %13391 = vst [vmem:[#allocation16_spill] sm:$0xff] %v10595_v4  ;;  %v10599_v36 = vpop.f32.mrb[150].mxu0  ;;  %v3211_v29 = vsel %vm1029_vm3, %v10034_v58, %v2859_v56 }
 0x2f5   :  { %v10601_v38 = vpop.f32.mrb[151].mxu0 }
 0x2f6   :  { %v3103_v20 = vpop.permute.xlu0 %3102 }
 0x2f7   :  { %v2915_v47 = vpop.permute.xlu1 %2914  ;;  %v3521_v21 = vsel %vm1088_vm4, %v3450_v33, %v3103_v20 }
 0x2f8   :  { %v3923_v2 = vpop.f32.mrb[76].mxu1  ;;  %v3267_v45 = vsel %vm1088_vm4, %v3211_v29, %v2915_v47 }
 0x2f9   :  { %v3924_v53 = vadd.f32 %v10465_v52, %v3923_v2  ;;  %v3925_v24 = vpop.f32.mrb[77].mxu1 }
 0x2fa   :  { %v10609_v57 = vpop.f32.mrb[152].mxu0  ;;  %v3159_v28 = vpop.permute.xlu0 %3158 }
 0x2fb   :  { %v10613_v4 = vadd.f32 %v10460_v51, %v3924_v53  ;;  %v2979_v25 = vpop.permute.xlu1 %2978  ;;  %v3926_v3 = vpop.f32.mrb[78].mxu1  ;;  %v3603_v27 = vsel %vm1147_vm5, %v3521_v21, %v3159_v28 }
 0x2fc   :  { %v3927_v50 = vadd.f32 %v10465_v52, %v3926_v3  ;;  %v3928_v2 = vpop.f32.mrb[79].mxu1  ;;  %v10617_v24 = vpop.f32.mrb[153].mxu0  ;;  %4073 = vmatprep.mubr.bf16.mxu1 %v3603_v27  ;;  %v3353_v58 = vsel %vm1147_vm5, %v3267_v45, %v2979_v25 }
 0x2fd   :  { %13392 = vst [vmem:[#allocation10_spill] sm:$0xff] %v10613_v4  ;;  %v10620_v56 = vpop.f32.mrb[154].mxu0  ;;  %4074 = vmatmul.mubr.bf16.gmra.mrb[152].mxu1 %v3353_v58 }
 0x2fe   :  { %v10623_v20 = vadd.f32 %v10469_v18, %v3927_v50  ;;  %v10625_v51 = vpop.f32.mrb[155].mxu0  ;;  %v3045_v47 = vpop.permute.xlu0 %3044 }
 0x2ff   :  { %v2861_v33 = vpop.permute.xlu1 %2860  ;;  %v3453_v25 = vsel %vm1029_vm3, %v10173_v17, %v3045_v47 }
 0x300   :  { %13393 = vst [vmem:[#allocation19_spill] sm:$0xff] %v10623_v20  ;;  %v3213_v2 = vsel %vm1029_vm3, %v10077_v42, %v2861_v33 }
 0x302   :  { %v3105_v53 = vpop.permute.xlu0 %3104  ;;  %v10627_v29 = vpop.f32.mrb[156].mxu0 }
 0x303   :  { %v2917_v3 = vpop.permute.xlu1 %2916  ;;  %v10629_v21 = vpop.f32.mrb[157].mxu0  ;;  %v3523_v58 = vsel %vm1088_vm4, %v3453_v25, %v3105_v53 }
 0x304   :  { %v3931_v28 = vpop.f32.mrb[80].mxu1  ;;  %v10631_v27 = vpop.f32.mrb[158].mxu0  ;;  %v3269_v43 = vsel %vm1088_vm4, %v3213_v2, %v2917_v3 }
 0x305   :  { %v3932_v45 = vadd.f32 %v10465_v52, %v3931_v28  ;;  %v3933_v18 = vpop.f32.mrb[81].mxu1  ;;  %v10636_v50 = vpop.f32.mrb[159].mxu0 }
 0x306   :  { %v3161_v20 = vpop.permute.xlu0 %3160  ;;  %v3934_v4 = vpop.f32.mrb[82].mxu1 }
 0x307   :  { %v10643_v62 = vadd.f32 %v10508_v9, %v3932_v45  ;;  %v2981_v22 = vpop.permute.xlu1 %2980  ;;  %v3935_v17 = vadd.f32 %v10465_v52, %v3934_v4  ;;  %v3936_v47 = vpop.f32.mrb[83].mxu1  ;;  %v3606_v28 = vsel %vm1147_vm5, %v3523_v58, %v3161_v20 }
 0x308   :  { %4081 = vmatprep.mubr.bf16.mxu1 %v3606_v28  ;;  %v3356_v18 = vsel %vm1147_vm5, %v3269_v43, %v2981_v22 }
 0x309   :  { %v10649_v42 = vadd.f32 %v10521_v49, %v3935_v17  ;;  %4082 = vmatmul.mubr.bf16.gmra.mrb[156].mxu1 %v3356_v18 }
 0x30a   :  { %v3047_v33 = vpop.permute.xlu0 %3046 }
 0x30b   :  { %v2863_v53 = vpop.permute.xlu1 %2862  ;;  %v3456_v9 = vsel %vm1029_vm3, %v10216_v34, %v3047_v33 }
 0x30c   :  { %v3215_v4 = vsel %vm1029_vm3, %v10115_v16, %v2863_v53 }
 0x30e   :  { %v3107_v25 = vpop.permute.xlu0 %3106 }
 0x30f   :  { %v2919_v3 = vpop.permute.xlu1 %2918  ;;  %v3525_v20 = vsel %vm1088_vm4, %v3456_v9, %v3107_v25 }
 0x310   :  { %v3271_v49 = vsel %vm1088_vm4, %v3215_v4, %v2919_v3 }
 0x311   :  { %v3939_v45 = vpop.f32.mrb[84].mxu1 }
 0x312   :  { %v3940_v2 = vadd.f32 %v10465_v52, %v3939_v45  ;;  %v3941_v22 = vpop.f32.mrb[85].mxu1  ;;  %v3163_v43 = vpop.permute.xlu0 %3162 }
 0x313   :  { %v2983_v58 = vpop.permute.xlu1 %2982  ;;  %v3942_v17 = vpop.f32.mrb[86].mxu1  ;;  %v3609_v47 = vsel %vm1147_vm5, %v3525_v20, %v3163_v43 }
 0x314   :  { %v10660_v28 = vadd.f32 %v10506_v46, %v3940_v2  ;;  %v3943_v34 = vadd.f32 %v10465_v52, %v3942_v17  ;;  %v3944_v18 = vpop.f32.mrb[87].mxu1  ;;  %4089 = vmatprep.mubr.bf16.mxu1 %v3609_v47  ;;  %v3359_v16 = vsel %vm1147_vm5, %v3271_v49, %v2983_v58 }
 0x315   :  { %4090 = vmatmul.mubr.bf16.gmra.mrb[160].mxu1 %v3359_v16 }
 0x316   :  { %v10665_v33 = vadd.f32 %v10512_v6, %v3943_v34  ;;  %v3049_v53 = vpop.permute.xlu0 %3048 }
 0x317   :  { %v2865_v25 = vpop.permute.xlu1 %2864  ;;  %v3459_v4 = vsel %vm1029_vm3, %v10254_v10, %v3049_v53 }
 0x318   :  { %v3217_v2 = vsel %vm1029_vm3, %v10153_v37, %v2865_v25 }
 0x31a   :  { %v3109_v3 = vpop.permute.xlu0 %3108 }
 0x31b   :  { %v2921_v9 = vpop.permute.xlu1 %2920  ;;  %v3527_v22 = vsel %vm1088_vm4, %v3459_v4, %v3109_v3 }
 0x31c   :  { %v3947_v45 = vpop.f32.mrb[88].mxu1  ;;  %v3273_v49 = vsel %vm1088_vm4, %v3217_v2, %v2921_v9 }
 0x31d   :  { %v3948_v46 = vadd.f32 %v10465_v52, %v3947_v45  ;;  %v3949_v20 = vpop.f32.mrb[89].mxu1 }
 0x31e   :  { %v10673_v43 = vpop.f32.mrb[160].mxu0  ;;  %v3165_v6 = vpop.permute.xlu0 %3164 }
 0x31f   :  { %v10677_v58 = vadd.f32 %v10548_v7, %v3948_v46  ;;  %v2985_v17 = vpop.permute.xlu1 %2984  ;;  %v3950_v47 = vpop.f32.mrb[90].mxu1  ;;  %v3612_v10 = vsel %vm1147_vm5, %v3527_v22, %v3165_v6 }
 0x320   :  { %v3951_v34 = vadd.f32 %v10465_v52, %v3950_v47  ;;  %v3952_v18 = vpop.f32.mrb[91].mxu1  ;;  %v10681_v16 = vpop.f32.mrb[161].mxu0  ;;  %4097 = vmatprep.mubr.bf16.mxu1 %v3612_v10  ;;  %v3362_v37 = vsel %vm1147_vm5, %v3273_v49, %v2985_v17 }
 0x321   :  { %v10684_v53 = vpop.f32.mrb[162].mxu0  ;;  %4098 = vmatmul.mubr.bf16.gmra.mrb[164].mxu1 %v3362_v37 }
 0x322   :  { %v10687_v25 = vadd.f32 %v10558_v15, %v3951_v34  ;;  %v10689_v7 = vpop.f32.mrb[163].mxu0  ;;  %v3051_v3 = vpop.permute.xlu0 %3050 }
 0x323   :  { %v2867_v9 = vpop.permute.xlu1 %2866  ;;  %v3462_v46 = vsel %vm1029_vm3, %v10289_v44, %v3051_v3 }
 0x324   :  { %v3219_v2 = vsel %vm1029_vm3, %v10196_v60, %v2867_v9 }
 0x326   :  { %v3111_v45 = vpop.permute.xlu0 %3110 }
 0x327   :  { %v2923_v4 = vpop.permute.xlu1 %2922  ;;  %v3529_v22 = vsel %vm1088_vm4, %v3462_v46, %v3111_v45 }
 0x328   :  { %v3275_v17 = vsel %vm1088_vm4, %v3219_v2, %v2923_v4 }
 0x329   :  { %v3955_v20 = vpop.f32.mrb[92].mxu1 }
 0x32a   :  { %v3956_v6 = vadd.f32 %v10465_v52, %v3955_v20  ;;  %v3957_v49 = vpop.f32.mrb[93].mxu1  ;;  %v3167_v15 = vpop.permute.xlu0 %3166 }
 0x32b   :  { %v2987_v47 = vpop.permute.xlu1 %2986  ;;  %v3958_v10 = vpop.f32.mrb[94].mxu1  ;;  %v3615_v34 = vsel %vm1147_vm5, %v3529_v22, %v3167_v15 }
 0x32c   :  { %v10700_v18 = vadd.f32 %v10540_v13, %v3956_v6  ;;  %v3959_v44 = vadd.f32 %v10465_v52, %v3958_v10  ;;  %v3960_v37 = vpop.f32.mrb[95].mxu1  ;;  %4105 = vmatprep.mubr.bf16.mxu1 %v3615_v34  ;;  %v3365_v60 = vsel %vm1147_vm5, %v3275_v17, %v2987_v47 }
 0x32d   :  { %4106 = vmatmul.mubr.bf16.gmra.mrb[168].mxu1 %v3365_v60 }
 0x32e   :  { %v10705_v3 = vadd.f32 %v10554_v11, %v3959_v44  ;;  %v3053_v9 = vpop.permute.xlu0 %3052 }
 0x32f   :  { %v2869_v45 = vpop.permute.xlu1 %2868  ;;  %v3465_v2 = vsel %vm1029_vm3, %v10341_v63, %v3053_v9 }
 0x330   :  { %v3221_v13 = vsel %vm1029_vm3, %v10234_v35, %v2869_v45 }
 0x332   :  { %v3113_v4 = vpop.permute.xlu0 %3112 }
 0x333   :  { %v2925_v46 = vpop.permute.xlu1 %2924  ;;  %v3531_v15 = vsel %vm1088_vm4, %v3465_v2, %v3113_v4 }
 0x334   :  { %v3277_v11 = vsel %vm1088_vm4, %v3221_v13, %v2925_v46 }
 0x335   :  { %v3963_v20 = vpop.f32.mrb[96].mxu1 }
 0x336   :  { %v3964_v22 = vadd.f32 %v10465_v52, %v3963_v20  ;;  %v3965_v6 = vpop.f32.mrb[97].mxu1  ;;  %v10712_v49 = vpop.f32.mrb[164].mxu0 }
 0x337   :  { %v3169_v17 = vpop.permute.xlu0 %3168  ;;  %v2989_v47 = vpop.permute.xlu1 %2988 }
 0x338   :  { %v10717_v10 = vadd.f32 %v10569_v54, %v3964_v22  ;;  %v3966_v34 = vpop.f32.mrb[98].mxu1  ;;  %v10719_v44 = vpop.f32.mrb[165].mxu0  ;;  %v3618_v63 = vsel %vm1147_vm5, %v3531_v15, %v3169_v17  ;;  %v3368_v35 = vsel %vm1147_vm5, %v3277_v11, %v2989_v47 }
 0x339   :  { %v3967_v37 = vadd.f32 %v10465_v52, %v3966_v34  ;;  %v3968_v60 = vpop.f32.mrb[99].mxu1  ;;  %4113 = vmatprep.mubr.bf16.mxu1 %v3618_v63  ;;  %v10724_v9 = vpop.f32.mrb[166].mxu0 }
 0x33a   :  { %4114 = vmatmul.mubr.bf16.gmra.mrb[172].mxu1 %v3368_v35  ;;  %v10726_v45 = vpop.f32.mrb[167].mxu0 }
 0x33b   :  { %v10729_v4 = vadd.f32 %v10579_v5, %v3967_v37  ;;  %v3055_v54 = vpop.permute.xlu0 %3054  ;;  %v2871_v46 = vpop.permute.xlu1 %2870 }
 0x33c   :  { %v3468_v22 = vsel %vm1029_vm3, %v10374_v31, %v3055_v54  ;;  %v3223_v6 = vsel %vm1029_vm3, %v10273_v61, %v2871_v46 }
 0x33f   :  { %v3115_v20 = vpop.permute.xlu0 %3114  ;;  %v2927_v2 = vpop.permute.xlu1 %2926 }
 0x340   :  { %v3533_v17 = vsel %vm1088_vm4, %v3468_v22, %v3115_v20  ;;  %v3279_v47 = vsel %vm1088_vm4, %v3223_v6, %v2927_v2 }
 0x341   :  { %v3971_v13 = vpop.f32.mrb[100].mxu1 }
 0x342   :  { %v3972_v15 = vadd.f32 %v10465_v52, %v3971_v13  ;;  %v3973_v11 = vpop.f32.mrb[101].mxu1 }
 0x343   :  { %v3171_v5 = vpop.permute.xlu0 %3170  ;;  %v2991_v34 = vpop.permute.xlu1 %2990 }
 0x344   :  { %v10739_v63 = vadd.f32 %v10567_v12, %v3972_v15  ;;  %v3974_v35 = vpop.f32.mrb[102].mxu1  ;;  %v3621_v37 = vsel %vm1147_vm5, %v3533_v17, %v3171_v5  ;;  %v3371_v31 = vsel %vm1147_vm5, %v3279_v47, %v2991_v34 }
 0x345   :  { %v3975_v60 = vadd.f32 %v10465_v52, %v3974_v35  ;;  %v3976_v61 = vpop.f32.mrb[103].mxu1  ;;  %4121 = vmatprep.mubr.bf16.mxu1 %v3621_v37 }
 0x346   :  { %4122 = vmatmul.mubr.bf16.gmra.mrb[176].mxu1 %v3371_v31 }
 0x347   :  { %v10745_v54 = vadd.f32 %v10571_v48, %v3975_v60  ;;  %v3057_v46 = vpop.permute.xlu0 %3056  ;;  %v2873_v20 = vpop.permute.xlu1 %2872 }
 0x348   :  { %v3471_v12 = vsel %vm1029_vm3, %v10409_v14, %v3057_v46  ;;  %v3225_v6 = vsel %vm1029_vm3, %v10317_v8, %v2873_v20 }
 0x34b   :  { %v3117_v2 = vpop.permute.xlu0 %3116  ;;  %v2929_v13 = vpop.permute.xlu1 %2928 }
 0x34c   :  { %v3535_v47 = vsel %vm1088_vm4, %v3471_v12, %v3117_v2  ;;  %v3281_v48 = vsel %vm1088_vm4, %v3225_v6, %v2929_v13 }
 0x34d   :  { %v3979_v22 = vpop.f32.mrb[104].mxu1 }
 0x34e   :  { %v3980_v15 = vadd.f32 %v10465_v52, %v3979_v22  ;;  %v3981_v11 = vpop.f32.mrb[105].mxu1  ;;  %v10752_v17 = vpop.f32.mrb[168].mxu0 }
 0x34f   :  { %v3173_v5 = vpop.permute.xlu0 %3172  ;;  %v2993_v34 = vpop.permute.xlu1 %2992 }
 0x350   :  { %v10757_v35 = vadd.f32 %v10597_v0, %v3980_v15  ;;  %v3982_v37 = vpop.f32.mrb[106].mxu1  ;;  %v10759_v31 = vpop.f32.mrb[169].mxu0  ;;  %v3624_v14 = vsel %vm1147_vm5, %v3535_v47, %v3173_v5  ;;  %v3374_v8 = vsel %vm1147_vm5, %v3281_v48, %v2993_v34 }
 0x351   :  { %v3983_v60 = vadd.f32 %v10465_v52, %v3982_v37  ;;  %v3984_v61 = vpop.f32.mrb[107].mxu1  ;;  %4129 = vmatprep.mubr.bf16.mxu1 %v3624_v14  ;;  %v10764_v46 = vpop.f32.mrb[170].mxu0 }
 0x352   :  { %4130 = vmatmul.mubr.bf16.gmra.mrb[180].mxu1 %v3374_v8  ;;  %v10766_v20 = vpop.f32.mrb[171].mxu0 }
 0x353   :  { %v10769_v2 = vadd.f32 %v10601_v38, %v3983_v60  ;;  %v3059_v0 = vpop.permute.xlu0 %3058  ;;  %v2875_v13 = vpop.permute.xlu1 %2874 }
 0x354   :  { %v3474_v22 = vsel %vm1029_vm3, %v10452_v41, %v3059_v0  ;;  %v3227_v15 = vsel %vm1029_vm3, %v10360_v55, %v2875_v13 }
 0x355   :  { %v3536_v12 = vsel %vm1088_vm4, %v3474_v22, %v13378_v1 }
 0x356   :  { %v3626_v6 = vsel %vm1147_vm5, %v3536_v12, %v13379_v39 }
 0x357   :  { %v2931_v11 = vpop.permute.xlu0 %2930  ;;  %v2995_v47 = vpop.permute.xlu1 %2994  ;;  %4137 = vmatprep.mubr.bf16.mxu1 %v3626_v6 }
 0x358   :  { %v3283_v38 = vsel %vm1088_vm4, %v3227_v15, %v2931_v11 }
 0x359   :  { %v3987_v48 = vpop.f32.mrb[108].mxu1  ;;  %v3377_v5 = vsel %vm1147_vm5, %v3283_v38, %v2995_v47 }
 0x35a   :  { %v3988_v34 = vadd.f32 %v10465_v52, %v3987_v48  ;;  %v3989_v41 = vpop.f32.mrb[109].mxu1  ;;  %4138 = vmatmul.mubr.bf16.gmra.mrb[184].mxu1 %v3377_v5 }
 0x35b   :  { %v3061_v37 = vpop.permute.xlu0 %3060  ;;  %v2877_v14 = vpop.permute.xlu1 %2876 }
 0x35c   :  { %v10783_v8 = vadd.f32 %v10592_v23, %v3988_v34  ;;  %v3477_v55 = vsel %vm1029_vm3, %v10515_v40, %v3061_v37  ;;  %v3990_v60 = vpop.f32.mrb[110].mxu1  ;;  %v3229_v12 = vsel %vm1029_vm3, %v10397_v30, %v2877_v14 }
 0x35d   :  { %v3991_v61 = vadd.f32 %v10465_v52, %v3990_v60  ;;  %v3992_v0 = vpop.f32.mrb[111].mxu1  ;;  %v3537_v13 = vsel %vm1088_vm4, %v3477_v55, %v13378_v1 }
 0x35e   :  { %v3628_v22 = vsel %vm1147_vm5, %v3537_v13, %v13379_v39 }
 0x35f   :  { %v10795_v6 = vadd.f32 %v10599_v36, %v3991_v61  ;;  %v2933_v23 = vpop.permute.xlu0 %2932  ;;  %v2997_v15 = vpop.permute.xlu1 %2996  ;;  %4145 = vmatprep.mubr.bf16.mxu1 %v3628_v22  ;;  %v13394_v61 = vld [vmem:[#allocation8_spill] sm:$0xff] }
 0x360   :  { %v3285_v40 = vsel %vm1088_vm4, %v3229_v12, %v2933_v23  ;;  %vm5614_vm4 = vcmask 7168  }
 0x361   :  { %v3380_v11 = vsel %vm1147_vm5, %v3285_v40, %v2997_v15  ;;  %vm5621_vm5 = vcmask 138240  }
 0x362   :  { %4146 = vmatmul.mubr.bf16.gmra.mrb[188].mxu1 %v3380_v11 }
 0x363   :  { %7579 = vmatprep.mubr.msk.bf16.mxu1 %vm1029_vm3, %v10423_v19 }
 0x365   :  { %v3995_v1 = vpop.f32.mrb[112].mxu1 }
 0x366   :  { %v3996_v39 = vadd.f32 %v10465_v52, %v3995_v1  ;;  %v3997_v47 = vpop.f32.mrb[113].mxu1  ;;  %v10802_v38 = vpop.f32.mrb[172].mxu0 }
 0x367   :  { %v3998_v30 = vpop.f32.mrb[114].mxu1  ;;  %v10804_v36 = vpop.f32.mrb[173].mxu0 }
 0x368   :  { %v10807_v48 = vadd.f32 %v10617_v24, %v3996_v39  ;;  %v3999_v5 = vadd.f32 %v10465_v52, %v3998_v30  ;;  %v4000_v34 = vpop.f32.mrb[115].mxu1  ;;  %v10810_v41 = vpop.f32.mrb[174].mxu0 }
 0x369   :  { %v10812_v37 = vpop.f32.mrb[175].mxu0 }
 0x36a   :  { %v10815_v19 = vadd.f32 %v10625_v51, %v3999_v5  ;;  %7580 = vmatmul.mubr.msk.bf16.vlgmr.msra.gmra.mrb[192].mxu1 %vm1029_vm3, %v10472_v59 }
 0x36b   :  { %7583 = vmatprep.mubr.msk.bf16.mxu1 %vm1029_vm3, %v10525_v32 }
 0x371   :  { %v4003_v14 = vpop.f32.mrb[116].mxu1 }
 0x372   :  { %v4004_v24 = vadd.f32 %v10465_v52, %v4003_v14  ;;  %v4005_v55 = vpop.f32.mrb[117].mxu1  ;;  %7584 = vmatmul.mubr.msk.bf16.gmra.mrb[196].mxu1 %vm1029_vm3, %v10561_v26 }
 0x373   :  { %v4006_v60 = vpop.f32.mrb[118].mxu1  ;;  %7587 = vmatprep.mubr.msk.bf16.mxu1 %vm1029_vm3, %v13394_v61 }
 0x374   :  { %v10827_v51 = vadd.f32 %v10609_v57, %v4004_v24  ;;  %v4007_v0 = vadd.f32 %v10465_v52, %v4006_v60  ;;  %v4008_v59 = vpop.f32.mrb[119].mxu1 }
 0x376   :  { %v10831_v13 = vadd.f32 %v10620_v56, %v4007_v0 }
 0x379   :  { %v4011_v32 = vpop.f32.mrb[120].mxu1 }
 0x37a   :  { %v4012_v22 = vadd.f32 %v10465_v52, %v4011_v32  ;;  %v4013_v12 = vpop.f32.mrb[121].mxu1  ;;  %7588 = vmatmul.mubr.msk.bf16.gmra.mrb[200].mxu1 %vm1029_vm3, %v13394_v61 }
 0x37b   :  { %v4014_v26 = vpop.f32.mrb[122].mxu1 }
 0x37c   :  { %v10837_v23 = vadd.f32 %v10629_v21, %v4012_v22  ;;  %v4015_v57 = vadd.f32 %v10465_v52, %v4014_v26  ;;  %v4016_v15 = vpop.f32.mrb[123].mxu1 }
 0x37e   :  { %v10841_v40 = vadd.f32 %v10636_v50, %v4015_v57  ;;  %v10843_v11 = vpop.f32.mrb[176].mxu0 }
 0x37f   :  { %v10845_v56 = vpop.f32.mrb[177].mxu0 }
 0x380   :  { %v10847_v1 = vpop.f32.mrb[178].mxu0 }
 0x381   :  { %v4019_v39 = vpop.f32.mrb[124].mxu1  ;;  %v10849_v47 = vpop.f32.mrb[179].mxu0 }
 0x382   :  { %v4020_v30 = vadd.f32 %v10465_v52, %v4019_v39  ;;  %v4021_v5 = vpop.f32.mrb[125].mxu1 }
 0x383   :  { %v4022_v21 = vpop.f32.mrb[126].mxu1 }
 0x384   :  { %v10853_v34 = vadd.f32 %v10627_v29, %v4020_v30  ;;  %v4023_v14 = vadd.f32 %v10465_v52, %v4022_v21  ;;  %v4024_v50 = vpop.f32.mrb[127].mxu1 }
 0x386   :  { %13395 = vst [vmem:[#allocation25_spill] sm:$0xff] %v10853_v34  ;;  %v10857_v24 = vadd.f32 %v10631_v27, %v4023_v14 }
 0x388   :  { %13396 = vst [vmem:[#allocation26_spill] sm:$0xff] %v10857_v24 }
 0x389   :  { %v4027_v55 = vpop.f32.mrb[128].mxu1 }
 0x38a   :  { %v4028_v60 = vadd.f32 %v10465_v52, %v4027_v55  ;;  %v4029_v61 = vpop.f32.mrb[129].mxu1 }
 0x38b   :  { %v4030_v0 = vpop.f32.mrb[130].mxu1 }
 0x38c   :  { %v10861_v59 = vadd.f32 %v10681_v16, %v4028_v60  ;;  %v4031_v32 = vadd.f32 %v10465_v52, %v4030_v0  ;;  %v4032_v22 = vpop.f32.mrb[131].mxu1 }
 0x38e   :  { %v10865_v29 = vadd.f32 %v10689_v7, %v4031_v32 }
 0x394   :  { %v4035_v12 = vpop.f32.mrb[132].mxu1 }
 0x395   :  { %v4036_v26 = vadd.f32 %v10465_v52, %v4035_v12  ;;  %v4037_v57 = vpop.f32.mrb[133].mxu1 }
 0x396   :  { %v4038_v27 = vpop.f32.mrb[134].mxu1 }
 0x397   :  { %v10869_v15 = vadd.f32 %v10673_v43, %v4036_v26  ;;  %v4039_v39 = vadd.f32 %v10465_v52, %v4038_v27  ;;  %v4040_v30 = vpop.f32.mrb[135].mxu1 }
 0x399   :  { %v10873_v16 = vadd.f32 %v10684_v53, %v4039_v39 }
 0x3a0   :  { %v4043_v5 = vpop.f32.mrb[136].mxu1 }
 0x3a1   :  { %v4044_v21 = vadd.f32 %v10465_v52, %v4043_v5  ;;  %v4045_v14 = vpop.f32.mrb[137].mxu1 }
 0x3a2   :  { %v4046_v7 = vpop.f32.mrb[138].mxu1 }
 0x3a3   :  { %v10877_v50 = vadd.f32 %v10719_v44, %v4044_v21  ;;  %v4047_v55 = vadd.f32 %v10465_v52, %v4046_v7  ;;  %v4048_v60 = vpop.f32.mrb[139].mxu1 }
 0x3a5   :  { %v10881_v43 = vadd.f32 %v10726_v45, %v4047_v55 }
 0x3ac   :  { %v4051_v61 = vpop.f32.mrb[140].mxu1 }
 0x3ad   :  { %v4052_v0 = vadd.f32 %v10465_v52, %v4051_v61  ;;  %v4053_v32 = vpop.f32.mrb[141].mxu1 }
 0x3ae   :  { %v4054_v53 = vpop.f32.mrb[142].mxu1 }
 0x3af   :  { %v10885_v22 = vadd.f32 %v10712_v49, %v4052_v0  ;;  %v4055_v12 = vadd.f32 %v10465_v52, %v4054_v53  ;;  %v4056_v26 = vpop.f32.mrb[143].mxu1 }
 0x3b1   :  { %v10889_v44 = vadd.f32 %v10724_v9, %v4055_v12 }
 0x3b8   :  { %v4059_v57 = vpop.f32.mrb[144].mxu1 }
 0x3b9   :  { %v4060_v27 = vadd.f32 %v10465_v52, %v4059_v57  ;;  %v4061_v39 = vpop.f32.mrb[145].mxu1 }
 0x3ba   :  { %v4062_v45 = vpop.f32.mrb[146].mxu1  ;;  %v13397_v39 = vld [vmem:[#allocation21_spill] sm:$0xff] }
 0x3bb   :  { %v10893_v30 = vadd.f32 %v10759_v31, %v4060_v27  ;;  %v4063_v5 = vadd.f32 %v10465_v52, %v4062_v45  ;;  %v4064_v21 = vpop.f32.mrb[147].mxu1  ;;  %v10916_v45 = vmax.f32 %v13397_v39, 0.0 }
 0x3bc   :  { %v13401_v21 = vld [vmem:[#allocation23_spill] sm:$0xff] }
 0x3bd   :  { %v10897_v49 = vadd.f32 %v10766_v20, %v4063_v5  ;;  %13398 = vst [vmem:[#allocation17_spill] sm:$0xff] %v10916_v45  ;;  %v13399_v5 = vld [vmem:[#allocation24_spill] sm:$0xff] }
 0x3c4   :  { %v4067_v14 = vpop.f32.mrb[148].mxu1 }
 0x3c5   :  { %v4068_v7 = vadd.f32 %v10465_v52, %v4067_v14  ;;  %v4069_v55 = vpop.f32.mrb[149].mxu1  ;;  %v10922_v14 = vmax.f32 %v13401_v21, 0.0 }
 0x3c6   :  { %v4070_v9 = vpop.f32.mrb[150].mxu1 }
 0x3c7   :  { %v10901_v60 = vadd.f32 %v10752_v17, %v4068_v7  ;;  %v4071_v61 = vadd.f32 %v10465_v52, %v4070_v9  ;;  %v4072_v0 = vpop.f32.mrb[151].mxu1  ;;  %13402 = vst [vmem:[#allocation20_spill] sm:$0xff] %v10922_v14  ;;  %v4508_v9 = vsel %vm1029_vm3, %v10916_v45, 0.0 }
 0x3c9   :  { %v10905_v31 = vadd.f32 %v10764_v46, %v4071_v61  ;;  %v10919_v46 = vmax.f32 %v13399_v5, 0.0  ;;  %v13405_v5 = vld [vmem:[#allocation15_spill] sm:$0xff] }
 0x3ca   :  { %v10942_v21 = vmax.f32 %v13405_v5, 0.0 }
 0x3cb   :  { %13400 = vst [vmem:[#allocation11_spill] sm:$0xff] %v10919_v46 }
 0x3cc   :  { %13406 = vst [vmem:[#allocation13_spill] sm:$0xff] %v10942_v21 }
 0x3d0   :  { %v4075_v32 = vpop.f32.mrb[152].mxu1 }
 0x3d1   :  { %v4076_v53 = vadd.f32 %v10465_v52, %v4075_v32  ;;  %v4077_v12 = vpop.f32.mrb[153].mxu1 }
 0x3d2   :  { %v4078_v20 = vpop.f32.mrb[154].mxu1  ;;  %v4510_v12 = vsel %vm1029_vm3, %v10922_v14, 0.0 }
 0x3d3   :  { %v10909_v26 = vadd.f32 %v10804_v36, %v4076_v53  ;;  %v4079_v57 = vadd.f32 %v10465_v52, %v4078_v20  ;;  %v4080_v27 = vpop.f32.mrb[155].mxu1  ;;  %v4507_v53 = vsel %vm1029_vm3, %v10919_v46, 0.0  ;;  %v13403_v20 = vld [vmem:[#allocation14_spill] sm:$0xff] }
 0x3d4   :  { %v4509_v27 = vadd.f32 %v4508_v9, %v4507_v53 }
 0x3d5   :  { %v10913_v17 = vadd.f32 %v10812_v37, %v4079_v57  ;;  %v10936_v57 = vmax.f32 %v13403_v20, 0.0  ;;  %v13408_v20 = vld [vmem:[#allocation10_spill] sm:$0xff] }
 0x3d6   :  { %v10952_v24 = vmax.f32 %v13408_v20, 0.0 }
 0x3d7   :  { %13404 = vst [vmem:[#allocation18_spill] sm:$0xff] %v10936_v57 }
 0x3dc   :  { %v4083_v7 = vpop.f32.mrb[156].mxu1 }
 0x3dd   :  { %v4084_v55 = vadd.f32 %v10465_v52, %v4083_v7  ;;  %v4085_v36 = vpop.f32.mrb[157].mxu1  ;;  %v4512_v7 = vsel %vm1029_vm3, %v10936_v57, 0.0 }
 0x3de   :  { %v4086_v61 = vpop.f32.mrb[158].mxu1  ;;  %v13407_v36 = vld [vmem:[#allocation16_spill] sm:$0xff] }
 0x3df   :  { %v10928_v37 = vadd.f32 %v10802_v38, %v4084_v55  ;;  %v4087_v0 = vadd.f32 %v10465_v52, %v4086_v61  ;;  %v4088_v32 = vpop.f32.mrb[159].mxu1  ;;  %v4511_v38 = vadd.f32 %v4510_v12, %v4509_v27  ;;  %v4514_v55 = vsel %vm1029_vm3, %v10942_v21, 0.0 }
 0x3e0   :  { %v10949_v61 = vmax.f32 %v13407_v36, 0.0 }
 0x3e1   :  { %v10939_v39 = vadd.f32 %v10810_v41, %v4087_v0  ;;  %v4513_v32 = vadd.f32 %v4512_v7, %v4511_v38  ;;  %v4518_v38 = vsel %vm1029_vm3, %v10952_v24, 0.0  ;;  %v13409_v7 = vld [vmem:[#allocation19_spill] sm:$0xff] }
 0x3e2   :  { %v4516_v12 = vsel %vm1029_vm3, %v10949_v61, 0.0  ;;  %v10964_v20 = vmax.f32 %v13409_v7, 0.0  ;;  %v10980_v7 = vmax.f32 %v10660_v28, 0.0  ;;  %v10992_v28 = vmax.f32 %v10665_v33, 0.0 }
 0x3e3   :  { %v4515_v41 = vadd.f32 %v4514_v55, %v4513_v32  ;;  %v11008_v33 = vmax.f32 %v10700_v18, 0.0  ;;  %v11022_v18 = vmax.f32 %v10865_v29, 0.0 }
 0x3e5   :  { %v4517_v55 = vadd.f32 %v4516_v12, %v4515_v41  ;;  %13416 = vst [vmem:[#allocation23_spill] sm:$0xff] %v11022_v18 }
 0x3e8   :  { %v4091_v9 = vpop.f32.mrb[160].mxu1 }
 0x3e9   :  { %v4092_v0 = vadd.f32 %v10465_v52, %v4091_v9  ;;  %v4093_v53 = vpop.f32.mrb[161].mxu1  ;;  %v10970_v9 = vmax.f32 %v10643_v62, 0.0 }
 0x3ea   :  { %v4094_v27 = vpop.f32.mrb[162].mxu1  ;;  %v4519_v53 = vadd.f32 %v4518_v38, %v4517_v55 }
 0x3eb   :  { %v10958_v5 = vadd.f32 %v10845_v56, %v4092_v0  ;;  %v4095_v34 = vadd.f32 %v10465_v52, %v4094_v27  ;;  %v4096_v36 = vpop.f32.mrb[163].mxu1  ;;  %v4520_v56 = vsel %vm1029_vm3, %v10964_v20, 0.0  ;;  %v4522_v0 = vsel %vm1029_vm3, %v10970_v9, 0.0 }
 0x3ec   :  { %v10977_v27 = vmax.f32 %v10649_v42, 0.0  ;;  %v4521_v36 = vadd.f32 %v4520_v56, %v4519_v53  ;;  %v4526_v53 = vsel %vm1029_vm3, %v10980_v7, 0.0 }
 0x3ed   :  { %v10967_v32 = vadd.f32 %v10849_v47, %v4095_v34 }
 0x3ee   :  { %13411 = vst [vmem:[#allocation22_spill] sm:$0xff] %v10977_v27  ;;  %v4523_v47 = vadd.f32 %v4522_v0, %v4521_v36  ;;  %v4524_v12 = vsel %vm1029_vm3, %v10977_v27, 0.0  ;;  %v10998_v36 = vmax.f32 %v10677_v58, 0.0 }
 0x3ef   :  { %13410 = vst [vmem:[#allocation9_spill] sm:$0xff] %v10967_v32 }
 0x3f0   :  { %v4525_v56 = vadd.f32 %v4524_v12, %v4523_v47 }
 0x3f4   :  { %v4099_v41 = vpop.f32.mrb[164].mxu1 }
 0x3f5   :  { %v4100_v34 = vadd.f32 %v10465_v52, %v4099_v41  ;;  %v4101_v62 = vpop.f32.mrb[165].mxu1  ;;  %v4527_v41 = vadd.f32 %v4526_v53, %v4525_v56  ;;  %v11025_v56 = vmax.f32 %v10717_v10, 0.0 }
 0x3f6   :  { %v4102_v38 = vpop.f32.mrb[166].mxu1 }
 0x3f7   :  { %v10986_v55 = vadd.f32 %v10843_v11, %v4100_v34  ;;  %v4103_v32 = vadd.f32 %v10465_v52, %v4102_v38  ;;  %v4104_v42 = vpop.f32.mrb[167].mxu1  ;;  %v4528_v11 = vsel %vm1029_vm3, %v10992_v28, 0.0  ;;  %v4530_v52 = vsel %vm1029_vm3, %v10998_v36, 0.0 }
 0x3f8   :  { %v11005_v34 = vmax.f32 %v10687_v25, 0.0  ;;  %v4529_v62 = vadd.f32 %v4528_v11, %v4527_v41  ;;  %v4534_v42 = vsel %vm1029_vm3, %v11008_v33, 0.0  ;;  %v11019_v25 = vmax.f32 %v10705_v3, 0.0 }
 0x3f9   :  { %v10995_v0 = vadd.f32 %v10847_v1, %v4103_v32  ;;  %v11028_v11 = vmax.f32 %v10861_v59, 0.0  ;;  %v4577_v3 = vsel %vm1029_vm3, %v11022_v18, 0.0  ;;  %v4538_v29 = vsel %vm1029_vm3, %v11025_v56, 0.0 }
 0x3fa   :  { %13413 = vst [vmem:[#allocation8_spill] sm:$0xff] %v11005_v34  ;;  %v4531_v1 = vadd.f32 %v4530_v52, %v4529_v62  ;;  %v4532_v58 = vsel %vm1029_vm3, %v11005_v34, 0.0  ;;  %v11031_v52 = vmax.f32 %v10869_v15, 0.0  ;;  %v4536_v62 = vsel %vm1029_vm3, %v11019_v25, 0.0 }
 0x3fb   :  { %13412 = vst [vmem:[#allocation12_spill] sm:$0xff] %v10995_v0  ;;  %13417 = vst [vmem:[#allocation14_spill] sm:$0xff] %v11028_v11  ;;  %v4576_v59 = vsel %vm1029_vm3, %v11028_v11, 0.0 }
 0x3fc   :  { %v4533_v53 = vadd.f32 %v4532_v58, %v4531_v1  ;;  %13418 = vst [vmem:[#allocation15_spill] sm:$0xff] %v11031_v52  ;;  %v11040_v1 = vmax.f32 %v10729_v4, 0.0  ;;  %v4579_v15 = vsel %vm1029_vm3, %v11031_v52, 0.0  ;;  %v11050_v58 = vmax.f32 %v10739_v63, 0.0 }
 0x3fd   :  { %v4648_v63 = vsel %vm1029_vm3, %v10919_v46, -inf  ;;  %v4649_v46 = vsel %vm1029_vm3, %v10916_v45, -inf }
 0x3fe   :  { %v4535_v41 = vadd.f32 %v4534_v42, %v4533_v53  ;;  %v11053_v53 = vmax.f32 %v10877_v50, 0.0  ;;  %v4542_v50 = vsel %vm1029_vm3, %v11050_v58, 0.0 }
 0x400   :  { %v11010_v47 = vpop.f32.mrb[168].mxu1  ;;  %v4537_v10 = vadd.f32 %v4536_v62, %v4535_v41  ;;  %13420 = vst [vmem:[#allocation10_spill] sm:$0xff] %v11053_v53  ;;  %v4540_v41 = vsel %vm1029_vm3, %v11040_v1, 0.0 }
 0x401   :  { %13414 = vst [vmem:[#allocation21_spill] sm:$0xff] %v11010_v47  ;;  %v4109_v32 = vpop.f32.mrb[169].mxu1 }
 0x402   :  { %v11014_v12 = vpop.f32.mrb[170].mxu1  ;;  %v11047_v32 = vmax.f32 %v10873_v16, 0.0  ;;  %v4539_v42 = vadd.f32 %v4538_v29, %v4537_v10  ;;  %v11070_v29 = vmax.f32 %v10745_v54, 0.0  ;;  %v11084_v54 = vmax.f32 %v10757_v35, 0.0 }
 0x403   :  { %13415 = vst [vmem:[#allocation24_spill] sm:$0xff] %v11014_v12  ;;  %v4112_v38 = vpop.f32.mrb[171].mxu1 }
 0x404   :  { %13419 = vst [vmem:[#allocation16_spill] sm:$0xff] %v11047_v32  ;;  %v4578_v38 = vadd.f32 %v4577_v3, %v4576_v59  ;;  %v4581_v47 = vsel %vm1029_vm3, %v11047_v32, 0.0  ;;  %v4650_v3 = vsel %vm1029_vm3, %v10922_v14, -inf  ;;  %13423 = vst [vmem:[#allocation28_spill] sm:$0xff] %v11070_v29  ;;  %v4541_v59 = vadd.f32 %v4540_v41, %v4539_v42 }
 0x405   :  { %v4654_v14 = vsel %vm1029_vm3, %v10942_v21, -inf  ;;  %v4656_v42 = vsel %vm1029_vm3, %v10949_v61, -inf  ;;  %v4658_v21 = vsel %vm1029_vm3, %v10952_v24, -inf }
 0x406   :  { %v4580_v62 = vadd.f32 %v4579_v15, %v4578_v38  ;;  %v4583_v15 = vsel %vm1029_vm3, %v11053_v53, 0.0  ;;  %v11077_v38 = vmax.f32 %v10881_v43, 0.0  ;;  %v4543_v41 = vadd.f32 %v4542_v50, %v4541_v59 }
 0x407   :  { %v11114_v59 = vmax.f32 %v10783_v8, 0.0  ;;  %v4668_v8 = vsel %vm1029_vm3, %v10992_v28, -inf }
 0x408   :  { %13424 = vst [vmem:[#allocation29_spill] sm:$0xff] %v11077_v38  ;;  %v4585_v35 = vsel %vm1029_vm3, %v11077_v38, 0.0 }
 0x40d   :  { %v11055_v4 = vpop.f32.mrb[172].mxu1 }
 0x40e   :  { %13421 = vst [vmem:[#allocation19_spill] sm:$0xff] %v11055_v4  ;;  %v4117_v12 = vpop.f32.mrb[173].mxu1  ;;  %v4544_v4 = vsel %vm1029_vm3, %v11070_v29, 0.0 }
 0x40f   :  { %v11061_v16 = vpop.f32.mrb[174].mxu1  ;;  %v4652_v12 = vsel %vm1029_vm3, %v10936_v57, -inf  ;;  %v11089_v57 = vmax.f32 %v10885_v22, 0.0  ;;  %v4546_v22 = vsel %vm1029_vm3, %v11084_v54, 0.0 }
 0x410   :  { %13422 = vst [vmem:[#allocation27_spill] sm:$0xff] %v11061_v16  ;;  %v4120_v10 = vpop.f32.mrb[175].mxu1  ;;  %v4651_v16 = vmax.f32 %v4648_v63, %v4650_v3  ;;  %v4653_v43 = vmax.f32 %v4649_v46, %v4652_v12  ;;  %v11102_v46 = vmax.f32 %v10769_v2, 0.0  ;;  %v4662_v63 = vsel %vm1029_vm3, %v10970_v9, -inf }
 0x411   :  { %v4582_v10 = vadd.f32 %v4581_v47, %v4580_v62  ;;  %13425 = vst [vmem:[#allocation30_spill] sm:$0xff] %v11089_v57  ;;  %v4660_v62 = vsel %vm1029_vm3, %v10964_v20, -inf  ;;  %v11109_v3 = vmax.f32 %v10889_v44, 0.0  ;;  %v4664_v12 = vsel %vm1029_vm3, %v10977_v27, -inf }
 0x412   :  { %v4655_v0 = vmax.f32 %v4651_v16, %v4654_v14  ;;  %v4657_v47 = vmax.f32 %v4653_v43, %v4656_v42  ;;  %v4545_v14 = vadd.f32 %v4544_v4, %v4543_v41  ;;  %v4587_v16 = vsel %vm1029_vm3, %v11089_v57, 0.0 }
 0x413   :  { %v4584_v45 = vadd.f32 %v4583_v15, %v4582_v10  ;;  %13426 = vst [vmem:[#allocation31_spill] sm:$0xff] %v11109_v3  ;;  %v4666_v10 = vsel %vm1029_vm3, %v10980_v7, -inf  ;;  %v11119_v4 = vmax.f32 %v10893_v30, 0.0  ;;  %v4670_v30 = vsel %vm1029_vm3, %v10998_v36, -inf }
 0x414   :  { %v4659_v50 = vmax.f32 %v4655_v0, %v4658_v21  ;;  %v4661_v2 = vmax.f32 %v4657_v47, %v4660_v62  ;;  %v4547_v42 = vadd.f32 %v4546_v22, %v4545_v14  ;;  %v4548_v21 = vsel %vm1029_vm3, %v11102_v46, 0.0 }
 0x415   :  { %v4586_v15 = vadd.f32 %v4585_v35, %v4584_v45  ;;  %13427 = vst [vmem:[#allocation32_spill] sm:$0xff] %v11119_v4  ;;  %v4589_v45 = vsel %vm1029_vm3, %v11109_v3, 0.0  ;;  %v4550_v62 = vsel %vm1029_vm3, %v11114_v59, 0.0  ;;  %v11136_v22 = vmax.f32 %v10795_v6, 0.0 }
 0x416   :  { %v4663_v44 = vmax.f32 %v4659_v50, %v4662_v63  ;;  %v4665_v27 = vmax.f32 %v4661_v2, %v4664_v12  ;;  %v4672_v14 = vsel %vm1029_vm3, %v11005_v34, -inf  ;;  %v4591_v50 = vsel %vm1029_vm3, %v11119_v4, 0.0 }
 0x417   :  { %v4588_v0 = vadd.f32 %v4587_v16, %v4586_v15  ;;  %13428 = vst [vmem:[#allocation33_spill] sm:$0xff] %v11136_v22  ;;  %v4549_v16 = vadd.f32 %v4548_v21, %v4547_v42  ;;  %v11143_v12 = vmax.f32 %v10897_v49, 0.0  ;;  %v4674_v2 = vsel %vm1029_vm3, %v11008_v33, -inf }
 0x418   :  { %v4667_v47 = vmax.f32 %v4663_v44, %v4666_v10  ;;  %v4669_v15 = vmax.f32 %v4665_v27, %v4668_v8  ;;  %v11148_v10 = vmax.f32 %v10807_v48, 0.0  ;;  %v11153_v42 = vmax.f32 %v10901_v60, 0.0 }
 0x419   :  { %v11121_v41 = vpop.f32.mrb[176].mxu1  ;;  %13429 = vst [vmem:[#allocation34_spill] sm:$0xff] %v11143_v12  ;;  %v4590_v6 = vadd.f32 %v4589_v45, %v4588_v0  ;;  %v4552_v49 = vsel %vm1029_vm3, %v11136_v22, 0.0  ;;  %v4678_v34 = vsel %vm1029_vm3, %v11025_v56, -inf  ;;  %v4593_v48 = vsel %vm1029_vm3, %v11143_v12, 0.0 }
 0x41a   :  { %v4125_v43 = vpop.f32.mrb[177].mxu1  ;;  %v4671_v44 = vmax.f32 %v4667_v47, %v4670_v30  ;;  %13430 = vst [vmem:[#allocation35_spill] sm:$0xff] %v11153_v42  ;;  %v4673_v21 = vmax.f32 %v4669_v15, %v4672_v14  ;;  %v4680_v45 = vsel %vm1029_vm3, %v11040_v1, -inf  ;;  %v4554_v60 = vsel %vm1029_vm3, %v11148_v10, 0.0 }
 0x41b   :  { %v11129_v35 = vpop.f32.mrb[178].mxu1  ;;  %v4676_v43 = vsel %vm1029_vm3, %v11019_v25, -inf  ;;  %v4592_v27 = vadd.f32 %v4591_v50, %v4590_v6  ;;  %v11166_v47 = vmax.f32 %v10815_v19, 0.0  ;;  %v4682_v30 = vsel %vm1029_vm3, %v11050_v58, -inf }
 0x41c   :  { %v4128_v63 = vpop.f32.mrb[179].mxu1  ;;  %v4675_v8 = vmax.f32 %v4671_v44, %v4674_v2  ;;  %v4677_v0 = vmax.f32 %v4673_v21, %v4676_v43  ;;  %v4595_v14 = vsel %vm1029_vm3, %v11153_v42, 0.0  ;;  %v4684_v15 = vsel %vm1029_vm3, %v11070_v29, -inf }
 0x41d   :  { %v4551_v63 = vadd.f32 %v4550_v62, %v4549_v16  ;;  %v11173_v16 = vmax.f32 %v10905_v31, 0.0  ;;  %v11178_v2 = vmax.f32 %v10827_v51, 0.0  ;;  %v4594_v6 = vadd.f32 %v4593_v48, %v4592_v27 }
 0x41e   :  { %v4679_v50 = vmax.f32 %v4675_v8, %v4678_v34  ;;  %v4681_v19 = vmax.f32 %v4677_v0, %v4680_v45  ;;  %v4686_v44 = vsel %vm1029_vm3, %v11084_v54, -inf  ;;  %v4556_v34 = vsel %vm1029_vm3, %v11166_v47, 0.0 }
 0x41f   :  { %v4553_v62 = vadd.f32 %v4552_v49, %v4551_v63  ;;  %13431 = vst [vmem:[#allocation36_spill] sm:$0xff] %v11173_v16  ;;  %v11183_v63 = vmax.f32 %v10909_v26, 0.0  ;;  %v4596_v49 = vadd.f32 %v4595_v14, %v4594_v6  ;;  %v4688_v51 = vsel %vm1029_vm3, %v11102_v46, -inf }
 0x420   :  { %v4683_v31 = vmax.f32 %v4679_v50, %v4682_v30  ;;  %v4685_v29 = vmax.f32 %v4681_v19, %v4684_v15  ;;  %v4597_v27 = vsel %vm1029_vm3, %v11173_v16, 0.0  ;;  %v4690_v26 = vsel %vm1029_vm3, %v11114_v59, -inf }
 0x421   :  { %v4555_v43 = vadd.f32 %v4554_v60, %v4553_v62  ;;  %13432 = vst [vmem:[#allocation37_spill] sm:$0xff] %v11183_v63  ;;  %v4558_v45 = vsel %vm1029_vm3, %v11178_v2, 0.0  ;;  %v11200_v60 = vmax.f32 %v10831_v13, 0.0  ;;  %v4692_v62 = vsel %vm1029_vm3, %v11136_v22, -inf }
 0x422   :  { %v4687_v0 = vmax.f32 %v4683_v31, %v4686_v44  ;;  %v4599_v50 = vsel %vm1029_vm3, %v11183_v63, 0.0  ;;  %v11207_v15 = vmax.f32 %v10913_v17, 0.0  ;;  %v4689_v6 = vmax.f32 %v4685_v29, %v4688_v51 }
 0x423   :  { %13433 = vst [vmem:[#allocation38_spill] sm:$0xff] %v11200_v60  ;;  %v4557_v14 = vadd.f32 %v4556_v34, %v4555_v43  ;;  %v4694_v19 = vsel %vm1029_vm3, %v11148_v10, -inf  ;;  %v11212_v44 = vmax.f32 %v10837_v23, 0.0  ;;  %v4598_v13 = vadd.f32 %v4597_v27, %v4596_v49 }
 0x424   :  { %13434 = vst [vmem:[#allocation39_spill] sm:$0xff] %v11207_v15  ;;  %v4691_v31 = vmax.f32 %v4687_v0, %v4690_v26  ;;  %v11217_v43 = vmax.f32 %v10928_v37, 0.0  ;;  %v4693_v34 = vmax.f32 %v4689_v6, %v4692_v62  ;;  %v4698_v17 = vsel %vm1029_vm3, %v11178_v2, -inf }
 0x425   :  { %v11185_v21 = vpop.f32.mrb[180].mxu1  ;;  %v4560_v29 = vsel %vm1029_vm3, %v11200_v60, 0.0  ;;  %v4600_v51 = vadd.f32 %v4599_v50, %v4598_v13  ;;  %v4700_v23 = vsel %vm1029_vm3, %v11200_v60, -inf  ;;  %v4601_v49 = vsel %vm1029_vm3, %v11207_v15, 0.0 }
 0x426   :  { %v4133_v8 = vpop.f32.mrb[181].mxu1  ;;  %13435 = vst [vmem:[#allocation40_spill] sm:$0xff] %v11217_v43  ;;  %v4695_v22 = vmax.f32 %v4691_v31, %v4694_v19  ;;  %v4562_v37 = vsel %vm1029_vm3, %v11212_v44, 0.0  ;;  %v4702_v26 = vsel %vm1029_vm3, %v11212_v44, -inf  ;;  %v4603_v50 = vsel %vm1029_vm3, %v11217_v43, 0.0 }
 0x427   :  { %v11193_v48 = vpop.f32.mrb[182].mxu1  ;;  %v4696_v8 = vsel %vm1029_vm3, %v11166_v47, -inf  ;;  %v11236_v6 = vmax.f32 %v10939_v39, 0.0  ;;  %v11241_v31 = vmax.f32 %v10841_v40, 0.0  ;;  %v11250_v39 = vmax.f32 %v10958_v5, 0.0 }
 0x428   :  { %v4136_v30 = vpop.f32.mrb[183].mxu1  ;;  %v4697_v0 = vmax.f32 %v4693_v34, %v4696_v8  ;;  %v4699_v62 = vmax.f32 %v4695_v22, %v4698_v17  ;;  %v4719_v8 = vsel %vm1029_vm3, %v11031_v52, -inf  ;;  %v4602_v34 = vadd.f32 %v4601_v49, %v4600_v51  ;;  %v13439_v17 = vld [vmem:[#allocation25_spill] sm:$0xff] }
 0x429   :  { %v4559_v30 = vadd.f32 %v4558_v45, %v4557_v14  ;;  %13436 = vst [vmem:[#allocation41_spill] sm:$0xff] %v11236_v6  ;;  %13437 = vst [vmem:[#allocation42_spill] sm:$0xff] %v11241_v31  ;;  %v4717_v40 = vsel %vm1029_vm3, %v11028_v11, -inf  ;;  %v4605_v5 = vsel %vm1029_vm3, %v11236_v6, 0.0 }
 0x42a   :  { %v4701_v13 = vmax.f32 %v4697_v0, %v4700_v23  ;;  %v11245_v22 = vmax.f32 %v4699_v62, %v4702_v26  ;;  %13438 = vst [vmem:[#allocation43_spill] sm:$0xff] %v11250_v39  ;;  %v4723_v23 = vsel %vm1029_vm3, %v11053_v53, -inf  ;;  %v4604_v51 = vadd.f32 %v4603_v50, %v4602_v34 }
 0x42b   :  { %v4561_v14 = vadd.f32 %v4560_v29, %v4559_v30  ;;  %v4721_v30 = vsel %vm1029_vm3, %v11047_v32, -inf  ;;  %v11253_v29 = vmax.f32 %v13439_v17, 0.0  ;;  %v4720_v49 = vmax.f32 %v4717_v40, %v4719_v8  ;;  %v13440_v17 = vld [vmem:[#allocation9_spill] sm:$0xff] }
 0x42c   :  { %v4725_v0 = vsel %vm1029_vm3, %v11077_v38, -inf  ;;  %v4704_v26 = vsel %vm1029_vm3, %v11241_v31, -inf  ;;  %v4729_v8 = vsel %vm1029_vm3, %v11109_v3, -inf  ;;  %v4607_v34 = vsel %vm1029_vm3, %v11250_v39, 0.0 }
 0x42d   :  { %v11227_v27 = vpop.f32.mrb[184].mxu1  ;;  %v4724_v50 = vmax.f32 %v4720_v49, %v4723_v23  ;;  %v11276_v40 = vmax.f32 %v13440_v17, 0.0  ;;  %v4566_v32 = vsel %vm1029_vm3, %v11253_v29, 0.0  ;;  %v13441_v49 = vld [vmem:[#allocation26_spill] sm:$0xff]  ;;  %v4733_v53 = vsel %vm1029_vm3, %v11143_v12, -inf }
 0x42e   :  { %v4141_v45 = vpop.f32.mrb[185].mxu1  ;;  %v11290_v17 = vmax.f32 %v10986_v55, 0.0 }
 0x42f   :  { %v11238_v19 = vpop.f32.mrb[186].mxu1  ;;  %v4563_v45 = vadd.f32 %v4562_v37, %v4561_v14  ;;  %v4564_v37 = vsel %vm1029_vm3, %v11241_v31, 0.0  ;;  %v4727_v14 = vsel %vm1029_vm3, %v11089_v57, -inf  ;;  %v11285_v57 = vmax.f32 %v13441_v49, 0.0 }
 0x430   :  { %v4144_v60 = vpop.f32.mrb[187].mxu1  ;;  %v4728_v3 = vmax.f32 %v4724_v50, %v4727_v14  ;;  %v4737_v14 = vsel %vm1029_vm3, %v11173_v16, -inf  ;;  %v4609_v50 = vsel %vm1029_vm3, %v11276_v40, 0.0  ;;  %v11304_v49 = vsel %vm1029_vm3, %v11253_v29, -inf }
 0x431   :  { %v4718_v60 = vsel %vm1029_vm3, %v11022_v18, -inf  ;;  %13442 = vst [vmem:[#allocation25_spill] sm:$0xff] %v11285_v57  ;;  %v4565_v11 = vadd.f32 %v4564_v37, %v4563_v45  ;;  %v4739_v45 = vsel %vm1029_vm3, %v11183_v63, -inf }
 0x432   :  { %v4722_v62 = vmax.f32 %v4718_v60, %v4721_v30  ;;  %v4731_v30 = vsel %vm1029_vm3, %v11119_v4, -inf  ;;  %v4606_v60 = vadd.f32 %v4605_v5, %v4604_v51  ;;  %v11296_v5 = vmax.f32 %v4701_v13, %v4704_v26  ;;  %v13443_v26 = vld [vmem:[#allocation12_spill] sm:$0xff] }
 0x433   :  { %v4567_v55 = vadd.f32 %v4566_v32, %v4565_v11  ;;  %v4568_v13 = vsel %vm1029_vm3, %v11285_v57, 0.0  ;;  %v11317_v11 = vsel %vm1029_vm3, %v11285_v57, -inf }
 0x434   :  { %v4726_v18 = vmax.f32 %v4722_v62, %v4725_v0  ;;  %v4735_v0 = vsel %vm1029_vm3, %v11153_v42, -inf  ;;  %v4608_v62 = vadd.f32 %v4607_v34, %v4606_v60 }
 0x435   :  { %v11278_v38 = vpop.f32.mrb[188].mxu1 }
 0x436   :  { %v4149_v23 = vpop.f32.mrb[189].mxu1  ;;  %v4730_v31 = vmax.f32 %v4726_v18, %v4729_v8  ;;  %v11313_v8 = vmax.f32 %v13443_v26, 0.0  ;;  %v4610_v34 = vadd.f32 %v4609_v50, %v4608_v62  ;;  %v4745_v62 = vsel %vm1029_vm3, %v11236_v6, -inf }
 0x437   :  { %v11292_v52 = vpop.f32.mrb[190].mxu1  ;;  %v4732_v23 = vmax.f32 %v4728_v3, %v4731_v30  ;;  %v4611_v3 = vsel %vm1029_vm3, %v11290_v17, 0.0  ;;  %v4707_v6 = vmax.f32 %v11245_v22, %v11304_v49 }
 0x438   :  { %v4152_v51 = vpop.f32.mrb[191].mxu1  ;;  %v4734_v18 = vmax.f32 %v4730_v31, %v4733_v53  ;;  %v11322_v53 = vld [vmem:[%s13149_s4] ss:$0 sm:$0xff]  ;;  %v13444_v31 = vld [vmem:[#allocation19_spill] sm:$0xff]  ;;  %v4612_v50 = vadd.f32 %v4611_v3, %v4610_v34  ;;  %s7215_s4 = sshll.u32 %s7747_s18, 4  ;;  %s7216_s4 = int_to_ptr.vmem [resolvable:$true] %s7215_s4 }
 0x439   :  { %v4736_v37 = vmax.f32 %v4732_v23, %v4735_v0  ;;  %v4116_v30 = vadd.f32 %v11322_v53, %v13444_v31  ;;  %v4741_v0 = vsel %vm1029_vm3, %v11207_v15, -inf  ;;  %v4743_v51 = vsel %vm1029_vm3, %v11217_v43, -inf  ;;  %v13445_v23 = vld [vmem:[#allocation21_spill] sm:$0xff]  ;;  %v13447_v15 = vld [vmem:[#allocation24_spill] sm:$0xff]  ;;  %s7712_s19 = scalar_lea.vmem %s7216_s4, 8192  ;;  %p7717_p6 = scmp.lt.s32.totalorder %s7216_s4, %s7216_s4 }
 0x43a   :  { %v4738_v32 = vmax.f32 %v4734_v18, %v4737_v14  ;;  %v4108_v26 = vadd.f32 %v11322_v53, %v13445_v23  ;;  %v13446_v18 = vld [vmem:[#allocation27_spill] sm:$0xff]  ;;  %v4111_v43 = vadd.f32 %v11322_v53, %v13447_v15  ;;  %v4709_v15 = vmax.f32 %v11296_v5, %v11317_v11  ;;  %p7713_p5 = scmp.ne.s32.totalorder %s7216_s4, %s7712_s19  ;;  %p7718_p7 = scmp.lt.s32.totalorder %s7712_s19, %s7712_s19 }
 0x43b   :  { %v4740_v60 = vmax.f32 %v4736_v37, %v4739_v45  ;;  %v4119_v16 = vadd.f32 %v11322_v53, %v13446_v18  ;;  %v4747_v45 = vsel %vm1029_vm3, %v11250_v39, -inf  ;;  %v4613_v37 = vsel %vm1029_vm3, %v11313_v8, 0.0 }
 0x43c   :  { %v4742_v3 = vmax.f32 %v4738_v32, %v4741_v0  ;;  %v4614_v57 = vadd.f32 %v4613_v37, %v4612_v50  ;;  %v4751_v32 = vsel %vm1029_vm3, %v11290_v17, -inf  ;;  %v4132_v5 = vadd.f32 %v11322_v53, %v11185_v21  ;;  %p7719_p8 = por %p7718_p7, %p7717_p6 }
 0x43d   :  { %v7581_v14 = vpop.f32.mrb[192].mxu1  ;;  %v4744_v34 = vmax.f32 %v4740_v60, %v4743_v51  ;;  %v4124_v11 = vadd.f32 %v11322_v53, %v11121_v41 }
 0x43e   :  { %v4405_v12 = vadd.f32 %v7581_v14, %v4116_v30  ;;  %v4396_v31 = vpop.f32.mrb[193].mxu1  ;;  %v11344_v30 = vadd.f32 %v4568_v13, %v4567_v55  ;;  %v4749_v14 = vsel %vm1029_vm3, %v11276_v40, -inf  ;;  %p7720_p9 = pnand %p7719_p8, %p7713_p5 }
 0x43f   :  { %v4397_v23 = vadd.f32 %v4396_v31, %v4108_v26  ;;  %v7582_v63 = vpop.f32.mrb[194].mxu1  ;;  %v4746_v26 = vmax.f32 %v4742_v3, %v4745_v62  ;;  %v4748_v31 = vmax.f32 %v4744_v34, %v4747_v45  ;;  %v4135_v62 = vadd.f32 %v11322_v53, %v11193_v48 }
 0x440   :  { %v4408_v42 = vadd.f32 %v7582_v63, %v4119_v16  ;;  %v4399_v18 = vpop.f32.mrb[195].mxu1  ;;  %v11354_v60 = vmax.f32 %v4405_v12, 0.0 }
 0x441   :  { %v11348_v39 = vmax.f32 %v4397_v23, 0.0  ;;  %v4400_v4 = vadd.f32 %v4399_v18, %v4111_v43  ;;  %v4750_v55 = vmax.f32 %v4746_v26, %v4749_v14  ;;  %v4753_v43 = vsel %vm1029_vm3, %v11313_v8, -inf }
 0x442   :  { %v11368_v0 = vmax.f32 %v4408_v42, 0.0  ;;  %v4752_v50 = vmax.f32 %v4748_v31, %v4751_v32  ;;  %v4619_v41 = vsel %vm1029_vm3, %v11354_v60, 0.0  ;;  %v4570_v31 = vrot.slane %v11344_v30, 4 }
 0x443   :  { %v4615_v16 = vsel %vm1029_vm3, %v11348_v39, 0.0  ;;  %v11358_v63 = vmax.f32 %v4400_v4, 0.0  ;;  %v4755_v12 = vsel %vm1029_vm3, %v11348_v39, -inf  ;;  %v4754_v14 = vmax.f32 %v4750_v55, %v4753_v43 }
 0x444   :  { %v4616_v13 = vadd.f32 %v4615_v16, %v4614_v57  ;;  %v4127_v57 = vadd.f32 %v11322_v53, %v11129_v35  ;;  %v4756_v34 = vmax.f32 %v4752_v50, %v4755_v12  ;;  %v4621_v32 = vsel %vm1029_vm3, %v11368_v0, 0.0 }
 0x445   :  { %v4617_v4 = vsel %vm1029_vm3, %v11358_v63, 0.0  ;;  %v7585_v51 = vpop.f32.mrb[196].mxu1  ;;  %v4757_v42 = vsel %vm1029_vm3, %v11358_v63, -inf }
 0x446   :  { %v4618_v45 = vadd.f32 %v4617_v4, %v4616_v13  ;;  %v4421_v37 = vadd.f32 %v7585_v51, %v4132_v5  ;;  %v4412_v21 = vpop.f32.mrb[197].mxu1  ;;  %v4140_v5 = vadd.f32 %v11322_v53, %v11227_v27  ;;  %v4759_v13 = vsel %vm1029_vm3, %v11354_v60, -inf }
 0x447   :  { %v4413_v23 = vadd.f32 %v4412_v21, %v4124_v11  ;;  %v7586_v3 = vpop.f32.mrb[198].mxu1  ;;  %v4758_v11 = vmax.f32 %v4754_v14, %v4757_v42  ;;  %v4151_v27 = vadd.f32 %v11322_v53, %v11292_v52  ;;  %v4710_v52 = vmax.f32 %v4707_v6, %v4709_v15 }
 0x448   :  { %v4620_v18 = vadd.f32 %v4619_v41, %v4618_v45  ;;  %v4424_v26 = vadd.f32 %v7586_v3, %v4135_v62  ;;  %v4415_v48 = vpop.f32.mrb[199].mxu1  ;;  %v11389_v4 = vmax.f32 %v4421_v37, 0.0  ;;  %v4148_v62 = vadd.f32 %v11322_v53, %v11278_v38 }
 0x449   :  { %v11383_v16 = vmax.f32 %v4413_v23, 0.0  ;;  %v4416_v35 = vadd.f32 %v4415_v48, %v4127_v57  ;;  %v4760_v45 = vmax.f32 %v4756_v34, %v4759_v13  ;;  %v4761_v37 = vsel %vm1029_vm3, %v11368_v0, -inf }
 0x44a   :  { %v4622_v12 = vadd.f32 %v4621_v32, %v4620_v18  ;;  %v11403_v21 = vmax.f32 %v4424_v26, 0.0  ;;  %v4762_v38 = vmax.f32 %v4758_v11, %v4761_v37  ;;  %v4143_v34 = vadd.f32 %v11322_v53, %v11238_v19 }
 0x44b   :  { %v4623_v55 = vsel %vm1029_vm3, %v11383_v16, 0.0  ;;  %v4763_v43 = vsel %vm1029_vm3, %v11383_v16, -inf  ;;  %v11395_v51 = vmax.f32 %v4416_v35, 0.0  ;;  %v4627_v26 = vsel %vm1029_vm3, %v11389_v4, 0.0 }
 0x44c   :  { %v4624_v50 = vadd.f32 %v4623_v55, %v4622_v12  ;;  %v4764_v23 = vmax.f32 %v4760_v45, %v4763_v43  ;;  %v4571_v35 = vadd.f32 %v4570_v31, %v11344_v30  ;;  %v4767_v43 = vsel %vm1029_vm3, %v11389_v4, -inf }
 0x44d   :  { %v4625_v57 = vsel %vm1029_vm3, %v11395_v51, 0.0  ;;  %v4765_v41 = vsel %vm1029_vm3, %v11395_v51, -inf  ;;  %v7589_v42 = vpop.f32.mrb[200].mxu1  ;;  %v4629_v6 = vsel %vm1029_vm3, %v11403_v21, 0.0  ;;  %v4769_v49 = vsel %vm1029_vm3, %v11403_v21, -inf }
 0x44e   :  { %v4626_v3 = vadd.f32 %v4625_v57, %v4624_v50  ;;  %v4437_v18 = vadd.f32 %v7589_v42, %v4148_v62  ;;  %v4428_v14 = vpop.f32.mrb[201].mxu1  ;;  %v4766_v12 = vmax.f32 %v4762_v38, %v4765_v41  ;;  %v4768_v30 = vmax.f32 %v4764_v23, %v4767_v43 }
 0x44f   :  { %v4429_v48 = vadd.f32 %v4428_v14, %v4140_v5  ;;  %v7590_v32 = vpop.f32.mrb[202].mxu1  ;;  %v4711_v50 = vrot.slane %v4710_v52, 4  ;;  %v4572_v38 = vrot.slane %v4571_v35, 2 }
 0x450   :  { %v4628_v13 = vadd.f32 %v4627_v26, %v4626_v3  ;;  %v4440_v55 = vadd.f32 %v7590_v32, %v4151_v27  ;;  %v4431_v11 = vpop.f32.mrb[203].mxu1  ;;  %v11425_v53 = vmax.f32 %v4437_v18, 0.0  ;;  %v4770_v57 = vmax.f32 %v4766_v12, %v4769_v49 }
 0x451   :  { %v11421_v22 = vmax.f32 %v4429_v48, 0.0  ;;  %v4432_v19 = vadd.f32 %v4431_v11, %v4143_v34  ;;  %v4712_v26 = vmax.f32 %v4710_v52, %v4711_v50  ;;  %v4573_v43 = vadd.f32 %v4572_v38, %v4571_v35 }
 0x452   :  { %v4630_v15 = vadd.f32 %v4629_v6, %v4628_v13  ;;  %v11431_v62 = vmax.f32 %v4440_v55, 0.0  ;;  %v4635_v18 = vsel %vm1029_vm3, %v11425_v53, 0.0  ;;  %v4775_v14 = vsel %vm1029_vm3, %v11425_v53, -inf }
 0x453   :  { %v4631_v31 = vsel %vm1029_vm3, %v11421_v22, 0.0  ;;  %v4771_v5 = vsel %vm1029_vm3, %v11421_v22, -inf  ;;  %v11433_v27 = vmax.f32 %v4432_v19, 0.0  ;;  %v4713_v6 = vrot.slane %v4712_v26, 2 }
 0x454   :  { %v4632_v45 = vadd.f32 %v4631_v31, %v4630_v15  ;;  %v4772_v37 = vmax.f32 %v4768_v30, %v4771_v5  ;;  %v4777_v34 = vsel %vm1029_vm3, %v11431_v62, -inf  ;;  %v4637_v12 = vsel %vm1029_vm3, %v11431_v62, 0.0 }
 0x455   :  { %v4633_v41 = vsel %vm1029_vm3, %v11433_v27, 0.0  ;;  %v4773_v42 = vsel %vm1029_vm3, %v11433_v27, -inf }
 0x456   :  { %v4634_v23 = vadd.f32 %v4633_v41, %v4632_v45  ;;  %v4774_v3 = vmax.f32 %v4770_v57, %v4773_v42  ;;  %v4776_v48 = vmax.f32 %v4772_v37, %v4775_v14  ;;  %v4574_v45 = vrot.slane %v4573_v43, 1 }
 0x457   :  { %v4714_v57 = vmax.f32 %v4712_v26, %v4713_v6  ;;  %v7361_v26 = vld [vmem:[%s13150_s5] ss:$0 sm:$0xff]  ;;  %v7364_v6 = vld [vmem:[%s13151_s6 + $0x1] ss:$0 sm:$0xff] }
 0x458   :  { %v4636_v32 = vadd.f32 %v4635_v18, %v4634_v23  ;;  %v4778_v13 = vmax.f32 %v4774_v3, %v4777_v34  ;;  %v4575_v50 = vadd.f32 %v4574_v45, %v4573_v43  ;;  %v7363_v34 = vld [vmem:[%s13150_s5 + $0x1] ss:$0 sm:$0xff]  ;;  %s7744_s5 = smov 1  }
 0x459   :  { %v4715_v42 = vrot.slane %v4714_v57, 1 }
 0x45a   :  { %v4638_v55 = vadd.f32 %v4637_v12, %v4636_v32  ;;  %v4779_v11 = vmax.f32 %v4776_v48, %v4778_v13  ;;  %v4646_v35 = vmul.f32 0.00390625, %v4575_v50 }
 0x45b   :  { %v4716_v14 = vmax.f32 %v4714_v57, %v4715_v42 }
 0x45c   :  { %v4639_v19 = vrot.slane %v4638_v55, 4  ;;  %v4780_v49 = vrot.slane %v4779_v11, 4 }
 0x45e   :  { %v4640_v15 = vadd.f32 %v4639_v19, %v4638_v55  ;;  %v4781_v30 = vmax.f32 %v4779_v11, %v4780_v49  ;;  %v7362_v49 = vld [vmem:[%s13151_s6] ss:$0 sm:$0xff]  ;;  %s12324_s6 = sld [smem:[#allocation2 + $0x4]] }
 0x460   :  { %v4641_v31 = vrot.slane %v4640_v15, 2  ;;  %v4782_v5 = vrot.slane %v4781_v30, 2 }
 0x462   :  { %v4642_v41 = vadd.f32 %v4641_v31, %v4640_v15  ;;  %v4783_v52 = vmax.f32 %v4781_v30, %v4782_v5 }
 0x464   :  { %v4643_v37 = vrot.slane %v4642_v41, 1  ;;  %v4784_v23 = vrot.slane %v4783_v52, 1 }
 0x466   :  { %v4644_v3 = vadd.f32 %v4643_v37, %v4642_v41  ;;  %v4785_v18 = vmax.f32 %v4783_v52, %v4784_v23  ;;  %v7743_v23 = vmov 1966171168  }
 0x468   :  { %v4647_v38 = vmul.f32 0.00390625, %v4644_v3  ;;  %v4794_v32 = vsel %vm4793_vm7, %v4785_v18, %v4716_v14  ;;  %v4845_v3 = vunpack.c.l.s4 %v7743_v23  ;;  %v13222_v18 = vlaneseq }
 0x46a   :  { %v4789_v48 = vsel %vm4788_vm6, %v4647_v38, %v4646_v35  ;;  %v4846_v35 = vunpack.c.0.s8 %v4845_v3  ;;  %v11462_v38 = vshrl.u32 %v13222_v18, 7 }
 0x46b   :  { %v4797_v13 = vsel %vm4796_vm8, %v4789_v48, %v4794_v32 }
 0x46c   :  { %v4821_v12 = vmul.f32 %v7363_v34, %v4797_v13  ;;  %v4803_v55 = vmul.f32 %v7361_v26, %v4797_v13  ;;  %13448 = vst [vmem:[#allocation9_spill] sm:$0xff] %v11462_v38  ;;  %v4849_v14 = vsub.s32 %v4846_v35, %v11462_v38  ;;  %v11466_v26 = vsub.s32 0, %v11462_v38 }
 0x46e   :  { %v4822_v11 = vsel %vm4804_vm9, %v4821_v12, 0.0  ;;  %v4805_v43 = vsel %vm4804_vm9, %v4803_v55, 0.0  ;;  %13449 = vst [vmem:[#allocation26_spill] sm:$0xff] %v11466_v26 }
 0x46f   :  { %4823 = vadd.xlane.f32.xlu1 %v4822_v11  ;;  %4806 = vadd.xlane.f32.xlu0 %v4805_v43  ;;  %v13450_v11 = vld [vmem:[#allocation20_spill] sm:$0xff] }
 0x4fc   :  { %v4824_v19 = vpop.xlane.xlu1 %4823  ;;  %v4807_v15 = vpop.xlane.xlu0 %4806 }
 0x4fd   :  { %v4825_v30 = vmax.f32 %v4824_v19, 0.0  ;;  %v4808_v31 = vmax.f32 %v4807_v15, 0.0 }
 0x4ff   :  { %v4831_v5 = vmul.f32 %v7364_v6, %v4825_v30  ;;  %v4814_v45 = vmul.f32 %v7362_v49, %v4808_v31  ;;  %v13452_v6 = vld [vmem:[#allocation11_spill] sm:$0xff]  ;;  %v13454_v30 = vld [vmem:[#allocation13_spill] sm:$0xff] }
 0x501   :  { %v4832_v57 = vadd.f32 %v4831_v5, %v4814_v45  ;;  %v13456_v5 = vld [vmem:[#allocation17_spill] sm:$0xff] }
 0x503   :  { %v4834_v41 = vrot.slane %v4832_v57, 2 }
 0x505   :  { %v4836_v52 = vadd.f32 %v4834_v41, %v4832_v57 }
 0x507   :  { %v7365_v50 = vmul.f32 -1.442695, %v4836_v52 }
 0x509   :  { %7675 = vpow2.f32 %v7365_v50  ;;  %v13459_v50 = vld [vmem:[#allocation18_spill] sm:$0xff] }
 0x513   :  { %v7676_v37 = vpop.eup %7675 }
 0x514   :  { %v4840_v42 = vadd.f32 1.0, %v7676_v37 }
 0x516   :  { %7677 = vrcp.f32 %v4840_v42 }
 0x520   :  { %v7678_v34 = vpop.eup %7677 }
 0x521   :  { %v4850_v48 = vrot.slane %v7678_v34, %v4849_v14 }
 0x523   :  { %v4851_v32 = vcombine.high %v4850_v48, %v4850_v48  ;;  %v4858_v13 = vrot.slane %v4850_v48, %v4849_v14 }
 0x525   :  { %v11468_v12 = vrot.slane %v4851_v32, %v4849_v14  ;;  %v11471_v55 = vrot.slane %v4858_v13, %v11466_v26  ;;  %v13466_v13 = vld [vmem:[#allocation22_spill] sm:$0xff] }
 0x527   :  { %v11475_v43 = vmul.f32 %v11471_v55, %v13450_v11  ;;  %v11479_v19 = vmul.f32 %v11471_v55, %v13452_v6  ;;  %v11487_v31 = vmul.f32 %v11471_v55, %v13454_v30  ;;  %v11491_v45 = vmul.f32 %v11471_v55, %v13456_v5  ;;  %v13471_v5 = vld [vmem:[#allocation8_spill] sm:$0xff] }
 0x528   :  { %v11499_v52 = vmul.f32 %v11471_v55, %v10952_v24  ;;  %v11503_v37 = vmul.f32 %v11471_v55, %v13459_v50  ;;  %v11511_v3 = vmul.f32 %v11471_v55, %v10970_v9  ;;  %v11515_v24 = vmul.f32 %v11471_v55, %v10949_v61 }
 0x529   :  { %13451 = vst [vmem:[#allocation12_spill] sm:$0xff] %v11475_v43  ;;  %13453 = vst [vmem:[#allocation19_spill] sm:$0xff] %v11479_v19  ;;  %v4946_v49 = vsel %vm1029_vm3, %v11475_v43, 0.0  ;;  %v4940_v15 = vsel %vm1029_vm3, %v11479_v19, 0.0  ;;  %v4952_v57 = vsel %vm1029_vm3, %v11487_v31, 0.0  ;;  %v4943_v41 = vsel %vm1029_vm3, %v11491_v45, 0.0 }
 0x52a   :  { %13455 = vst [vmem:[#allocation21_spill] sm:$0xff] %v11487_v31  ;;  %13457 = vst [vmem:[#allocation27_spill] sm:$0xff] %v11491_v45  ;;  %4947 = vadd.xlane.f32.xlu1 %v4946_v49  ;;  %4941 = vadd.xlane.f32.xlu0 %v4940_v15  ;;  %v4958_v42 = vsel %vm1029_vm3, %v11499_v52, 0.0  ;;  %v4949_v23 = vsel %vm1029_vm3, %v11503_v37, 0.0  ;;  %v4964_v35 = vsel %vm1029_vm3, %v11511_v3, 0.0  ;;  %v4955_v14 = vsel %vm1029_vm3, %v11515_v24, 0.0 }
 0x52b   :  { %13458 = vst [vmem:[#allocation24_spill] sm:$0xff] %v11499_v52  ;;  %13460 = vst [vmem:[#allocation20_spill] sm:$0xff] %v11503_v37  ;;  %v11523_v34 = vmul.f32 %v11471_v55, %v10980_v7  ;;  %v11527_v9 = vmul.f32 %v11471_v55, %v10964_v20  ;;  %v11535_v32 = vmul.f32 %v11471_v55, %v10998_v36 }
 0x52c   :  { %13461 = vst [vmem:[#allocation11_spill] sm:$0xff] %v11511_v3  ;;  %13462 = vst [vmem:[#allocation13_spill] sm:$0xff] %v11515_v24  ;;  %v11539_v7 = vmul.f32 %v11471_v55, %v13466_v13  ;;  %v11547_v6 = vmul.f32 %v11471_v55, %v11008_v33  ;;  %v11551_v36 = vmul.f32 %v11471_v55, %v10992_v28 }
 0x52d   :  { %13463 = vst [vmem:[#allocation17_spill] sm:$0xff] %v11523_v34  ;;  %13464 = vst [vmem:[#allocation18_spill] sm:$0xff] %v11527_v9  ;;  %v4970_v61 = vsel %vm1029_vm3, %v11523_v34, 0.0  ;;  %v4961_v48 = vsel %vm1029_vm3, %v11527_v9, 0.0  ;;  %v4976_v20 = vsel %vm1029_vm3, %v11535_v32, 0.0  ;;  %v11559_v30 = vmul.f32 %v11471_v55, %v11025_v56 }
 0x52e   :  { %4953 = vadd.xlane.f32.xlu1 %v4952_v57  ;;  %4944 = vadd.xlane.f32.xlu0 %v4943_v41  ;;  %13465 = vst [vmem:[#allocation44_spill] sm:$0xff] %v11535_v32  ;;  %13467 = vst [vmem:[#allocation22_spill] sm:$0xff] %v11539_v7  ;;  %v4967_v11 = vsel %vm1029_vm3, %v11539_v7, 0.0  ;;  %v4982_v49 = vsel %vm1029_vm3, %v11547_v6, 0.0  ;;  %v4973_v15 = vsel %vm1029_vm3, %v11551_v36, 0.0  ;;  %v11563_v33 = vmul.f32 %v11471_v55, %v13471_v5 }
 0x52f   :  { %13468 = vst [vmem:[#allocation45_spill] sm:$0xff] %v11547_v6  ;;  %13469 = vst [vmem:[#allocation46_spill] sm:$0xff] %v11551_v36  ;;  %v4988_v28 = vsel %vm1029_vm3, %v11559_v30, 0.0  ;;  %v11571_v41 = vmul.f32 %v11471_v55, %v11050_v58  ;;  %v11575_v56 = vmul.f32 %v11471_v55, %v11019_v25  ;;  %v11587_v58 = vmul.f32 %v11471_v55, %v11040_v1 }
 0x530   :  { %13470 = vst [vmem:[#allocation47_spill] sm:$0xff] %v11559_v30  ;;  %13472 = vst [vmem:[#allocation8_spill] sm:$0xff] %v11563_v33  ;;  %v4979_v57 = vsel %vm1029_vm3, %v11563_v33, 0.0  ;;  %v11607_v13 = vmul.f32 %v11471_v55, %v11148_v10 }
 0x531   :  { %13473 = vst [vmem:[#allocation48_spill] sm:$0xff] %v11571_v41  ;;  %13474 = vst [vmem:[#allocation49_spill] sm:$0xff] %v11575_v56  ;;  %v4994_v50 = vsel %vm1029_vm3, %v11571_v41, 0.0 }
 0x532   :  { %4959 = vadd.xlane.f32.xlu1 %v4958_v42  ;;  %4950 = vadd.xlane.f32.xlu0 %v4949_v23  ;;  %v4985_v42 = vsel %vm1029_vm3, %v11575_v56, 0.0  ;;  %v11583_v23 = vmul.f32 %v11471_v55, %v11084_v54  ;;  %13476 = vst [vmem:[#allocation51_spill] sm:$0xff] %v11587_v58  ;;  %13480 = vst [vmem:[#allocation53_spill] sm:$0xff] %v11607_v13 }
 0x534   :  { %13475 = vst [vmem:[#allocation50_spill] sm:$0xff] %v11583_v23  ;;  %v5000_v25 = vsel %vm1029_vm3, %v11583_v23, 0.0 }
 0x536   :  { %4965 = vadd.xlane.f32.xlu1 %v4964_v35  ;;  %4956 = vadd.xlane.f32.xlu0 %v4955_v14  ;;  %v4991_v35 = vsel %vm1029_vm3, %v11587_v58, 0.0  ;;  %v11595_v14 = vmul.f32 %v11471_v55, %v11114_v59  ;;  %v11611_v59 = vmul.f32 %v11471_v55, %v11102_v46 }
 0x538   :  { %13477 = vst [vmem:[#allocation52_spill] sm:$0xff] %v11595_v14  ;;  %v5006_v1 = vsel %vm1029_vm3, %v11595_v14, 0.0  ;;  %13481 = vst [vmem:[#allocation54_spill] sm:$0xff] %v11611_v59 }
 0x53a   :  { %4971 = vadd.xlane.f32.xlu1 %v4970_v61  ;;  %4962 = vadd.xlane.f32.xlu0 %v4961_v48  ;;  %v13478_v61 = vld [vmem:[#allocation28_spill] sm:$0xff] }
 0x53b   :  { %v11599_v54 = vmul.f32 %v11471_v55, %v13478_v61  ;;  %v13490_v61 = vld [vmem:[#allocation42_spill] sm:$0xff] }
 0x53d   :  { %13479 = vst [vmem:[#allocation28_spill] sm:$0xff] %v11599_v54  ;;  %v4997_v48 = vsel %vm1029_vm3, %v11599_v54, 0.0 }
 0x53e   :  { %4977 = vadd.xlane.f32.xlu1 %v4976_v20  ;;  %4968 = vadd.xlane.f32.xlu0 %v4967_v11  ;;  %v5012_v20 = vsel %vm1029_vm3, %v11607_v13, 0.0  ;;  %v5003_v11 = vsel %vm1029_vm3, %v11611_v59, 0.0 }
 0x542   :  { %4983 = vadd.xlane.f32.xlu1 %v4982_v49  ;;  %4974 = vadd.xlane.f32.xlu0 %v4973_v15  ;;  %v11619_v49 = vmul.f32 %v11471_v55, %v11178_v2  ;;  %v13483_v15 = vld [vmem:[#allocation33_spill] sm:$0xff]  ;;  %v11635_v2 = vmul.f32 %v11471_v55, %v11166_v47 }
 0x543   :  { %v11623_v10 = vmul.f32 %v11471_v55, %v13483_v15  ;;  %v5640_v15 = vsel %vm1029_vm3, %v11487_v31, -inf }
 0x544   :  { %13482 = vst [vmem:[#allocation55_spill] sm:$0xff] %v11619_v49  ;;  %v5018_v46 = vsel %vm1029_vm3, %v11619_v49, 0.0  ;;  %13486 = vst [vmem:[#allocation57_spill] sm:$0xff] %v11635_v2 }
 0x545   :  { %13484 = vst [vmem:[#allocation33_spill] sm:$0xff] %v11623_v10  ;;  %v5009_v5 = vsel %vm1029_vm3, %v11623_v10, 0.0 }
 0x546   :  { %4989 = vadd.xlane.f32.xlu1 %v4988_v28  ;;  %4980 = vadd.xlane.f32.xlu0 %v4979_v57  ;;  %v11631_v28 = vmul.f32 %v11471_v55, %v11212_v44 }
 0x548   :  { %13485 = vst [vmem:[#allocation56_spill] sm:$0xff] %v11631_v28  ;;  %v5024_v57 = vsel %vm1029_vm3, %v11631_v28, 0.0 }
 0x54a   :  { %4995 = vadd.xlane.f32.xlu1 %v4994_v50  ;;  %4986 = vadd.xlane.f32.xlu0 %v4985_v42  ;;  %v5015_v50 = vsel %vm1029_vm3, %v11635_v2, 0.0  ;;  %v11643_v42 = vmul.f32 %v11471_v55, %v11253_v29  ;;  %v5631_v29 = vsel %vm1029_vm3, %v11491_v45, -inf }
 0x54c   :  { %13487 = vst [vmem:[#allocation58_spill] sm:$0xff] %v11643_v42  ;;  %v5030_v47 = vsel %vm1029_vm3, %v11643_v42, 0.0 }
 0x54e   :  { %5001 = vadd.xlane.f32.xlu1 %v5000_v25  ;;  %4992 = vadd.xlane.f32.xlu0 %v4991_v35  ;;  %v13488_v25 = vld [vmem:[#allocation38_spill] sm:$0xff] }
 0x54f   :  { %v11647_v44 = vmul.f32 %v11471_v55, %v13488_v25  ;;  %v5679_v25 = vsel %vm1029_vm3, %v11587_v58, -inf }
 0x551   :  { %13489 = vst [vmem:[#allocation38_spill] sm:$0xff] %v11647_v44  ;;  %v5021_v35 = vsel %vm1029_vm3, %v11647_v44, 0.0 }
 0x552   :  { %5007 = vadd.xlane.f32.xlu1 %v5006_v1  ;;  %4998 = vadd.xlane.f32.xlu0 %v4997_v48  ;;  %v11655_v1 = vmul.f32 %v11471_v55, %v13490_v61  ;;  %v5643_v61 = vsel %vm1029_vm3, %v11515_v24, -inf }
 0x554   :  { %13491 = vst [vmem:[#allocation42_spill] sm:$0xff] %v11655_v1  ;;  %v5027_v48 = vsel %vm1029_vm3, %v11655_v1, 0.0 }
 0x556   :  { %5013 = vadd.xlane.f32.xlu1 %v5012_v20  ;;  %5004 = vadd.xlane.f32.xlu0 %v5003_v11  ;;  %v13492_v20 = vld [vmem:[#allocation25_spill] sm:$0xff] }
 0x557   :  { %v11663_v11 = vmul.f32 %v11471_v55, %v13492_v20  ;;  %v5673_v55 = vsel %vm1029_vm3, %v11575_v56, -inf  ;;  %v5652_v20 = vsel %vm1029_vm3, %v11511_v3, -inf }
 0x559   :  { %13493 = vst [vmem:[#allocation25_spill] sm:$0xff] %v11663_v11 }
 0x55a   :  { %5019 = vadd.xlane.f32.xlu1 %v5018_v46  ;;  %5010 = vadd.xlane.f32.xlu0 %v5009_v5  ;;  %v5033_v46 = vsel %vm1029_vm3, %v11663_v11, 0.0  ;;  %v5646_v5 = vsel %vm1029_vm3, %v11499_v52, -inf }
 0x55e   :  { %5025 = vadd.xlane.f32.xlu1 %v5024_v57  ;;  %5016 = vadd.xlane.f32.xlu0 %v5015_v50  ;;  %v5628_v57 = vsel %vm1029_vm3, %v11479_v19, -inf  ;;  %v5634_v50 = vsel %vm1029_vm3, %v11475_v43, -inf }
 0x562   :  { %5031 = vadd.xlane.f32.xlu1 %v5030_v47  ;;  %5022 = vadd.xlane.f32.xlu0 %v5021_v35  ;;  %v5637_v47 = vsel %vm1029_vm3, %v11503_v37, -inf  ;;  %v5685_v35 = vsel %vm1029_vm3, %v11599_v54, -inf  ;;  %v13519_v54 = vld [vmem:[#allocation34_spill] sm:$0xff] }
 0x566   :  { %5632 = vmax.xlane.f32.xlu1 %v5631_v29  ;;  %5028 = vadd.xlane.f32.xlu0 %v5027_v48  ;;  %v5688_v29 = vsel %vm1029_vm3, %v11583_v23, -inf  ;;  %v5670_v48 = vsel %vm1029_vm3, %v11547_v6, -inf }
 0x56a   :  { %5641 = vmax.xlane.f32.xlu1 %v5640_v15  ;;  %5034 = vadd.xlane.f32.xlu0 %v5033_v46  ;;  %v5676_v15 = vsel %vm1029_vm3, %v11559_v30, -inf  ;;  %v5694_v46 = vsel %vm1029_vm3, %v11595_v14, -inf }
 0x56e   :  { %5647 = vmax.xlane.f32.xlu1 %v5646_v5  ;;  %5629 = vmax.xlane.f32.xlu0 %v5628_v57  ;;  %v5682_v5 = vsel %vm1029_vm3, %v11571_v41, -inf  ;;  %v5658_v57 = vsel %vm1029_vm3, %v11523_v34, -inf  ;;  %v13521_v41 = vld [vmem:[#allocation43_spill] sm:$0xff] }
 0x572   :  { %5674 = vmax.xlane.f32.xlu1 %v5673_v55  ;;  %5635 = vmax.xlane.f32.xlu0 %v5634_v50  ;;  %v5649_v55 = vsel %vm1029_vm3, %v11527_v9, -inf  ;;  %v5700_v50 = vsel %vm1029_vm3, %v11607_v13, -inf }
 0x576   :  { %5680 = vmax.xlane.f32.xlu1 %v5679_v25  ;;  %5638 = vmax.xlane.f32.xlu0 %v5637_v47  ;;  %v5691_v25 = vsel %vm1029_vm3, %v11611_v59, -inf  ;;  %v5664_v47 = vsel %vm1029_vm3, %v11535_v32, -inf }
 0x57a   :  { %5686 = vmax.xlane.f32.xlu1 %v5685_v35  ;;  %5644 = vmax.xlane.f32.xlu0 %v5643_v61  ;;  %v5655_v35 = vsel %vm1029_vm3, %v11539_v7, -inf  ;;  %v5706_v61 = vsel %vm1029_vm3, %v11619_v49, -inf }
 0x57e   :  { %5689 = vmax.xlane.f32.xlu1 %v5688_v29  ;;  %5671 = vmax.xlane.f32.xlu0 %v5670_v48  ;;  %v5697_v29 = vsel %vm1029_vm3, %v11623_v10, -inf  ;;  %v11715_v48 = vrot.slane %v11468_v12, %v11466_v26  ;;  %v5667_v12 = vsel %vm1029_vm3, %v11563_v33, -inf }
 0x582   :  { %5653 = vmax.xlane.f32.xlu1 %v5652_v20  ;;  %5677 = vmax.xlane.f32.xlu0 %v5676_v15  ;;  %v5712_v20 = vsel %vm1029_vm3, %v11631_v28, -inf  ;;  %v5661_v15 = vsel %vm1029_vm3, %v11551_v36, -inf }
 0x586   :  { %5695 = vmax.xlane.f32.xlu1 %v5694_v46  ;;  %5683 = vmax.xlane.f32.xlu0 %v5682_v5  ;;  %v5718_v46 = vsel %vm1029_vm3, %v11643_v42, -inf  ;;  %v5703_v5 = vsel %vm1029_vm3, %v11635_v2, -inf  ;;  %v13515_v2 = vld [vmem:[#allocation31_spill] sm:$0xff] }
 0x587   :  { %v11796_v13 = vmul.f32 %v11715_v48, %v13515_v2 }
 0x589   :  { %13516 = vst [vmem:[#allocation31_spill] sm:$0xff] %v11796_v13  ;;  %v5057_v2 = vsel %vm1029_vm3, %v11796_v13, 0.0 }
 0x58a   :  { %5659 = vmax.xlane.f32.xlu1 %v5658_v57  ;;  %5650 = vmax.xlane.f32.xlu0 %v5649_v55  ;;  %v13494_v57 = vld [vmem:[#allocation14_spill] sm:$0xff] }
 0x58b   :  { %v11727_v55 = vmul.f32 %v11715_v48, %v13494_v57 }
 0x58d   :  { %13495 = vst [vmem:[#allocation14_spill] sm:$0xff] %v11727_v55 }
 0x58e   :  { %5701 = vmax.xlane.f32.xlu1 %v5700_v50  ;;  %5692 = vmax.xlane.f32.xlu0 %v5691_v25  ;;  %v5036_v50 = vsel %vm1029_vm3, %v11727_v55, 0.0  ;;  %v13496_v25 = vld [vmem:[#allocation15_spill] sm:$0xff] }
 0x592   :  { %5665 = vmax.xlane.f32.xlu1 %v5664_v47  ;;  %5656 = vmax.xlane.f32.xlu0 %v5655_v35  ;;  %v11735_v47 = vmul.f32 %v11715_v48, %v13496_v25  ;;  %v5709_v35 = vsel %vm1029_vm3, %v11647_v44, -inf  ;;  %v13502_v25 = vld [vmem:[#allocation23_spill] sm:$0xff] }
 0x594   :  { %13497 = vst [vmem:[#allocation15_spill] sm:$0xff] %v11735_v47 }
 0x596   :  { %5707 = vmax.xlane.f32.xlu1 %v5706_v61  ;;  %5698 = vmax.xlane.f32.xlu0 %v5697_v29  ;;  %v5042_v61 = vsel %vm1029_vm3, %v11735_v47, 0.0  ;;  %v13498_v29 = vld [vmem:[#allocation10_spill] sm:$0xff] }
 0x59a   :  { %5713 = vmax.xlane.f32.xlu1 %v5712_v20  ;;  %5662 = vmax.xlane.f32.xlu0 %v5661_v15  ;;  %v11743_v20 = vmul.f32 %v11715_v48, %v13498_v29  ;;  %v5715_v15 = vsel %vm1029_vm3, %v11655_v1, -inf  ;;  %v13511_v1 = vld [vmem:[#allocation29_spill] sm:$0xff] }
 0x59b   :  { %v11784_v28 = vmul.f32 %v11715_v48, %v13511_v1  ;;  %v13517_v1 = vld [vmem:[#allocation40_spill] sm:$0xff] }
 0x59c   :  { %13499 = vst [vmem:[#allocation10_spill] sm:$0xff] %v11743_v20  ;;  %v11800_v10 = vmul.f32 %v11715_v48, %v13517_v1 }
 0x59d   :  { %13512 = vst [vmem:[#allocation29_spill] sm:$0xff] %v11784_v28 }
 0x59e   :  { %5719 = vmax.xlane.f32.xlu1 %v5718_v46  ;;  %5704 = vmax.xlane.f32.xlu0 %v5703_v5  ;;  %v5048_v46 = vsel %vm1029_vm3, %v11743_v20, 0.0  ;;  %v13500_v5 = vld [vmem:[#allocation30_spill] sm:$0xff]  ;;  %13518 = vst [vmem:[#allocation40_spill] sm:$0xff] %v11800_v10  ;;  %v5078_v1 = vsel %vm1029_vm3, %v11800_v10, 0.0 }
 0x59f   :  { %v11751_v57 = vmul.f32 %v11715_v48, %v13500_v5  ;;  %v13506_v5 = vld [vmem:[#allocation16_spill] sm:$0xff] }
 0x5a0   :  { %v11771_v18 = vmul.f32 %v11715_v48, %v13506_v5  ;;  %v13513_v5 = vld [vmem:[#allocation37_spill] sm:$0xff] }
 0x5a1   :  { %13501 = vst [vmem:[#allocation30_spill] sm:$0xff] %v11751_v57  ;;  %v11788_v44 = vmul.f32 %v11715_v48, %v13513_v5 }
 0x5a2   :  { %5668 = vmax.xlane.f32.xlu0 %v5667_v12  ;;  %5037 = vadd.xlane.f32.xlu1 %v5036_v50  ;;  %v5721_v12 = vsel %vm1029_vm3, %v11663_v11, -inf  ;;  %v5054_v50 = vsel %vm1029_vm3, %v11751_v57, 0.0  ;;  %13507 = vst [vmem:[#allocation16_spill] sm:$0xff] %v11771_v18  ;;  %v13508_v11 = vld [vmem:[#allocation35_spill] sm:$0xff] }
 0x5a3   :  { %13514 = vst [vmem:[#allocation37_spill] sm:$0xff] %v11788_v44  ;;  %v5072_v49 = vsel %vm1029_vm3, %v11788_v44, 0.0 }
 0x5a6   :  { %5710 = vmax.xlane.f32.xlu0 %v5709_v35  ;;  %5043 = vadd.xlane.f32.xlu1 %v5042_v61  ;;  %v11759_v35 = vmul.f32 %v11715_v48, %v13502_v25  ;;  %v13504_v61 = vld [vmem:[#allocation32_spill] sm:$0xff]  ;;  %v11775_v25 = vmul.f32 %v11715_v48, %v13508_v11 }
 0x5a7   :  { %v11763_v29 = vmul.f32 %v11715_v48, %v13504_v61  ;;  %v13510_v61 = vlaneseq }
 0x5a8   :  { %13503 = vst [vmem:[#allocation23_spill] sm:$0xff] %v11759_v35  ;;  %13509 = vst [vmem:[#allocation35_spill] sm:$0xff] %v11775_v25 }
 0x5a9   :  { %13505 = vst [vmem:[#allocation32_spill] sm:$0xff] %v11763_v29  ;;  %v5262_v42 = vand.u32 127, %v13510_v61  ;;  %v5051_v61 = vsel %vm1029_vm3, %v11784_v28, 0.0 }
 0x5aa   :  { %5716 = vmax.xlane.f32.xlu0 %v5715_v15  ;;  %5049 = vadd.xlane.f32.xlu1 %v5048_v46  ;;  %v5039_v15 = vsel %vm1029_vm3, %v11759_v35, 0.0  ;;  %v5060_v46 = vsel %vm1029_vm3, %v11763_v29, 0.0 }
 0x5ab   :  { %v5267_v11 = vadd.s32 4294967288, %v5262_v42  ;;  %v11803_v5 = vsub.s32 %v5262_v42, %v11462_v38  ;;  %v11814_v42 = vmul.f32 %v11715_v48, %v13519_v54 }
 0x5ad   :  { %13520 = vst [vmem:[#allocation34_spill] sm:$0xff] %v11814_v42  ;;  %v5063_v54 = vsel %vm1029_vm3, %v11814_v42, 0.0 }
 0x5ae   :  { %5722 = vmax.xlane.f32.xlu0 %v5721_v12  ;;  %5055 = vadd.xlane.f32.xlu1 %v5054_v50  ;;  %v5045_v12 = vsel %vm1029_vm3, %v11771_v18, 0.0  ;;  %v5066_v50 = vsel %vm1029_vm3, %v11775_v25, 0.0 }
 0x5b2   :  { %5040 = vadd.xlane.f32.xlu0 %v5039_v15  ;;  %5061 = vadd.xlane.f32.xlu1 %v5060_v46 }
 0x5b6   :  { %5046 = vadd.xlane.f32.xlu0 %v5045_v12  ;;  %5067 = vadd.xlane.f32.xlu1 %v5066_v50  ;;  %v11806_v12 = vsub.s32 %v5267_v11, %v11462_v38  ;;  %v11818_v11 = vmul.f32 %v11715_v48, %v13521_v41  ;;  %v13523_v41 = vld [vmem:[#allocation36_spill] sm:$0xff] }
 0x5b7   :  { %v4948_v15 = vpop.xlane.xlu1 %4947  ;;  %v4942_v46 = vpop.xlane.xlu0 %4941 }
 0x5b8   :  { %v5133_v50 = vmul.f32 0.03125, %v4942_v46  ;;  %13522 = vst [vmem:[#allocation43_spill] sm:$0xff] %v11818_v11  ;;  %v5135_v46 = vmul.f32 0.03125, %v4948_v15  ;;  %v5084_v6 = vsel %vm1029_vm3, %v11818_v11, 0.0  ;;  %v11829_v15 = vmul.f32 %v11715_v48, %v13523_v41 }
 0x5ba   :  { %5052 = vadd.xlane.f32.xlu0 %v5051_v61  ;;  %5073 = vadd.xlane.f32.xlu1 %v5072_v49  ;;  %v5266_v49 = vrot.slane %v5133_v50, %v11803_v5  ;;  %13524 = vst [vmem:[#allocation36_spill] sm:$0xff] %v11829_v15  ;;  %v5277_v50 = vrot.slane %v5135_v46, %v11803_v5  ;;  %v5069_v46 = vsel %vm1029_vm3, %v11829_v15, 0.0 }
 0x5bb   :  { %v4954_v14 = vpop.xlane.xlu1 %4953  ;;  %v4945_v59 = vpop.xlane.xlu0 %4944 }
 0x5bc   :  { %v5134_v23 = vmul.f32 0.03125, %v4945_v59 }
 0x5be   :  { %v5271_v61 = vrot.slane %v5134_v23, %v11806_v12  ;;  %5058 = vadd.xlane.f32.xlu0 %v5057_v2  ;;  %5079 = vadd.xlane.f32.xlu1 %v5078_v1  ;;  %v11833_v23 = vmul.f32 %v11715_v48, %v11290_v17  ;;  %v5137_v2 = vmul.f32 0.03125, %v4954_v14 }
 0x5bf   :  { %v4960_v59 = vpop.xlane.xlu1 %4959  ;;  %v4951_v58 = vpop.xlane.xlu0 %4950 }
 0x5c0   :  { %v5273_v30 = vsel %vm5272_vm10, %v5271_v61, %v5266_v49  ;;  %v5136_v56 = vmul.f32 0.03125, %v4951_v58  ;;  %13525 = vst [vmem:[#allocation59_spill] sm:$0xff] %v11833_v23  ;;  %v11839_v61 = vmul.f32 %v11715_v48, %v11348_v39  ;;  %v5090_v14 = vsel %vm1029_vm3, %v11833_v23, 0.0 }
 0x5c1   :  { %v5139_v32 = vmul.f32 0.03125, %v4960_v59 }
 0x5c2   :  { %v5281_v58 = vrot.slane %v5136_v56, %v11806_v12  ;;  %5064 = vadd.xlane.f32.xlu0 %v5063_v54  ;;  %5085 = vadd.xlane.f32.xlu1 %v5084_v6  ;;  %13526 = vst [vmem:[#allocation60_spill] sm:$0xff] %v11839_v61  ;;  %v13527_v56 = vld [vmem:[#allocation39_spill] sm:$0xff]  ;;  %v5286_v54 = vrot.slane %v5137_v2, %v11803_v5  ;;  %v5096_v59 = vsel %vm1029_vm3, %v11839_v61, 0.0 }
 0x5c3   :  { %v4966_v1 = vpop.xlane.xlu1 %4965  ;;  %v4957_v49 = vpop.xlane.xlu0 %4956  ;;  %v11849_v6 = vmul.f32 %v11715_v48, %v13527_v56 }
 0x5c4   :  { %v5282_v41 = vsel %vm5272_vm10, %v5281_v58, %v5277_v50  ;;  %v5138_v33 = vmul.f32 0.03125, %v4957_v49 }
 0x5c5   :  { %v5554_v17 = vsel %vm5553_vm11, %v5282_v41, %v5273_v30  ;;  %13528 = vst [vmem:[#allocation39_spill] sm:$0xff] %v11849_v6  ;;  %v11855_v30 = vmul.f32 %v11715_v48, %v11354_v60  ;;  %v5075_v56 = vsel %vm1029_vm3, %v11849_v6, 0.0 }
 0x5c6   :  { %v5290_v39 = vrot.slane %v5138_v33, %v11806_v12  ;;  %5070 = vadd.xlane.f32.xlu0 %v5069_v46  ;;  %5091 = vadd.xlane.f32.xlu1 %v5090_v14  ;;  %v13530_v33 = vld [vmem:[#allocation41_spill] sm:$0xff]  ;;  %v5295_v46 = vrot.slane %v5139_v32, %v11803_v5  ;;  %v5141_v14 = vmul.f32 0.03125, %v4966_v1 }
 0x5c7   :  { %v4972_v50 = vpop.xlane.xlu1 %4971  ;;  %v4963_v58 = vpop.xlane.xlu0 %4962  ;;  %13529 = vst [vmem:[#allocation61_spill] sm:$0xff] %v11855_v30  ;;  %v11865_v2 = vmul.f32 %v11715_v48, %v13530_v33  ;;  %v5102_v1 = vsel %vm1029_vm3, %v11855_v30, 0.0 }
 0x5c8   :  { %v5291_v49 = vsel %vm5272_vm10, %v5290_v39, %v5286_v54  ;;  %v5140_v41 = vmul.f32 0.03125, %v4963_v58  ;;  %v11871_v39 = vmul.f32 %v11715_v48, %v11383_v16 }
 0x5c9   :  { %v5555_v36 = vsel %vm4793_vm7, %v5291_v49, %v5554_v17  ;;  %13531 = vst [vmem:[#allocation41_spill] sm:$0xff] %v11865_v2  ;;  %v5081_v32 = vsel %vm1029_vm3, %v11865_v2, 0.0 }
 0x5ca   :  { %v5299_v60 = vrot.slane %v5140_v41, %v11806_v12  ;;  %5076 = vadd.xlane.f32.xlu0 %v5075_v56  ;;  %5097 = vadd.xlane.f32.xlu1 %v5096_v59  ;;  %13532 = vst [vmem:[#allocation62_spill] sm:$0xff] %v11871_v39  ;;  %v11881_v41 = vmul.f32 %v11715_v48, %v11276_v40  ;;  %v5143_v59 = vmul.f32 0.03125, %v4972_v50  ;;  %v5108_v50 = vsel %vm1029_vm3, %v11871_v39, 0.0 }
 0x5cb   :  { %v4978_v54 = vpop.xlane.xlu1 %4977  ;;  %v4969_v17 = vpop.xlane.xlu0 %4968  ;;  %v5304_v56 = vrot.slane %v5141_v14, %v11803_v5  ;;  %v11896_v14 = vmul.f32 %v11715_v48, %v11313_v8 }
 0x5cc   :  { %v5300_v58 = vsel %vm5272_vm10, %v5299_v60, %v5295_v46  ;;  %v5142_v49 = vmul.f32 0.03125, %v4969_v17  ;;  %13533 = vst [vmem:[#allocation63_spill] sm:$0xff] %v11881_v41  ;;  %v11887_v60 = vmul.f32 %v11715_v48, %v11389_v4  ;;  %v5087_v40 = vsel %vm1029_vm3, %v11881_v41, 0.0 }
 0x5cd   :  { %v5557_v33 = vsel %vm5556_vm12, %v5300_v58, %v5555_v36  ;;  %13535 = vst [vmem:[#allocation65_spill] sm:$0xff] %v11896_v14 }
 0x5ce   :  { %v5308_v16 = vrot.slane %v5142_v49, %v11806_v12  ;;  %5082 = vadd.xlane.f32.xlu0 %v5081_v32  ;;  %5103 = vadd.xlane.f32.xlu1 %v5102_v1  ;;  %13534 = vst [vmem:[#allocation64_spill] sm:$0xff] %v11887_v60  ;;  %v5313_v32 = vrot.slane %v5143_v59, %v11803_v5  ;;  %v5145_v1 = vmul.f32 0.03125, %v4978_v54  ;;  %v5093_v54 = vsel %vm1029_vm3, %v11896_v14, 0.0 }
 0x5cf   :  { %v4984_v46 = vpop.xlane.xlu1 %4983  ;;  %v4975_v36 = vpop.xlane.xlu0 %4974  ;;  %v5114_v59 = vsel %vm1029_vm3, %v11887_v60, 0.0 }
 0x5d0   :  { %v5309_v17 = vsel %vm5272_vm10, %v5308_v16, %v5304_v56  ;;  %v5144_v58 = vmul.f32 0.03125, %v4975_v36  ;;  %v11903_v36 = vmul.f32 %v11715_v48, %v11358_v63 }
 0x5d1   :  { %v5559_v49 = vsel %vm5558_vm13, %v5309_v17, %v5557_v33  ;;  %v11908_v33 = vmul.f32 %v11715_v48, %v11421_v22  ;;  %v11919_v22 = vmul.f32 %v11715_v48, %v11368_v0 }
 0x5d2   :  { %v5317_v4 = vrot.slane %v5144_v58, %v11806_v12  ;;  %5088 = vadd.xlane.f32.xlu0 %v5087_v40  ;;  %5109 = vadd.xlane.f32.xlu1 %v5108_v50  ;;  %13536 = vst [vmem:[#allocation66_spill] sm:$0xff] %v11903_v36  ;;  %v5322_v58 = vrot.slane %v5145_v1, %v11803_v5  ;;  %v5147_v40 = vmul.f32 0.03125, %v4984_v46  ;;  %v5099_v46 = vsel %vm1029_vm3, %v11903_v36, 0.0 }
 0x5d3   :  { %v4990_v56 = vpop.xlane.xlu1 %4989  ;;  %v4981_v16 = vpop.xlane.xlu0 %4980  ;;  %13537 = vst [vmem:[#allocation67_spill] sm:$0xff] %v11908_v33  ;;  %13538 = vst [vmem:[#allocation68_spill] sm:$0xff] %v11919_v22 }
 0x5d4   :  { %v5318_v34 = vsel %vm5272_vm10, %v5317_v4, %v5313_v32  ;;  %v5146_v8 = vmul.f32 0.03125, %v4981_v16  ;;  %v5149_v0 = vmul.f32 0.03125, %v4990_v56 }
 0x5d5   :  { %v5561_v17 = vsel %vm5560_vm14, %v5318_v34, %v5559_v49  ;;  %v11924_v34 = vmul.f32 %v11715_v48, %v11425_v53  ;;  %v5120_v49 = vsel %vm1029_vm3, %v11908_v33, 0.0 }
 0x5d6   :  { %v5326_v63 = vrot.slane %v5146_v8, %v11806_v12  ;;  %5094 = vadd.xlane.f32.xlu0 %v5093_v54  ;;  %5115 = vadd.xlane.f32.xlu1 %v5114_v59  ;;  %v5331_v8 = vrot.slane %v5147_v40, %v11803_v5  ;;  %v5340_v56 = vrot.slane %v5149_v0, %v11803_v5 }
 0x5d7   :  { %v4996_v50 = vpop.xlane.xlu1 %4995  ;;  %v4987_v32 = vpop.xlane.xlu0 %4986  ;;  %13539 = vst [vmem:[#allocation69_spill] sm:$0xff] %v11924_v34  ;;  %v5126_v40 = vsel %vm1029_vm3, %v11924_v34, 0.0 }
 0x5d8   :  { %v5148_v4 = vmul.f32 0.03125, %v4987_v32  ;;  %v5327_v16 = vsel %vm5272_vm10, %v5326_v63, %v5322_v58  ;;  %v11938_v32 = vmul.f32 %v11715_v48, %v11395_v51  ;;  %v11949_v51 = vmul.f32 %v11715_v48, %v11403_v21 }
 0x5d9   :  { %v11931_v1 = vsel %vm5562_vm15, %v5327_v16, %v5561_v17  ;;  %v5105_v17 = vsel %vm1029_vm3, %v11919_v22, 0.0 }
 0x5da   :  { %v5335_v54 = vrot.slane %v5148_v4, %v11806_v12  ;;  %5100 = vadd.xlane.f32.xlu0 %v5099_v46  ;;  %5121 = vadd.xlane.f32.xlu1 %v5120_v49  ;;  %13540 = vst [vmem:[#allocation70_spill] sm:$0xff] %v11938_v32  ;;  %v5151_v4 = vmul.f32 0.03125, %v4996_v50  ;;  %13541 = vst [vmem:[#allocation71_spill] sm:$0xff] %v11949_v51  ;;  %v5111_v7 = vsel %vm1029_vm3, %v11938_v32, 0.0  ;;  %v5727_v50 = vsel %vm1029_vm3, %v11759_v35, -inf }
 0x5db   :  { %v5002_v59 = vpop.xlane.xlu1 %5001  ;;  %v4993_v58 = vpop.xlane.xlu0 %4992 }
 0x5dc   :  { %v5336_v53 = vsel %vm5272_vm10, %v5335_v54, %v5331_v8  ;;  %v5150_v63 = vmul.f32 0.03125, %v4993_v58  ;;  %v5349_v0 = vrot.slane %v5151_v4, %v11803_v5 }
 0x5de   :  { %v5344_v16 = vrot.slane %v5150_v63, %v11806_v12  ;;  %5106 = vadd.xlane.f32.xlu0 %v5105_v17  ;;  %5127 = vadd.xlane.f32.xlu1 %v5126_v40  ;;  %v5153_v63 = vmul.f32 0.03125, %v5002_v59  ;;  %v5733_v59 = vsel %vm1029_vm3, %v11771_v18, -inf }
 0x5df   :  { %v5008_v46 = vpop.xlane.xlu1 %5007  ;;  %v4999_v49 = vpop.xlane.xlu0 %4998 }
 0x5e0   :  { %v5345_v8 = vsel %vm5272_vm10, %v5344_v16, %v5340_v56  ;;  %v5152_v54 = vmul.f32 0.03125, %v4999_v49  ;;  %v5155_v4 = vmul.f32 0.03125, %v5008_v46  ;;  %v5769_v46 = vsel %vm1029_vm3, %v11865_v2, -inf }
 0x5e1   :  { %v5564_v58 = vsel %vm4788_vm6, %v5345_v8, %v5336_v53  ;;  %v11961_v53 = vmul.f32 %v11715_v48, %v11433_v27  ;;  %v5117_v8 = vsel %vm1029_vm3, %v11949_v51, 0.0 }
 0x5e2   :  { %v5353_v17 = vrot.slane %v5152_v54, %v11806_v12  ;;  %5112 = vadd.xlane.f32.xlu0 %v5111_v7  ;;  %5728 = vmax.xlane.f32.xlu1 %v5727_v50  ;;  %v5358_v7 = vrot.slane %v5153_v63, %v11803_v5  ;;  %v5367_v63 = vrot.slane %v5155_v4, %v11803_v5 }
 0x5e3   :  { %v5014_v40 = vpop.xlane.xlu1 %5013  ;;  %v5005_v56 = vpop.xlane.xlu0 %5004  ;;  %13542 = vst [vmem:[#allocation72_spill] sm:$0xff] %v11961_v53 }
 0x5e4   :  { %v5354_v21 = vsel %vm5272_vm10, %v5353_v17, %v5349_v0  ;;  %v5154_v16 = vmul.f32 0.03125, %v5005_v56 }
 0x5e5   :  { %v5565_v49 = vsel %vm5553_vm11, %v5354_v21, %v5564_v58  ;;  %v11973_v58 = vmul.f32 %v11715_v48, %v11431_v62  ;;  %v5123_v21 = vsel %vm1029_vm3, %v11961_v53, 0.0 }
 0x5e6   :  { %v5362_v54 = vrot.slane %v5154_v16, %v11806_v12  ;;  %5118 = vadd.xlane.f32.xlu0 %v5117_v8  ;;  %5734 = vmax.xlane.f32.xlu1 %v5733_v59  ;;  %v5157_v16 = vmul.f32 0.03125, %v5014_v40 }
 0x5e7   :  { %v5020_v50 = vpop.xlane.xlu1 %5019  ;;  %v5011_v0 = vpop.xlane.xlu0 %5010  ;;  %13543 = vst [vmem:[#allocation73_spill] sm:$0xff] %v11973_v58 }
 0x5e8   :  { %v5363_v27 = vsel %vm5272_vm10, %v5362_v54, %v5358_v7  ;;  %v5156_v17 = vmul.f32 0.03125, %v5011_v0  ;;  %v5775_v54 = vsel %vm1029_vm3, %v11881_v41, -inf  ;;  %v5376_v4 = vrot.slane %v5157_v16, %v11803_v5 }
 0x5e9   :  { %v5566_v56 = vsel %vm4793_vm7, %v5363_v27, %v5565_v49  ;;  %v5129_v49 = vsel %vm1029_vm3, %v11973_v58, 0.0  ;;  %v5159_v40 = vmul.f32 0.03125, %v5020_v50 }
 0x5ea   :  { %v5371_v8 = vrot.slane %v5156_v17, %v11806_v12  ;;  %5124 = vadd.xlane.f32.xlu0 %v5123_v21  ;;  %5770 = vmax.xlane.f32.xlu1 %v5769_v46 }
 0x5eb   :  { %v5026_v59 = vpop.xlane.xlu1 %5025  ;;  %v5017_v7 = vpop.xlane.xlu0 %5016  ;;  %v5385_v50 = vrot.slane %v5159_v40, %v11803_v5 }
 0x5ec   :  { %v5372_v62 = vsel %vm5272_vm10, %v5371_v8, %v5367_v63  ;;  %v5158_v48 = vmul.f32 0.03125, %v5017_v7  ;;  %v5724_v8 = vsel %vm1029_vm3, %v11727_v55, -inf  ;;  %v5739_v7 = vsel %vm1029_vm3, %v11784_v28, -inf }
 0x5ed   :  { %v5567_v0 = vsel %vm5556_vm12, %v5372_v62, %v5566_v56  ;;  %v5161_v16 = vmul.f32 0.03125, %v5026_v59 }
 0x5ee   :  { %v5380_v27 = vrot.slane %v5158_v48, %v11806_v12  ;;  %5130 = vadd.xlane.f32.xlu0 %v5129_v49  ;;  %5776 = vmax.xlane.f32.xlu1 %v5775_v54 }
 0x5ef   :  { %v11990_v17 = vpop.xlane.xlu1 %5031  ;;  %v5023_v21 = vpop.xlane.xlu0 %5022  ;;  %v5394_v59 = vrot.slane %v5161_v16, %v11803_v5 }
 0x5f0   :  { %v5381_v46 = vsel %vm5272_vm10, %v5380_v27, %v5376_v4  ;;  %v5160_v63 = vmul.f32 0.03125, %v5023_v21  ;;  %v5730_v27 = vsel %vm1029_vm3, %v11735_v47, -inf  ;;  %v5781_v21 = vsel %vm1029_vm3, %v11896_v14, -inf }
 0x5f1   :  { %v5568_v56 = vsel %vm5558_vm13, %v5381_v46, %v5567_v0 }
 0x5f2   :  { %v5389_v62 = vrot.slane %v5160_v63, %v11806_v12  ;;  %5725 = vmax.xlane.f32.xlu0 %v5724_v8  ;;  %5740 = vmax.xlane.f32.xlu1 %v5739_v7  ;;  %v5766_v7 = vsel %vm1029_vm3, %v11800_v10, -inf }
 0x5f3   :  { %v12000_v48 = vpop.xlane.xlu1 %5632  ;;  %v5029_v49 = vpop.xlane.xlu0 %5028 }
 0x5f4   :  { %v5162_v54 = vmul.f32 0.03125, %v5029_v49  ;;  %v5390_v4 = vsel %vm5272_vm10, %v5389_v62, %v5385_v50  ;;  %v5742_v50 = vsel %vm1029_vm3, %v11751_v57, -inf  ;;  %v5772_v49 = vsel %vm1029_vm3, %v11818_v11, -inf }
 0x5f5   :  { %v5569_v0 = vsel %vm5560_vm14, %v5390_v4, %v5568_v56 }
 0x5f6   :  { %v5398_v40 = vrot.slane %v5162_v54, %v11806_v12  ;;  %5731 = vmax.xlane.f32.xlu0 %v5730_v27  ;;  %5782 = vmax.xlane.f32.xlu1 %v5781_v21  ;;  %v5784_v54 = vsel %vm1029_vm3, %v11839_v61, -inf  ;;  %v5736_v21 = vsel %vm1029_vm3, %v11743_v20, -inf }
 0x5f7   :  { %v12010_v46 = vpop.xlane.xlu1 %5641  ;;  %v12012_v63 = vpop.xlane.xlu0 %5034 }
 0x5f8   :  { %v5399_v8 = vsel %vm5272_vm10, %v5398_v40, %v5394_v59 }
 0x5f9   :  { %v12020_v56 = vsel %vm5562_vm15, %v5399_v8, %v5569_v0  ;;  %v5748_v0 = vsel %vm1029_vm3, %v11763_v29, -inf  ;;  %v5778_v8 = vsel %vm1029_vm3, %v11833_v23, -inf }
 0x5fa   :  { %5767 = vmax.xlane.f32.xlu0 %v5766_v7  ;;  %5743 = vmax.xlane.f32.xlu1 %v5742_v50  ;;  %v5790_v7 = vsel %vm1029_vm3, %v11855_v30, -inf }
 0x5fb   :  { %v12022_v16 = vpop.xlane.xlu1 %5647  ;;  %v12024_v62 = vpop.xlane.xlu0 %5629 }
 0x5fe   :  { %5773 = vmax.xlane.f32.xlu0 %v5772_v49  ;;  %5785 = vmax.xlane.f32.xlu1 %v5784_v54  ;;  %v5745_v54 = vsel %vm1029_vm3, %v11796_v13, -inf }
 0x5ff   :  { %v12030_v4 = vpop.xlane.xlu1 %5674  ;;  %v12032_v27 = vpop.xlane.xlu0 %5635 }
 0x600   :  { %v5954_v57 = vrot.slane %v12030_v4, %v11806_v12 }
 0x602   :  { %5737 = vmax.xlane.f32.xlu0 %v5736_v21  ;;  %5749 = vmax.xlane.f32.xlu1 %v5748_v0  ;;  %v5754_v21 = vsel %vm1029_vm3, %v11775_v25, -inf }
 0x603   :  { %v12038_v59 = vpop.xlane.xlu1 %5680  ;;  %v12040_v40 = vpop.xlane.xlu0 %5638 }
 0x606   :  { %5779 = vmax.xlane.f32.xlu0 %v5778_v8  ;;  %5791 = vmax.xlane.f32.xlu1 %v5790_v7  ;;  %v5787_v8 = vsel %vm1029_vm3, %v11903_v36, -inf  ;;  %v5796_v7 = vsel %vm1029_vm3, %v11871_v39, -inf }
 0x607   :  { %v12046_v50 = vpop.xlane.xlu1 %5686  ;;  %v12048_v49 = vpop.xlane.xlu0 %5644 }
 0x60a   :  { %5746 = vmax.xlane.f32.xlu0 %v5745_v54  ;;  %5755 = vmax.xlane.f32.xlu1 %v5754_v21  ;;  %v5751_v54 = vsel %vm1029_vm3, %v11814_v42, -inf  ;;  %v5760_v21 = vsel %vm1029_vm3, %v11788_v44, -inf  ;;  %v5163_v44 = vmul.f32 0.03125, %v11990_v17  ;;  %v5817_v17 = vsel %vm1029_vm3, %v11973_v58, -inf }
 0x60b   :  { %v12054_v0 = vpop.xlane.xlu1 %5689  ;;  %v12056_v61 = vpop.xlane.xlu0 %5671 }
 0x60e   :  { %5788 = vmax.xlane.f32.xlu0 %v5787_v8  ;;  %5797 = vmax.xlane.f32.xlu1 %v5796_v7  ;;  %v5793_v8 = vsel %vm1029_vm3, %v11919_v22, -inf  ;;  %v5802_v7 = vsel %vm1029_vm3, %v11887_v60, -inf  ;;  %v5799_v60 = vsel %vm1029_vm3, %v11938_v32, -inf  ;;  %v5805_v32 = vsel %vm1029_vm3, %v11949_v51, -inf }
 0x60f   :  { %v12062_v30 = vpop.xlane.xlu1 %5653  ;;  %v12064_v14 = vpop.xlane.xlu0 %5677 }
 0x612   :  { %5752 = vmax.xlane.f32.xlu0 %v5751_v54  ;;  %5761 = vmax.xlane.f32.xlu1 %v5760_v21  ;;  %v5757_v54 = vsel %vm1029_vm3, %v11829_v15, -inf  ;;  %v5808_v21 = vsel %vm1029_vm3, %v11908_v33, -inf  ;;  %v5763_v33 = vsel %vm1029_vm3, %v11849_v6, -inf  ;;  %v5403_v15 = vrot.slane %v5163_v44, %v11803_v5 }
 0x613   :  { %v12070_v23 = vpop.xlane.xlu1 %5695  ;;  %v12072_v36 = vpop.xlane.xlu0 %5683 }
 0x616   :  { %5794 = vmax.xlane.f32.xlu0 %v5793_v8  ;;  %5803 = vmax.xlane.f32.xlu1 %v5802_v7  ;;  %v5814_v8 = vsel %vm1029_vm3, %v11924_v34, -inf }
 0x617   :  { %v12078_v39 = vpop.xlane.xlu1 %5659  ;;  %v12080_v41 = vpop.xlane.xlu0 %5650 }
 0x61a   :  { %5758 = vmax.xlane.f32.xlu0 %v5757_v54  ;;  %5809 = vmax.xlane.f32.xlu1 %v5808_v21  ;;  %v5164_v54 = vmul.f32 0.03125, %v12012_v63 }
 0x61b   :  { %v12086_v11 = vpop.xlane.xlu1 %5701  ;;  %v5693_v22 = vpop.xlane.xlu0 %5692 }
 0x61c   :  { %v5981_v29 = vrot.slane %v5693_v22, %v11806_v12 }
 0x61e   :  { %5800 = vmax.xlane.f32.xlu0 %v5799_v60  ;;  %5815 = vmax.xlane.f32.xlu1 %v5814_v8  ;;  %v5407_v60 = vrot.slane %v5164_v54, %v11806_v12 }
 0x61f   :  { %v12092_v7 = vpop.xlane.xlu1 %5665  ;;  %v12094_v2 = vpop.xlane.xlu0 %5656 }
 0x620   :  { %v5408_v25 = vsel %vm5272_vm10, %v5407_v60, %v5403_v15  ;;  %v5959_v15 = vrot.slane %v12064_v14, %v11803_v5  ;;  %v5950_v60 = vrot.slane %v12056_v61, %v11803_v5  ;;  %v5972_v14 = vrot.slane %v12046_v50, %v11806_v12 }
 0x622   :  { %5764 = vmax.xlane.f32.xlu0 %v5763_v33  ;;  %v5811_v33 = vsel %vm1029_vm3, %v11961_v53, -inf  ;;  %v5955_v22 = vsel %vm5272_vm10, %v5954_v57, %v5950_v60 }
 0x623   :  { %v5708_v21 = vpop.xlane.xlu1 %5707  ;;  %v5699_v10 = vpop.xlane.xlu0 %5698 }
 0x624   :  { %v5990_v61 = vrot.slane %v5699_v10, %v11806_v12 }
 0x626   :  { %5806 = vmax.xlane.f32.xlu0 %v5805_v32  ;;  %v5590_v32 = vsel %vm302_vm0, %v5408_v25, 0.0  ;;  %v5968_v25 = vrot.slane %v12072_v36, %v11803_v5  ;;  %v5977_v36 = vrot.slane %v12054_v0, %v11803_v5  ;;  %v5995_v0 = vrot.slane %v12086_v11, %v11803_v5 }
 0x627   :  { %v5714_v8 = vpop.xlane.xlu1 %5713  ;;  %v12103_v34 = vpop.xlane.xlu0 %5662 }
 0x628   :  { %v5973_v4 = vsel %vm5272_vm10, %v5972_v14, %v5968_v25  ;;  %v6013_v25 = vrot.slane %v5714_v8, %v11803_v5 }
 0x62a   :  { %5812 = vmax.xlane.f32.xlu0 %v5811_v33 }
 0x62b   :  { %v5720_v63 = vpop.xlane.xlu1 %5719  ;;  %v5705_v6 = vpop.xlane.xlu0 %5704 }
 0x62c   :  { %v6022_v20 = vrot.slane %v5720_v63, %v11803_v5  ;;  %v5982_v63 = vsel %vm5272_vm10, %v5981_v29, %v5977_v36 }
 0x62e   :  { %5818 = vmax.xlane.f32.xlu0 %v5817_v17 }
 0x62f   :  { %v12112_v54 = vpop.xlane.xlu0 %5668  ;;  %5600 = vrot.lane.b32.xlu1 %v5590_v32, %s7744_s5  ;;  %v12115_v44 = vpop.xlane.xlu1 %5037  ;;  %v5963_v32 = vrot.slane %v12038_v59, %v11806_v12  ;;  %v5999_v59 = vrot.slane %v5705_v6, %v11806_v12 }
 0x631   :  { %v5964_v28 = vsel %vm5272_vm10, %v5963_v32, %v5959_v15  ;;  %v6000_v32 = vsel %vm5272_vm10, %v5999_v59, %v5995_v0 }
 0x632   :  { %v6178_v15 = vsel %vm4788_vm6, %v5964_v28, %v5955_v22 }
 0x633   :  { %v5711_v51 = vpop.xlane.xlu0 %5710  ;;  %v12117_v53 = vpop.xlane.xlu1 %5043 }
 0x634   :  { %v6008_v50 = vrot.slane %v5711_v51, %v11806_v12  ;;  %v6179_v51 = vsel %vm5553_vm11, %v5973_v4, %v6178_v15 }
 0x635   :  { %v6180_v11 = vsel %vm4793_vm7, %v5982_v63, %v6179_v51 }
 0x637   :  { %v5717_v33 = vpop.xlane.xlu0 %5716  ;;  %v12119_v42 = vpop.xlane.xlu1 %5049 }
 0x638   :  { %v6017_v6 = vrot.slane %v5717_v33, %v11806_v12 }
 0x63b   :  { %v5723_v17 = vpop.xlane.xlu0 %5722  ;;  %v12127_v58 = vpop.xlane.xlu1 %5055 }
 0x63c   :  { %v6026_v13 = vrot.slane %v5723_v17, %v11806_v12  ;;  %v5986_v17 = vrot.slane %v12070_v23, %v11803_v5  ;;  %v6004_v23 = vrot.slane %v5708_v21, %v11803_v5 }
 0x63e   :  { %v6027_v57 = vsel %vm5272_vm10, %v6026_v13, %v6022_v20  ;;  %v5991_v60 = vsel %vm5272_vm10, %v5990_v61, %v5986_v17  ;;  %v6009_v29 = vsel %vm5272_vm10, %v6008_v50, %v6004_v23  ;;  %v6018_v20 = vsel %vm5272_vm10, %v6017_v6, %v6013_v25 }
 0x63f   :  { %v12148_v18 = vpop.xlane.xlu0 %5040  ;;  %v12150_v10 = vpop.xlane.xlu1 %5061  ;;  %v6204_v13 = vsel %vm302_vm0, %v6027_v57, 0.0  ;;  %v6181_v28 = vsel %vm5556_vm12, %v5991_v60, %v6180_v11 }
 0x640   :  { %v6182_v21 = vsel %vm5558_vm13, %v6000_v32, %v6181_v28 }
 0x641   :  { %v6183_v8 = vsel %vm5560_vm14, %v6009_v29, %v6182_v21 }
 0x642   :  { %v6184_v59 = vsel %vm5562_vm15, %v6018_v20, %v6183_v8 }
 0x643   :  { %v12165_v14 = vpop.xlane.xlu0 %5046  ;;  %v12167_v33 = vpop.xlane.xlu1 %5067 }
 0x644   :  { %6214 = vrot.lane.b32.xlu0 %v6204_v13, %s7744_s5 }
 0x647   :  { %v12175_v61 = vpop.xlane.xlu0 %5052  ;;  %v12177_v36 = vpop.xlane.xlu1 %5073 }
 0x648   :  { %6212 = vrot.lane.b32.xlu0 %v6184_v59, %s7744_s5 }
 0x64b   :  { %v12181_v22 = vpop.xlane.xlu0 %5058  ;;  %v5080_v17 = vpop.xlane.xlu1 %5079 }
 0x64c   :  { %5598 = vrot.lane.b32.xlu0 %v12020_v56, %s7744_s5  ;;  %v5179_v47 = vmul.f32 0.03125, %v5080_v17 }
 0x64e   :  { %v5475_v17 = vrot.slane %v5179_v47, %v11803_v5 }
 0x64f   :  { %v12185_v4 = vpop.xlane.xlu0 %5064  ;;  %v5086_v50 = vpop.xlane.xlu1 %5085 }
 0x650   :  { %v5181_v8 = vmul.f32 0.03125, %v5086_v50 }
 0x653   :  { %v12187_v0 = vpop.xlane.xlu0 %5070  ;;  %v5092_v63 = vpop.xlane.xlu1 %5091 }
 0x654   :  { %v5183_v35 = vmul.f32 0.03125, %v5092_v63 }
 0x656   :  { %v5493_v63 = vrot.slane %v5183_v35, %v11803_v5 }
 0x657   :  { %v12189_v6 = vpop.xlane.xlu0 %5076  ;;  %v5098_v57 = vpop.xlane.xlu1 %5097 }
 0x658   :  { %v5185_v52 = vmul.f32 0.03125, %v5098_v57 }
 0x65b   :  { %v5083_v15 = vpop.xlane.xlu0 %5082  ;;  %v5104_v23 = vpop.xlane.xlu1 %5103 }
 0x65c   :  { %v5180_v20 = vmul.f32 0.03125, %v5083_v15  ;;  %v5187_v43 = vmul.f32 0.03125, %v5104_v23  ;;  %v5484_v15 = vrot.slane %v5181_v8, %v11803_v5 }
 0x65e   :  { %v5479_v37 = vrot.slane %v5180_v20, %v11806_v12 }
 0x65f   :  { %v5089_v60 = vpop.xlane.xlu0 %5088  ;;  %v5110_v51 = vpop.xlane.xlu1 %5109 }
 0x660   :  { %v5182_v56 = vmul.f32 0.03125, %v5089_v60  ;;  %v5189_v60 = vmul.f32 0.03125, %v5110_v51  ;;  %v5480_v51 = vsel %vm5272_vm10, %v5479_v37, %v5475_v17 }
 0x662   :  { %v5488_v24 = vrot.slane %v5182_v56, %v11806_v12  ;;  %v5520_v35 = vrot.slane %v5189_v60, %v11803_v5 }
 0x663   :  { %v5095_v25 = vpop.xlane.xlu0 %5094  ;;  %v5116_v32 = vpop.xlane.xlu1 %5115 }
 0x664   :  { %v5184_v21 = vmul.f32 0.03125, %v5095_v25  ;;  %v5191_v25 = vmul.f32 0.03125, %v5116_v32  ;;  %v5489_v23 = vsel %vm5272_vm10, %v5488_v24, %v5484_v15 }
 0x666   :  { %v5497_v45 = vrot.slane %v5184_v21, %v11806_v12  ;;  %v5511_v21 = vrot.slane %v5187_v43, %v11803_v5  ;;  %v5529_v24 = vrot.slane %v5191_v25, %v11803_v5 }
 0x667   :  { %v5101_v11 = vpop.xlane.xlu0 %5100  ;;  %v5122_v29 = vpop.xlane.xlu1 %5121 }
 0x668   :  { %v5186_v59 = vmul.f32 0.03125, %v5101_v11  ;;  %v5498_v47 = vsel %vm5272_vm10, %v5497_v45, %v5493_v63  ;;  %v5193_v32 = vmul.f32 0.03125, %v5122_v29 }
 0x66a   :  { %v5506_v50 = vrot.slane %v5186_v59, %v11806_v12 }
 0x66b   :  { %v5107_v13 = vpop.xlane.xlu0 %5106  ;;  %v12191_v28 = vpop.xlane.xlu1 %5127 }
 0x66c   :  { %v5188_v55 = vmul.f32 0.03125, %v5107_v13 }
 0x66e   :  { %v5515_v57 = vrot.slane %v5188_v55, %v11806_v12 }
 0x66f   :  { %v5113_v3 = vpop.xlane.xlu0 %5112  ;;  %v12193_v9 = vpop.xlane.xlu1 %5728 }
 0x670   :  { %v5190_v31 = vmul.f32 0.03125, %v5113_v3  ;;  %v5502_v3 = vrot.slane %v5185_v52, %v11803_v5  ;;  %v5577_v52 = vsel %vm4788_vm6, %v5489_v23, %v5480_v51 }
 0x671   :  { %v5578_v43 = vsel %vm5553_vm11, %v5498_v47, %v5577_v52 }
 0x672   :  { %v5524_v56 = vrot.slane %v5190_v31, %v11806_v12  ;;  %v5507_v55 = vsel %vm5272_vm10, %v5506_v50, %v5502_v3  ;;  %v5516_v31 = vsel %vm5272_vm10, %v5515_v57, %v5511_v21  ;;  %v5538_v50 = vrot.slane %v5193_v32, %v11803_v5 }
 0x673   :  { %v5119_v11 = vpop.xlane.xlu0 %5118  ;;  %v12203_v13 = vpop.xlane.xlu1 %5734  ;;  %v5579_v60 = vsel %vm4793_vm7, %v5507_v55, %v5578_v43 }
 0x674   :  { %v5192_v20 = vmul.f32 0.03125, %v5119_v11  ;;  %v5525_v45 = vsel %vm5272_vm10, %v5524_v56, %v5520_v35  ;;  %v5580_v63 = vsel %vm5556_vm12, %v5516_v31, %v5579_v60  ;;  %v5909_v60 = vrot.slane %v12048_v49, %v11806_v12 }
 0x675   :  { %v5581_v11 = vsel %vm5558_vm13, %v5525_v45, %v5580_v63 }
 0x676   :  { %v5533_v8 = vrot.slane %v5192_v20, %v11806_v12 }
 0x677   :  { %v5125_v59 = vpop.xlane.xlu0 %5124  ;;  %v12217_v15 = vpop.xlane.xlu1 %5770 }
 0x678   :  { %v5194_v37 = vmul.f32 0.03125, %v5125_v59  ;;  %v5534_v29 = vsel %vm5272_vm10, %v5533_v8, %v5529_v24 }
 0x679   :  { %v5582_v23 = vsel %vm5560_vm14, %v5534_v29, %v5581_v11  ;;  %v5887_v29 = vrot.slane %v12024_v62, %v11803_v5  ;;  %v5905_v11 = vrot.slane %v12010_v46, %v11803_v5  ;;  %v5914_v62 = vrot.slane %v12022_v16, %v11803_v5 }
 0x67a   :  { %v5542_v17 = vrot.slane %v5194_v37, %v11806_v12  ;;  %v5900_v37 = vrot.slane %v12040_v40, %v11806_v12  ;;  %v5891_v40 = vrot.slane %v12000_v48, %v11806_v12  ;;  %v5923_v48 = vrot.slane %v12062_v30, %v11803_v5 }
 0x67b   :  { %v12226_v25 = vpop.xlane.xlu0 %5130  ;;  %v12228_v57 = vpop.xlane.xlu1 %5776  ;;  %v5168_v16 = vmul.f32 0.03125, %v12165_v14  ;;  %v5932_v30 = vrot.slane %v12078_v39, %v11803_v5 }
 0x67c   :  { %v5543_v3 = vsel %vm5272_vm10, %v5542_v17, %v5538_v50  ;;  %v5896_v50 = vrot.slane %v12032_v27, %v11803_v5  ;;  %v5910_v27 = vsel %vm5272_vm10, %v5909_v60, %v5905_v11  ;;  %v5167_v11 = vmul.f32 0.03125, %v12117_v53 }
 0x67d   :  { %v5583_v56 = vsel %vm5562_vm15, %v5543_v3, %v5582_v23  ;;  %v5918_v3 = vrot.slane %v12080_v41, %v11806_v12  ;;  %v5927_v23 = vrot.slane %v12094_v2, %v11806_v12  ;;  %v5936_v2 = vrot.slane %v12103_v34, %v11806_v12 }
 0x67e   :  { %5604 = vrot.lane.b32.xlu0 %v5583_v56, %s7744_s5  ;;  %v5901_v49 = vsel %vm5272_vm10, %v5900_v37, %v5896_v50  ;;  %v5892_v56 = vsel %vm5272_vm10, %v5891_v40, %v5887_v29  ;;  %v5170_v29 = vmul.f32 0.03125, %v12175_v61  ;;  %v5166_v40 = vmul.f32 0.03125, %v12148_v18 }
 0x67f   :  { %v12235_v20 = vpop.xlane.xlu0 %5725  ;;  %v12237_v51 = vpop.xlane.xlu1 %5740  ;;  %v6172_v41 = vsel %vm5553_vm11, %v5901_v49, %v5892_v56  ;;  %v5919_v37 = vsel %vm5272_vm10, %v5918_v3, %v5914_v62  ;;  %v5928_v50 = vsel %vm5272_vm10, %v5927_v23, %v5923_v48  ;;  %v5172_v49 = vmul.f32 0.03125, %v12181_v22 }
 0x680   :  { %v6173_v60 = vsel %vm4793_vm7, %v5910_v27, %v6172_v41  ;;  %v5945_v3 = vrot.slane %v12112_v54, %v11806_v12  ;;  %v5169_v34 = vmul.f32 0.03125, %v12119_v42  ;;  %v5941_v61 = vrot.slane %v12092_v7, %v11803_v5 }
 0x681   :  { %v6174_v14 = vsel %vm5556_vm12, %v5919_v37, %v6173_v60  ;;  %v5165_v53 = vmul.f32 0.03125, %v12115_v44  ;;  %v5171_v18 = vmul.f32 0.03125, %v12127_v58  ;;  %v5425_v22 = vrot.slane %v5168_v16, %v11806_v12 }
 0x682   :  { %v6175_v39 = vsel %vm5558_vm13, %v5928_v50, %v6174_v14  ;;  %v5937_v27 = vsel %vm5272_vm10, %v5936_v2, %v5932_v30  ;;  %v5434_v23 = vrot.slane %v5170_v29, %v11806_v12  ;;  %v5174_v54 = vmul.f32 0.03125, %v12185_v4 }
 0x683   :  { %v12239_v21 = vpop.xlane.xlu0 %5731  ;;  %v12241_v47 = vpop.xlane.xlu1 %5782  ;;  %v5421_v7 = vrot.slane %v5167_v11, %v11803_v5  ;;  %v5416_v58 = vrot.slane %v5166_v40, %v11806_v12  ;;  %v5443_v44 = vrot.slane %v5172_v49, %v11806_v12  ;;  %v5176_v56 = vmul.f32 0.03125, %v12187_v0 }
 0x684   :  { %v5946_v4 = vsel %vm5272_vm10, %v5945_v3, %v5941_v61  ;;  %v5430_v41 = vrot.slane %v5169_v34, %v11803_v5  ;;  %v5173_v48 = vmul.f32 0.03125, %v12150_v10  ;;  %v5178_v37 = vmul.f32 0.03125, %v12189_v6 }
 0x685   :  { %v5412_v0 = vrot.slane %v5165_v53, %v11803_v5  ;;  %v5439_v60 = vrot.slane %v5171_v18, %v11803_v5  ;;  %v5426_v2 = vsel %vm5272_vm10, %v5425_v22, %v5421_v7  ;;  %v5175_v29 = vmul.f32 0.03125, %v12167_v33 }
 0x686   :  { %v5435_v10 = vsel %vm5272_vm10, %v5434_v23, %v5430_v41  ;;  %v5177_v6 = vmul.f32 0.03125, %v12177_v36  ;;  %v5452_v50 = vrot.slane %v5174_v54, %v11806_v12  ;;  %v6176_v11 = vsel %vm5560_vm14, %v5937_v27, %v6175_v39 }
 0x687   :  { %v12243_v35 = vpop.xlane.xlu0 %5767  ;;  %v12245_v55 = vpop.xlane.xlu1 %5743  ;;  %v5417_v40 = vsel %vm5272_vm10, %v5416_v58, %v5412_v0  ;;  %v5444_v33 = vsel %vm5272_vm10, %v5443_v44, %v5439_v60  ;;  %v5461_v49 = vrot.slane %v5176_v56, %v11806_v12  ;;  %v6177_v30 = vsel %vm5562_vm15, %v5946_v4, %v6176_v11 }
 0x688   :  { %v5448_v14 = vrot.slane %v5173_v48, %v11803_v5  ;;  %v5571_v36 = vsel %vm5553_vm11, %v5426_v2, %v5417_v40  ;;  %v5470_v3 = vrot.slane %v5178_v37, %v11806_v12  ;;  %v5457_v53 = vrot.slane %v5175_v29, %v11803_v5 }
 0x689   :  { %v5572_v18 = vsel %vm4793_vm7, %v5435_v10, %v5571_v36  ;;  %v5196_v22 = vmul.f32 0.03125, %v12226_v25  ;;  %v12382_v39 = vsel %vm302_vm0, 0.0, %v11931_v1  ;;  %v5466_v27 = vrot.slane %v5177_v6, %v11803_v5 }
 0x68a   :  { %v12386_v23 = vsel %vm5556_vm12, %v5444_v33, %v5572_v18  ;;  %v12389_v54 = vsel %vm5272_vm10, %v5452_v50, %v5448_v14  ;;  %v12392_v7 = vsel %vm302_vm0, 0.0, %v6177_v30  ;;  %v12399_v1 = vsel %vm5272_vm10, %v5461_v49, %v5457_v53 }
 0x68b   :  { %v12247_v32 = vpop.xlane.xlu0 %5773  ;;  %v12249_v8 = vpop.xlane.xlu1 %5785  ;;  %v5195_v25 = vmul.f32 0.03125, %v12191_v28  ;;  %v12403_v58 = vstv %s12324_s6  ;;  %v12406_v44 = vstv %s12326_s13  ;;  %v12411_v4 = vsel %vm5272_vm10, %v5470_v3, %v5466_v27 }
 0x68c   :  { %v12414_v41 = vstv %s12332_s14  ;;  %v12417_v48 = vstv %s12334_s16  ;;  %v12420_v37 = vstv %s12342_s17  ;;  %v5551_v28 = vrot.slane %v5196_v22, %v11806_v12 }
 0x68d   :  { %13544 = vst [vmem:[#allocation74_spill] sm:$0xff] %v12417_v48  ;;  %v6040_v0 = vrot.slane %v12239_v21, %v11803_v5  ;;  %v12426_v60 = vstv %s12350_s21  ;;  %v12429_v2 = vstv %s12344_s20  ;;  %v6031_v29 = vrot.slane %v12235_v20, %v11803_v5 }
 0x68e   :  { %v12434_v6 = vstv %s12352_s22  ;;  %v12437_v50 = vstv %s12358_s23  ;;  %v12440_v11 = vstv %s12360_s24  ;;  %v5547_v40 = vrot.slane %v5195_v25, %v11803_v5 }
 0x68f   :  { %v12251_v52 = vpop.xlane.xlu0 %5737  ;;  %v12253_v24 = vpop.xlane.xlu1 %5749  ;;  %v6044_v21 = vrot.slane %v12203_v13, %v11806_v12  ;;  %v6103_v33 = vrot.slane %v12247_v32, %v11803_v5  ;;  %v6035_v49 = vrot.slane %v12193_v9, %v11806_v12  ;;  %v6107_v30 = vrot.slane %v12228_v57, %v11806_v12 }
 0x690   :  { %v6049_v20 = vrot.slane %v12251_v52, %v11803_v5  ;;  %v12456_v36 = vstv %s12373_s25  ;;  %v12459_v3 = vstv %s12375_s26  ;;  %v6053_v13 = vrot.slane %v12237_v51, %v11806_v12 }
 0x691   :  { %v6045_v32 = vsel %vm5272_vm10, %v6044_v21, %v6040_v0  ;;  %v6094_v52 = vrot.slane %v12243_v35, %v11803_v5  ;;  %v5552_v53 = vsel %vm5272_vm10, %v5551_v28, %v5547_v40  ;;  %v6098_v9 = vrot.slane %v12217_v15, %v11806_v12 }
 0x692   :  { %v6036_v57 = vsel %vm5272_vm10, %v6035_v49, %v6031_v29  ;;  %v12471_v18 = vstv %s12394_s27  ;;  %v12474_v22 = vstv %s12396_s28  ;;  %v6108_v27 = vsel %vm5272_vm10, %v6107_v30, %v6103_v33 }
 0x693   :  { %v12255_v31 = vpop.xlane.xlu0 %5779  ;;  %v12257_v59 = vpop.xlane.xlu1 %5791  ;;  %v6054_v51 = vsel %vm5272_vm10, %v6053_v13, %v6049_v20  ;;  %v6185_v28 = vsel %vm5553_vm11, %v6045_v32, %v6036_v57  ;;  %v6116_v15 = vrot.slane %v12241_v47, %v11806_v12  ;;  %v5591_v21 = vsel %vm302_vm0, %v5552_v53, 0.0 }
 0x694   :  { %v6112_v25 = vrot.slane %v12255_v31, %v11803_v5  ;;  %v6099_v33 = vsel %vm5272_vm10, %v6098_v9, %v6094_v52  ;;  %v6058_v31 = vrot.slane %v12245_v55, %v11803_v5  ;;  %v6067_v49 = vrot.slane %v12253_v24, %v11803_v5 }
 0x695   :  { %v6191_v47 = vsel %vm4788_vm6, %v6108_v27, %v6099_v33 }
 0x696   :  { %v6117_v13 = vsel %vm5272_vm10, %v6116_v15, %v6112_v25 }
 0x697   :  { %v12259_v43 = vpop.xlane.xlu0 %5746  ;;  %v12261_v45 = vpop.xlane.xlu1 %5755 }
 0x698   :  { %v6062_v35 = vrot.slane %v12259_v43, %v11806_v12  ;;  %v6121_v43 = vrot.slane %v12249_v8, %v11803_v5  ;;  %v6076_v52 = vrot.slane %v12261_v45, %v11803_v5 }
 0x69a   :  { %v6063_v55 = vsel %vm5272_vm10, %v6062_v35, %v6058_v31 }
 0x69b   :  { %v12271_v17 = vpop.xlane.xlu0 %5788  ;;  %v12273_v63 = vpop.xlane.xlu1 %5797 }
 0x69c   :  { %v6125_v0 = vrot.slane %v12271_v17, %v11806_v12  ;;  %v6186_v17 = vsel %vm4793_vm7, %v6054_v51, %v6185_v28  ;;  %v6139_v35 = vrot.slane %v12273_v63, %v11803_v5 }
 0x69d   :  { %v6187_v51 = vsel %vm5556_vm12, %v6063_v55, %v6186_v17 }
 0x69e   :  { %v6126_v24 = vsel %vm5272_vm10, %v6125_v0, %v6121_v43 }
 0x69f   :  { %v12288_v19 = vpop.xlane.xlu0 %5752  ;;  %v12290_v46 = vpop.xlane.xlu1 %5761 }
 0x6a0   :  { %v6071_v20 = vrot.slane %v12288_v19, %v11806_v12  ;;  %v6130_v19 = vrot.slane %v12257_v59, %v11803_v5  ;;  %v6085_v57 = vrot.slane %v12290_v46, %v11803_v5  ;;  %v6192_v59 = vsel %vm5553_vm11, %v6117_v13, %v6191_v47 }
 0x6a2   :  { %v6072_v9 = vsel %vm5272_vm10, %v6071_v20, %v6067_v49 }
 0x6a3   :  { %v12311_v62 = vpop.xlane.xlu0 %5794  ;;  %v12322_v42 = vpop.xlane.xlu1 %5803 }
 0x6a4   :  { %v6148_v0 = vrot.slane %v12322_v42, %v11803_v5 }
 0x6a7   :  { %v12340_v16 = vpop.xlane.xlu0 %5758  ;;  %v12369_v34 = vpop.xlane.xlu1 %5809 }
 0x6a8   :  { %v6080_v30 = vrot.slane %v12340_v16, %v11806_v12  ;;  %v6134_v16 = vrot.slane %v12311_v62, %v11806_v12  ;;  %v6193_v62 = vsel %vm4793_vm7, %v6126_v24, %v6192_v59 }
 0x6aa   :  { %v6081_v45 = vsel %vm5272_vm10, %v6080_v30, %v6076_v52  ;;  %v6135_v15 = vsel %vm5272_vm10, %v6134_v16, %v6130_v19 }
 0x6ab   :  { %v12371_v61 = vpop.xlane.xlu0 %5800  ;;  %v5816_v10 = vpop.xlane.xlu1 %5815 }
 0x6ac   :  { %v6143_v31 = vrot.slane %v12371_v61, %v11806_v12 }
 0x6af   :  { %v12408_v56 = vpop.xlane.xlu0 %5764  ;;  %v5601_v29 = vpop.permute.xlu1 %5600 }
 0x6b0   :  { %v6089_v8 = vrot.slane %v12408_v56, %v11806_v12  ;;  %v5617_v32 = vsel %vm5614_vm4, 0.0, %v5601_v29  ;;  %v6166_v56 = vrot.slane %v5816_v10, %v11803_v5  ;;  %v6188_v10 = vsel %vm5558_vm13, %v6072_v9, %v6187_v51 }
 0x6b1   :  { %v5624_v25 = vsel %vm5621_vm5, %v5617_v32, 0.0  ;;  %v6189_v63 = vsel %vm5560_vm14, %v6081_v45, %v6188_v10  ;;  %v6194_v51 = vsel %vm5556_vm12, %v6135_v15, %v6193_v62  ;;  %v6157_v45 = vrot.slane %v12369_v34, %v11803_v5 }
 0x6b2   :  { %v6090_v28 = vsel %vm5272_vm10, %v6089_v8, %v6085_v57  ;;  %v6383_v20 = vmul.f32 %v12403_v58, %v5624_v25  ;;  %v6437_v42 = vmul.f32 %v12406_v44, %v5624_v25  ;;  %v6336_v49 = vmul.f32 %v12420_v37, %v5624_v25 }
 0x6b3   :  { %v12453_v14 = vpop.xlane.xlu0 %5806  ;;  %v6190_v17 = vsel %vm5562_vm15, %v6090_v28, %v6189_v63  ;;  %v6491_v55 = vmul.f32 %v12429_v2, %v5624_v25  ;;  %v6592_v9 = vmul.f32 %v12417_v48, %v5624_v25  ;;  %v6144_v28 = vsel %vm5272_vm10, %v6143_v31, %v6139_v35 }
 0x6b4   :  { %v6152_v30 = vrot.slane %v12453_v14, %v11806_v12 }
 0x6b7   :  { %v12487_v40 = vpop.xlane.xlu0 %5812 }
 0x6bb   :  { %v5819_v53 = vpop.xlane.xlu0 %5818 }
 0x6bc   :  { %v6170_v27 = vrot.slane %v5819_v53, %v11806_v12  ;;  %v6538_v53 = vmul.f32 %v12414_v41, %v5624_v25  ;;  %v6161_v25 = vrot.slane %v12487_v40, %v11806_v12 }
 0x6be   :  { %v6171_v46 = vsel %vm5272_vm10, %v6170_v27, %v6166_v56 }
 0x6bf   :  { %v6215_v29 = vpop.permute.xlu0 %6214  ;;  %v6205_v33 = vsel %vm302_vm0, %v6171_v46, 0.0  ;;  %v6153_v46 = vsel %vm5272_vm10, %v6152_v30, %v6148_v0 }
 0x6c0   :  { %v6230_v43 = vsel %vm5614_vm4, 0.0, %v6215_v29  ;;  %6220 = vrot.lane.b32.xlu1 %v6205_v33, %s7744_s5 }
 0x6c1   :  { %v6236_v47 = vsel %vm5621_vm5, %v6230_v43, 0.0 }
 0x6c2   :  { %v6391_v61 = vmul.f32 %v12426_v60, %v6236_v47  ;;  %v6445_v13 = vmul.f32 %v12434_v6, %v6236_v47  ;;  %v6546_v32 = vmul.f32 %v12437_v50, %v6236_v47  ;;  %v6600_v19 = vmul.f32 %v12440_v11, %v6236_v47 }
 0x6c3   :  { %v6213_v8 = vpop.permute.xlu0 %6212  ;;  %v6344_v52 = vmul.f32 %v12456_v36, %v6236_v47  ;;  %v6499_v24 = vmul.f32 %v12459_v3, %v6236_v47 }
 0x6c4   :  { %v6229_v16 = vsel %vm5614_vm4, 0.0, %v6213_v8  ;;  %5606 = vrot.lane.b32.xlu1 %v5591_v21, %s7744_s5  ;;  %v6397_v14 = vadd.f32 %v6391_v61, %v6383_v20  ;;  %v6451_v56 = vadd.f32 %v6445_v13, %v6437_v42  ;;  %v6203_v21 = vsel %vm302_vm0, 0.0, %v6190_v17 }
 0x6c5   :  { %v12558_v57 = vsel %vm5621_vm5, %v6229_v16, 0.0  ;;  %v6350_v27 = vadd.f32 %v6344_v52, %v6336_v49  ;;  %v12560_v59 = vadd.f32 %v6499_v24, %v6491_v55  ;;  %v6552_v29 = vadd.f32 %v6546_v32, %v6538_v53 }
 0x6c6   :  { %v6606_v33 = vadd.f32 %v6600_v19, %v6592_v9  ;;  %v6249_v5 = vmul.f32 %v12474_v22, %v12558_v57  ;;  %v6390_v34 = vmul.f32 %v12426_v60, %v12558_v57  ;;  %v6410_v62 = vrot.slane %v6397_v14, 1 }
 0x6c7   :  { %v5599_v10 = vpop.permute.xlu0 %5598  ;;  %v6444_v12 = vmul.f32 %v12434_v6, %v12558_v57  ;;  %v6464_v40 = vrot.slane %v6451_v56, 1  ;;  %v6545_v15 = vmul.f32 %v12437_v50, %v12558_v57  ;;  %v6599_v31 = vmul.f32 %v12440_v11, %v12558_v57 }
 0x6c8   :  { %v5616_v43 = vsel %vm5614_vm4, 0.0, %v5599_v10  ;;  %6210 = vrot.lane.b32.xlu1 %v12392_v7, %s7744_s5  ;;  %v6343_v63 = vmul.f32 %v12456_v36, %v12558_v57  ;;  %v6565_v61 = vrot.slane %v6552_v29, 2  ;;  %v6619_v13 = vrot.slane %v6606_v33, 2 }
 0x6c9   :  { %v5623_v35 = vsel %vm5621_vm5, %v5616_v43, 0.0  ;;  %v6364_v24 = vrot.slane %v6350_v27, 1  ;;  %v6498_v16 = vmul.f32 %v12459_v3, %v12558_v57  ;;  %v6162_v10 = vsel %vm5272_vm10, %v6161_v25, %v6157_v45 }
 0x6ca   :  { %v6243_v0 = vmul.f32 %v12471_v18, %v5623_v35  ;;  %v6382_v7 = vmul.f32 %v12403_v58, %v5623_v35  ;;  %v6436_v20 = vmul.f32 %v12406_v44, %v5623_v35  ;;  %v6537_v47 = vmul.f32 %v12414_v41, %v5623_v35 }
 0x6cb   :  { %v6591_v17 = vmul.f32 %v12417_v48, %v5623_v35  ;;  %v6335_v42 = vmul.f32 %v12420_v37, %v5623_v35  ;;  %v6195_v27 = vsel %vm5558_vm13, %v6144_v28, %v6194_v51  ;;  %v5574_v25 = vsel %vm5558_vm13, %v12389_v54, %v12386_v23 }
 0x6cc   :  { %5596 = vrot.lane.b32.xlu1 %v12382_v39, %s7744_s5  ;;  %v12596_v49 = vadd.f32 %v6249_v5, %v6243_v0  ;;  %v12598_v30 = vadd.f32 %v6390_v34, %v6382_v7  ;;  %v12602_v55 = vadd.f32 %v6444_v12, %v6436_v20  ;;  %v12604_v8 = vadd.f32 %v6545_v15, %v6537_v47 }
 0x6cd   :  { %v12606_v32 = vadd.f32 %v6599_v31, %v6591_v17  ;;  %v12608_v19 = vadd.f32 %v6343_v63, %v6335_v42  ;;  %v6490_v39 = vmul.f32 %v12429_v2, %v5623_v35  ;;  %v6519_v34 = vrot.slane %v12560_v59, 2 }
 0x6ce   :  { %v13292_v52 = vrot.slane %v12598_v30, 1  ;;  %v13289_v14 = vrot.slane %v12602_v55, 1  ;;  %v13288_v53 = vrot.slane %v12604_v8, 2  ;;  %v5575_v12 = vsel %vm5560_vm14, %v12399_v1, %v5574_v25 }
 0x6cf   :  { %v13287_v9 = vrot.slane %v12606_v32, 2  ;;  %v13291_v56 = vrot.slane %v12608_v19, 1  ;;  %v12626_v33 = vadd.f32 %v6498_v16, %v6490_v39  ;;  %v12669_v54 = vstv %s12600_s3 }
 0x6d0   :  { %6216 = vrot.lane.b32.xlu1 %v6203_v21, %s7744_s5  ;;  %v12624_v29 = vsel %vm461_vm1, %v13292_v52, %v6410_v62  ;;  %v12631_v43 = vsel %vm461_vm1, %v13289_v14, %v6464_v40  ;;  %v12636_v45 = vsel %vm549_vm2, %v13288_v53, %v6565_v61  ;;  %v6196_v21 = vsel %vm5560_vm14, %v6153_v46, %v6195_v27 }
 0x6d1   :  { %v12641_v51 = vsel %vm549_vm2, %v13287_v9, %v6619_v13  ;;  %v12646_v28 = vsel %vm461_vm1, %v13291_v56, %v6364_v24  ;;  %v13290_v5 = vrot.slane %v12626_v33, 2  ;;  %v6197_v62 = vsel %vm5562_vm15, %v6162_v10, %v6196_v21 }
 0x6d2   :  { %v12658_v40 = vstv %s12588_s29  ;;  %v5576_v46 = vsel %vm5562_vm15, %v12411_v4, %v5575_v12  ;;  %v12673_v0 = vstv %s7369_s0  ;;  %v6269_v1 = vmul.f32 %v12669_v54, %v12558_v57 }
 0x6d3   :  { %v12666_v23 = vsel %vm549_vm2, %v13290_v5, %v6519_v34  ;;  %v6263_v59 = vmul.f32 %v12658_v40, %v5623_v35  ;;  %v5589_v15 = vsel %vm302_vm0, 0.0, %v5576_v46  ;;  %v12678_v7 = vstv %s7370_s2 }
 0x6d4   :  { %6218 = vrot.lane.b32.xlu1 %v6197_v62, %s7744_s5  ;;  %13545 = vst [vmem:[#allocation75_spill] sm:$0xff] %v12666_v23  ;;  %v6299_v31 = vmul.f32 %v12673_v0, %v5623_v35  ;;  %v6305_v63 = vmul.f32 %v12678_v7, %v12558_v57 }
 0x6d5   :  { %v6273_v4 = vadd.f32 %v6269_v1, %v6263_v59 }
 0x6d6   :  { %v6309_v20 = vadd.f32 %v6305_v63, %v6299_v31 }
 0x6d8   :  { %5602 = vrot.lane.b32.xlu1 %v5589_v15, %s7744_s5 }
 0x6dc   :  { %6282 = vrot.lane.b32.xlu1 %v6273_v4, %s7745_s30 }
 0x6e0   :  { %6318 = vrot.lane.b32.xlu1 %v6309_v20, %s7746_s15 }
 0x6f0   :  { %v5605_v46 = vpop.permute.xlu0 %5604 }
 0x6f1   :  { %v5619_v31 = vsel %vm5614_vm4, 0.0, %v5605_v46 }
 0x732   :  { %v6221_v47 = vpop.permute.xlu1 %6220 }
 0x733   :  { %v6233_v17 = vsel %vm5614_vm4, 0.0, %v6221_v47 }
 0x734   :  { %v12687_v61 = vsel %vm5621_vm5, %v6233_v17, 0.0  ;;  %v12724_v17 = vsel %vm5621_vm5, %v5619_v31, 0.0 }
 0x735   :  { %v6347_v39 = vmul.f32 %v12456_v36, %v12687_v61  ;;  %v6502_v10 = vmul.f32 %v12459_v3, %v12687_v61 }
 0x736   :  { %v5607_v42 = vpop.permute.xlu1 %5606 }
 0x737   :  { %v5620_v13 = vsel %vm5614_vm4, 0.0, %v5607_v42 }
 0x738   :  { %v12691_v35 = vsel %vm5621_vm5, %v5620_v13, 0.0 }
 0x739   :  { %v6339_v57 = vmul.f32 %v12420_v37, %v12691_v35  ;;  %v6494_v16 = vmul.f32 %v12429_v2, %v12691_v35  ;;  %v12780_v53 = vmul.f32 %v12403_v58, %v12691_v35 }
 0x73a   :  { %v6211_v24 = vpop.permute.xlu1 %6210 }
 0x73b   :  { %v6228_v27 = vsel %vm5614_vm4, 0.0, %v6211_v24  ;;  %v12702_v21 = vadd.f32 %v6347_v39, %v6339_v57  ;;  %v12704_v25 = vadd.f32 %v6502_v10, %v6494_v16 }
 0x73c   :  { %v12707_v34 = vsel %vm5621_vm5, %v6228_v27, 0.0  ;;  %v6265_v27 = vmul.f32 %v12658_v40, %v12724_v17 }
 0x73d   :  { %v6268_v1 = vmul.f32 %v12669_v54, %v12707_v34  ;;  %v6304_v47 = vmul.f32 %v12678_v7, %v12707_v34  ;;  %v6248_v10 = vmul.f32 %v12474_v22, %v12707_v34  ;;  %v6443_v56 = vmul.f32 %v12434_v6, %v12707_v34 }
 0x73e   :  { %v5597_v62 = vpop.permute.xlu1 %5596  ;;  %v6598_v26 = vmul.f32 %v12440_v11, %v12707_v34 }
 0x73f   :  { %v5615_v12 = vsel %vm5614_vm4, 0.0, %v5597_v62 }
 0x740   :  { %v12711_v59 = vsel %vm5621_vm5, %v5615_v12, 0.0  ;;  %v6301_v12 = vmul.f32 %v12673_v0, %v12724_v17 }
 0x741   :  { %v6262_v15 = vmul.f32 %v12658_v40, %v12711_v59  ;;  %v6298_v20 = vmul.f32 %v12673_v0, %v12711_v59  ;;  %v6242_v13 = vmul.f32 %v12471_v18, %v12711_v59  ;;  %v6590_v52 = vmul.f32 %v12417_v48, %v12711_v59 }
 0x742   :  { %v6217_v4 = vpop.permute.xlu1 %6216  ;;  %v6334_v38 = vmul.f32 %v12420_v37, %v12711_v59 }
 0x743   :  { %v6272_v63 = vadd.f32 %v6268_v1, %v6262_v15  ;;  %v6231_v24 = vsel %vm5614_vm4, 0.0, %v6217_v4  ;;  %v6308_v39 = vadd.f32 %v6304_v47, %v6298_v20  ;;  %v6381_v1 = vmul.f32 %v12403_v58, %v12711_v59 }
 0x744   :  { %v12743_v46 = vsel %vm5621_vm5, %v6231_v24, 0.0  ;;  %v12749_v4 = vmul.f32 %v12403_v58, %v12724_v17  ;;  %v12751_v31 = vadd.f32 %v6248_v10, %v6242_v13  ;;  %v6245_v13 = vmul.f32 %v12471_v18, %v12724_v17 }
 0x745   :  { %6280 = vrot.lane.b32.xlu0 %v6272_v63, %s7745_s30 }
 0x746   :  { %v6219_v42 = vpop.permute.xlu1 %6218  ;;  %13546 = vst [vmem:[#allocation76_spill] sm:$0xff] %v12751_v31  ;;  %v6342_v31 = vmul.f32 %v12456_v36, %v12707_v34 }
 0x747   :  { %v6232_v57 = vsel %vm5614_vm4, 0.0, %v6219_v42  ;;  %v12758_v42 = vmul.f32 %v12406_v44, %v12724_v17 }
 0x748   :  { %v12731_v16 = vsel %vm5621_vm5, %v6232_v57, 0.0  ;;  %v6389_v57 = vmul.f32 %v12426_v60, %v12707_v34 }
 0x749   :  { %6316 = vrot.lane.b32.xlu0 %v6308_v39, %s7746_s15  ;;  %v6271_v62 = vmul.f32 %v12669_v54, %v12731_v16  ;;  %v6307_v47 = vmul.f32 %v12678_v7, %v12731_v16  ;;  %v6338_v39 = vmul.f32 %v12420_v37, %v12724_v17 }
 0x74a   :  { %v5603_v15 = vpop.permute.xlu1 %5602  ;;  %v6395_v9 = vadd.f32 %v6389_v57, %v6381_v1  ;;  %v6536_v1 = vmul.f32 %v12414_v41, %v12711_v59  ;;  %v6544_v57 = vmul.f32 %v12437_v50, %v12707_v34 }
 0x74b   :  { %v5618_v63 = vsel %vm5614_vm4, 0.0, %v5603_v15  ;;  %v6275_v20 = vadd.f32 %v6271_v62, %v6265_v27  ;;  %v6270_v27 = vmul.f32 %v12669_v54, %v12743_v46  ;;  %v6435_v62 = vmul.f32 %v12406_v44, %v12711_v59 }
 0x74c   :  { %v12761_v24 = vsel %vm5621_vm5, %v5618_v63, 0.0  ;;  %v6493_v15 = vmul.f32 %v12429_v2, %v12724_v17  ;;  %v6311_v54 = vadd.f32 %v6307_v47, %v6301_v12 }
 0x74d   :  { %6286 = vrot.lane.b32.xlu1 %v6275_v20, %s7745_s30  ;;  %v6264_v10 = vmul.f32 %v12658_v40, %v12761_v24  ;;  %v12784_v20 = vmul.f32 %v12426_v60, %v12687_v61  ;;  %v6251_v40 = vmul.f32 %v12474_v22, %v12731_v16  ;;  %v6300_v5 = vmul.f32 %v12673_v0, %v12761_v24 }
 0x74e   :  { %v6283_v63 = vpop.permute.xlu1 %6282  ;;  %v6306_v0 = vmul.f32 %v12678_v7, %v12743_v46  ;;  %v6449_v47 = vadd.f32 %v6443_v56, %v6435_v62  ;;  %v6550_v7 = vadd.f32 %v6544_v57, %v6536_v1  ;;  %v6348_v56 = vadd.f32 %v6342_v31, %v6334_v38 }
 0x74f   :  { %v6274_v14 = vadd.f32 %v6270_v27, %v6264_v10  ;;  %v6293_v12 = vadd.f32 %v6283_v63, %v12596_v49  ;;  %v6407_v27 = vrot.slane %v6395_v9, 1  ;;  %v12807_v23 = vadd.f32 %v6251_v40, %v6245_v13 }
 0x750   :  { %v6310_v49 = vadd.f32 %v6306_v0, %v6300_v5  ;;  %v6250_v63 = vmul.f32 %v12474_v22, %v12743_v46  ;;  %v6489_v9 = vmul.f32 %v12429_v2, %v12711_v59  ;;  %v6497_v13 = vmul.f32 %v12459_v3, %v12707_v34 }
 0x751   :  { %6322 = vrot.lane.b32.xlu1 %v6311_v54, %s7746_s15  ;;  %6284 = vrot.lane.b32.xlu0 %v6274_v14, %s7745_s30  ;;  %v6244_v14 = vmul.f32 %v12471_v18, %v12761_v24  ;;  %v6461_v5 = vrot.slane %v6449_v47, 1  ;;  %v6604_v62 = vadd.f32 %v6598_v26, %v6590_v52  ;;  %v6361_v18 = vrot.slane %v6348_v56, 1 }
 0x752   :  { %v6319_v10 = vpop.permute.xlu1 %6318  ;;  %v6503_v38 = vadd.f32 %v6497_v13, %v6489_v9  ;;  %v6346_v59 = vmul.f32 %v12456_v36, %v12731_v16  ;;  %v6337_v34 = vmul.f32 %v12420_v37, %v12761_v24  ;;  %v13547_v31 = vrot.slane %v12598_v30, 1 }
 0x753   :  { %v6329_v48 = vadd.f32 %v6319_v10, %v6293_v12  ;;  %v12822_v40 = vadd.f32 %v6250_v63, %v6244_v14  ;;  %v6393_v26 = vmul.f32 %v12426_v60, %v12731_v16  ;;  %v6345_v52 = vmul.f32 %v12456_v36, %v12743_v46 }
 0x754   :  { %v6516_v1 = vrot.slane %v6503_v38, 2  ;;  %v6352_v37 = vadd.f32 %v6346_v59, %v6338_v39  ;;  %v6492_v30 = vmul.f32 %v12429_v2, %v12761_v24  ;;  %v6369_v36 = vrot.slane %v12702_v21, 1 }
 0x755   :  { %6419 = vrot.lane.b32.xlu1 %v12624_v29, %s7745_s30  ;;  %6320 = vrot.lane.b32.xlu0 %v6310_v49, %s7746_s15  ;;  %v12825_v22 = vadd.f32 %v12646_v28, %v6329_v48  ;;  %v6409_v29 = vsel %vm461_vm1, %v6407_v27, %v13547_v31  ;;  %v6501_v48 = vmul.f32 %v12459_v3, %v12731_v16  ;;  %v13548_v28 = vrot.slane %v12608_v19, 1 }
 0x756   :  { %v6351_v57 = vadd.f32 %v6345_v52, %v6337_v34  ;;  %v6500_v19 = vmul.f32 %v12459_v3, %v12743_v46  ;;  %v6562_v0 = vrot.slane %v6550_v7, 2  ;;  %v6447_v47 = vmul.f32 %v12434_v6, %v12731_v16 }
 0x757   :  { %v12843_v54 = vsel %vm461_vm1, %v6361_v18, %v13548_v28  ;;  %v6507_v12 = vadd.f32 %v6501_v48, %v6493_v15  ;;  %v13549_v39 = vrot.slane %v12626_v33, 2  ;;  %v6367_v10 = vrot.slane %v6352_v37, 1 }
 0x758   :  { %v6524_v49 = vrot.slane %v12704_v25, 2  ;;  %v6506_v21 = vadd.f32 %v6500_v19, %v6492_v30  ;;  %v13550_v15 = vrot.slane %v12602_v55, 1  ;;  %v6399_v3 = vadd.f32 %v6393_v26, %v12749_v4 }
 0x759   :  { %6473 = vrot.lane.b32.xlu1 %v12631_v43, %s7746_s15  ;;  %6417 = vrot.lane.b32.xlu0 %v6409_v29, %s7745_s30  ;;  %v12858_v2 = vsel %vm549_vm2, %v6516_v1, %v13549_v39  ;;  %v6366_v43 = vrot.slane %v6351_v57, 1  ;;  %v6522_v27 = vrot.slane %v6507_v12, 2  ;;  %v6384_v14 = vmul.f32 %v12403_v58, %v12761_v24 }
 0x75a   :  { %v6463_v63 = vsel %vm461_vm1, %v6461_v5, %v13550_v15  ;;  %v12868_v33 = vsel %vm461_vm1, %v6367_v10, %v6369_v36  ;;  %v6440_v25 = vmul.f32 %v12406_v44, %v12691_v35  ;;  %v6521_v4 = vrot.slane %v6506_v21, 2 }
 0x75b   :  { %v12876_v55 = vsel %vm461_vm1, %v6366_v43, %v6367_v10  ;;  %v12879_v7 = vsel %vm549_vm2, %v6522_v27, %v6524_v49  ;;  %v6400_v58 = vadd.f32 %v12784_v20, %v12780_v53  ;;  %v6448_v56 = vmul.f32 %v12434_v6, %v12687_v61 }
 0x75c   :  { %v6616_v9 = vrot.slane %v6604_v62, 2  ;;  %v6453_v13 = vadd.f32 %v6447_v47, %v12758_v42  ;;  %v6548_v5 = vmul.f32 %v12437_v50, %v12731_v16  ;;  %v12891_v18 = vsel %vm549_vm2, %v6521_v4, %v6522_v27  ;;  %v13554_v4 = vld [vmem:[#allocation76_spill] sm:$0xff] }
 0x75d   :  { %6574 = vrot.lane.b32.xlu1 %v12636_v45, %s7745_s30  ;;  %6471 = vrot.lane.b32.xlu0 %v6463_v63, %s7746_s15  ;;  %v6392_v45 = vmul.f32 %v12426_v60, %v12743_v46  ;;  %v13551_v38 = vrot.slane %v12604_v8, 2  ;;  %v6413_v53 = vrot.slane %v6399_v3, 1  ;;  %v6438_v34 = vmul.f32 %v12406_v44, %v12761_v24 }
 0x75e   :  { %v6454_v60 = vadd.f32 %v6448_v56, %v6440_v25  ;;  %v6540_v42 = vmul.f32 %v12414_v41, %v12724_v17  ;;  %v6415_v62 = vrot.slane %v6400_v58, 1  ;;  %v6541_v8 = vmul.f32 %v12414_v41, %v12691_v35 }
 0x75f   :  { %v6564_v59 = vsel %vm549_vm2, %v6562_v0, %v13551_v38  ;;  %v6398_v20 = vadd.f32 %v6392_v45, %v6384_v14  ;;  %v6549_v31 = vmul.f32 %v12437_v50, %v12687_v61  ;;  %v6446_v29 = vmul.f32 %v12434_v6, %v12743_v46 }
 0x760   :  { %v13552_v44 = vrot.slane %v12606_v32, 2  ;;  %v6467_v26 = vrot.slane %v6453_v13, 1  ;;  %v6554_v52 = vadd.f32 %v6548_v5, %v6540_v42  ;;  %v6602_v48 = vmul.f32 %v12440_v11, %v12731_v16  ;;  %v13553_v32 = vld [vmem:[#allocation74_spill] sm:$0xff] }
 0x761   :  { %6628 = vrot.lane.b32.xlu1 %v12641_v51, %s7746_s15  ;;  %6572 = vrot.lane.b32.xlu0 %v6564_v59, %s7745_s30  ;;  %v6416_v28 = vsel %vm461_vm1, %v6413_v53, %v6415_v62  ;;  %v6412_v1 = vrot.slane %v6398_v20, 1  ;;  %v6452_v37 = vadd.f32 %v6446_v29, %v6438_v34  ;;  %v6539_v30 = vmul.f32 %v12414_v41, %v12761_v24 }
 0x762   :  { %v6618_v51 = vsel %vm549_vm2, %v6616_v9, %v13552_v44  ;;  %v6469_v6 = vrot.slane %v6454_v60, 1  ;;  %v6594_v36 = vmul.f32 %v13553_v32, %v12724_v17  ;;  %v6555_v57 = vadd.f32 %v6549_v31, %v6541_v8 }
 0x763   :  { %v6595_v12 = vmul.f32 %v13553_v32, %v12691_v35  ;;  %v6547_v16 = vmul.f32 %v12437_v50, %v12743_v46  ;;  %v6568_v0 = vrot.slane %v6554_v52, 2  ;;  %v6603_v41 = vmul.f32 %v12440_v11, %v12687_v61 }
 0x764   :  { %v6470_v19 = vsel %vm461_vm1, %v6467_v26, %v6469_v6  ;;  %v6608_v47 = vadd.f32 %v6602_v48, %v6594_v36  ;;  %v6414_v39 = vsel %vm461_vm1, %v6412_v1, %v6413_v53  ;;  %v6466_v10 = vrot.slane %v6452_v37, 1 }
 0x765   :  { %6423 = vrot.lane.b32.xlu1 %v6416_v28, %s7745_s30  ;;  %6626 = vrot.lane.b32.xlu0 %v6618_v51, %s7746_s15  ;;  %v6553_v43 = vadd.f32 %v6547_v16, %v6539_v30  ;;  %v6593_v17 = vmul.f32 %v13553_v32, %v12761_v24  ;;  %v6570_v35 = vrot.slane %v6555_v57, 2  ;;  %v6609_v50 = vadd.f32 %v6603_v41, %v6595_v12 }
 0x766   :  { %v6601_v27 = vmul.f32 %v12440_v11, %v12743_v46  ;;  %v6622_v49 = vrot.slane %v6608_v47, 2  ;;  %v6468_v21 = vsel %vm461_vm1, %v6466_v10, %v6467_v26  ;;  %v13555_v26 = vld [vmem:[#allocation75_spill] sm:$0xff] }
 0x767   :  { %v6571_v61 = vsel %vm549_vm2, %v6568_v0, %v6570_v35  ;;  %v6567_v15 = vrot.slane %v6553_v43, 2  ;;  %v6624_v24 = vrot.slane %v6609_v50, 2 }
 0x768   :  { %v6607_v63 = vadd.f32 %v6601_v27, %v6593_v17 }
 0x769   :  { %6477 = vrot.lane.b32.xlu1 %v6470_v19, %s7746_s15  ;;  %6421 = vrot.lane.b32.xlu0 %v6414_v39, %s7745_s30  ;;  %v6625_v3 = vsel %vm549_vm2, %v6622_v49, %v6624_v24  ;;  %v6569_v14 = vsel %vm549_vm2, %v6567_v15, %v6568_v0 }
 0x76a   :  { %v6621_v25 = vrot.slane %v6607_v63, 2 }
 0x76c   :  { %v6623_v11 = vsel %vm549_vm2, %v6621_v25, %v6622_v49 }
 0x76d   :  { %6578 = vrot.lane.b32.xlu1 %v6571_v61, %s7745_s30  ;;  %6475 = vrot.lane.b32.xlu0 %v6468_v21, %s7746_s15 }
 0x771   :  { %6632 = vrot.lane.b32.xlu1 %v6625_v3, %s7746_s15  ;;  %6576 = vrot.lane.b32.xlu0 %v6569_v14, %s7745_s30 }
 0x775   :  { %6630 = vrot.lane.b32.xlu0 %v6623_v11, %s7746_s15 }
 0x7b7   :  { %v6281_v46 = vpop.permute.xlu0 %6280 }
 0x7b8   :  { %v6292_v58 = vadd.f32 %v6281_v46, %v13554_v4  ;;  %v13557_v4 = vld [vmem:[#allocation9_spill] sm:$0xff] }
 0x7bb   :  { %v6317_v56 = vpop.permute.xlu0 %6316 }
 0x7bc   :  { %v6328_v45 = vadd.f32 %v6317_v56, %v6292_v58  ;;  %v6679_v58 = vsub.s32 1, %v13557_v4 }
 0x7be   :  { %v6375_v9 = vadd.f32 %v12843_v54, %v6328_v45 }
 0x7bf   :  { %v6287_v13 = vpop.permute.xlu1 %6286 }
 0x7c0   :  { %v6295_v5 = vadd.f32 %v6287_v13, %v12807_v23 }
 0x7c3   :  { %v6285_v38 = vpop.permute.xlu0 %6284  ;;  %v6323_v59 = vpop.permute.xlu1 %6322 }
 0x7c4   :  { %v6294_v53 = vadd.f32 %v6285_v38, %v12822_v40  ;;  %v6331_v20 = vadd.f32 %v6323_v59, %v6295_v5  ;;  %v6701_v5 = vsub.s32 3, %v13557_v4  ;;  %v6712_v59 = vsub.s32 4, %v13557_v4 }
 0x7c6   :  { %v6378_v34 = vadd.f32 %v12868_v33, %v6331_v20  ;;  %v6734_v20 = vsub.s32 6, %v13557_v4 }
 0x7c7   :  { %v6321_v60 = vpop.permute.xlu0 %6320  ;;  %v6420_v42 = vpop.permute.xlu1 %6419 }
 0x7c8   :  { %v6330_v62 = vadd.f32 %v6321_v60, %v6294_v53  ;;  %v6430_v8 = vadd.f32 %v6420_v42, %v12825_v22  ;;  %v6723_v53 = vsub.s32 5, %v13557_v4 }
 0x7ca   :  { %v6377_v31 = vadd.f32 %v12876_v55, %v6330_v62 }
 0x7cb   :  { %v6418_v29 = vpop.permute.xlu0 %6417  ;;  %v6474_v44 = vpop.permute.xlu1 %6473 }
 0x7cc   :  { %v6484_v54 = vadd.f32 %v6474_v44, %v6430_v8  ;;  %v6429_v51 = vadd.f32 %v6418_v29, %v6375_v9  ;;  %v6690_v9 = vsub.s32 2, %v13557_v4 }
 0x7ce   :  { %v6531_v23 = vadd.f32 %v13555_v26, %v6484_v54 }
 0x7cf   :  { %v6472_v52 = vpop.permute.xlu0 %6471  ;;  %v6575_v48 = vpop.permute.xlu1 %6574 }
 0x7d0   :  { %v6483_v28 = vadd.f32 %v6472_v52, %v6429_v51  ;;  %v6585_v63 = vadd.f32 %v6575_v48, %v6531_v23 }
 0x7d2   :  { %v6530_v40 = vadd.f32 %v12858_v2, %v6483_v28 }
 0x7d3   :  { %v6573_v1 = vpop.permute.xlu0 %6572  ;;  %v6629_v33 = vpop.permute.xlu1 %6628 }
 0x7d4   :  { %v6584_v37 = vadd.f32 %v6573_v1, %v6530_v40 }
 0x7d7   :  { %v6627_v30 = vpop.permute.xlu0 %6626  ;;  %v6424_v6 = vpop.permute.xlu1 %6423 }
 0x7d8   :  { %v6638_v32 = vadd.f32 %v6627_v30, %v6584_v37  ;;  %v6432_v36 = vadd.f32 %v6424_v6, %v6378_v34  ;;  %v6745_v34 = vsub.s32 7, %v13557_v4 }
 0x7da   :  { %v7383_v22 = vmul.f32 -1.442695, %v6638_v32 }
 0x7db   :  { %v6422_v55 = vpop.permute.xlu0 %6421  ;;  %v6478_v57 = vpop.permute.xlu1 %6477 }
 0x7dc   :  { %7679 = vpow2.f32 %v7383_v22  ;;  %v6486_v12 = vadd.f32 %v6478_v57, %v6432_v36  ;;  %v6431_v16 = vadd.f32 %v6422_v55, %v6377_v31 }
 0x7de   :  { %v6533_v19 = vadd.f32 %v12879_v7, %v6486_v12  ;;  %v6639_v7 = vadd.f32 %v6629_v33, %v6585_v63  ;;  %v13560_v63 = vld [vmem:[#allocation12_spill] sm:$0xff] }
 0x7df   :  { %v6476_v0 = vpop.permute.xlu0 %6475  ;;  %v6579_v41 = vpop.permute.xlu1 %6578 }
 0x7e0   :  { %v6485_v47 = vadd.f32 %v6476_v0, %v6431_v16  ;;  %v6587_v39 = vadd.f32 %v6579_v41, %v6533_v19  ;;  %v7384_v3 = vmul.f32 -1.442695, %v6639_v7 }
 0x7e2   :  { %v6532_v2 = vadd.f32 %v12891_v18, %v6485_v47  ;;  %v13556_v18 = vld [vmem:[#allocation26_spill] sm:$0xff] }
 0x7e3   :  { %v6577_v10 = vpop.permute.xlu0 %6576  ;;  %v6633_v43 = vpop.permute.xlu1 %6632 }
 0x7e4   :  { %v6641_v17 = vadd.f32 %v6633_v43, %v6587_v39  ;;  %v6586_v50 = vadd.f32 %v6577_v10, %v6532_v2 }
 0x7e6   :  { %v7680_v35 = vpop.eup %7679  ;;  %v7386_v27 = vmul.f32 -1.442695, %v6641_v17  ;;  %v13558_v17 = vld [vmem:[#allocation19_spill] sm:$0xff] }
 0x7e7   :  { %v6654_v49 = vadd.f32 1.0, %v7680_v35  ;;  %v6631_v61 = vpop.permute.xlu0 %6630 }
 0x7e8   :  { %7681 = vpow2.f32 %v7386_v27  ;;  %v6640_v21 = vadd.f32 %v6631_v61, %v6586_v50  ;;  %v13559_v50 = vld [vmem:[#allocation27_spill] sm:$0xff] }
 0x7e9   :  { %7683 = vrcp.f32 %v6654_v49 }
 0x7ea   :  { %v7385_v15 = vmul.f32 -1.442695, %v6640_v21 }
 0x7ec   :  { %7685 = vpow2.f32 %v7385_v15 }
 0x7f2   :  { %v7682_v24 = vpop.eup %7681 }
 0x7f3   :  { %v7684_v14 = vpop.eup %7683  ;;  %v6657_v25 = vadd.f32 1.0, %v7682_v24  ;;  %v13561_v24 = vld [vmem:[#allocation20_spill] sm:$0xff] }
 0x7f4   :  { %v6669_v11 = vrot.slane %v7684_v14, %v13556_v18  ;;  %v6680_v45 = vrot.slane %v7684_v14, %v6679_v58  ;;  %v6691_v13 = vrot.slane %v7684_v14, %v6690_v9  ;;  %v6702_v42 = vrot.slane %v7684_v14, %v6701_v5 }
 0x7f5   :  { %7687 = vrcp.f32 %v6657_v25  ;;  %v6713_v52 = vrot.slane %v7684_v14, %v6712_v59  ;;  %v6724_v6 = vrot.slane %v7684_v14, %v6723_v53  ;;  %v6735_v32 = vrot.slane %v7684_v14, %v6734_v20 }
 0x7f6   :  { %v7686_v46 = vpop.eup %7685  ;;  %7689 = vpow2.f32 %v7384_v3  ;;  %6675 = vbcast.lane.b32.xlu1 %v6669_v11, 264  ;;  %6671 = vbcast.lane.b32.xlu0 %v6669_v11, 256  ;;  %v6746_v22 = vrot.slane %v7684_v14, %v6745_v34 }
 0x7f7   :  { %v6656_v56 = vadd.f32 1.0, %v7686_v46  ;;  %v13562_v46 = vld [vmem:[#allocation21_spill] sm:$0xff] }
 0x7f9   :  { %7691 = vrcp.f32 %v6656_v56 }
 0x7fa   :  { %6686 = vbcast.lane.b32.xlu1 %v6680_v45, 264  ;;  %6682 = vbcast.lane.b32.xlu0 %v6680_v45, 256 }
 0x7fe   :  { %6697 = vbcast.lane.b32.xlu1 %v6691_v13, 264  ;;  %6693 = vbcast.lane.b32.xlu0 %v6691_v13, 256 }
 0x7ff   :  { %v12960_v38 = vpop.eup %7687 }
 0x800   :  { %v7690_v60 = vpop.eup %7689  ;;  %v12967_v62 = vrot.slane %v12960_v38, %v6679_v58  ;;  %v12970_v8 = vrot.slane %v12960_v38, %v6690_v9  ;;  %v12973_v31 = vrot.slane %v12960_v38, %v6701_v5  ;;  %v12976_v29 = vrot.slane %v12960_v38, %v6712_v59 }
 0x801   :  { %v12979_v44 = vrot.slane %v12960_v38, %v6723_v53  ;;  %v12982_v54 = vrot.slane %v12960_v38, %v6734_v20  ;;  %v12985_v51 = vrot.slane %v12960_v38, %v6745_v34  ;;  %v6655_v23 = vadd.f32 1.0, %v7690_v60 }
 0x802   :  { %6708 = vbcast.lane.b32.xlu1 %v6702_v42, 264  ;;  %6704 = vbcast.lane.b32.xlu0 %v6702_v42, 256  ;;  %v6933_v2 = vrot.slane %v12960_v38, %v13556_v18  ;;  %v13564_v38 = vld [vmem:[#allocation24_spill] sm:$0xff] }
 0x803   :  { %v7692_v26 = vpop.eup %7691  ;;  %7693 = vrcp.f32 %v6655_v23 }
 0x804   :  { %v6856_v48 = vrot.slane %v7692_v26, %v6679_v58  ;;  %v6867_v28 = vrot.slane %v7692_v26, %v6690_v9  ;;  %v6878_v40 = vrot.slane %v7692_v26, %v6701_v5  ;;  %v6889_v1 = vrot.slane %v7692_v26, %v6712_v59 }
 0x805   :  { %v6900_v33 = vrot.slane %v7692_v26, %v6723_v53  ;;  %v6911_v37 = vrot.slane %v7692_v26, %v6734_v20  ;;  %v6922_v30 = vrot.slane %v7692_v26, %v6745_v34  ;;  %v6845_v39 = vrot.slane %v7692_v26, %v13556_v18 }
 0x806   :  { %6719 = vbcast.lane.b32.xlu1 %v6713_v52, 264  ;;  %6715 = vbcast.lane.b32.xlu0 %v6713_v52, 256  ;;  %v13568_v52 = vld [vmem:[#allocation17_spill] sm:$0xff] }
 0x80a   :  { %6730 = vbcast.lane.b32.xlu1 %v6724_v6, 264  ;;  %6726 = vbcast.lane.b32.xlu0 %v6724_v6, 256  ;;  %v13570_v6 = vld [vmem:[#allocation44_spill] sm:$0xff] }
 0x80d   :  { %v7694_v36 = vpop.eup %7693 }
 0x80e   :  { %6741 = vbcast.lane.b32.xlu1 %v6735_v32, 264  ;;  %6737 = vbcast.lane.b32.xlu0 %v6735_v32, 256  ;;  %v6757_v55 = vrot.slane %v7694_v36, %v13556_v18  ;;  %v6768_v57 = vrot.slane %v7694_v36, %v6679_v58  ;;  %v6779_v12 = vrot.slane %v7694_v36, %v6690_v9  ;;  %v13563_v58 = vld [vmem:[#allocation13_spill] sm:$0xff] }
 0x80f   :  { %v6790_v16 = vrot.slane %v7694_v36, %v6701_v5  ;;  %v6801_v19 = vrot.slane %v7694_v36, %v6712_v59  ;;  %v6812_v0 = vrot.slane %v7694_v36, %v6723_v53  ;;  %v6823_v41 = vrot.slane %v7694_v36, %v6734_v20  ;;  %v13565_v53 = vld [vmem:[#allocation18_spill] sm:$0xff] }
 0x810   :  { %v6834_v47 = vrot.slane %v7694_v36, %v6745_v34 }
 0x812   :  { %6752 = vbcast.lane.b32.xlu1 %v6746_v22, 264  ;;  %6748 = vbcast.lane.b32.xlu0 %v6746_v22, 256  ;;  %v13571_v22 = vld [vmem:[#allocation8_spill] sm:$0xff] }
 0x816   :  { %6763 = vbcast.lane.b32.xlu1 %v6757_v55, 264  ;;  %6759 = vbcast.lane.b32.xlu0 %v6757_v55, 256 }
 0x81a   :  { %6774 = vbcast.lane.b32.xlu1 %v6768_v57, 264  ;;  %6770 = vbcast.lane.b32.xlu0 %v6768_v57, 256 }
 0x81e   :  { %6785 = vbcast.lane.b32.xlu1 %v6779_v12, 264  ;;  %6781 = vbcast.lane.b32.xlu0 %v6779_v12, 256 }
 0x822   :  { %6796 = vbcast.lane.b32.xlu1 %v6790_v16, 264  ;;  %6792 = vbcast.lane.b32.xlu0 %v6790_v16, 256 }
 0x826   :  { %6807 = vbcast.lane.b32.xlu1 %v6801_v19, 264  ;;  %6803 = vbcast.lane.b32.xlu0 %v6801_v19, 256  ;;  %v13572_v19 = vld [vmem:[#allocation45_spill] sm:$0xff] }
 0x82a   :  { %6818 = vbcast.lane.b32.xlu1 %v6812_v0, 264  ;;  %6814 = vbcast.lane.b32.xlu0 %v6812_v0, 256 }
 0x82e   :  { %6829 = vbcast.lane.b32.xlu1 %v6823_v41, 264  ;;  %6825 = vbcast.lane.b32.xlu0 %v6823_v41, 256  ;;  %v13573_v41 = vld [vmem:[#allocation49_spill] sm:$0xff] }
 0x832   :  { %6840 = vbcast.lane.b32.xlu1 %v6834_v47, 264  ;;  %6836 = vbcast.lane.b32.xlu0 %v6834_v47, 256 }
 0x836   :  { %6851 = vbcast.lane.b32.xlu1 %v6845_v39, 264  ;;  %6847 = vbcast.lane.b32.xlu0 %v6845_v39, 256 }
 0x83a   :  { %6862 = vbcast.lane.b32.xlu1 %v6856_v48, 264  ;;  %6858 = vbcast.lane.b32.xlu0 %v6856_v48, 256 }
 0x83e   :  { %6873 = vbcast.lane.b32.xlu1 %v6867_v28, 264  ;;  %6869 = vbcast.lane.b32.xlu0 %v6867_v28, 256  ;;  %v13569_v28 = vld [vmem:[#allocation46_spill] sm:$0xff] }
 0x842   :  { %6884 = vbcast.lane.b32.xlu1 %v6878_v40, 264  ;;  %6880 = vbcast.lane.b32.xlu0 %v6878_v40, 256 }
 0x846   :  { %6895 = vbcast.lane.b32.xlu1 %v6889_v1, 264  ;;  %6891 = vbcast.lane.b32.xlu0 %v6889_v1, 256 }
 0x84a   :  { %6906 = vbcast.lane.b32.xlu1 %v6900_v33, 264  ;;  %6902 = vbcast.lane.b32.xlu0 %v6900_v33, 256 }
 0x84e   :  { %6917 = vbcast.lane.b32.xlu1 %v6911_v37, 264  ;;  %6913 = vbcast.lane.b32.xlu0 %v6911_v37, 256 }
 0x852   :  { %6928 = vbcast.lane.b32.xlu1 %v6922_v30, 264  ;;  %6924 = vbcast.lane.b32.xlu0 %v6922_v30, 256 }
 0x856   :  { %6939 = vbcast.lane.b32.xlu1 %v6933_v2, 264  ;;  %6935 = vbcast.lane.b32.xlu0 %v6933_v2, 256 }
 0x85a   :  { %6950 = vbcast.lane.b32.xlu1 %v12967_v62, 264  ;;  %6946 = vbcast.lane.b32.xlu0 %v12967_v62, 256 }
 0x85e   :  { %6961 = vbcast.lane.b32.xlu1 %v12970_v8, 264  ;;  %6957 = vbcast.lane.b32.xlu0 %v12970_v8, 256  ;;  %v13566_v8 = vld [vmem:[#allocation11_spill] sm:$0xff] }
 0x862   :  { %6972 = vbcast.lane.b32.xlu1 %v12973_v31, 264  ;;  %6968 = vbcast.lane.b32.xlu0 %v12973_v31, 256 }
 0x866   :  { %6983 = vbcast.lane.b32.xlu1 %v12976_v29, 264  ;;  %6979 = vbcast.lane.b32.xlu0 %v12976_v29, 256  ;;  %v13567_v29 = vld [vmem:[#allocation22_spill] sm:$0xff] }
 0x868   :  { %v6672_v10 = vpop.permute.xlu0 %6671  ;;  %v6676_v43 = vpop.permute.xlu1 %6675 }
 0x869   :  { %v7018_v35 = vmul.f32 %v6672_v10, %v13558_v17  ;;  %v7019_v27 = vmul.f32 %v6676_v43, %v13559_v50  ;;  %v13574_v17 = vld [vmem:[#allocation47_spill] sm:$0xff] }
 0x86a   :  { %6994 = vbcast.lane.b32.xlu1 %v12979_v44, 264  ;;  %6990 = vbcast.lane.b32.xlu0 %v12979_v44, 256  ;;  %v13575_v50 = vld [vmem:[#allocation51_spill] sm:$0xff] }
 0x86b   :  { %v7082_v49 = vmax.f32 %v7018_v35, 0.0  ;;  %v7083_v61 = vmax.f32 %v7019_v27, 0.0 }
 0x86c   :  { %v6683_v21 = vpop.permute.xlu0 %6682  ;;  %v6687_v15 = vpop.permute.xlu1 %6686 }
 0x86d   :  { %7146 = vst.msk [vmem:[#allocation5] sm:$0xff] %vm1029_vm3, %v7082_v49  ;;  %7147 = vst.msk [vmem:[#allocation5 + $0x8] sm:$0xff] %vm1029_vm3, %v7083_v61  ;;  %v7020_v7 = vmul.f32 %v6683_v21, %v13560_v63  ;;  %v7021_v3 = vmul.f32 %v6687_v15, %v13561_v24  ;;  %v13576_v63 = vld [vmem:[#allocation48_spill] sm:$0xff] }
 0x86e   :  { %7005 = vbcast.lane.b32.xlu1 %v12982_v54, 264  ;;  %7001 = vbcast.lane.b32.xlu0 %v12982_v54, 256  ;;  %v13577_v24 = vld [vmem:[#allocation28_spill] sm:$0xff] }
 0x86f   :  { %v7084_v14 = vmax.f32 %v7020_v7, 0.0  ;;  %v7085_v25 = vmax.f32 %v7021_v3, 0.0 }
 0x870   :  { %v6694_v18 = vpop.permute.xlu0 %6693  ;;  %v6698_v11 = vpop.permute.xlu1 %6697 }
 0x871   :  { %7148 = vst.msk [vmem:[#allocation5 + $0x10] sm:$0xff] %vm1029_vm3, %v7084_v14  ;;  %7149 = vst.msk [vmem:[#allocation5 + $0x18] sm:$0xff] %vm1029_vm3, %v7085_v25  ;;  %v7022_v4 = vmul.f32 %v6694_v18, %v13562_v46  ;;  %v7023_v56 = vmul.f32 %v6698_v11, %v13563_v58  ;;  %v13578_v46 = vld [vmem:[#allocation50_spill] sm:$0xff] }
 0x872   :  { %7016 = vbcast.lane.b32.xlu1 %v12985_v51, 264  ;;  %7012 = vbcast.lane.b32.xlu0 %v12985_v51, 256  ;;  %v13579_v58 = vld [vmem:[#allocation54_spill] sm:$0xff] }
 0x873   :  { %v7086_v45 = vmax.f32 %v7022_v4, 0.0  ;;  %v7087_v9 = vmax.f32 %v7023_v56, 0.0 }
 0x874   :  { %v6705_v13 = vpop.permute.xlu0 %6704  ;;  %v6709_v5 = vpop.permute.xlu1 %6708 }
 0x875   :  { %7150 = vst.msk [vmem:[#allocation5 + $0x20] sm:$0xff] %vm1029_vm3, %v7086_v45  ;;  %7151 = vst.msk [vmem:[#allocation5 + $0x28] sm:$0xff] %vm1029_vm3, %v7087_v9  ;;  %v7024_v59 = vmul.f32 %v6705_v13, %v13564_v38  ;;  %v7025_v20 = vmul.f32 %v6709_v5, %v13565_v53  ;;  %v13580_v38 = vld [vmem:[#allocation52_spill] sm:$0xff]  ;;  %v13581_v53 = vld [vmem:[#allocation33_spill] sm:$0xff] }
 0x877   :  { %v7088_v34 = vmax.f32 %v7024_v59, 0.0  ;;  %v7089_v60 = vmax.f32 %v7025_v20, 0.0 }
 0x878   :  { %v6716_v42 = vpop.permute.xlu0 %6715  ;;  %v6720_v62 = vpop.permute.xlu1 %6719 }
 0x879   :  { %7152 = vst.msk [vmem:[#allocation5 + $0x30] sm:$0xff] %vm1029_vm3, %v7088_v34  ;;  %7153 = vst.msk [vmem:[#allocation5 + $0x38] sm:$0xff] %vm1029_vm3, %v7089_v60  ;;  %v7026_v31 = vmul.f32 %v6716_v42, %v13566_v8  ;;  %v7027_v44 = vmul.f32 %v6720_v62, %v13567_v29  ;;  %v13582_v8 = vld [vmem:[#allocation53_spill] sm:$0xff] }
 0x87a   :  { %v13583_v29 = vld [vmem:[#allocation57_spill] sm:$0xff] }
 0x87b   :  { %v7090_v54 = vmax.f32 %v7026_v31, 0.0  ;;  %v7091_v51 = vmax.f32 %v7027_v44, 0.0 }
 0x87c   :  { %v6727_v26 = vpop.permute.xlu0 %6726  ;;  %v6731_v23 = vpop.permute.xlu1 %6730 }
 0x87d   :  { %7154 = vst.msk [vmem:[#allocation5 + $0x40] sm:$0xff] %vm1029_vm3, %v7090_v54  ;;  %7155 = vst.msk [vmem:[#allocation5 + $0x48] sm:$0xff] %vm1029_vm3, %v7091_v51  ;;  %v7028_v48 = vmul.f32 %v6727_v26, %v13568_v52  ;;  %v7029_v40 = vmul.f32 %v6731_v23, %v13569_v28  ;;  %v13584_v52 = vld [vmem:[#allocation55_spill] sm:$0xff]  ;;  %v13585_v28 = vld [vmem:[#allocation38_spill] sm:$0xff] }
 0x87f   :  { %v7092_v1 = vmax.f32 %v7028_v48, 0.0  ;;  %v7093_v33 = vmax.f32 %v7029_v40, 0.0 }
 0x880   :  { %v6738_v37 = vpop.permute.xlu0 %6737  ;;  %v6742_v30 = vpop.permute.xlu1 %6741 }
 0x881   :  { %7156 = vst.msk [vmem:[#allocation5 + $0x50] sm:$0xff] %vm1029_vm3, %v7092_v1  ;;  %7157 = vst.msk [vmem:[#allocation5 + $0x58] sm:$0xff] %vm1029_vm3, %v7093_v33  ;;  %v7030_v32 = vmul.f32 %v6738_v37, %v13570_v6  ;;  %v7031_v36 = vmul.f32 %v6742_v30, %v13571_v22  ;;  %v13586_v6 = vld [vmem:[#allocation56_spill] sm:$0xff]  ;;  %v13587_v22 = vld [vmem:[#allocation42_spill] sm:$0xff] }
 0x883   :  { %v7094_v55 = vmax.f32 %v7030_v32, 0.0  ;;  %v7095_v57 = vmax.f32 %v7031_v36, 0.0 }
 0x884   :  { %v6749_v12 = vpop.permute.xlu0 %6748  ;;  %v6753_v16 = vpop.permute.xlu1 %6752 }
 0x885   :  { %7158 = vst.msk [vmem:[#allocation5 + $0x60] sm:$0xff] %vm1029_vm3, %v7094_v55  ;;  %7159 = vst.msk [vmem:[#allocation5 + $0x68] sm:$0xff] %vm1029_vm3, %v7095_v57  ;;  %v7032_v0 = vmul.f32 %v6749_v12, %v13572_v19  ;;  %v7033_v47 = vmul.f32 %v6753_v16, %v13573_v41  ;;  %v13588_v19 = vld [vmem:[#allocation58_spill] sm:$0xff]  ;;  %v13589_v41 = vld [vmem:[#allocation25_spill] sm:$0xff] }
 0x887   :  { %v7096_v39 = vmax.f32 %v7032_v0, 0.0  ;;  %v7097_v2 = vmax.f32 %v7033_v47, 0.0 }
 0x888   :  { %v6760_v10 = vpop.permute.xlu0 %6759  ;;  %v6764_v43 = vpop.permute.xlu1 %6763 }
 0x889   :  { %7160 = vst.msk [vmem:[#allocation5 + $0x70] sm:$0xff] %vm1029_vm3, %v7096_v39  ;;  %7161 = vst.msk [vmem:[#allocation5 + $0x78] sm:$0xff] %vm1029_vm3, %v7097_v2  ;;  %v7034_v35 = vmul.f32 %v6760_v10, %v13574_v17  ;;  %v7035_v27 = vmul.f32 %v6764_v43, %v13575_v50  ;;  %v13590_v17 = vld [vmem:[#allocation14_spill] sm:$0xff]  ;;  %v13591_v50 = vld [vmem:[#allocation23_spill] sm:$0xff] }
 0x88b   :  { %v7098_v49 = vmax.f32 %v7034_v35, 0.0  ;;  %v7099_v61 = vmax.f32 %v7035_v27, 0.0 }
 0x88c   :  { %v6771_v21 = vpop.permute.xlu0 %6770  ;;  %v6775_v15 = vpop.permute.xlu1 %6774 }
 0x88d   :  { %7162 = vst.msk [vmem:[#allocation5 + $0x80] sm:$0xff] %vm1029_vm3, %v7098_v49  ;;  %7163 = vst.msk [vmem:[#allocation5 + $0x88] sm:$0xff] %vm1029_vm3, %v7099_v61  ;;  %v7036_v7 = vmul.f32 %v6771_v21, %v13576_v63  ;;  %v7037_v3 = vmul.f32 %v6775_v15, %v13577_v24  ;;  %v13592_v63 = vld [vmem:[#allocation15_spill] sm:$0xff]  ;;  %v13593_v24 = vld [vmem:[#allocation16_spill] sm:$0xff] }
 0x88f   :  { %v7100_v14 = vmax.f32 %v7036_v7, 0.0  ;;  %v7101_v25 = vmax.f32 %v7037_v3, 0.0 }
 0x890   :  { %v6782_v18 = vpop.permute.xlu0 %6781  ;;  %v6786_v11 = vpop.permute.xlu1 %6785 }
 0x891   :  { %7164 = vst.msk [vmem:[#allocation5 + $0x90] sm:$0xff] %vm1029_vm3, %v7100_v14  ;;  %7165 = vst.msk [vmem:[#allocation5 + $0x98] sm:$0xff] %vm1029_vm3, %v7101_v25  ;;  %v7038_v4 = vmul.f32 %v6782_v18, %v13578_v46  ;;  %v7039_v56 = vmul.f32 %v6786_v11, %v13579_v58  ;;  %v13594_v46 = vld [vmem:[#allocation10_spill] sm:$0xff]  ;;  %v13595_v58 = vld [vmem:[#allocation29_spill] sm:$0xff] }
 0x893   :  { %v7102_v45 = vmax.f32 %v7038_v4, 0.0  ;;  %v7103_v9 = vmax.f32 %v7039_v56, 0.0 }
 0x894   :  { %v6793_v13 = vpop.permute.xlu0 %6792  ;;  %v6797_v5 = vpop.permute.xlu1 %6796 }
 0x895   :  { %7166 = vst.msk [vmem:[#allocation5 + $0xa0] sm:$0xff] %vm1029_vm3, %v7102_v45  ;;  %7167 = vst.msk [vmem:[#allocation5 + $0xa8] sm:$0xff] %vm1029_vm3, %v7103_v9  ;;  %v7040_v59 = vmul.f32 %v6793_v13, %v13580_v38  ;;  %v7041_v20 = vmul.f32 %v6797_v5, %v13581_v53  ;;  %v13596_v38 = vld [vmem:[#allocation30_spill] sm:$0xff]  ;;  %v13597_v53 = vld [vmem:[#allocation31_spill] sm:$0xff] }
 0x897   :  { %v7104_v34 = vmax.f32 %v7040_v59, 0.0  ;;  %v7105_v60 = vmax.f32 %v7041_v20, 0.0 }
 0x898   :  { %v6804_v42 = vpop.permute.xlu0 %6803  ;;  %v6808_v62 = vpop.permute.xlu1 %6807 }
 0x899   :  { %7168 = vst.msk [vmem:[#allocation5 + $0xb0] sm:$0xff] %vm1029_vm3, %v7104_v34  ;;  %7169 = vst.msk [vmem:[#allocation5 + $0xb8] sm:$0xff] %vm1029_vm3, %v7105_v60  ;;  %v7042_v31 = vmul.f32 %v6804_v42, %v13582_v8  ;;  %v7043_v44 = vmul.f32 %v6808_v62, %v13583_v29  ;;  %v13598_v8 = vld [vmem:[#allocation32_spill] sm:$0xff]  ;;  %v13599_v29 = vld [vmem:[#allocation34_spill] sm:$0xff] }
 0x89b   :  { %v7106_v54 = vmax.f32 %v7042_v31, 0.0  ;;  %v7107_v51 = vmax.f32 %v7043_v44, 0.0 }
 0x89c   :  { %v6815_v26 = vpop.permute.xlu0 %6814  ;;  %v6819_v23 = vpop.permute.xlu1 %6818 }
 0x89d   :  { %7170 = vst.msk [vmem:[#allocation5 + $0xc0] sm:$0xff] %vm1029_vm3, %v7106_v54  ;;  %7171 = vst.msk [vmem:[#allocation5 + $0xc8] sm:$0xff] %vm1029_vm3, %v7107_v51  ;;  %v7044_v48 = vmul.f32 %v6815_v26, %v13584_v52  ;;  %v7045_v40 = vmul.f32 %v6819_v23, %v13585_v28  ;;  %v13600_v52 = vld [vmem:[#allocation35_spill] sm:$0xff]  ;;  %v13601_v28 = vld [vmem:[#allocation36_spill] sm:$0xff] }
 0x89f   :  { %v7108_v1 = vmax.f32 %v7044_v48, 0.0  ;;  %v7109_v33 = vmax.f32 %v7045_v40, 0.0 }
 0x8a0   :  { %v6826_v37 = vpop.permute.xlu0 %6825  ;;  %v6830_v30 = vpop.permute.xlu1 %6829 }
 0x8a1   :  { %7172 = vst.msk [vmem:[#allocation5 + $0xd0] sm:$0xff] %vm1029_vm3, %v7108_v1  ;;  %7173 = vst.msk [vmem:[#allocation5 + $0xd8] sm:$0xff] %vm1029_vm3, %v7109_v33  ;;  %v7046_v32 = vmul.f32 %v6826_v37, %v13586_v6  ;;  %v7047_v36 = vmul.f32 %v6830_v30, %v13587_v22  ;;  %v13602_v6 = vld [vmem:[#allocation37_spill] sm:$0xff]  ;;  %v13603_v22 = vld [vmem:[#allocation39_spill] sm:$0xff] }
 0x8a3   :  { %v7110_v55 = vmax.f32 %v7046_v32, 0.0  ;;  %v7111_v57 = vmax.f32 %v7047_v36, 0.0 }
 0x8a4   :  { %v6837_v12 = vpop.permute.xlu0 %6836  ;;  %v6841_v16 = vpop.permute.xlu1 %6840 }
 0x8a5   :  { %7174 = vst.msk [vmem:[#allocation5 + $0xe0] sm:$0xff] %vm1029_vm3, %v7110_v55  ;;  %7175 = vst.msk [vmem:[#allocation5 + $0xe8] sm:$0xff] %vm1029_vm3, %v7111_v57  ;;  %v7048_v0 = vmul.f32 %v6837_v12, %v13588_v19  ;;  %v7049_v47 = vmul.f32 %v6841_v16, %v13589_v41  ;;  %v13604_v19 = vld [vmem:[#allocation40_spill] sm:$0xff]  ;;  %v13605_v41 = vld [vmem:[#allocation41_spill] sm:$0xff] }
 0x8a7   :  { %v7112_v39 = vmax.f32 %v7048_v0, 0.0  ;;  %v7113_v2 = vmax.f32 %v7049_v47, 0.0 }
 0x8a8   :  { %v6848_v10 = vpop.permute.xlu0 %6847  ;;  %v6852_v43 = vpop.permute.xlu1 %6851 }
 0x8a9   :  { %7176 = vst.msk [vmem:[#allocation5 + $0xf0] sm:$0xff] %vm1029_vm3, %v7112_v39  ;;  %7177 = vst.msk [vmem:[#allocation5 + $0xf8] sm:$0xff] %vm1029_vm3, %v7113_v2  ;;  %v7050_v35 = vmul.f32 %v6848_v10, %v13590_v17  ;;  %v7051_v27 = vmul.f32 %v6852_v43, %v13591_v50  ;;  %v13606_v17 = vld [vmem:[#allocation43_spill] sm:$0xff] }
 0x8aa   :  { %v13607_v50 = vld [vmem:[#allocation63_spill] sm:$0xff] }
 0x8ab   :  { %v7114_v49 = vmax.f32 %v7050_v35, 0.0  ;;  %v7115_v61 = vmax.f32 %v7051_v27, 0.0 }
 0x8ac   :  { %v6859_v21 = vpop.permute.xlu0 %6858  ;;  %v6863_v15 = vpop.permute.xlu1 %6862 }
 0x8ad   :  { %7178 = vst.msk [vmem:[#allocation5 + $0x100] sm:$0xff] %vm1029_vm3, %v7114_v49  ;;  %7179 = vst.msk [vmem:[#allocation5 + $0x108] sm:$0xff] %vm1029_vm3, %v7115_v61  ;;  %v7052_v7 = vmul.f32 %v6859_v21, %v13592_v63  ;;  %v7053_v3 = vmul.f32 %v6863_v15, %v13593_v24  ;;  %v13608_v63 = vld [vmem:[#allocation59_spill] sm:$0xff]  ;;  %v13609_v24 = vld [vmem:[#allocation65_spill] sm:$0xff] }
 0x8af   :  { %v7116_v14 = vmax.f32 %v7052_v7, 0.0  ;;  %v7117_v25 = vmax.f32 %v7053_v3, 0.0 }
 0x8b0   :  { %v6870_v18 = vpop.permute.xlu0 %6869  ;;  %v6874_v11 = vpop.permute.xlu1 %6873 }
 0x8b1   :  { %7180 = vst.msk [vmem:[#allocation5 + $0x110] sm:$0xff] %vm1029_vm3, %v7116_v14  ;;  %7181 = vst.msk [vmem:[#allocation5 + $0x118] sm:$0xff] %vm1029_vm3, %v7117_v25  ;;  %v7054_v4 = vmul.f32 %v6870_v18, %v13594_v46  ;;  %v7055_v56 = vmul.f32 %v6874_v11, %v13595_v58  ;;  %v13610_v46 = vld [vmem:[#allocation60_spill] sm:$0xff]  ;;  %v13611_v58 = vld [vmem:[#allocation66_spill] sm:$0xff] }
 0x8b3   :  { %v7118_v45 = vmax.f32 %v7054_v4, 0.0  ;;  %v7119_v9 = vmax.f32 %v7055_v56, 0.0 }
 0x8b4   :  { %v6881_v13 = vpop.permute.xlu0 %6880  ;;  %v6885_v5 = vpop.permute.xlu1 %6884 }
 0x8b5   :  { %7182 = vst.msk [vmem:[#allocation5 + $0x120] sm:$0xff] %vm1029_vm3, %v7118_v45  ;;  %7183 = vst.msk [vmem:[#allocation5 + $0x128] sm:$0xff] %vm1029_vm3, %v7119_v9  ;;  %v7056_v59 = vmul.f32 %v6881_v13, %v13596_v38  ;;  %v7057_v20 = vmul.f32 %v6885_v5, %v13597_v53  ;;  %v13612_v38 = vld [vmem:[#allocation61_spill] sm:$0xff]  ;;  %v13613_v53 = vld [vmem:[#allocation68_spill] sm:$0xff] }
 0x8b7   :  { %v7120_v34 = vmax.f32 %v7056_v59, 0.0  ;;  %v7121_v60 = vmax.f32 %v7057_v20, 0.0 }
 0x8b8   :  { %v6892_v42 = vpop.permute.xlu0 %6891  ;;  %v6896_v62 = vpop.permute.xlu1 %6895 }
 0x8b9   :  { %7184 = vst.msk [vmem:[#allocation5 + $0x130] sm:$0xff] %vm1029_vm3, %v7120_v34  ;;  %7185 = vst.msk [vmem:[#allocation5 + $0x138] sm:$0xff] %vm1029_vm3, %v7121_v60  ;;  %v7058_v31 = vmul.f32 %v6892_v42, %v13598_v8  ;;  %v7059_v44 = vmul.f32 %v6896_v62, %v13599_v29  ;;  %v13614_v8 = vld [vmem:[#allocation62_spill] sm:$0xff] }
 0x8ba   :  { %v13615_v29 = vld [vmem:[#allocation70_spill] sm:$0xff] }
 0x8bb   :  { %v7122_v54 = vmax.f32 %v7058_v31, 0.0  ;;  %v7123_v51 = vmax.f32 %v7059_v44, 0.0 }
 0x8bc   :  { %v6903_v26 = vpop.permute.xlu0 %6902  ;;  %v6907_v23 = vpop.permute.xlu1 %6906 }
 0x8bd   :  { %7186 = vst.msk [vmem:[#allocation5 + $0x140] sm:$0xff] %vm1029_vm3, %v7122_v54  ;;  %7187 = vst.msk [vmem:[#allocation5 + $0x148] sm:$0xff] %vm1029_vm3, %v7123_v51  ;;  %v7060_v48 = vmul.f32 %v6903_v26, %v13600_v52  ;;  %v7061_v40 = vmul.f32 %v6907_v23, %v13601_v28  ;;  %v13616_v52 = vld [vmem:[#allocation64_spill] sm:$0xff]  ;;  %v13617_v28 = vld [vmem:[#allocation71_spill] sm:$0xff] }
 0x8bf   :  { %v7124_v1 = vmax.f32 %v7060_v48, 0.0  ;;  %v7125_v33 = vmax.f32 %v7061_v40, 0.0 }
 0x8c0   :  { %v6914_v37 = vpop.permute.xlu0 %6913  ;;  %v6918_v30 = vpop.permute.xlu1 %6917 }
 0x8c1   :  { %7188 = vst.msk [vmem:[#allocation5 + $0x150] sm:$0xff] %vm1029_vm3, %v7124_v1  ;;  %7189 = vst.msk [vmem:[#allocation5 + $0x158] sm:$0xff] %vm1029_vm3, %v7125_v33  ;;  %v7062_v32 = vmul.f32 %v6914_v37, %v13602_v6  ;;  %v7063_v36 = vmul.f32 %v6918_v30, %v13603_v22  ;;  %v13618_v6 = vld [vmem:[#allocation67_spill] sm:$0xff]  ;;  %v13619_v22 = vld [vmem:[#allocation72_spill] sm:$0xff] }
 0x8c3   :  { %v7126_v55 = vmax.f32 %v7062_v32, 0.0  ;;  %v7127_v57 = vmax.f32 %v7063_v36, 0.0 }
 0x8c4   :  { %v6925_v12 = vpop.permute.xlu0 %6924  ;;  %v6929_v16 = vpop.permute.xlu1 %6928 }
 0x8c5   :  { %7190 = vst.msk [vmem:[#allocation5 + $0x160] sm:$0xff] %vm1029_vm3, %v7126_v55  ;;  %7191 = vst.msk [vmem:[#allocation5 + $0x168] sm:$0xff] %vm1029_vm3, %v7127_v57  ;;  %v7064_v0 = vmul.f32 %v6925_v12, %v13604_v19  ;;  %v7065_v47 = vmul.f32 %v6929_v16, %v13605_v41  ;;  %v13620_v19 = vld [vmem:[#allocation69_spill] sm:$0xff] }
 0x8c6   :  { %v13621_v41 = vld [vmem:[#allocation73_spill] sm:$0xff] }
 0x8c7   :  { %v7128_v39 = vmax.f32 %v7064_v0, 0.0  ;;  %v7129_v2 = vmax.f32 %v7065_v47, 0.0 }
 0x8c8   :  { %v6936_v10 = vpop.permute.xlu0 %6935  ;;  %v6940_v43 = vpop.permute.xlu1 %6939 }
 0x8c9   :  { %7192 = vst.msk [vmem:[#allocation5 + $0x170] sm:$0xff] %vm1029_vm3, %v7128_v39  ;;  %7193 = vst.msk [vmem:[#allocation5 + $0x178] sm:$0xff] %vm1029_vm3, %v7129_v2  ;;  %v7066_v35 = vmul.f32 %v6936_v10, %v13606_v17  ;;  %v7067_v27 = vmul.f32 %v6940_v43, %v13607_v50 }
 0x8cb   :  { %v7130_v49 = vmax.f32 %v7066_v35, 0.0  ;;  %v7131_v61 = vmax.f32 %v7067_v27, 0.0 }
 0x8cc   :  { %v6947_v21 = vpop.permute.xlu0 %6946  ;;  %v6951_v15 = vpop.permute.xlu1 %6950 }
 0x8cd   :  { %7194 = vst.msk [vmem:[#allocation5 + $0x180] sm:$0xff] %vm1029_vm3, %v7130_v49  ;;  %7195 = vst.msk [vmem:[#allocation5 + $0x188] sm:$0xff] %vm1029_vm3, %v7131_v61  ;;  %v7068_v7 = vmul.f32 %v6947_v21, %v13608_v63  ;;  %v7069_v3 = vmul.f32 %v6951_v15, %v13609_v24 }
 0x8cf   :  { %v7132_v14 = vmax.f32 %v7068_v7, 0.0  ;;  %v7133_v25 = vmax.f32 %v7069_v3, 0.0 }
 0x8d0   :  { %v6958_v18 = vpop.permute.xlu0 %6957  ;;  %v6962_v11 = vpop.permute.xlu1 %6961 }
 0x8d1   :  { %7196 = vst.msk [vmem:[#allocation5 + $0x190] sm:$0xff] %vm1029_vm3, %v7132_v14  ;;  %7197 = vst.msk [vmem:[#allocation5 + $0x198] sm:$0xff] %vm1029_vm3, %v7133_v25  ;;  %v7070_v4 = vmul.f32 %v6958_v18, %v13610_v46  ;;  %v7071_v56 = vmul.f32 %v6962_v11, %v13611_v58 }
 0x8d3   :  { %v7134_v45 = vmax.f32 %v7070_v4, 0.0  ;;  %v7135_v9 = vmax.f32 %v7071_v56, 0.0 }
 0x8d4   :  { %v6969_v13 = vpop.permute.xlu0 %6968  ;;  %v6973_v5 = vpop.permute.xlu1 %6972 }
 0x8d5   :  { %7198 = vst.msk [vmem:[#allocation5 + $0x1a0] sm:$0xff] %vm1029_vm3, %v7134_v45  ;;  %7199 = vst.msk [vmem:[#allocation5 + $0x1a8] sm:$0xff] %vm1029_vm3, %v7135_v9  ;;  %v7072_v59 = vmul.f32 %v6969_v13, %v13612_v38  ;;  %v7073_v20 = vmul.f32 %v6973_v5, %v13613_v53 }
 0x8d7   :  { %v7136_v34 = vmax.f32 %v7072_v59, 0.0  ;;  %v7137_v60 = vmax.f32 %v7073_v20, 0.0 }
 0x8d8   :  { %v6980_v42 = vpop.permute.xlu0 %6979  ;;  %v6984_v62 = vpop.permute.xlu1 %6983 }
 0x8d9   :  { %7200 = vst.msk [vmem:[#allocation5 + $0x1b0] sm:$0xff] %vm1029_vm3, %v7136_v34  ;;  %7201 = vst.msk [vmem:[#allocation5 + $0x1b8] sm:$0xff] %vm1029_vm3, %v7137_v60  ;;  %v7074_v31 = vmul.f32 %v6980_v42, %v13614_v8  ;;  %v7075_v44 = vmul.f32 %v6984_v62, %v13615_v29 }
 0x8db   :  { %v7138_v54 = vmax.f32 %v7074_v31, 0.0  ;;  %v7139_v51 = vmax.f32 %v7075_v44, 0.0 }
 0x8dc   :  { %v6991_v26 = vpop.permute.xlu0 %6990  ;;  %v6995_v23 = vpop.permute.xlu1 %6994 }
 0x8dd   :  { %7202 = vst.msk [vmem:[#allocation5 + $0x1c0] sm:$0xff] %vm1029_vm3, %v7138_v54  ;;  %7203 = vst.msk [vmem:[#allocation5 + $0x1c8] sm:$0xff] %vm1029_vm3, %v7139_v51  ;;  %v7076_v48 = vmul.f32 %v6991_v26, %v13616_v52  ;;  %v7077_v40 = vmul.f32 %v6995_v23, %v13617_v28 }
 0x8df   :  { %v7140_v1 = vmax.f32 %v7076_v48, 0.0  ;;  %v7141_v33 = vmax.f32 %v7077_v40, 0.0 }
 0x8e0   :  { %v7002_v37 = vpop.permute.xlu0 %7001  ;;  %v7006_v30 = vpop.permute.xlu1 %7005 }
 0x8e1   :  { %7204 = vst.msk [vmem:[#allocation5 + $0x1d0] sm:$0xff] %vm1029_vm3, %v7140_v1  ;;  %7205 = vst.msk [vmem:[#allocation5 + $0x1d8] sm:$0xff] %vm1029_vm3, %v7141_v33  ;;  %v7078_v32 = vmul.f32 %v7002_v37, %v13618_v6  ;;  %v7079_v36 = vmul.f32 %v7006_v30, %v13619_v22 }
 0x8e3   :  { %v7142_v55 = vmax.f32 %v7078_v32, 0.0  ;;  %v7143_v57 = vmax.f32 %v7079_v36, 0.0 }
 0x8e4   :  { %v7013_v12 = vpop.permute.xlu0 %7012  ;;  %v7017_v16 = vpop.permute.xlu1 %7016 }
 0x8e5   :  { %7206 = vst.msk [vmem:[#allocation5 + $0x1e0] sm:$0xff] %vm1029_vm3, %v7142_v55  ;;  %7207 = vst.msk [vmem:[#allocation5 + $0x1e8] sm:$0xff] %vm1029_vm3, %v7143_v57  ;;  %v7080_v0 = vmul.f32 %v7013_v12, %v13620_v19  ;;  %v7081_v47 = vmul.f32 %v7017_v16, %v13621_v41 }
 0x8e7   :  { %v7144_v39 = vmax.f32 %v7080_v0, 0.0  ;;  %v7145_v2 = vmax.f32 %v7081_v47, 0.0 }
 0x8e9   :  { %7208 = vst.msk [vmem:[#allocation5 + $0x1f0] sm:$0xff] %vm1029_vm3, %v7144_v39  ;;  %7209 = vst.msk [vmem:[#allocation5 + $0x1f8] sm:$0xff] %vm1029_vm3, %v7145_v2 }
 0x8ea   :  { %7723 = shalt.err (!%p7720_p9)
}
 0x8eb   :  { %s7724_s11 = scalar_lea.hbm %s13153_s8, 8192 }
 0x8ec   :  { %p7725_p10 = scmp.ne.s32.totalorder %s13153_s8, %s7724_s11  ;;  %p7728_p11 = scmp.lt.u32.totalorder %s7724_s11, %s13153_s8 }
 0x8ee   :  { %p7730_p12 = pnand %p7728_p11, %p7725_p10 }
 0x8f0   :  { %7733 = shalt.err (!%p7730_p12)
}
 0x8f1   :  { %s7748_s6 = smov 128   ;;  %s7749_s13 = smov 8  }
 0x8f2   :  { %7221 = dma.vmem_to_hbm [thread:$0]  %s7216_s4, 8192, %s13153_s8, [#allocation3], %s7748_s6, %s7748_s6, %s7749_s13  }
 0x8f3   :  { %7736 = dma.done.wait [#allocation3], 8192  }
 0x8f4   :  { %7737 = vsyncadd [#allocation3], 4294959104 }
 0x8f5   :  { %7225 = vsyncpa [#allocation3], 1 }
 0x8f6   :  { %7226 = vsyncpa [#allocation4], 1 }

</bundles_post_ra>
